<compile_context>
chip_gen: v7x
topology: tpu7x:2x2x1
jax: 0.10.0
libtpu: 0.0.40
codegen_flags: <defaults>
</compile_context>

<pallas_src>
import math

import jax
import jax.numpy as jnp
from jax.experimental import pallas as pl
from jax.experimental.pallas import tpu as pltpu


# ---------------------------------------------------------------------------
# Kernel 2: MLP head  ((B, 64*L) bf16 -> (B, 1) f32 with sigmoid)
# ---------------------------------------------------------------------------
def mlp_kernel(f_ref, w1t_ref, b1_ref, w2t_ref, b2_ref, w3_ref, b3_ref, o_ref):
    # Standard (M,K)@(K,N) matmuls: weights pre-transposed outside the kernel.
    dn = (((1,), (0,)), ((), ()))
    h = jax.lax.dot_general(f_ref[...], w1t_ref[...], dn,
                            preferred_element_type=jnp.float32)  # bf16 x bf16 -> f32
    h = jnp.maximum(h + b1_ref[...], 0.0)                        # (B, L)
    h = jax.lax.dot_general(h, w2t_ref[...], dn,
                            preferred_element_type=jnp.float32)  # (B, L)
    h = jnp.maximum(h + b2_ref[...], 0.0)
    logit = jnp.sum(h * w3_ref[...], axis=1, keepdims=True) + b3_ref[...]
    o_ref[...] = jax.nn.sigmoid(logit)                           # (B, 1)


# ---------------------------------------------------------------------------
# One-time weight preparation
# ---------------------------------------------------------------------------
def prepare_params(p, eps=1e-5):
    """Fold eval-mode BN into the conv weights, flatten conv2 taps to (64,96),
    pre-transpose the fc weights, cast the MXU-fed weights to bf16."""
    s1 = p["bn1_gamma"] / jnp.sqrt(p["bn1_var"] + eps)
    t1 = p["bn1_beta"] - p["bn1_mean"] * s1
    s2 = p["bn2_gamma"] / jnp.sqrt(p["bn2_var"] + eps)
    t2 = p["bn2_beta"] - p["bn2_mean"] * s2
    # conv1: (32,1,3) -> (32,3), BN folded (VPU, keep f32)
    w1 = p["w1"][:, 0, :] * s1[:, None]
    b1 = (p["b1"] * s1 + t1).reshape(32, 1)
    # conv2: (64,32,3) -> (64, 96) laid out as [o, tap*32 + c_in], BN folded, bf16 for MXU
    w2 = jnp.transpose(p["w2"] * s2[:, None, None], (0, 2, 1)).reshape(64, 96)
    b2 = (p["b2"] * s2 + t2).reshape(64, 1)
    return {
        "w1": w1, "b1": b1,
        "w2": w2.astype(jnp.bfloat16), "b2": b2,
        "fc1_wT": p["fc1_w"].T.astype(jnp.bfloat16),   # (64*L, L), bf16 halves HBM read
        "fc1_b": p["fc1_b"].reshape(1, -1),
        "fc2_wT": p["fc2_w"].T,                        # (L, L)
        "fc2_b": p["fc2_b"].reshape(1, -1),
        "fc3_w": p["fc3_w"],                           # (1, L)
        "fc3_b": p["fc3_b"].reshape(1, 1),
    }


# ---------------------------------------------------------------------------
# Forward
# ---------------------------------------------------------------------------
def cnn1_forward(x, dp):
    """x: (B, L) float32; dp: prepare_params() output."""
    B, L = x.shape
    BL = B * L
    x2 = x.reshape(1, BL)          # fused batch*length on the lane axis

    # --- Kernel 1: conv stack, whole batch in one invocation ---------------
    def feature_kernel(x_ref, w1_ref, b1_ref, w2_ref, b2_ref, o_ref):
        # Per-sample boundary masks along the fused B*L lane axis (built once).
        lane = jax.lax.broadcasted_iota(jnp.int32, (1, BL), 1)
        pos = lane % L
        first = pos == 0          # start of a sample (left pad position)
        last = pos == L - 1       # end of a sample (right pad position)

        def shift_prev(a, fill):  # out[..., k] = a[..., k-1] within each sample
            return jnp.where(first, fill, pltpu.roll(a, 1, 1))

        def shift_next(a, fill):  # out[..., k] = a[..., k+1] within each sample
            return jnp.where(last, fill, pltpu.roll(a, BL - 1, 1))

        def pool3(h):             # MaxPool1d(kernel_size=3, stride=1, padding=1)
            neg = jnp.float32(-jnp.inf)
            return jnp.maximum(jnp.maximum(shift_prev(h, neg), h),
                               shift_next(h, neg))

        zero = jnp.float32(0.0)
        xv = x_ref[...]                               # (1, BL) f32
        w1 = w1_ref[...]                              # (32, 3), BN folded
        # Conv1d(1, 32, k=3, pad=1) on the VPU (cross-correlation, no flip).
        h1 = (w1[:, 0:1] * shift_prev(xv, zero)
              + w1[:, 1:2] * xv
              + w1[:, 2:3] * shift_next(xv, zero)
              + b1_ref[...])                          # (32, BL)
        p1 = pool3(jnp.maximum(h1, 0.0))              # ReLU; pool

        # Conv1d(32, 64, k=3, pad=1) as ONE (64,96)x(96,BL) MXU matmul, bf16 in / f32 acc.
        stacked = jnp.concatenate(
            [shift_prev(p1, zero), p1, shift_next(p1, zero)], axis=0)  # (96, BL)
        h2 = jnp.dot(w2_ref[...], stacked.astype(jnp.bfloat16),
                     preferred_element_type=jnp.float32) + b2_ref[...]  # (64, BL) f32
        # lane-dense (64, BL) bf16 store (halves intermediate HBM traffic)
        o_ref[...] = pool3(jnp.maximum(h2, 0.0)).astype(jnp.bfloat16)

    vmem = pl.BlockSpec(memory_space=pltpu.MemorySpace.VMEM)
    feats = pl.pallas_call(
        feature_kernel,
        out_shape=jax.ShapeDtypeStruct((64, BL), jnp.bfloat16),
        in_specs=[vmem] * 5,
        out_specs=vmem,
    )(x2, dp["w1"], dp["b1"], dp["w2"], dp["b2"])

    # glue: PyTorch x.view(B, -1) channel-major flatten.  A 128 KiB bf16 XLA
    # transpose — far cheaper/safer than an in-kernel lane<->sublane relayout
    # or transposing the 2 MiB fc1 weight.
    flat = feats.reshape(64, B, L).transpose(1, 0, 2).reshape(B, 64 * L)

    # --- Kernel 2: MLP head -------------------------------------------------
    out = pl.pallas_call(
        mlp_kernel,
        out_shape=jax.ShapeDtypeStruct((B, 1), jnp.float32),
        in_specs=[vmem] * 7,
        out_specs=vmem,
    )(flat, dp["fc1_wT"], dp["fc1_b"], dp["fc2_wT"], dp["fc2_b"],
      dp["fc3_w"], dp["fc3_b"])
    return out


# ---------------------------------------------------------------------------
# Pure-JAX f32 reference (PyTorch eval-mode semantics) for validation
# ---------------------------------------------------------------------------
def ref_forward(x, p, eps=1e-5):
    B, L = x.shape

    def conv3(inp, w, b):  # inp (B, Ci, L), w (Co, Ci, 3)
        prev = jnp.concatenate([jnp.zeros_like(inp[..., :1]), inp[..., :-1]], -1)
        nxt = jnp.concatenate([inp[..., 1:], jnp.zeros_like(inp[..., :1])], -1)
        out = (jnp.einsum("oi,bil->bol", w[:, :, 0], prev, precision="highest")
               + jnp.einsum("oi,bil->bol", w[:, :, 1], inp, precision="highest")
               + jnp.einsum("oi,bil->bol", w[:, :, 2], nxt, precision="highest"))
        return out + b[None, :, None]

    def bn(h, g, bta, m, v):
        s = g / jnp.sqrt(v + eps)
        return h * s[None, :, None] + (bta - m * s)[None, :, None]

    def pool3(h):
        neg = jnp.full_like(h[..., :1], -jnp.inf)
        prev = jnp.concatenate([neg, h[..., :-1]], -1)
        nxt = jnp.concatenate([h[..., 1:], neg], -1)
        return jnp.maximum(jnp.maximum(prev, h), nxt)

    h = pool3(jnp.maximum(bn(conv3(x[:, None, :], p["w1"], p["b1"]),
                             p["bn1_gamma"], p["bn1_beta"],
                             p["bn1_mean"], p["bn1_var"]), 0.0))
    h = pool3(jnp.maximum(bn(conv3(h, p["w2"], p["b2"]),
                             p["bn2_gamma"], p["bn2_beta"],
                             p["bn2_mean"], p["bn2_var"]), 0.0))
    f = h.reshape(B, -1)
    z = jnp.maximum(jnp.dot(f, p["fc1_w"].T, precision="highest") + p["fc1_b"], 0.0)
    z = jnp.maximum(jnp.dot(z, p["fc2_w"].T, precision="highest") + p["fc2_b"], 0.0)
    return jax.nn.sigmoid(jnp.dot(z, p["fc3_w"].T, precision="highest") + p["fc3_b"])


# ---------------------------------------------------------------------------
def make_params(L, key):
    ks = jax.random.split(key, 18)
    f32 = jnp.float32
    u = lambda k, s: jax.random.uniform(k, s, f32, 0.5, 1.5)
    return {
        "w1": jax.random.normal(ks[0], (32, 1, 3), f32) / math.sqrt(3.0),
        "b1": jax.random.normal(ks[1], (32,), f32) * 0.1,
        "bn1_gamma": u(ks[2], (32,)),
        "bn1_beta": jax.random.normal(ks[3], (32,), f32) * 0.1,
        "bn1_mean": jax.random.normal(ks[4], (32,), f32) * 0.1,
        "bn1_var": u(ks[5], (32,)),
        "w2": jax.random.normal(ks[6], (64, 32, 3), f32) / math.sqrt(96.0),
        "b2": jax.random.normal(ks[7], (64,), f32) * 0.1,
        "bn2_gamma": u(ks[8], (64,)),
        "bn2_beta": jax.random.normal(ks[9], (64,), f32) * 0.1,
        "bn2_mean": jax.random.normal(ks[10], (64,), f32) * 0.1,
        "bn2_var": u(ks[11], (64,)),
        "fc1_w": jax.random.normal(ks[12], (L, 64 * L), f32) / math.sqrt(64 * L),
        "fc1_b": jax.random.normal(ks[13], (L,), f32) * 0.1,
        "fc2_w": jax.random.normal(ks[14], (L, L), f32) / math.sqrt(L),
        "fc2_b": jax.random.normal(ks[15], (L,), f32) * 0.1,
        "fc3_w": jax.random.normal(ks[16], (1, L), f32) / math.sqrt(L),
        "fc3_b": jax.random.normal(ks[17], (1,), f32) * 0.1,
    }


if __name__ == "__main__":
    B, L = 8, 128          # n_input = 128, batch = 8
    key = jax.random.PRNGKey(0)
    pkey, xkey = jax.random.split(key)
    params = make_params(L, pkey)
    x = jax.random.normal(xkey, (B, L), jnp.float32)

    dev_params = prepare_params(params)          # one-time weight prep
    fwd = jax.jit(cnn1_forward)

    out = fwd(x, dev_params)
    out = jax.block_until_ready(out)

    assert out.shape == (B, 1), out.shape
    ref = ref_forward(x, params)
    # conv2/fc1 run with bf16 operands (f32 accumulation) -> compare loosely vs f32 ref.
    assert bool(jnp.allclose(out, ref, atol=3e-2, rtol=3e-2)), (
        float(jnp.max(jnp.abs(out - ref))))

    print("KERNEL_OK")
</pallas_src>

<mosaic_0001>
module attributes {stable_mosaic.version = 11 : i64} {
  func.func @feature_kernel(%arg0: memref<1x1024xf32, #tpu.memory_space<vmem>>, %arg1: memref<32x3xf32, #tpu.memory_space<vmem>>, %arg2: memref<32x1xf32, #tpu.memory_space<vmem>>, %arg3: memref<64x96xbf16, #tpu.memory_space<vmem>>, %arg4: memref<64x1xf32, #tpu.memory_space<vmem>>, %arg5: memref<64x1024xbf16, #tpu.memory_space<vmem>>) attributes {dimension_semantics = [], scalar_prefetch = 0 : i64, scratch_operands = 0 : i64, tpu.core_type = #tpu.core_type<tc>} {
    %0 = tpu.iota {dimensions = array<i32: 1>} : vector<1x1024xi32>
    %c128_i32 = arith.constant 128 : i32
    %c0_i32 = arith.constant 0 : i32
    %1 = arith.cmpi eq, %c128_i32, %c0_i32 : i32
    %c1_i32 = arith.constant 1 : i32
    %2 = arith.select %1, %c1_i32, %c128_i32 : i32
    %3 = vector.broadcast %2 : i32 to vector<1x1024xi32>
    %4 = arith.remsi %0, %3 : vector<1x1024xi32>
    %c0_i32_0 = arith.constant 0 : i32
    %5 = vector.broadcast %c0_i32_0 : i32 to vector<1x1024xi32>
    %6 = arith.cmpi ne, %4, %5 : vector<1x1024xi32>
    %c0_i32_1 = arith.constant 0 : i32
    %7 = vector.broadcast %c0_i32_1 : i32 to vector<1x1024xi32>
    %8 = arith.cmpi slt, %4, %7 : vector<1x1024xi32>
    %c0_i32_2 = arith.constant 0 : i32
    %9 = arith.cmpi slt, %2, %c0_i32_2 : i32
    %10 = vector.broadcast %9 : i1 to vector<1x1024xi1>
    %11 = vector.broadcast %10 : vector<1x1024xi1> to vector<1x1024xi1>
    %12 = arith.xori %8, %11 : vector<1x1024xi1>
    %13 = arith.andi %12, %6 : vector<1x1024xi1>
    %14 = vector.broadcast %2 : i32 to vector<1x1024xi32>
    %15 = arith.addi %4, %14 : vector<1x1024xi32>
    %16 = arith.select %13, %15, %4 : vector<1x1024xi1>, vector<1x1024xi32>
    %c0_i32_3 = arith.constant 0 : i32
    %17 = vector.broadcast %c0_i32_3 : i32 to vector<1x1024xi32>
    %18 = arith.cmpi eq, %16, %17 : vector<1x1024xi32>
    %c127_i32 = arith.constant 127 : i32
    %19 = vector.broadcast %c127_i32 : i32 to vector<1x1024xi32>
    %20 = arith.cmpi eq, %16, %19 : vector<1x1024xi32>
    %c0 = arith.constant 0 : index
    %c0_4 = arith.constant 0 : index
    %21 = vector.load %arg0[%c0, %c0_4] : memref<1x1024xf32, #tpu.memory_space<vmem>>, vector<1x1024xf32>
    %c0_5 = arith.constant 0 : index
    %c0_6 = arith.constant 0 : index
    %22 = vector.load %arg1[%c0_5, %c0_6] : memref<32x3xf32, #tpu.memory_space<vmem>>, vector<32x3xf32>
    %23 = vector.extract_strided_slice %22 {offsets = [0, 0], sizes = [32, 1], strides = [1, 1]} : vector<32x3xf32> to vector<32x1xf32>
    %c1_i32_7 = arith.constant 1 : i32
    %24 = tpu.dynamic_rotate %21 by %c1_i32_7 dim 1 : vector<1x1024xf32>, i32 -> vector<1x1024xf32>
    %cst = arith.constant 0.000000e+00 : f32
    %25 = vector.broadcast %cst : f32 to vector<1x1024xf32>
    %26 = arith.select %18, %25, %24 : vector<1x1024xi1>, vector<1x1024xf32>
    %27 = vector.broadcast %23 : vector<32x1xf32> to vector<32x1024xf32>
    %28 = vector.broadcast %26 : vector<1x1024xf32> to vector<32x1024xf32>
    %29 = arith.mulf %27, %28 : vector<32x1024xf32>
    %30 = vector.extract_strided_slice %22 {offsets = [0, 1], sizes = [32, 1], strides = [1, 1]} : vector<32x3xf32> to vector<32x1xf32>
    %31 = vector.broadcast %30 : vector<32x1xf32> to vector<32x1024xf32>
    %32 = vector.broadcast %21 : vector<1x1024xf32> to vector<32x1024xf32>
    %33 = arith.mulf %31, %32 : vector<32x1024xf32>
    %34 = arith.addf %29, %33 : vector<32x1024xf32>
    %35 = vector.extract_strided_slice %22 {offsets = [0, 2], sizes = [32, 1], strides = [1, 1]} : vector<32x3xf32> to vector<32x1xf32>
    %c1023_i32 = arith.constant 1023 : i32
    %36 = tpu.dynamic_rotate %21 by %c1023_i32 dim 1 : vector<1x1024xf32>, i32 -> vector<1x1024xf32>
    %cst_8 = arith.constant 0.000000e+00 : f32
    %37 = vector.broadcast %cst_8 : f32 to vector<1x1024xf32>
    %38 = arith.select %20, %37, %36 : vector<1x1024xi1>, vector<1x1024xf32>
    %39 = vector.broadcast %35 : vector<32x1xf32> to vector<32x1024xf32>
    %40 = vector.broadcast %38 : vector<1x1024xf32> to vector<32x1024xf32>
    %41 = arith.mulf %39, %40 : vector<32x1024xf32>
    %42 = arith.addf %34, %41 : vector<32x1024xf32>
    %c0_9 = arith.constant 0 : index
    %c0_10 = arith.constant 0 : index
    %43 = vector.load %arg2[%c0_9, %c0_10] : memref<32x1xf32, #tpu.memory_space<vmem>>, vector<32x1xf32>
    %44 = vector.broadcast %43 : vector<32x1xf32> to vector<32x1024xf32>
    %45 = arith.addf %42, %44 : vector<32x1024xf32>
    %cst_11 = arith.constant 0.000000e+00 : f32
    %46 = vector.broadcast %cst_11 : f32 to vector<32x1024xf32>
    %47 = arith.maximumf %45, %46 : vector<32x1024xf32>
    %c1_i32_12 = arith.constant 1 : i32
    %48 = tpu.dynamic_rotate %47 by %c1_i32_12 dim 1 : vector<32x1024xf32>, i32 -> vector<32x1024xf32>
    %cst_13 = arith.constant 0xFF800000 : f32
    %49 = vector.shape_cast %18 : vector<1x1024xi1> to vector<1x1024xi1>
    %50 = vector.broadcast %49 : vector<1x1024xi1> to vector<32x1024xi1>
    %51 = vector.broadcast %cst_13 : f32 to vector<32x1024xf32>
    %52 = arith.select %50, %51, %48 : vector<32x1024xi1>, vector<32x1024xf32>
    %53 = arith.maximumf %52, %47 : vector<32x1024xf32>
    %c1023_i32_14 = arith.constant 1023 : i32
    %54 = tpu.dynamic_rotate %47 by %c1023_i32_14 dim 1 : vector<32x1024xf32>, i32 -> vector<32x1024xf32>
    %cst_15 = arith.constant 0xFF800000 : f32
    %55 = vector.shape_cast %20 : vector<1x1024xi1> to vector<1x1024xi1>
    %56 = vector.broadcast %55 : vector<1x1024xi1> to vector<32x1024xi1>
    %57 = vector.broadcast %cst_15 : f32 to vector<32x1024xf32>
    %58 = arith.select %56, %57, %54 : vector<32x1024xi1>, vector<32x1024xf32>
    %59 = arith.maximumf %53, %58 : vector<32x1024xf32>
    %c1_i32_16 = arith.constant 1 : i32
    %60 = tpu.dynamic_rotate %59 by %c1_i32_16 dim 1 : vector<32x1024xf32>, i32 -> vector<32x1024xf32>
    %cst_17 = arith.constant 0.000000e+00 : f32
    %61 = vector.shape_cast %18 : vector<1x1024xi1> to vector<1x1024xi1>
    %62 = vector.broadcast %61 : vector<1x1024xi1> to vector<32x1024xi1>
    %63 = vector.broadcast %cst_17 : f32 to vector<32x1024xf32>
    %64 = arith.select %62, %63, %60 : vector<32x1024xi1>, vector<32x1024xf32>
    %c1023_i32_18 = arith.constant 1023 : i32
    %65 = tpu.dynamic_rotate %59 by %c1023_i32_18 dim 1 : vector<32x1024xf32>, i32 -> vector<32x1024xf32>
    %cst_19 = arith.constant 0.000000e+00 : f32
    %66 = vector.shape_cast %20 : vector<1x1024xi1> to vector<1x1024xi1>
    %67 = vector.broadcast %66 : vector<1x1024xi1> to vector<32x1024xi1>
    %68 = vector.broadcast %cst_19 : f32 to vector<32x1024xf32>
    %69 = arith.select %67, %68, %65 : vector<32x1024xi1>, vector<32x1024xf32>
    %70 = tpu.concatenate %64, %59, %69 in 0 : vector<32x1024xf32>, vector<32x1024xf32>, vector<32x1024xf32> -> vector<96x1024xf32>
    %c0_20 = arith.constant 0 : index
    %c0_21 = arith.constant 0 : index
    %71 = vector.load %arg3[%c0_20, %c0_21] : memref<64x96xbf16, #tpu.memory_space<vmem>>, vector<64x96xbf16>
    %72 = arith.truncf %70 : vector<96x1024xf32> to vector<96x1024xbf16>
    %cst_22 = arith.constant dense<0.000000e+00> : vector<64x1024xf32>
    %73 = tpu.matmul %71, %72, %cst_22 {dimension_numbers = #tpu.dot_dimension_numbers<[1], [0], [0], [1], [0, 0, 1, 1], [], []>} : vector<64x96xbf16>, vector<96x1024xbf16>, vector<64x1024xf32> -> vector<64x1024xf32>
    %c0_23 = arith.constant 0 : index
    %c0_24 = arith.constant 0 : index
    %74 = vector.load %arg4[%c0_23, %c0_24] : memref<64x1xf32, #tpu.memory_space<vmem>>, vector<64x1xf32>
    %75 = vector.broadcast %74 : vector<64x1xf32> to vector<64x1024xf32>
    %76 = arith.addf %73, %75 : vector<64x1024xf32>
    %cst_25 = arith.constant 0.000000e+00 : f32
    %77 = vector.broadcast %cst_25 : f32 to vector<64x1024xf32>
    %78 = arith.maximumf %76, %77 : vector<64x1024xf32>
    %c1_i32_26 = arith.constant 1 : i32
    %79 = tpu.dynamic_rotate %78 by %c1_i32_26 dim 1 : vector<64x1024xf32>, i32 -> vector<64x1024xf32>
    %cst_27 = arith.constant 0xFF800000 : f32
    %80 = vector.shape_cast %18 : vector<1x1024xi1> to vector<1x1024xi1>
    %81 = vector.broadcast %80 : vector<1x1024xi1> to vector<64x1024xi1>
    %82 = vector.broadcast %cst_27 : f32 to vector<64x1024xf32>
    %83 = arith.select %81, %82, %79 : vector<64x1024xi1>, vector<64x1024xf32>
    %84 = arith.maximumf %83, %78 : vector<64x1024xf32>
    %c1023_i32_28 = arith.constant 1023 : i32
    %85 = tpu.dynamic_rotate %78 by %c1023_i32_28 dim 1 : vector<64x1024xf32>, i32 -> vector<64x1024xf32>
    %cst_29 = arith.constant 0xFF800000 : f32
    %86 = vector.shape_cast %20 : vector<1x1024xi1> to vector<1x1024xi1>
    %87 = vector.broadcast %86 : vector<1x1024xi1> to vector<64x1024xi1>
    %88 = vector.broadcast %cst_29 : f32 to vector<64x1024xf32>
    %89 = arith.select %87, %88, %85 : vector<64x1024xi1>, vector<64x1024xf32>
    %90 = arith.maximumf %84, %89 : vector<64x1024xf32>
    %91 = arith.truncf %90 : vector<64x1024xf32> to vector<64x1024xbf16>
    %c0_30 = arith.constant 0 : index
    %c0_31 = arith.constant 0 : index
    %92 = vector.load %arg5[%c0_30, %c0_31] : memref<64x1024xbf16, #tpu.memory_space<vmem>>, vector<64x1024xbf16>
    tpu.vector_store %arg5[%c0_30, %c0_31], %91 {strides = array<i32>} : memref<64x1024xbf16, #tpu.memory_space<vmem>>, vector<64x1024xbf16>,
    return
  }
}

module attributes {stable_mosaic.version = 11 : i64} {
  func.func @mlp_kernel(%arg0: memref<8x8192xbf16, #tpu.memory_space<vmem>>, %arg1: memref<8192x128xbf16, #tpu.memory_space<vmem>>, %arg2: memref<1x128xf32, #tpu.memory_space<vmem>>, %arg3: memref<128x128xf32, #tpu.memory_space<vmem>>, %arg4: memref<1x128xf32, #tpu.memory_space<vmem>>, %arg5: memref<1x128xf32, #tpu.memory_space<vmem>>, %arg6: memref<1x1xf32, #tpu.memory_space<vmem>>, %arg7: memref<8x1xf32, #tpu.memory_space<vmem>>) attributes {dimension_semantics = [], scalar_prefetch = 0 : i64, scratch_operands = 0 : i64, tpu.core_type = #tpu.core_type<tc>} {
    %c0 = arith.constant 0 : index
    %c0_0 = arith.constant 0 : index
    %0 = vector.load %arg0[%c0, %c0_0] : memref<8x8192xbf16, #tpu.memory_space<vmem>>, vector<8x8192xbf16>
    %c0_1 = arith.constant 0 : index
    %c0_2 = arith.constant 0 : index
    %1 = vector.load %arg1[%c0_1, %c0_2] : memref<8192x128xbf16, #tpu.memory_space<vmem>>, vector<8192x128xbf16>
    %cst = arith.constant dense<0.000000e+00> : vector<8x128xf32>
    %2 = tpu.matmul %0, %1, %cst {dimension_numbers = #tpu.dot_dimension_numbers<[1], [0], [0], [1], [0, 0, 1, 1], [], []>} : vector<8x8192xbf16>, vector<8192x128xbf16>, vector<8x128xf32> -> vector<8x128xf32>
    %c0_3 = arith.constant 0 : index
    %c0_4 = arith.constant 0 : index
    %3 = vector.load %arg2[%c0_3, %c0_4] : memref<1x128xf32, #tpu.memory_space<vmem>>, vector<1x128xf32>
    %4 = vector.broadcast %3 : vector<1x128xf32> to vector<8x128xf32>
    %5 = arith.addf %2, %4 : vector<8x128xf32>
    %cst_5 = arith.constant 0.000000e+00 : f32
    %6 = vector.broadcast %cst_5 : f32 to vector<8x128xf32>
    %7 = arith.maximumf %5, %6 : vector<8x128xf32>
    %c0_6 = arith.constant 0 : index
    %c0_7 = arith.constant 0 : index
    %8 = vector.load %arg3[%c0_6, %c0_7] : memref<128x128xf32, #tpu.memory_space<vmem>>, vector<128x128xf32>
    %cst_8 = arith.constant dense<0.000000e+00> : vector<8x128xf32>
    %9 = tpu.matmul %7, %8, %cst_8 {dimension_numbers = #tpu.dot_dimension_numbers<[1], [0], [0], [1], [0, 0, 1, 1], [], []>} : vector<8x128xf32>, vector<128x128xf32>, vector<8x128xf32> -> vector<8x128xf32>
    %c0_9 = arith.constant 0 : index
    %c0_10 = arith.constant 0 : index
    %10 = vector.load %arg4[%c0_9, %c0_10] : memref<1x128xf32, #tpu.memory_space<vmem>>, vector<1x128xf32>
    %11 = vector.broadcast %10 : vector<1x128xf32> to vector<8x128xf32>
    %12 = arith.addf %9, %11 : vector<8x128xf32>
    %cst_11 = arith.constant 0.000000e+00 : f32
    %13 = vector.broadcast %cst_11 : f32 to vector<8x128xf32>
    %14 = arith.maximumf %12, %13 : vector<8x128xf32>
    %c0_12 = arith.constant 0 : index
    %c0_13 = arith.constant 0 : index
    %15 = vector.load %arg5[%c0_12, %c0_13] : memref<1x128xf32, #tpu.memory_space<vmem>>, vector<1x128xf32>
    %16 = vector.broadcast %15 : vector<1x128xf32> to vector<8x128xf32>
    %17 = arith.mulf %14, %16 : vector<8x128xf32>
    %cst_14 = arith.constant dense<0.000000e+00> : vector<8xf32>
    %18 = vector.multi_reduction <add>, %17, %cst_14 [1] : vector<8x128xf32> to vector<8xf32>
    %19 = vector.shape_cast %18 : vector<8xf32> to vector<8x1xf32>
    %c0_15 = arith.constant 0 : index
    %c0_16 = arith.constant 0 : index
    %20 = vector.load %arg6[%c0_15, %c0_16] : memref<1x1xf32, #tpu.memory_space<vmem>>, vector<1x1xf32>
    %21 = vector.broadcast %20 : vector<1x1xf32> to vector<8x1xf32>
    %22 = arith.addf %19, %21 : vector<8x1xf32>
    %23 = arith.negf %22 : vector<8x1xf32>
    %24 = math.exp %23 : vector<8x1xf32>
    %cst_17 = arith.constant 1.000000e+00 : f32
    %25 = vector.broadcast %cst_17 : f32 to vector<8x1xf32>
    %26 = arith.addf %25, %24 : vector<8x1xf32>
    %27 = arith.divf %25, %26 : vector<8x1xf32>
    %c0_18 = arith.constant 0 : index
    %c0_19 = arith.constant 0 : index
    %28 = vector.load %arg7[%c0_18, %c0_19] : memref<8x1xf32, #tpu.memory_space<vmem>>, vector<8x1xf32>
    tpu.vector_store %arg7[%c0_18, %c0_19], %27 {strides = array<i32>} : memref<8x1xf32, #tpu.memory_space<vmem>>, vector<8x1xf32>,
    return
  }
}

</mosaic_0001>

<bundles_post_ra>
// kernel: cnn1_forward.2
= control target key start
LH: loop header
LB: loop body
LE: loop exit
PB: predicated region body
PF: predicated region fallthrough
CT: control target
= control target key end

     0   :  { %10 = vsyncpa [#allocation3], 0  ;;  %s7696_s0 = inlined_call_operand.hbm [shape: f32[1,1024], index: 0, kind: input, shape index: {}]   ;;  %s7697_s1 = inlined_call_operand.vmem [shape: f32[32,3], index: 1, kind: input, shape index: {}]   ;;  %s7698_s2 = inlined_call_operand.vmem [shape: f32[32,1], index: 2, kind: input, shape index: {}]   ;;  %s7699_s3 = inlined_call_operand.hbm [shape: bf16[64,96], index: 3, kind: input, shape index: {}]   ;;  %s7700_s4 = inlined_call_operand.vmem [shape: f32[64,1], index: 4, kind: input, shape index: {}]   ;;  %s7701_s5 = inlined_call_operand.vmem [shape: bf16[64,1024], index: 5, kind: output, shape index: {}]  }
   0x1   :  { %11 = vsyncpa [#allocation5], 0  ;;  %s3567_s18 = smov [#allocation2]   ;;  %s3568_s20 = smov [#allocation4]  }
   0x2   :  { %s18_s19 = sshll.u32 %s3567_s18, 4  ;;  %s31_s21 = sshll.u32 %s3568_s20, 4  ;;  %s19_s19 = int_to_ptr.vmem [resolvable:$true] %s18_s19  ;;  %s3606_s21 = int_to_ptr.vmem [resolvable:$true] %s31_s21 }
   0x3   :  { %s3519_s24 = scalar_lea.hbm %s7696_s0, 128 }
   0x4   :  { %p3520_p0 = scmp.ne.s32.totalorder %s7696_s0, %s3519_s24  ;;  %p3523_p1 = scmp.lt.u32.totalorder %s3519_s24, %s7696_s0 }
   0x6   :  { %p3525_p2 = pnand %p3523_p1, %p3520_p0 }
   0x8   :  { %3528 = shalt.err (!%p3525_p2)
}
   0x9   :  { %s3529_s29 = scalar_lea.vmem %s19_s19, 128  ;;  %p3534_p4 = scmp.lt.s32.totalorder %s19_s19, %s19_s19 }
   0xa   :  { %p3530_p3 = scmp.ne.s32.totalorder %s19_s19, %s3529_s29  ;;  %p3535_p5 = scmp.lt.s32.totalorder %s3529_s29, %s3529_s29 }
   0xc   :  { %p3536_p6 = por %p3535_p5, %p3534_p4 }
   0xe   :  { %p3537_p7 = pnand %p3536_p6, %p3530_p3 }
  0x10   :  { %3540 = shalt.err (!%p3537_p7)
}
  0x11   :  { %21 = dma.hbm_to_vmem [thread:$0]  %s7696_s0, 128, %s19_s19, [#allocation3]  }
  0x12   :  { %s3541_s9 = scalar_lea.hbm %s7699_s3, 512 }
  0x13   :  { %p3542_p8 = scmp.ne.s32.totalorder %s7699_s3, %s3541_s9  ;;  %p3545_p9 = scmp.lt.u32.totalorder %s3541_s9, %s7699_s3 }
  0x15   :  { %p3547_p10 = pnand %p3545_p9, %p3542_p8 }
  0x17   :  { %3550 = shalt.err (!%p3547_p10)
}
  0x18   :  { %s3551_s14 = scalar_lea.vmem %s3606_s21, 512  ;;  %p3556_p12 = scmp.lt.s32.totalorder %s3606_s21, %s3606_s21 }
  0x19   :  { %p3552_p11 = scmp.ne.s32.totalorder %s3606_s21, %s3551_s14  ;;  %p3557_p13 = scmp.lt.s32.totalorder %s3551_s14, %s3551_s14 }
  0x1b   :  { %p3558_p0 = por %p3557_p13, %p3556_p12 }
  0x1d   :  { %p3559_p1 = pnand %p3558_p0, %p3552_p11 }
  0x1f   :  { %3562 = shalt.err (!%p3559_p1)
}
  0x20   :  { %s3569_s0 = smov 64   ;;  %s3570_s15 = smov 4  }
  0x21   :  { %37 = dma.hbm_to_vmem [thread:$0]  %s7699_s3, 512, %s3606_s21, [#allocation5], %s3569_s0, %s3569_s0, %s3570_s15  }
  0x22   :  { %3563 = dma.done.wait [#allocation3], 128  }
  0x23   :  { %3564 = vsyncadd [#allocation3], 4294967168 }
  0x24   :  { %3565 = dma.done.wait [#allocation5], 512  }
  0x25   :  { %3566 = vsyncadd [#allocation5], 4294966784  ;;  %v47_v0 = vlaneseq  ;;  %v3571_v1 = vmov 1   ;;  %v7702_v2 = vmov 0   ;;  %v168_v8 = vld [vmem:[#allocation2] sm:$0xff]  ;;  %s3573_s3 = smov 1  }
  0x26   :  { %2870 = vset.pattern.permute.xlu0 %v3571_v1  ;;  %2868 = vset.pattern.permute.xlu1 %v7702_v2  ;;  %v170_v21 = vld [vmem:[%s7697_s1 + $0x8] sm:$0xff]  ;;  %v171_v22 = vld [vmem:[%s7697_s1 + $0x10] sm:$0xff]  ;;  %s3574_s22 = smov 127   ;;  %v3575_v23 = vmov 2   ;;  %v169_v24 = vld [vmem:[%s7697_s1] sm:$0xff]  ;;  %v7984_v53 = vmov 0 }
  0x27   :  { %v175_v3 = vshrl.u32 %v47_v0, 7  ;;  %1494 = vmatprep.mubr.bf16.mxu1 %v7702_v2  ;;  %1421 = vmatprep.mubr.bf16.mxu0 %v7702_v2  ;;  %v172_v25 = vld [vmem:[%s7697_s1 + $0x18] sm:$0xff]  ;;  %v557_v26 = vld [vmem:[%s7698_s2 + $0x8] sm:$0xff]  ;;  %v556_v27 = vld [vmem:[%s7698_s2] sm:$0xff]  ;;  %v3719_v36 = vand.u32 127, %v47_v0  ;;  %v7987_v54 = vmov 0 }
  0x28   :  { %v558_v28 = vld [vmem:[%s7698_s2 + $0x10] sm:$0xff]  ;;  %v559_v29 = vld [vmem:[%s7698_s2 + $0x18] sm:$0xff]  ;;  %v7990_v59 = vmov 0  ;;  %v7993_v60 = vmov 0 }
  0x29   :  { %v3641_v4 = vsub.s32 0, %v175_v3  ;;  %v184_v5 = vsub.s32 2, %v175_v3  ;;  %v188_v6 = vsub.s32 3, %v175_v3  ;;  %v180_v7 = vsub.s32 1, %v175_v3  ;;  %7983 = vst [vmem:[#allocation10_spill] sm:$0xff] %v3719_v36 }
  0x2a   :  { %v196_v13 = vsub.s32 5, %v175_v3  ;;  %v192_v14 = vsub.s32 4, %v175_v3  ;;  %v204_v15 = vsub.s32 7, %v175_v3  ;;  %v200_v16 = vsub.s32 6, %v175_v3 }
  0x2b   :  { %v3643_v9 = vrot.slane %v168_v8, %v184_v5  ;;  %v3646_v10 = vrot.slane %v168_v8, %v3641_v4  ;;  %v3652_v11 = vrot.slane %v168_v8, %v188_v6  ;;  %v3654_v12 = vrot.slane %v168_v8, %v180_v7 }
  0x2c   :  { %v3660_v17 = vrot.slane %v168_v8, %v196_v13  ;;  %v3662_v18 = vrot.slane %v168_v8, %v192_v14  ;;  %v3668_v19 = vrot.slane %v168_v8, %v204_v15  ;;  %v3670_v20 = vrot.slane %v168_v8, %v200_v16 }
  0x2d   :  { %218 = vrot.lane.b32.xlu1 %v3643_v9, %s3573_s3  ;;  %214 = vrot.lane.b32.xlu0 %v3646_v10, %s3573_s3  ;;  %v3722_v37 = vadd.s32 384, %v3719_v36  ;;  %v3725_v38 = vadd.s32 128, %v3719_v36  ;;  %v3728_v41 = vadd.s32 256, %v3719_v36  ;;  %v3731_v42 = vadd.s32 512, %v3719_v36 }
  0x2e   :  { %7981 = vst [vmem:[#allocation8_spill] sm:$0xff] %v3668_v19  ;;  %7982 = vst [vmem:[#allocation9_spill] sm:$0xff] %v3670_v20  ;;  %v3734_v43 = vadd.s32 640, %v3719_v36  ;;  %v3739_v46 = vadd.s32 768, %v3719_v36  ;;  %vm7819_vm0 = vcmp.lt.s32.totalorder %v3719_v36, 1  ;;  %v3749_v51 = vadd.s32 896, %v3719_v36 }
  0x2f   :  { %v81_v44 = vand.u32 127, %v3722_v37  ;;  %v67_v45 = vand.u32 127, %v3725_v38  ;;  %v74_v49 = vand.u32 127, %v3728_v41  ;;  %v7707_v50 = vand.u32 127, %v3731_v42 }
  0x30   :  { %v7706_v52 = vand.u32 127, %v3734_v43  ;;  %vm7732_vm3 = vcmp.eq.s32.totalorder %v3719_v36, 0  ;;  %v7705_v55 = vand.u32 127, %v3739_v46  ;;  %v7996_v3 = vmov 0 }
  0x31   :  { %220 = vrot.lane.b32.xlu1 %v3652_v11, %s3573_s3  ;;  %216 = vrot.lane.b32.xlu0 %v3654_v12, %s3573_s3  ;;  %vm3754_vm1 = vcmp.eq.s32.totalorder %v81_v44, 0  ;;  %vm3760_vm2 = vcmp.eq.s32.totalorder %v67_v45, 0  ;;  %vm3774_vm4 = vcmp.eq.s32.totalorder %v74_v49, 0  ;;  %vm3780_vm5 = vcmp.eq.s32.totalorder %v7707_v50, 0 }
  0x32   :  { %v7985_v53 = vsel %vm3754_vm1, 4294967295, %v7984_v53  ;;  %v7988_v54 = vsel %vm3760_vm2, 4294967295, %v7987_v54  ;;  %v7991_v59 = vsel %vm3774_vm4, 4294967295, %v7990_v59  ;;  %v7994_v60 = vsel %vm3780_vm5, 4294967295, %v7993_v60 }
  0x33   :  { %7986 = vst [vmem:[#allocation11_spill] sm:$0xff] %v7985_v53  ;;  %7989 = vst [vmem:[#allocation12_spill] sm:$0xff] %v7988_v54  ;;  %vm3795_vm6 = vcmp.eq.s32.totalorder %v7706_v52, 0  ;;  %vm3807_vm7 = vcmp.eq.s32.totalorder %v7705_v55, 0  ;;  %v7999_v8 = vmov 0  ;;  %vm7788_vm9 = vcmp.lt.s32.totalorder %v3719_v36, 127 }
  0x34   :  { %7992 = vst [vmem:[#allocation13_spill] sm:$0xff] %v7991_v59  ;;  %7995 = vst [vmem:[#allocation14_spill] sm:$0xff] %v7994_v60  ;;  %v7997_v3 = vsel %vm3795_vm6, 4294967295, %v7996_v3  ;;  %v8000_v8 = vsel %vm3807_vm7, 4294967295, %v7999_v8  ;;  %vm7731_vm10 = vcmp.eq.s32.totalorder %v3719_v36, 127  ;;  %vm3897_vm11 = vcmp.eq.s32.totalorder %v67_v45, 127 }
  0x35   :  { %224 = vrot.lane.b32.xlu1 %v3660_v17, %s3573_s3  ;;  %222 = vrot.lane.b32.xlu0 %v3662_v18, %s3573_s3  ;;  %7998 = vst [vmem:[#allocation15_spill] sm:$0xff] %v7997_v3  ;;  %8001 = vst [vmem:[#allocation16_spill] sm:$0xff] %v8000_v8  ;;  %vm3905_vm12 = vcmp.eq.s32.totalorder %v74_v49, 127  ;;  %vm3937_vm13 = vcmp.eq.s32.totalorder %v81_v44, 127  ;;  %v8023_v37 = vmov 0  ;;  %v8026_v44 = vand.u32 127, %v3734_v43 }
  0x37   :  { %vm3957_vm15 = vcmp.eq.s32.totalorder %v8026_v44, 127 }
  0x39   :  { %228 = vrot.lane.b32.xlu1 %v3668_v19, %s3573_s3  ;;  %226 = vrot.lane.b32.xlu0 %v3670_v20, %s3573_s3 }
  0x3d   :  { %254 = vperm.xlu1 %2868, %v170_v21   ;;  %336 = vperm.xlu0 %2870, %v170_v21  }
  0x41   :  { %259 = vperm.xlu1 %2868, %v171_v22   ;;  %411 = vrot.lane.b32.xlu0 %v3646_v10, %s3574_s22 }
  0x42   :  { %2871 = vset.pattern.permute.xlu0 %v3575_v23 }
  0x45   :  { %2869 = vset.pattern.permute.xlu1 %v3571_v1  ;;  %415 = vrot.lane.b32.xlu0 %v3643_v9, %s3574_s22  ;;  %v7704_v1 = vand.u32 127, %v3749_v51 }
  0x46   :  { %332 = vperm.xlu1 %2869, %v169_v24  }
  0x47   :  { %vm3827_vm8 = vcmp.eq.s32.totalorder %v7704_v1, 0  ;;  %v8012_v1 = vmov 0 }
  0x48   :  { %v8013_v1 = vsel %vm3905_vm12, 4294967295, %v8012_v1 }
  0x49   :  { %419 = vrot.lane.b32.xlu0 %v3662_v18, %s3574_s22  ;;  %8014 = vst [vmem:[#allocation23_spill] sm:$0xff] %v8013_v1 }
  0x4a   :  { %340 = vperm.xlu1 %2869, %v171_v22  }
  0x4d   :  { %423 = vrot.lane.b32.xlu0 %v3670_v20, %s3574_s22 }
  0x4e   :  { %344 = vperm.xlu1 %2869, %v172_v25  }
  0x51   :  { %445 = vperm.xlu0 %2871, %v169_v24  }
  0x52   :  { %413 = vrot.lane.b32.xlu1 %v3654_v12, %s3574_s22 }
  0x53   :  { %2872 = vset.pattern.permute.xlu1 %v3575_v23 }
  0x55   :  { %457 = vperm.xlu0 %2871, %v172_v25  }
  0x56   :  { %417 = vrot.lane.b32.xlu1 %v3652_v11, %s3574_s22 }
  0x59   :  { %2873 = vset.pattern.permute.xlu0 %v7702_v2 }
  0x5a   :  { %421 = vrot.lane.b32.xlu1 %v3660_v17, %s3574_s22  ;;  %249 = vperm.xlu0 %2873, %v169_v24   ;;  %v8002_v24 = vmov 0 }
  0x5b   :  { %v8003_v24 = vsel %vm3827_vm8, 4294967295, %v8002_v24 }
  0x5c   :  { %8004 = vst [vmem:[#allocation17_spill] sm:$0xff] %v8003_v24  ;;  %v8027_v24 = vmov 0 }
  0x5d   :  { %v8028_v24 = vsel %vm3957_vm15, 4294967295, %v8027_v24 }
  0x5e   :  { %425 = vrot.lane.b32.xlu1 %v3668_v19, %s3574_s22  ;;  %264 = vperm.xlu0 %2873, %v172_v25   ;;  %8029 = vst [vmem:[#allocation30_spill] sm:$0xff] %v8028_v24 }
  0x62   :  { %449 = vperm.xlu1 %2872, %v170_v21   ;;  %567 = vperm.xlu0 %2873, %v557_v26  }
  0x66   :  { %453 = vperm.xlu1 %2872, %v171_v22  }
  0x6a   :  { %2874 = vset.pattern.permute.xlu1 %v7702_v2 }
  0x6b   :  { %562 = vperm.xlu1 %2874, %v556_v27  }
  0x6f   :  { %572 = vperm.xlu1 %2874, %v558_v28  }
  0x73   :  { %577 = vperm.xlu1 %2874, %v559_v29  }
  0x9f   :  { %v219_v30 = vpop.permute.xlu1 %218  ;;  %v215_v31 = vpop.permute.xlu0 %214 }
  0xa3   :  { %v221_v32 = vpop.permute.xlu1 %220  ;;  %v217_v33 = vpop.permute.xlu0 %216 }
  0xa4   :  { %v235_v58 = vsel %vm7819_vm0, %v219_v30, %v221_v32  ;;  %v236_v62 = vsel %vm7819_vm0, %v217_v33, %v219_v30  ;;  %v237_v63 = vsel %vm7819_vm0, %v215_v31, %v217_v33 }
  0xa5   :  { %v242_v6 = vsel %vm3754_vm1, 0.0, %v235_v58  ;;  %v240_v14 = vsel %vm3760_vm2, 0.0, %v237_v63  ;;  %v241_v15 = vsel %vm3774_vm4, 0.0, %v236_v62 }
  0xa6   :  { %v3834_v26 = vrot.slane %v242_v6, %v3641_v4  ;;  %v3840_v28 = vrot.slane %v240_v14, %v3641_v4  ;;  %v3843_v29 = vrot.slane %v241_v15, %v3641_v4 }
  0xa7   :  { %v225_v34 = vpop.permute.xlu1 %224  ;;  %v223_v35 = vpop.permute.xlu0 %222 }
  0xa8   :  { %v234_v0 = vsel %vm7819_vm0, %v221_v32, %v223_v35  ;;  %v233_v5 = vsel %vm7819_vm0, %v223_v35, %v225_v34 }
  0xa9   :  { %v243_v16 = vsel %vm3780_vm5, 0.0, %v234_v0  ;;  %v244_v23 = vsel %vm3795_vm6, 0.0, %v233_v5 }
  0xaa   :  { %v3846_v30 = vrot.slane %v243_v16, %v3641_v4  ;;  %v3853_v33 = vrot.slane %v244_v23, %v3641_v4 }
  0xab   :  { %v229_v39 = vpop.permute.xlu1 %228  ;;  %v227_v40 = vpop.permute.xlu0 %226 }
  0xac   :  { %v238_v61 = vsel %vm7819_vm0, %v229_v39, %v215_v31  ;;  %v232_v21 = vsel %vm7819_vm0, %v225_v34, %v227_v40  ;;  %v231_v25 = vsel %vm7819_vm0, %v227_v40, %v229_v39  ;;  %8005 = vst [vmem:[#allocation18_spill] sm:$0xff] %v3853_v33 }
  0xad   :  { %v239_v7 = vsel %vm7732_vm3, 0.0, %v238_v61  ;;  %v245_v31 = vsel %vm3807_vm7, 0.0, %v232_v21  ;;  %v246_v34 = vsel %vm3827_vm8, 0.0, %v231_v25 }
  0xae   :  { %v3837_v27 = vrot.slane %v239_v7, %v3641_v4  ;;  %v3873_v0 = vrot.slane %v245_v31, %v3641_v4  ;;  %v3890_v23 = vrot.slane %v246_v34, %v3641_v4  ;;  %v8009_v31 = vmov 0 }
  0xaf   :  { %v8010_v31 = vsel %vm3897_vm11, 4294967295, %v8009_v31 }
  0xb0   :  { %8006 = vst [vmem:[#allocation19_spill] sm:$0xff] %v3873_v0  ;;  %8007 = vst [vmem:[#allocation20_spill] sm:$0xff] %v3890_v23 }
  0xb1   :  { %8011 = vst [vmem:[#allocation22_spill] sm:$0xff] %v8010_v31 }
  0xbc   :  { %v3741_v47 = vpop.permute.xlu1 %254  ;;  %v3743_v48 = vpop.permute.xlu0 %336 }
  0xbd   :  { %v307_v39 = vmul.f32 %v3837_v27, %v3741_v47  ;;  %v355_v40 = vmul.f32 %v3743_v48, %v3646_v10  ;;  %v308_v58 = vmul.f32 %v3840_v28, %v3741_v47  ;;  %v356_v61 = vmul.f32 %v3743_v48, %v3654_v12 }
  0xbe   :  { %v309_v62 = vmul.f32 %v3843_v29, %v3741_v47  ;;  %v357_v63 = vmul.f32 %v3743_v48, %v3643_v9  ;;  %v310_v5 = vmul.f32 %v3834_v26, %v3741_v47  ;;  %v358_v6 = vmul.f32 %v3743_v48, %v3652_v11 }
  0xbf   :  { %v311_v14 = vmul.f32 %v3846_v30, %v3741_v47  ;;  %v359_v15 = vmul.f32 %v3743_v48, %v3662_v18  ;;  %v312_v16 = vmul.f32 %v3853_v33, %v3741_v47  ;;  %v360_v21 = vmul.f32 %v3743_v48, %v3660_v17 }
  0xc0   :  { %v3766_v56 = vpop.permute.xlu1 %259  ;;  %v3768_v57 = vpop.permute.xlu0 %411  ;;  %v3901_v2 = vadd.f32 %v355_v40, %v307_v39  ;;  %v3909_v34 = vadd.f32 %v356_v61, %v308_v58  ;;  %v3911_v55 = vadd.f32 %v357_v63, %v309_v62  ;;  %v313_v52 = vmul.f32 %v3873_v0, %v3741_v47 }
  0xc1   :  { %v361_v38 = vmul.f32 %v3743_v48, %v3670_v20  ;;  %v315_v45 = vmul.f32 %v3837_v27, %v3766_v56  ;;  %v316_v41 = vmul.f32 %v3840_v28, %v3766_v56  ;;  %v3921_v49 = vadd.f32 %v358_v6, %v310_v5 }
  0xc2   :  { %8015 = vst [vmem:[#allocation24_spill] sm:$0xff] %v3911_v55  ;;  %v317_v39 = vmul.f32 %v3843_v29, %v3766_v56  ;;  %v3927_v58 = vadd.f32 %v359_v15, %v311_v14  ;;  %v318_v61 = vmul.f32 %v3834_v26, %v3766_v56  ;;  %v3931_v62 = vadd.f32 %v360_v21, %v312_v16 }
  0xc3   :  { %8016 = vst [vmem:[#allocation25_spill] sm:$0xff] %v3921_v49  ;;  %v319_v63 = vmul.f32 %v3846_v30, %v3766_v56  ;;  %v8019_v5 = vmov 0  ;;  %v320_v6 = vmul.f32 %v3853_v33, %v3766_v56  ;;  %v314_v14 = vmul.f32 %v3890_v23, %v3741_v47 }
  0xc4   :  { %v3811_v13 = vpop.permute.xlu0 %415  ;;  %8017 = vst [vmem:[#allocation26_spill] sm:$0xff] %v3927_v58  ;;  %8018 = vst [vmem:[#allocation27_spill] sm:$0xff] %v3931_v62  ;;  %v8020_v5 = vsel %vm3937_vm13, 4294967295, %v8019_v5  ;;  %v322_v15 = vmul.f32 %v3890_v23, %v3766_v56  ;;  %v362_v16 = vmul.f32 %v3743_v48, %v3668_v19  ;;  %v8022_v21 = vand.u32 127, %v3731_v42 }
  0xc5   :  { %v3821_v22 = vpop.permute.xlu1 %332  ;;  %8021 = vst [vmem:[#allocation28_spill] sm:$0xff] %v8020_v5  ;;  %v3969_v48 = vadd.f32 %v361_v38, %v313_v52  ;;  %v321_v42 = vmul.f32 %v3873_v0, %v3766_v56 }
  0xc6   :  { %vm3951_vm14 = vcmp.eq.s32.totalorder %v8022_v21, 127  ;;  %v3963_v47 = vmul.f32 %v3821_v22, %v3646_v10  ;;  %v3967_v8 = vmul.f32 %v3821_v22, %v3654_v12  ;;  %v3977_v21 = vmul.f32 %v3821_v22, %v3643_v9 }
  0xc7   :  { %v8024_v37 = vsel %vm3951_vm14, 4294967295, %v8023_v37  ;;  %8030 = vst [vmem:[#allocation31_spill] sm:$0xff] %v3969_v48  ;;  %v3983_v3 = vmul.f32 %v3821_v22, %v3652_v11  ;;  %v3999_v54 = vmul.f32 %v3821_v22, %v3662_v18  ;;  %v4003_v23 = vmul.f32 %v3821_v22, %v3660_v17 }
  0xc8   :  { %v3850_v32 = vpop.permute.xlu0 %419  ;;  %8025 = vst [vmem:[#allocation29_spill] sm:$0xff] %v8024_v37  ;;  %v4014_v62 = vmul.f32 %v3821_v22, %v3670_v20  ;;  %v4016_v33 = vadd.f32 %v362_v16, %v314_v14  ;;  %v4020_v58 = vmul.f32 %v3821_v22, %v3668_v19 }
  0xc9   :  { %v3857_v35 = vpop.permute.xlu1 %340  ;;  %8031 = vst [vmem:[#allocation32_spill] sm:$0xff] %v3999_v54  ;;  %8032 = vst [vmem:[#allocation33_spill] sm:$0xff] %v4003_v23 }
  0xca   :  { %v363_v43 = vmul.f32 %v3857_v35, %v3646_v10  ;;  %v364_v44 = vmul.f32 %v3857_v35, %v3654_v12  ;;  %v365_v60 = vmul.f32 %v3857_v35, %v3643_v9  ;;  %v366_v53 = vmul.f32 %v3857_v35, %v3652_v11  ;;  %8033 = vst [vmem:[#allocation34_spill] sm:$0xff] %v4020_v58 }
  0xcb   :  { %v368_v48 = vmul.f32 %v3857_v35, %v3660_v17  ;;  %v370_v49 = vmul.f32 %v3857_v35, %v3668_v19 }
  0xcc   :  { %v3879_v7 = vpop.permute.xlu0 %423  ;;  %v4030_v55 = vadd.f32 %v363_v43, %v315_v45  ;;  %v4032_v14 = vadd.f32 %v364_v44, %v316_v41  ;;  %v4034_v16 = vadd.f32 %v365_v60, %v317_v39  ;;  %v4036_v22 = vadd.f32 %v366_v53, %v318_v61 }
  0xcd   :  { %v3892_v25 = vpop.permute.xlu1 %344  ;;  %v8035_v45 = vmov 0  ;;  %v8038_v60 = vand.u32 127, %v3749_v51  ;;  %v8039_v53 = vmov 0 }
  0xce   :  { %8008 = vst [vmem:[#allocation21_spill] sm:$0xff] %v3892_v25  ;;  %v371_v61 = vmul.f32 %v3892_v25, %v3646_v10 }
  0xcf   :  { %vm4053_vm3 = vcmp.eq.s32.totalorder %v8038_v60, 127 }
  0xd0   :  { %v3925_v40 = vpop.permute.xlu0 %445  ;;  %v8040_v53 = vsel %vm4053_vm3, 4294967295, %v8039_v53 }
  0xd1   :  { %v414_v50 = vpop.permute.xlu1 %413  ;;  %8041 = vst [vmem:[#allocation36_spill] sm:$0xff] %v8040_v53 }
  0xd2   :  { %v433_v52 = vsel %vm7788_vm9, %v414_v50, %v3811_v13  ;;  %v434_v56 = vsel %vm7788_vm9, %v3768_v57, %v414_v50  ;;  %v367_v50 = vmul.f32 %v3857_v35, %v3662_v18 }
  0xd3   :  { %v436_v23 = vsel %vm7731_vm10, 0.0, %v434_v56  ;;  %v437_v54 = vsel %vm3897_vm11, 0.0, %v433_v52 }
  0xd4   :  { %v3991_v38 = vpop.permute.xlu0 %457  ;;  %v4057_v41 = vadd.f32 %v367_v50, %v319_v63  ;;  %v4065_v39 = vrot.slane %v437_v54, %v3641_v4  ;;  %v372_v63 = vmul.f32 %v3892_v25, %v3654_v12 }
  0xd5   :  { %v418_v59 = vpop.permute.xlu1 %417 }
  0xd6   :  { %v432_v0 = vsel %vm7788_vm9, %v3811_v13, %v418_v59  ;;  %v369_v13 = vmul.f32 %v3857_v35, %v3670_v20  ;;  %v431_v56 = vsel %vm7788_vm9, %v418_v59, %v3850_v32  ;;  %v8034_v35 = vand.u32 127, %v3739_v46 }
  0xd7   :  { %v438_v52 = vsel %vm3905_vm12, 0.0, %v432_v0  ;;  %v4059_v59 = vadd.f32 %v368_v48, %v320_v6  ;;  %v4062_v0 = vrot.slane %v436_v23, %v3641_v4  ;;  %v4077_v6 = vadd.f32 %v370_v49, %v322_v15 }
  0xd8   :  { %vm4047_vm10 = vcmp.eq.s32.totalorder %v8034_v35, 127  ;;  %v4079_v23 = vadd.f32 %v369_v13, %v321_v42  ;;  %v439_v54 = vsel %vm3937_vm13, 0.0, %v431_v56  ;;  %v4084_v48 = vrot.slane %v438_v52, %v3641_v4 }
  0xd9   :  { %v422_v31 = vpop.permute.xlu1 %421  ;;  %v4043_v19 = vpop.permute.xlu0 %249  ;;  %v8036_v45 = vsel %vm4047_vm10, 4294967295, %v8035_v45  ;;  %8042 = vst [vmem:[#allocation37_spill] sm:$0xff] %v4059_v59  ;;  %8043 = vst [vmem:[#allocation38_spill] sm:$0xff] %v4077_v6  ;;  %v4096_v49 = vmul.f32 %v3892_v25, %v3652_v11  ;;  %v4100_v15 = vmul.f32 %v3892_v25, %v3662_v18  ;;  %v493_v44 = vmul.f32 %v4065_v39, %v3925_v40  ;;  %v8045_v59 = vld [vmem:[#allocation24_spill] sm:$0xff] }
  0xda   :  { %8037 = vst [vmem:[#allocation35_spill] sm:$0xff] %v8036_v45  ;;  %v429_v46 = vsel %vm7788_vm9, %v422_v31, %v3879_v7  ;;  %v430_v51 = vsel %vm7788_vm9, %v3850_v32, %v422_v31  ;;  %8044 = vst [vmem:[#allocation39_spill] sm:$0xff] %v4079_v23  ;;  %v299_v43 = vmul.f32 %v3837_v27, %v4043_v19 }
  0xdb   :  { %v373_v32 = vmul.f32 %v3892_v25, %v3643_v9  ;;  %v440_v10 = vsel %vm3951_vm14, 0.0, %v430_v51  ;;  %v441_v12 = vsel %vm3957_vm15, 0.0, %v429_v46  ;;  %v492_v9 = vmul.f32 %v4062_v0, %v3925_v40 }
  0xdc   :  { %v516_v50 = vmul.f32 %v4062_v0, %v3991_v38  ;;  %v4112_v13 = vmul.f32 %v3892_v25, %v3660_v17  ;;  %v4115_v11 = vrot.slane %v439_v54, %v3641_v4  ;;  %v300_v18 = vmul.f32 %v3840_v28, %v4043_v19 }
  0xdd   :  { %v426_v31 = vpop.permute.xlu1 %425  ;;  %v4102_v42 = vpop.permute.xlu0 %264  ;;  %v301_v56 = vmul.f32 %v3843_v29, %v4043_v19  ;;  %v517_v52 = vmul.f32 %v4065_v39, %v3991_v38  ;;  %v4124_v35 = vrot.slane %v440_v10, %v3641_v4  ;;  %v4127_v60 = vrot.slane %v441_v12, %v3641_v4 }
  0xde   :  { %v379_v17 = vadd.f32 %v3963_v47, %v299_v43  ;;  %v494_v46 = vmul.f32 %v4084_v48, %v3925_v40  ;;  %v428_v51 = vsel %vm7788_vm9, %v3879_v7, %v426_v31  ;;  %v435_v54 = vsel %vm7788_vm9, %v426_v31, %v3768_v57 }
  0xdf   :  { %v323_v10 = vmul.f32 %v3837_v27, %v4102_v42  ;;  %v302_v12 = vmul.f32 %v3834_v26, %v4043_v19  ;;  %v324_v7 = vmul.f32 %v3840_v28, %v4102_v42  ;;  %v325_v57 = vmul.f32 %v3843_v29, %v4102_v42 }
  0xe0   :  { %v380_v31 = vadd.f32 %v3967_v8, %v300_v18  ;;  %v381_v37 = vadd.f32 %v3977_v21, %v301_v56  ;;  %v495_v5 = vmul.f32 %v4115_v11, %v3925_v40  ;;  %v442_v1 = vsel %vm4047_vm10, 0.0, %v428_v51 }
  0xe1   :  { %v4138_v24 = vpop.permute.xlu1 %449  ;;  %v443_v36 = vsel %vm4053_vm3, 0.0, %v435_v54  ;;  %v518_v8 = vmul.f32 %v4084_v48, %v3991_v38  ;;  %v403_v56 = vadd.f32 %v371_v61, %v323_v10  ;;  %v382_v25 = vadd.f32 %v3983_v3, %v302_v12  ;;  %v4171_v45 = vpop.permute.xlu0 %567  ;;  %v8046_v61 = vld [vmem:[#allocation25_spill] sm:$0xff] }
  0xe2   :  { %v500_v47 = vmul.f32 %v4062_v0, %v4138_v24  ;;  %v501_v43 = vmul.f32 %v4065_v39, %v4138_v24  ;;  %v502_v27 = vmul.f32 %v4084_v48, %v4138_v24  ;;  %v503_v28 = vmul.f32 %v4115_v11, %v4138_v24 }
  0xe3   :  { %v524_v51 = vadd.f32 %v492_v9, %v379_v17  ;;  %v404_v53 = vadd.f32 %v372_v63, %v324_v7  ;;  %v405_v54 = vadd.f32 %v373_v32, %v325_v57  ;;  %v303_v20 = vmul.f32 %v3846_v30, %v4043_v19 }
  0xe4   :  { %v532_v21 = vadd.f32 %v500_v47, %v3901_v2  ;;  %v533_v18 = vadd.f32 %v501_v43, %v3909_v34  ;;  %v525_v23 = vadd.f32 %v493_v44, %v380_v31  ;;  %v526_v58 = vadd.f32 %v494_v46, %v381_v37  ;;  %v8047_v46 = vld [vmem:[#allocation32_spill] sm:$0xff] }
  0xe5   :  { %v4166_v29 = vpop.permute.xlu1 %453  ;;  %v534_v6 = vadd.f32 %v502_v27, %v8045_v59  ;;  %v504_v2 = vmul.f32 %v4124_v35, %v4138_v24  ;;  %v4179_v34 = vrot.slane %v442_v1, %v3641_v4  ;;  %v4182_v3 = vrot.slane %v443_v36, %v3641_v4 }
  0xe6   :  { %v535_v9 = vadd.f32 %v503_v28, %v8046_v61  ;;  %v496_v63 = vmul.f32 %v4124_v35, %v3925_v40  ;;  %v4188_v32 = vadd.f32 %v4171_v45, %v532_v21  ;;  %v4191_v37 = vadd.f32 %v4171_v45, %v533_v18  ;;  %v8049_v61 = vld [vmem:[#allocation18_spill] sm:$0xff] }
  0xe7   :  { %v548_v59 = vadd.f32 %v516_v50, %v403_v56  ;;  %v527_v44 = vadd.f32 %v495_v5, %v382_v25  ;;  %v508_v1 = vmul.f32 %v4062_v0, %v4166_v29  ;;  %v549_v4 = vadd.f32 %v517_v52, %v404_v53  ;;  %v8048_v50 = vld [vmem:[#allocation26_spill] sm:$0xff] }
  0xe8   :  { %v550_v36 = vadd.f32 %v518_v8, %v405_v54  ;;  %v383_v10 = vadd.f32 %v8047_v46, %v303_v20  ;;  %v4205_v43 = vadd.f32 %v4171_v45, %v534_v6  ;;  %v536_v25 = vadd.f32 %v504_v2, %v8048_v50 }
  0xe9   :  { %v509_v5 = vmul.f32 %v4065_v39, %v4166_v29  ;;  %v4211_v0 = vadd.f32 %v4171_v45, %v535_v9  ;;  %v326_v20 = vmul.f32 %v3834_v26, %v4102_v42  ;;  %v7760_v7 = vmax.f32 %v4191_v37, 0.0 }
  0xea   :  { %v4193_v17 = vpop.permute.xlu1 %562  ;;  %v528_v53 = vadd.f32 %v496_v63, %v383_v10  ;;  %v510_v6 = vmul.f32 %v4084_v48, %v4166_v29  ;;  %v511_v26 = vmul.f32 %v4115_v11, %v4166_v29  ;;  %v4242_v8 = vadd.f32 %v4171_v45, %v536_v25 }
  0xeb   :  { %v4199_v12 = vadd.f32 %v4193_v17, %v524_v51  ;;  %v4202_v47 = vadd.f32 %v4193_v17, %v525_v23  ;;  %v7750_v23 = vmax.f32 %v4188_v32, 0.0  ;;  %v4223_v39 = vadd.f32 %v4193_v17, %v526_v58 }
  0xec   :  { %v4226_v31 = vadd.f32 %v4193_v17, %v527_v44  ;;  %v4229_v27 = vadd.f32 %v4193_v17, %v528_v53  ;;  %v540_v58 = vadd.f32 %v508_v1, %v4030_v55  ;;  %v7758_v21 = vmax.f32 %v4205_v43, 0.0 }
  0xed   :  { %v7751_v52 = vmax.f32 %v4199_v12, 0.0  ;;  %v7769_v48 = vmax.f32 %v4202_v47, 0.0  ;;  %v541_v18 = vadd.f32 %v509_v5, %v4032_v14  ;;  %v7756_v56 = vmax.f32 %v4211_v0, 0.0 }
  0xee   :  { %v4220_v57 = vpop.permute.xlu1 %572  ;;  %v406_v51 = vadd.f32 %v4096_v49, %v326_v20  ;;  %v542_v2 = vadd.f32 %v510_v6, %v4034_v16  ;;  %v519_v55 = vmul.f32 %v4115_v11, %v3991_v38  ;;  %v304_v9 = vmul.f32 %v8049_v61, %v4043_v19  ;;  %v8051_v20 = vld [vmem:[#allocation33_spill] sm:$0xff] }
  0xef   :  { %v4237_v28 = vpack.i.bf16 %v7750_v23, %v7751_v52  ;;  %v4251_v54 = vadd.f32 %v4220_v57, %v540_v58  ;;  %v7759_v14 = vmax.f32 %v4223_v39, 0.0  ;;  %v7757_v49 = vmax.f32 %v4226_v31, 0.0  ;;  %v8052_v52 = vld [vmem:[#allocation27_spill] sm:$0xff] }
  0xf0   :  { %v7753_v44 = vmax.f32 %v4229_v27, 0.0  ;;  %v543_v1 = vadd.f32 %v511_v26, %v4036_v22  ;;  %v4268_v16 = vpack.i.bf16 %v7760_v7, %v7769_v48  ;;  %v7752_v10 = vmax.f32 %v4242_v8, 0.0 }
  0xf1   :  { %2876 = vrot.lane.b32.xlu0 %v4237_v28, %s3573_s3  ;;  %v551_v50 = vadd.f32 %v519_v55, %v406_v51  ;;  %v497_v25 = vmul.f32 %v4127_v60, %v3925_v40  ;;  %v505_v22 = vmul.f32 %v4127_v60, %v4138_v24  ;;  %v327_v5 = vmul.f32 %v3846_v30, %v4102_v42 }
  0xf2   :  { %v4258_v63 = vpop.permute.xlu1 %577  ;;  %v4288_v53 = vadd.f32 %v4220_v57, %v541_v18  ;;  %v384_v6 = vadd.f32 %v8051_v20, %v304_v9  ;;  %v4295_v26 = vpack.i.bf16 %v7758_v21, %v7759_v14  ;;  %v4301_v30 = vpack.i.bf16 %v7756_v56, %v7757_v49  ;;  %v8054_v14 = vld [vmem:[#allocation31_spill] sm:$0xff] }
  0xf3   :  { %v4271_v11 = vadd.f32 %v4258_v63, %v548_v59  ;;  %v4274_v46 = vadd.f32 %v4258_v63, %v549_v4  ;;  %v7755_v59 = vmax.f32 %v4251_v54, 0.0  ;;  %v4304_v58 = vadd.f32 %v4220_v57, %v542_v2 }
  0xf4   :  { %v4310_v18 = vpack.i.bf16 %v7752_v10, %v7753_v44  ;;  %v4320_v9 = vadd.f32 %v4258_v63, %v550_v36  ;;  %v4323_v2 = vadd.f32 %v4220_v57, %v543_v1  ;;  %v4326_v20 = vadd.f32 %v4258_v63, %v551_v50 }
  0xf5   :  { %8050 = vst [vmem:[#allocation24_spill] sm:$0xff] %v4271_v11  ;;  %2886 = vrot.lane.b32.xlu0 %v4268_v16, %s3573_s3  ;;  %v7754_v4 = vmax.f32 %v4271_v11, 0.0  ;;  %v7761_v55 = vmax.f32 %v4274_v46, 0.0  ;;  %v529_v23 = vadd.f32 %v497_v25, %v384_v6  ;;  %v537_v10 = vadd.f32 %v505_v22, %v8052_v52 }
  0xf6   :  { %v407_v44 = vadd.f32 %v4100_v15, %v327_v5  ;;  %v7768_v36 = vmax.f32 %v4288_v53, 0.0  ;;  %v498_v50 = vmul.f32 %v4179_v34, %v3925_v40  ;;  %v506_v25 = vmul.f32 %v4179_v34, %v4138_v24 }
  0xf7   :  { %v4316_v51 = vpack.i.bf16 %v7754_v4, %v7755_v59  ;;  %v8053_v4 = vld [vmem:[#allocation19_spill] sm:$0xff]  ;;  %v7763_v52 = vmax.f32 %v4304_v58, 0.0  ;;  %v512_v15 = vmul.f32 %v4124_v35, %v4166_v29  ;;  %v520_v22 = vmul.f32 %v4124_v35, %v3991_v38 }
  0xf8   :  { %v305_v1 = vmul.f32 %v8053_v4, %v4043_v19  ;;  %v328_v5 = vmul.f32 %v8049_v61, %v4102_v42  ;;  %v4352_v6 = vpack.i.bf16 %v7761_v55, %v7768_v36  ;;  %v7762_v59 = vmax.f32 %v4320_v9, 0.0 }
  0xf9   :  { %2881 = vrot.lane.b32.xlu1 %v4316_v51, %s3573_s3  ;;  %2896 = vrot.lane.b32.xlu0 %v4295_v26, %s3573_s3  ;;  %v4356_v56 = vadd.f32 %v4193_v17, %v529_v23  ;;  %v552_v21 = vadd.f32 %v520_v22, %v407_v44  ;;  %v538_v7 = vadd.f32 %v506_v25, %v8054_v14  ;;  %v7764_v55 = vmax.f32 %v4326_v20, 0.0 }
  0xfa   :  { %v385_v49 = vadd.f32 %v4014_v62, %v305_v1  ;;  %v408_v35 = vadd.f32 %v4112_v13, %v328_v5  ;;  %v507_v61 = vmul.f32 %v4182_v3, %v4138_v24  ;;  %v4369_v23 = vadd.f32 %v4171_v45, %v537_v10  ;;  %v8055_v5 = vld [vmem:[#allocation38_spill] sm:$0xff] }
  0xfb   :  { %v515_v14 = vmul.f32 %v4182_v3, %v4166_v29  ;;  %v544_v13 = vadd.f32 %v512_v15, %v4057_v41  ;;  %v4375_v44 = vadd.f32 %v4258_v63, %v552_v21  ;;  %v513_v24 = vmul.f32 %v4127_v60, %v4166_v29 }
  0xfc   :  { %v530_v62 = vadd.f32 %v498_v50, %v385_v49  ;;  %v521_v1 = vmul.f32 %v4127_v60, %v3991_v38  ;;  %v4385_v10 = vpack.i.bf16 %v7762_v59, %v7763_v52  ;;  %v7765_v49 = vmax.f32 %v4323_v2, 0.0  ;;  %v8056_v59 = vld [vmem:[#allocation20_spill] sm:$0xff] }
  0xfd   :  { %2891 = vrot.lane.b32.xlu1 %v4352_v6, %s3573_s3  ;;  %2906 = vrot.lane.b32.xlu0 %v4301_v30, %s3573_s3  ;;  %v7767_v50 = vmax.f32 %v4356_v56, 0.0  ;;  %v4393_v21 = vadd.f32 %v4220_v57, %v544_v13  ;;  %v4396_v25 = vadd.f32 %v4171_v45, %v538_v7  ;;  %v539_v15 = vadd.f32 %v507_v61, %v4016_v33  ;;  %v8057_v61 = vld [vmem:[#allocation37_spill] sm:$0xff] }
  0xfe   :  { %v4390_v41 = vadd.f32 %v4193_v17, %v530_v62  ;;  %v553_v60 = vadd.f32 %v521_v1, %v408_v35  ;;  %v7766_v22 = vmax.f32 %v4369_v23, 0.0  ;;  %v547_v62 = vadd.f32 %v515_v14, %v8055_v5 }
  0xff   :  { %v306_v13 = vmul.f32 %v8056_v59, %v4043_v19  ;;  %v514_v7 = vmul.f32 %v4179_v34, %v4166_v29  ;;  %v2910_v33 = vpack.i.bf16 %v7764_v55, %v7765_v49  ;;  %v7776_v35 = vmax.f32 %v4375_v44, 0.0 }
 0x100   :  { %v545_v1 = vadd.f32 %v513_v24, %v8057_v61  ;;  %v4416_v52 = vadd.f32 %v4258_v63, %v553_v60  ;;  %v2925_v19 = vpack.i.bf16 %v7766_v22, %v7767_v50  ;;  %v7775_v14 = vmax.f32 %v4390_v41, 0.0  ;;  %v8058_v61 = vld [vmem:[#allocation34_spill] sm:$0xff]  ;;  %v8059_v50 = vld [vmem:[#allocation39_spill] sm:$0xff] }
 0x101   :  { %2901 = vrot.lane.b32.xlu1 %v4385_v10, %s3573_s3  ;;  %2916 = vrot.lane.b32.xlu0 %v4310_v18, %s3573_s3  ;;  %v603_v29 = vadd.f32 %v4220_v57, %v547_v62  ;;  %v499_v5 = vmul.f32 %v4182_v3, %v3925_v40  ;;  %v7778_v55 = vmax.f32 %v4393_v21, 0.0  ;;  %v7774_v24 = vmax.f32 %v4396_v25, 0.0 }
 0x102   :  { %v4428_v49 = vadd.f32 %v4220_v57, %v545_v1  ;;  %v595_v60 = vadd.f32 %v4171_v45, %v539_v15  ;;  %v386_v22 = vadd.f32 %v8058_v61, %v306_v13  ;;  %v546_v62 = vadd.f32 %v514_v7, %v8059_v50  ;;  %v8061_v61 = vld [vmem:[#allocation21_spill] sm:$0xff] }
 0x103   :  { %v2920_v40 = vpack.i.bf16 %v7776_v35, %v7778_v55  ;;  %v7771_v1 = vmax.f32 %v4416_v52, 0.0  ;;  %v2935_v36 = vpack.i.bf16 %v7774_v24, %v7775_v14  ;;  %v4445_v48 = vmax.f32 %v603_v29, 0.0 }
 0x104   :  { %v531_v11 = vadd.f32 %v499_v5, %v386_v22  ;;  %v602_v45 = vadd.f32 %v4220_v57, %v546_v62  ;;  %v7772_v50 = vmax.f32 %v4428_v49, 0.0  ;;  %v4451_v15 = vmax.f32 %v595_v60, 0.0  ;;  %v8060_v60 = vld [vmem:[#allocation9_spill] sm:$0xff] }
 0x105   :  { %2911 = vrot.lane.b32.xlu1 %v2910_v33, %s3573_s3  ;;  %2926 = vrot.lane.b32.xlu0 %v2925_v19, %s3573_s3  ;;  %v377_v62 = vmul.f32 %v8061_v61, %v8060_v60  ;;  %v8065_v24 = vmax.f32 %v4202_v47, 0.0 }
 0x106   :  { %v587_v13 = vadd.f32 %v4193_v17, %v531_v11  ;;  %v2930_v7 = vpack.i.bf16 %v7771_v1, %v7772_v50  ;;  %v2945_v22 = vpack.i.bf16 %v4445_v48, %v4451_v15  ;;  %v4460_v29 = vmax.f32 %v602_v45, 0.0  ;;  %v8062_v45 = vld [vmem:[#allocation8_spill] sm:$0xff] }
 0x107   :  { %v329_v17 = vmul.f32 %v8053_v4, %v4102_v42  ;;  %v330_v11 = vmul.f32 %v8056_v59, %v4102_v42  ;;  %v523_v4 = vmul.f32 %v4182_v3, %v3991_v38 }
 0x108   :  { %v4464_v57 = vmax.f32 %v587_v13, 0.0  ;;  %v378_v13 = vmul.f32 %v8061_v61, %v8062_v45 }
 0x109   :  { %2921 = vrot.lane.b32.xlu1 %v2920_v40, %s3573_s3  ;;  %2936 = vrot.lane.b32.xlu0 %v2935_v36, %s3573_s3  ;;  %v409_v1 = vadd.f32 %v377_v62, %v329_v17 }
 0x10a   :  { %v2940_v5 = vpack.i.bf16 %v4464_v57, %v4460_v29  ;;  %v410_v50 = vadd.f32 %v378_v13, %v330_v11 }
 0x10c   :  { %v555_v59 = vadd.f32 %v523_v4, %v410_v50 }
 0x10d   :  { %2931 = vrot.lane.b32.xlu1 %v2930_v7, %s3573_s3  ;;  %2946 = vrot.lane.b32.xlu0 %v2945_v22, %s3573_s3  ;;  %v522_v22 = vmul.f32 %v4179_v34, %v3991_v38 }
 0x10e   :  { %v611_v34 = vadd.f32 %v4258_v63, %v555_v59 }
 0x10f   :  { %v554_v42 = vadd.f32 %v522_v22, %v409_v1 }
 0x110   :  { %v4496_v3 = vmax.f32 %v611_v34, 0.0 }
 0x111   :  { %2941 = vrot.lane.b32.xlu1 %v2940_v5, %s3573_s3  ;;  %2956 = vrot.lane.b32.xlu0 %v4268_v16, %s3574_s22  ;;  %v2975_v16 = vpack.i.bf16 %v4451_v15, %v4464_v57  ;;  %v610_v5 = vadd.f32 %v4258_v63, %v554_v42 }
 0x112   :  { %v3010_v63 = vpack.i.bf16 %v4496_v3, %v4445_v48 }
 0x113   :  { %v4494_v38 = vmax.f32 %v610_v5, 0.0 }
 0x115   :  { %2951 = vrot.lane.b32.xlu1 %v4237_v28, %s3574_s22  ;;  %2966 = vrot.lane.b32.xlu0 %v4301_v30, %s3574_s22  ;;  %v2980_v28 = vpack.i.bf16 %v4494_v38, %v4496_v3 }
 0x119   :  { %2961 = vrot.lane.b32.xlu1 %v4295_v26, %s3574_s22  ;;  %2976 = vrot.lane.b32.xlu0 %v2975_v16, %s3574_s22  ;;  %v3030_v26 = vpack.i.bf16 %v4494_v38, %v4460_v29 }
 0x11d   :  { %2971 = vrot.lane.b32.xlu1 %v4310_v18, %s3574_s22  ;;  %2986 = vrot.lane.b32.xlu0 %v4316_v51, %s3574_s22 }
 0x121   :  { %2981 = vrot.lane.b32.xlu1 %v2980_v28, %s3573_s3  ;;  %2996 = vrot.lane.b32.xlu0 %v4385_v10, %s3574_s22 }
 0x125   :  { %2991 = vrot.lane.b32.xlu1 %v4352_v6, %s3574_s22  ;;  %3006 = vrot.lane.b32.xlu0 %v2920_v40, %s3574_s22 }
 0x129   :  { %3001 = vrot.lane.b32.xlu1 %v2910_v33, %s3574_s22  ;;  %3016 = vrot.lane.b32.xlu0 %v2925_v19, %s3574_s22 }
 0x12d   :  { %3011 = vrot.lane.b32.xlu1 %v3010_v63, %s3574_s22  ;;  %3026 = vrot.lane.b32.xlu0 %v2935_v36, %s3574_s22  ;;  %v8063_v36 = vld [vmem:[#allocation10_spill] sm:$0xff] }
 0x12e   :  { %vm8098_vm9 = vcmp.eq.s32.totalorder %v8063_v36, 0 }
 0x131   :  { %3021 = vrot.lane.b32.xlu1 %v2930_v7, %s3574_s22 }
 0x135   :  { %3031 = vrot.lane.b32.xlu1 %v3030_v26, %s3574_s22 }
 0x163   :  { %v4520_v30 = vpop.permute.xlu0 %2876 }
 0x164   :  { %v7779_v33 = vunpack.i.l.bf16 %v4520_v30  ;;  %v7773_v11 = vunpack.i.h.bf16 %v4520_v30 }
 0x167   :  { %v2887_v18 = vpop.permute.xlu0 %2886 }
 0x168   :  { %v2888_v10 = vunpack.i.l.bf16 %v2887_v18  ;;  %v2889_v1 = vunpack.i.h.bf16 %v2887_v18 }
 0x16a   :  { %v732_v50 = vsel %vm7819_vm0, %v7779_v33, %v2888_v10  ;;  %v733_v22 = vsel %vm7819_vm0, %v7773_v11, %v2889_v1 }
 0x16b   :  { %v4522_v51 = vpop.permute.xlu1 %2881  ;;  %v2897_v6 = vpop.permute.xlu0 %2896  ;;  %v757_v42 = vsel %vm3760_vm2, -inf, %v732_v50 }
 0x16c   :  { %v2899_v7 = vunpack.i.h.bf16 %v2897_v6  ;;  %v2898_v17 = vunpack.i.l.bf16 %v2897_v6  ;;  %v7777_v59 = vunpack.i.h.bf16 %v4522_v51  ;;  %v7780_v16 = vunpack.i.l.bf16 %v4522_v51 }
 0x16d   :  { %v4560_v14 = vmax.f32 %v757_v42, %v8065_v24  ;;  %v8067_v24 = vmax.f32 %v4191_v37, 0.0 }
 0x16e   :  { %v728_v5 = vsel %vm7819_vm0, %v2888_v10, %v2898_v17  ;;  %v729_v34 = vsel %vm7819_vm0, %v2889_v1, %v2899_v7  ;;  %v765_v10 = vsel %vm3760_vm2, -inf, %v733_v22 }
 0x16f   :  { %v2892_v19 = vpop.permute.xlu1 %2891  ;;  %v2907_v40 = vpop.permute.xlu0 %2906  ;;  %v4576_v42 = vmax.f32 %v765_v10, %v8067_v24 }
 0x170   :  { %v2894_v60 = vunpack.i.h.bf16 %v2892_v19  ;;  %v2893_v61 = vunpack.i.l.bf16 %v2892_v19  ;;  %v2908_v62 = vunpack.i.l.bf16 %v2907_v40  ;;  %v2909_v28 = vunpack.i.h.bf16 %v2907_v40 }
 0x172   :  { %v734_v26 = vsel %vm7819_vm0, %v7780_v16, %v2893_v61  ;;  %v735_v18 = vsel %vm7819_vm0, %v7777_v59, %v2894_v60  ;;  %v724_v40 = vsel %vm7819_vm0, %v2898_v17, %v2908_v62  ;;  %v758_v59 = vsel %vm3774_vm4, -inf, %v728_v5 }
 0x173   :  { %v2902_v45 = vpop.permute.xlu1 %2901  ;;  %v4530_v13 = vpop.permute.xlu0 %2916  ;;  %v773_v22 = vsel %vm3760_vm2, -inf, %v734_v26  ;;  %v781_v17 = vsel %vm3760_vm2, -inf, %v735_v18  ;;  %v759_v55 = vsel %vm3754_vm1, -inf, %v724_v40  ;;  %v8069_v18 = vmax.f32 %v4223_v39, 0.0 }
 0x174   :  { %v2903_v63 = vunpack.i.l.bf16 %v2902_v45  ;;  %v2904_v6 = vunpack.i.h.bf16 %v2902_v45  ;;  %v2918_v19 = vunpack.i.l.bf16 %v4530_v13  ;;  %v2919_v1 = vunpack.i.h.bf16 %v4530_v13 }
 0x175   :  { %v766_v45 = vsel %vm3774_vm4, -inf, %v729_v34  ;;  %v725_v13 = vsel %vm7819_vm0, %v2899_v7, %v2909_v28  ;;  %v4586_v33 = vmax.f32 %v758_v59, %v8069_v18  ;;  %v8070_v7 = vmax.f32 %v4205_v43, 0.0 }
 0x176   :  { %v730_v47 = vsel %vm7819_vm0, %v2893_v61, %v2903_v63  ;;  %v731_v34 = vsel %vm7819_vm0, %v2894_v60, %v2904_v6  ;;  %v720_v26 = vsel %vm7819_vm0, %v2908_v62, %v2918_v19  ;;  %v721_v37 = vsel %vm7819_vm0, %v2909_v28, %v2919_v1 }
 0x177   :  { %v2912_v50 = vpop.permute.xlu1 %2911  ;;  %v2927_v11 = vpop.permute.xlu0 %2926  ;;  %v4590_v61 = vmax.f32 %v766_v45, %v8070_v7  ;;  %v8071_v60 = vmax.f32 %v4288_v53, 0.0  ;;  %v8072_v62 = vmax.f32 %v4274_v46, 0.0  ;;  %v767_v43 = vsel %vm3754_vm1, -inf, %v725_v13 }
 0x178   :  { %v2913_v10 = vunpack.i.l.bf16 %v2912_v50  ;;  %v774_v59 = vsel %vm3774_vm4, -inf, %v730_v47  ;;  %v8073_v28 = vmax.f32 %v4226_v31, 0.0  ;;  %v782_v18 = vsel %vm3774_vm4, -inf, %v731_v34 }
 0x179   :  { %v4598_v16 = vmax.f32 %v773_v22, %v8071_v60  ;;  %v4602_v39 = vmax.f32 %v781_v17, %v8072_v62  ;;  %v760_v22 = vsel %vm3780_vm5, -inf, %v720_v26  ;;  %v2914_v7 = vunpack.i.h.bf16 %v2912_v50 }
 0x17a   :  { %v4610_v45 = vmax.f32 %v759_v55, %v8073_v28  ;;  %v768_v46 = vsel %vm3780_vm5, -inf, %v721_v37  ;;  %v2929_v17 = vunpack.i.h.bf16 %v2927_v11  ;;  %v2928_v60 = vunpack.i.l.bf16 %v2927_v11 }
 0x17b   :  { %v2922_v24 = vpop.permute.xlu1 %2921  ;;  %v4594_v40 = vpop.permute.xlu0 %2936  ;;  %v8075_v62 = vmax.f32 %v4211_v0, 0.0  ;;  %v8076_v31 = vmax.f32 %v4304_v58, 0.0  ;;  %v726_v34 = vsel %vm7819_vm0, %v2903_v63, %v2913_v10  ;;  %v8077_v37 = vmax.f32 %v4320_v9, 0.0 }
 0x17c   :  { %v2923_v13 = vunpack.i.l.bf16 %v2922_v24  ;;  %v2924_v28 = vunpack.i.h.bf16 %v2922_v24  ;;  %v8078_v0 = vmax.f32 %v4229_v27, 0.0  ;;  %v2939_v58 = vunpack.i.h.bf16 %v4594_v40 }
 0x17d   :  { %v4620_v47 = vmax.f32 %v767_v43, %v8075_v62  ;;  %v4624_v55 = vmax.f32 %v774_v59, %v8076_v31  ;;  %v4634_v11 = vmax.f32 %v782_v18, %v8077_v37  ;;  %v2938_v59 = vunpack.i.l.bf16 %v4594_v40 }
 0x17e   :  { %v4638_v43 = vmax.f32 %v760_v22, %v8078_v0  ;;  %v8079_v62 = vmax.f32 %v4242_v8, 0.0  ;;  %v727_v24 = vsel %vm7819_vm0, %v2904_v6, %v2914_v7  ;;  %v775_v27 = vsel %vm3754_vm1, -inf, %v726_v34 }
 0x17f   :  { %v4628_v26 = vpop.permute.xlu1 %2931  ;;  %v4630_v50 = vpop.permute.xlu0 %2946  ;;  %v716_v18 = vsel %vm7819_vm0, %v2918_v19, %v2928_v60  ;;  %v717_v40 = vsel %vm7819_vm0, %v2919_v1, %v2929_v17  ;;  %v722_v8 = vsel %vm7819_vm0, %v2913_v10, %v2923_v13  ;;  %v723_v22 = vsel %vm7819_vm0, %v2914_v7, %v2924_v28 }
 0x180   :  { %v4644_v63 = vmax.f32 %v768_v46, %v8079_v62  ;;  %v7783_v31 = vunpack.i.h.bf16 %v4628_v26  ;;  %v7781_v9 = vunpack.i.l.bf16 %v4628_v26  ;;  %v712_v6 = vsel %vm7819_vm0, %v2928_v60, %v2938_v59 }
 0x181   :  { %v713_v46 = vsel %vm7819_vm0, %v2929_v17, %v2939_v58  ;;  %v783_v1 = vsel %vm3754_vm1, -inf, %v727_v24  ;;  %v2948_v17 = vunpack.i.l.bf16 %v4630_v50  ;;  %v8080_v60 = vmax.f32 %v4323_v2, 0.0 }
 0x182   :  { %v718_v10 = vsel %vm7819_vm0, %v2923_v13, %v7781_v9  ;;  %v719_v7 = vsel %vm7819_vm0, %v2924_v28, %v7783_v31  ;;  %v761_v34 = vsel %vm3795_vm6, -inf, %v716_v18  ;;  %v769_v24 = vsel %vm3795_vm6, -inf, %v717_v40 }
 0x183   :  { %v4665_v37 = vpop.permute.xlu1 %2941  ;;  %v4667_v19 = vpop.permute.xlu0 %2956  ;;  %v4682_v0 = vmax.f32 %v775_v27, %v8080_v60  ;;  %v776_v13 = vsel %vm3780_vm5, -inf, %v722_v8  ;;  %v784_v9 = vsel %vm3780_vm5, -inf, %v723_v22  ;;  %v762_v28 = vsel %vm3807_vm7, -inf, %v712_v6  ;;  %vm8101_vm5 = vmmov %vm8098_vm9 }
 0x184   :  { %v770_v2 = vsel %vm3807_vm7, -inf, %v713_v46  ;;  %v2944_v27 = vunpack.i.h.bf16 %v4665_v37  ;;  %v8083_v60 = vmax.f32 %v4326_v20, 0.0  ;;  %v777_v40 = vsel %vm3795_vm6, -inf, %v718_v10 }
 0x185   :  { %v785_v8 = vsel %vm3795_vm6, -inf, %v719_v7  ;;  %v8084_v22 = vunpack.i.l.bf16 %v4522_v51  ;;  %v8085_v31 = vunpack.i.h.bf16 %v4630_v50  ;;  %v8086_v20 = vmax.f32 %v4356_v56, 0.0 }
 0x186   :  { %v4699_v18 = vmax.f32 %v783_v1, %v8083_v60  ;;  %v8087_v60 = vmax.f32 %v4369_v23, 0.0  ;;  %v709_v7 = vsel %vm7819_vm0, %v2939_v58, %v2948_v17  ;;  %v8088_v62 = vunpack.i.l.bf16 %v4520_v30 }
 0x187   :  { %v738_v6 = vsel %vm7819_vm0, %v8085_v31, %v8084_v22  ;;  %v2952_v46 = vpop.permute.xlu1 %2951  ;;  %v4711_v53 = vpop.permute.xlu0 %2966  ;;  %v4715_v1 = vmax.f32 %v761_v34, %v8086_v20  ;;  %v8089_v31 = vmax.f32 %v4393_v21, 0.0  ;;  %v8090_v56 = vmax.f32 %v4375_v44, 0.0 }
 0x188   :  { %v4719_v10 = vmax.f32 %v769_v24, %v8087_v60  ;;  %v736_v5 = vsel %vm7819_vm0, %v2944_v27, %v8088_v62  ;;  %v8091_v23 = vmax.f32 %v4390_v41, 0.0  ;;  %v8093_v20 = vmax.f32 %v4396_v25, 0.0 }
 0x189   :  { %v4729_v22 = vmax.f32 %v776_v13, %v8089_v31  ;;  %v4733_v34 = vmax.f32 %v784_v9, %v8090_v56  ;;  %v8095_v60 = vmax.f32 %v4428_v49, 0.0  ;;  %v8096_v21 = vmax.f32 %v4416_v52, 0.0 }
 0x18a   :  { %v4737_v24 = vmax.f32 %v762_v28, %v8091_v23  ;;  %v4741_v58 = vmax.f32 %v770_v2, %v8093_v20  ;;  %v772_v44 = vsel %vm8098_vm9, -inf, %v738_v6  ;;  %v8099_v9 = vunpack.i.h.bf16 %v4520_v30 }
 0x18b   :  { %v4745_v4 = vmax.f32 %v777_v40, %v8095_v60  ;;  %v4749_v62 = vmax.f32 %v785_v8, %v8096_v21  ;;  %v771_v25 = vsel %vm3827_vm8, -inf, %v709_v7  ;;  %v756_v49 = vsel %vm8101_vm5, -inf, %v736_v5  ;;  %v2962_v52 = vpop.permute.xlu1 %2961  ;;  %v4762_v40 = vpop.permute.xlu0 %2976 }
 0x18c   :  { %8092 = vst [vmem:[#allocation25_spill] sm:$0xff] %v4737_v24  ;;  %8094 = vst [vmem:[#allocation32_spill] sm:$0xff] %v4741_v58  ;;  %v737_v41 = vsel %vm7819_vm0, %v2948_v17, %v8099_v9  ;;  %v2959_v28 = vunpack.i.h.bf16 %v4667_v19  ;;  %v2954_v2 = vunpack.i.h.bf16 %v2952_v46  ;;  %v2943_v8 = vunpack.i.l.bf16 %v4665_v37 }
 0x18d   :  { %8097 = vst [vmem:[#allocation26_spill] sm:$0xff] %v4749_v62  ;;  %v2958_v6 = vunpack.i.l.bf16 %v4667_v19  ;;  %v2953_v30 = vunpack.i.l.bf16 %v2952_v46  ;;  %v2964_v31 = vunpack.i.h.bf16 %v2962_v52  ;;  %vm8102_vm9 = vcmp.lt.s32.totalorder %v8063_v36, 127 }
 0x18e   :  { %v909_v17 = vsel %vm8102_vm9, %v2954_v2, %v2959_v28  ;;  %v2969_v7 = vunpack.i.h.bf16 %v4711_v53  ;;  %v2968_v56 = vunpack.i.l.bf16 %v4711_v53  ;;  %v2963_v5 = vunpack.i.l.bf16 %v2962_v52  ;;  %vm8104_vm6 = vmmov %vm8102_vm9 }
 0x18f   :  { %v764_v23 = vsel %vm8101_vm5, -inf, %v737_v41  ;;  %v708_v20 = vsel %vm7819_vm0, %v2938_v59, %v2944_v27  ;;  %v8103_v37 = vmax.f32 %v4199_v12, 0.0  ;;  %v908_v19 = vsel %vm8104_vm6, %v2953_v30, %v2958_v6  ;;  %vm8106_vm9 = vmmov %vm8104_vm6  ;;  %v4785_v41 = vpop.permute.xlu1 %2971  ;;  %v4787_v59 = vpop.permute.xlu0 %2986 }
 0x190   :  { %vm8105_vm4 = vcmp.eq.s32.totalorder %v8063_v36, 127  ;;  %v900_v21 = vsel %vm8106_vm9, %v2963_v5, %v2968_v56  ;;  %vm8107_vm1 = vmmov %vm8104_vm6  ;;  %v8112_v9 = vunpack.i.h.bf16 %v4630_v50  ;;  %v8113_v62 = vunpack.i.l.bf16 %v4628_v26 }
 0x191   :  { %v788_v60 = vmax.f32 %v756_v49, %v8103_v37  ;;  %v932_v46 = vsel %vm8105_vm4, -inf, %v908_v19  ;;  %v901_v53 = vsel %vm8107_vm1, %v2964_v31, %v2969_v7  ;;  %vm8108_vm5 = vmmov %vm8105_vm4  ;;  %v934_v52 = vsel %vm3905_vm12, -inf, %v900_v21 }
 0x192   :  { %v940_v12 = vsel %vm8108_vm5, -inf, %v909_v17  ;;  %vm8109_vm6 = vmmov %vm8107_vm1  ;;  %v8111_v19 = vmax.f32 %v4188_v32, 0.0  ;;  %v710_v24 = vsel %vm7819_vm0, %v2943_v8, %v8112_v9  ;;  %v714_v17 = vsel %vm7819_vm0, %v8113_v62, %v2943_v8 }
 0x193   :  { %v904_v27 = vsel %vm8109_vm6, %v2958_v6, %v2963_v5  ;;  %v7797_v6 = vunpack.i.l.bf16 %v4785_v41  ;;  %v763_v5 = vsel %vm3827_vm8, -inf, %v708_v20  ;;  %v905_v21 = vsel %vm8107_vm1, %v2959_v28, %v2964_v31  ;;  %v4820_v62 = vpop.permute.xlu1 %2981  ;;  %v4822_v8 = vpop.permute.xlu0 %2996  ;;  %vm8118_vm4 = vmmov %vm8107_vm1 }
 0x194   :  { %v796_v58 = vmax.f32 %v764_v23, %v8111_v19  ;;  %v942_v32 = vsel %vm3905_vm12, -inf, %v901_v53  ;;  %v4813_v50 = vmax.f32 %v788_v60, %v932_v46  ;;  %v933_v9 = vsel %vm3897_vm11, -inf, %v904_v27  ;;  %vm8120_vm9 = vmmov %vm8107_vm1 }
 0x195   :  { %v7798_v19 = vunpack.i.h.bf16 %v4785_v41  ;;  %v4825_v20 = vmax.f32 %v4586_v33, %v934_v52  ;;  %v8116_v28 = vmax.f32 %v4251_v54, 0.0  ;;  %v778_v60 = vsel %vm3807_vm7, -inf, %v714_v17  ;;  %vm8121_vm5 = vmmov %vm8107_vm1 }
 0x196   :  { %v4818_v37 = vmax.f32 %v796_v58, %v940_v12  ;;  %v8117_v46 = vunpack.i.h.bf16 %v4762_v40  ;;  %v8119_v53 = vunpack.i.l.bf16 %v4762_v40  ;;  %v941_v33 = vsel %vm3897_vm11, -inf, %v905_v21  ;;  %vm8123_vm6 = vmmov %vm8107_vm1 }
 0x197   :  { %v4829_v31 = vmax.f32 %v772_v44, %v8116_v28  ;;  %v896_v54 = vsel %vm8121_vm5, %v2968_v56, %v7797_v6  ;;  %v4852_v27 = vmax.f32 %v4590_v61, %v942_v32  ;;  %v795_v52 = vmax.f32 %v763_v5, %v4464_v57  ;;  %v4875_v57 = vpop.permute.xlu0 %3006 }
 0x198   :  { %8115 = vst [vmem:[#allocation18_spill] sm:$0xff] %v4818_v37  ;;  %v913_v58 = vsel %vm8118_vm4, %v8117_v46, %v2954_v2  ;;  %v912_v12 = vsel %vm8120_vm9, %v8119_v53, %v2953_v30  ;;  %v4849_v44 = vpack.i.bf16 %v4818_v37, %v4813_v50  ;;  %v803_v2 = vmax.f32 %v771_v25, %v4451_v15  ;;  %vm8127_vm4 = vmmov %vm8107_vm1 }
 0x199   :  { %v779_v30 = vsel %vm3827_vm8, -inf, %v710_v24  ;;  %v4859_v17 = vmax.f32 %v4560_v14, %v933_v9  ;;  %v947_v56 = vsel %vm4053_vm3, -inf, %v913_v58  ;;  %v939_v28 = vsel %vm4053_vm3, -inf, %v912_v12  ;;  %v2992_v14 = vpop.permute.xlu1 %2991  ;;  %vm8130_vm9 = vmmov %vm8107_vm1 }
 0x19a   :  { %v897_v61 = vsel %vm8123_vm6, %v2969_v7, %v7798_v19  ;;  %3036 = vrot.lane.b32.xlu0 %v4849_v44, %s3573_s3  ;;  %v4873_v15 = vpack.i.bf16 %v4852_v27, %v4825_v20  ;;  %v4878_v24 = vmax.f32 %v778_v60, %v4460_v29  ;;  %v935_v5 = vsel %vm3937_vm13, -inf, %v896_v54  ;;  %vm8133_vm6 = vmmov %vm8107_vm1 }
 0x19b   :  { %v2983_v32 = vunpack.i.l.bf16 %v4820_v62  ;;  %v4884_v7 = vmax.f32 %v4576_v42, %v941_v33  ;;  %v2999_v9 = vunpack.i.h.bf16 %v4822_v8  ;;  %v2998_v46 = vunpack.i.l.bf16 %v4822_v8  ;;  %v4926_v19 = vpop.permute.xlu0 %3016 }
 0x19c   :  { %v2994_v58 = vunpack.i.h.bf16 %v2992_v14  ;;  %v2993_v53 = vunpack.i.l.bf16 %v2992_v14  ;;  %v943_v12 = vsel %vm3937_vm13, -inf, %v897_v61  ;;  %v4894_v60 = vmax.f32 %v795_v52, %v939_v28 }
 0x19d   :  { %v4892_v29 = vpack.i.bf16 %v4884_v7, %v4859_v17  ;;  %v4896_v54 = vmax.f32 %v803_v2, %v947_v56  ;;  %v2988_v42 = vunpack.i.l.bf16 %v4787_v59  ;;  %v4906_v61 = vmax.f32 %v4610_v45, %v935_v5  ;;  %v3002_v14 = vpop.permute.xlu1 %3001 }
 0x19e   :  { %8125 = vst [vmem:[#allocation33_spill] sm:$0xff] %v4894_v60  ;;  %3046 = vrot.lane.b32.xlu0 %v4873_v15, %s3573_s3  ;;  %v906_v8 = vsel %vm8107_vm1, %v2993_v53, %v2998_v46  ;;  %v907_v33 = vsel %vm8127_vm4, %v2994_v58, %v2999_v9  ;;  %v2984_v52 = vunpack.i.h.bf16 %v4820_v62  ;;  %v8128_v2 = vunpack.i.h.bf16 %v4522_v51 }
 0x19f   :  { %8126 = vst [vmem:[#allocation27_spill] sm:$0xff] %v4896_v54  ;;  %3041 = vrot.lane.b32.xlu1 %v4892_v29, %s3573_s3  ;;  %v949_v28 = vsel %vm3897_vm11, -inf, %v906_v8  ;;  %v957_v6 = vsel %vm3897_vm11, -inf, %v907_v33  ;;  %v4921_v45 = vpack.i.bf16 %v4896_v54, %v4894_v60  ;;  %v4924_v62 = vmax.f32 %v4620_v47, %v943_v12 }
 0x1a0   :  { %v739_v56 = vsel %vm7819_vm0, %v2983_v32, %v8128_v2  ;;  %v3004_v51 = vunpack.i.h.bf16 %v3002_v14  ;;  %v3003_v5 = vunpack.i.l.bf16 %v3002_v14  ;;  %v4929_v2 = vmax.f32 %v779_v30, %v4445_v48 }
 0x1a1   :  { %8129 = vst [vmem:[#allocation19_spill] sm:$0xff] %v4921_v45  ;;  %v2989_v37 = vunpack.i.h.bf16 %v4787_v59  ;;  %v910_v8 = vsel %vm8130_vm9, %v2988_v42, %v2993_v53  ;;  %v4940_v47 = vpack.i.bf16 %v4924_v62, %v4906_v61  ;;  %v4942_v12 = vpop.permute.xlu1 %3011  ;;  %v4945_v48 = vmax.f32 %v4598_v16, %v949_v28  ;;  %vm8137_vm9 = vmmov %vm8127_vm4 }
 0x1a2   :  { %3056 = vrot.lane.b32.xlu0 %v4921_v45, %s3573_s3  ;;  %v4948_v59 = vmax.f32 %v4602_v39, %v957_v6  ;;  %v8131_v30 = vunpack.i.h.bf16 %v4628_v26  ;;  %v711_v14 = vsel %vm7819_vm0, %v2984_v52, %v2983_v32  ;;  %vm8132_vm5 = vcmp.eq.s32.totalorder %v8063_v36, 0  ;;  %v3027_v45 = vpop.permute.xlu0 %3026 }
 0x1a3   :  { %v780_v33 = vsel %vm8132_vm5, -inf, %v739_v56  ;;  %v911_v23 = vsel %vm8133_vm6, %v2989_v37, %v2994_v58  ;;  %vm8134_vm1 = vcmp.eq.s32.totalorder %v8063_v36, 127  ;;  %3051 = vrot.lane.b32.xlu1 %v4940_v47, %s3573_s3  ;;  %v8135_v39 = vunpack.i.l.bf16 %v4875_v57  ;;  %vm8138_vm5 = vmmov %vm8127_vm4 }
 0x1a4   :  { %v715_v53 = vsel %vm7819_vm0, %v8131_v30, %v2984_v52  ;;  %v948_v16 = vsel %vm8134_vm1, -inf, %v910_v8  ;;  %v8136_v6 = vunpack.i.h.bf16 %v4875_v57  ;;  %v3019_v52 = vunpack.i.h.bf16 %v4926_v19  ;;  %vm8139_vm6 = vmmov %vm8127_vm4 }
 0x1a5   :  { %v898_v26 = vsel %vm8127_vm4, %v3003_v5, %v8135_v39  ;;  %v902_v58 = vsel %vm8138_vm5, %v2998_v46, %v3003_v5  ;;  %v903_v56 = vsel %vm8139_vm6, %v2999_v9, %v3004_v51  ;;  %v3018_v28 = vunpack.i.l.bf16 %v4926_v19  ;;  %v3022_v46 = vpop.permute.xlu1 %3021  ;;  %v8140_v5 = vld [vmem:[#allocation24_spill] sm:$0xff]  ;;  %vm8145_vm5 = vmmov %vm8127_vm4 }
 0x1a6   :  { %v899_v32 = vsel %vm8137_vm9, %v3004_v51, %v8136_v6  ;;  %v3014_v8 = vunpack.i.h.bf16 %v4942_v12  ;;  %v786_v30 = vsel %vm3807_vm7, -inf, %v715_v53  ;;  %v956_v39 = vsel %vm8134_vm1, -inf, %v911_v23  ;;  %vm8144_vm9 = vmmov %vm8127_vm4 }
 0x1a7   :  { %v3013_v6 = vunpack.i.l.bf16 %v4942_v12  ;;  %v4986_v54 = vpack.i.bf16 %v4948_v59, %v4945_v48  ;;  %v8141_v9 = vmax.f32 %v8140_v5, 0.0  ;;  %v951_v19 = vsel %vm3937_vm13, -inf, %v898_v26  ;;  %vm8146_vm6 = vmmov %vm8127_vm4 }
 0x1a8   :  { %v959_v53 = vsel %vm3937_vm13, -inf, %v899_v32  ;;  %v4995_v35 = vmax.f32 %v4829_v31, %v948_v16  ;;  %v787_v23 = vsel %vm3827_vm8, -inf, %v711_v14  ;;  %v950_v12 = vsel %vm3905_vm12, -inf, %v902_v58  ;;  %vm8148_vm1 = vmmov %vm8127_vm4 }
 0x1a9   :  { %v812_v51 = vmax.f32 %v780_v33, %v8141_v9  ;;  %v958_v60 = vsel %vm3905_vm12, -inf, %v903_v56  ;;  %v8142_v33 = vunpack.i.h.bf16 %v4785_v41  ;;  %3066 = vrot.lane.b32.xlu0 %v4986_v54, %s3573_s3  ;;  %v8143_v31 = vunpack.i.l.bf16 %v4785_v41  ;;  %v3032_v41 = vpop.permute.xlu1 %3031 }
 0x1aa   :  { %v915_v14 = vsel %vm8145_vm5, %v3014_v8, %v2989_v37  ;;  %v3029_v32 = vunpack.i.h.bf16 %v3027_v45  ;;  %v914_v56 = vsel %vm8146_vm6, %v3013_v6, %v2988_v42  ;;  %v3028_v5 = vunpack.i.l.bf16 %v3027_v45  ;;  %vm8153_vm5 = vmmov %vm8148_vm1 }
 0x1ab   :  { %v893_v26 = vsel %vm8127_vm4, %v8142_v33, %v3019_v52  ;;  %v892_v16 = vsel %vm8144_vm9, %v8143_v31, %v3018_v28  ;;  %v5015_v58 = vmax.f32 %v812_v51, %v956_v39  ;;  %v5020_v9 = vmax.f32 %v4682_v0, %v951_v19  ;;  %vm8150_vm4 = vmmov %vm8148_vm1 }
 0x1ac   :  { %v5023_v33 = vmax.f32 %v4699_v18, %v959_v53  ;;  %v3023_v13 = vunpack.i.l.bf16 %v3022_v46  ;;  %v5030_v37 = vmax.f32 %v4624_v55, %v950_v12  ;;  %v5033_v39 = vmax.f32 %v4634_v11, %v958_v60  ;;  %vm8152_vm9 = vmmov %vm8148_vm1 }
 0x1ad   :  { %v5027_v31 = vpack.i.bf16 %v5015_v58, %v4995_v35  ;;  %v818_v42 = vmax.f32 %v786_v30, %v4494_v38  ;;  %v963_v0 = vsel %vm4053_vm3, -inf, %v915_v14  ;;  %v3024_v45 = vunpack.i.h.bf16 %v3022_v46  ;;  %vm8155_vm6 = vmmov %vm8148_vm1 }
 0x1ae   :  { %v5040_v18 = vpack.i.bf16 %v5023_v33, %v5020_v9  ;;  %v955_v51 = vsel %vm4053_vm3, -inf, %v914_v56  ;;  %v5048_v55 = vpack.i.bf16 %v5033_v39, %v5030_v37  ;;  %v3034_v11 = vunpack.i.h.bf16 %v3032_v41 }
 0x1af   :  { %3061 = vrot.lane.b32.xlu1 %v5027_v31, %s3573_s3  ;;  %v3033_v38 = vunpack.i.l.bf16 %v3032_v41  ;;  %v819_v60 = vmax.f32 %v787_v23, %v4496_v3  ;;  %v944_v46 = vsel %vm3951_vm14, -inf, %v893_v26  ;;  %v936_v19 = vsel %vm3951_vm14, -inf, %v892_v16 }
 0x1b0   :  { %v889_v53 = vsel %vm8148_vm1, %v3019_v52, %v3029_v32  ;;  %3076 = vrot.lane.b32.xlu0 %v5040_v18, %s3573_s3  ;;  %v8149_v12 = vunpack.i.l.bf16 %v4762_v40  ;;  %v8151_v56 = vunpack.i.h.bf16 %v4762_v40  ;;  %v888_v23 = vsel %vm8153_vm5, %v3018_v28, %v3028_v5  ;;  %vm8160_vm5 = vmmov %vm8148_vm1 }
 0x1b1   :  { %v8154_v26 = vunpack.i.l.bf16 %v4875_v57  ;;  %v8156_v16 = vunpack.i.h.bf16 %v4875_v57  ;;  %v5080_v40 = vmax.f32 %v819_v60, %v963_v0 }
 0x1b2   :  { %v884_v14 = vsel %vm8150_vm4, %v3028_v5, %v8149_v12  ;;  %v885_v3 = vsel %vm8152_vm9, %v3029_v32, %v8151_v56  ;;  %v5078_v12 = vmax.f32 %v4929_v2, %v955_v51  ;;  %v945_v32 = vsel %vm3957_vm15, -inf, %v889_v53  ;;  %vm8158_vm4 = vmmov %vm8148_vm1 }
 0x1b3   :  { %v894_v52 = vsel %vm8155_vm6, %v8154_v26, %v3023_v13  ;;  %v895_v41 = vsel %vm8148_vm1, %v8156_v16, %v3024_v45  ;;  %3071 = vrot.lane.b32.xlu1 %v5048_v55, %s3573_s3  ;;  %v887_v28 = vsel %vm8158_vm4, %v3034_v11, %v3014_v8  ;;  %vm8159_vm9 = vmmov %vm8148_vm1  ;;  %v891_v5 = vsel %vm8160_vm5, %v3024_v45, %v3034_v11  ;;  %v8162_v45 = vld [vmem:[#allocation35_spill] sm:$0xff]  ;;  %v8163_v26 = vld [vmem:[#allocation26_spill] sm:$0xff] }
 0x1b4   :  { %v890_v57 = vsel %vm8159_vm9, %v3023_v13, %v3033_v38  ;;  %vm8161_vm6 = vmmov %vm8148_vm1  ;;  %3086 = vrot.lane.b32.xlu0 %v4892_v29, %s3574_s22  ;;  %v5098_v0 = vpack.i.bf16 %v5080_v40, %v5078_v12  ;;  %v5101_v51 = vmax.f32 %v4638_v43, %v936_v19  ;;  %v5104_v8 = vmax.f32 %v4644_v63, %v944_v46 }
 0x1b5   :  { %v886_v2 = vsel %vm8161_vm6, %v3033_v38, %v3013_v6  ;;  %v937_v13 = vsel %vm3957_vm15, -inf, %v888_v23  ;;  %v938_v11 = vsel %vm4047_vm10, -inf, %v884_v14  ;;  %v952_v6 = vsel %vm3951_vm14, -inf, %v894_v52  ;;  %v8164_v52 = vld [vmem:[#allocation25_spill] sm:$0xff]  ;;  %vm2619_vm1 = vmneg %vm3760_vm2 }
 0x1b6   :  { %v960_v29 = vsel %vm3951_vm14, -inf, %v895_v41  ;;  %v946_v38 = vsel %vm4047_vm10, -inf, %v885_v3  ;;  %v953_v43 = vsel %vm3957_vm15, -inf, %v890_v57  ;;  %v961_v63 = vsel %vm3957_vm15, -inf, %v891_v5  ;;  %vm5267_vm5 = vmpackc.low %vm2619_vm1, %vm2619_vm1  ;;  %v8178_v57 = vld [vmem:[#allocation13_spill] sm:$0xff] }
 0x1b7   :  { %v954_v60 = vsel %vm4047_vm10, -inf, %v886_v2  ;;  %v962_v46 = vsel %vm4047_vm10, -inf, %v887_v28  ;;  %3081 = vrot.lane.b32.xlu1 %v5098_v0, %s3573_s3  ;;  %v3100_v19 = vpack.i.bf16 %v5104_v8, %v5101_v51  ;;  %v5131_v53 = vmax.f32 %v4729_v22, %v952_v6  ;;  %v8165_v22 = vld [vmem:[#allocation32_spill] sm:$0xff]  ;;  %v8168_v6 = vld [vmem:[#allocation27_spill] sm:$0xff] }
 0x1b8   :  { %3096 = vrot.lane.b32.xlu0 %v4940_v47, %s3574_s22  ;;  %v5134_v14 = vmax.f32 %v4733_v34, %v960_v29  ;;  %v5137_v56 = vmax.f32 %v4715_v1, %v937_v13  ;;  %v5140_v3 = vmax.f32 %v4719_v10, %v945_v32  ;;  %v5143_v23 = vmax.f32 %v4745_v4, %v953_v43  ;;  %v8176_v13 = vld [vmem:[#allocation11_spill] sm:$0xff] }
 0x1b9   :  { %v5146_v47 = vmax.f32 %v8163_v26, %v961_v63  ;;  %v5149_v16 = vmax.f32 %v8164_v52, %v938_v11  ;;  %v5152_v41 = vmax.f32 %v8165_v22, %v946_v38  ;;  %v5155_v34 = vmax.f32 %v4878_v24, %v954_v60  ;;  %v8166_v24 = vld [vmem:[#allocation18_spill] sm:$0xff]  ;;  %v8167_v11 = vld [vmem:[#allocation33_spill] sm:$0xff]  ;;  %v1309_v22 = vld [vmem:[%s7700_s4 + $0x8] sm:$0xff] }
 0x1ba   :  { %v5157_v1 = vmax.f32 %v818_v42, %v962_v46  ;;  %v3125_v46 = vpack.i.bf16 %v5134_v14, %v5131_v53  ;;  %v1310_v52 = vld [vmem:[%s7700_s4 + $0x10] sm:$0xff]  ;;  %vm8171_vm4 = vcmp.eq.s32.totalorder %v8063_v36, 0  ;;  %vm8179_vm1 = vnez %v8178_v57 }
 0x1bb   :  { %3091 = vrot.lane.b32.xlu1 %v4873_v15, %s3574_s22  ;;  %v3145_v26 = vpack.i.bf16 %v5152_v41, %v5149_v16  ;;  %vm5257_vm9 = vmneg %vm8171_vm4  ;;  %vm8177_vm4 = vnez %v8176_v13 }
 0x1bc   :  { %3106 = vrot.lane.b32.xlu0 %v4849_v44, %s3574_s22  ;;  %vm2663_vm2 = vmneg %vm8177_vm4 }
 0x1bd   :  { %vm2668_vm6 = vmneg %vm8179_vm1 }
 0x1be   :  { %vm5306_vm4 = vmpackc.low %vm2663_vm2, %vm2663_vm2 }
 0x1bf   :  { %3101 = vrot.lane.b32.xlu1 %v3100_v19, %s3574_s22  ;;  %vm8182_vm1 = vmpackc.low %vm5257_vm9, %vm5257_vm9 }
 0x1c0   :  { %3116 = vrot.lane.b32.xlu0 %v5048_v55, %s3574_s22  ;;  %v3140_v55 = vpack.i.bf16 %v5140_v3, %v5137_v56  ;;  %vm5315_vm10 = vmpackc.low %vm2668_vm6, %vm2668_vm6 }
 0x1c1   :  { %vm8186_vm2 = vmmov %vm8182_vm1 }
 0x1c2   :  { %vm2639_vm9 = vmneg %vm3897_vm11 }
 0x1c3   :  { %3111 = vrot.lane.b32.xlu1 %v4986_v54, %s3574_s22  ;;  %v3155_v54 = vpack.i.bf16 %v5146_v47, %v5143_v23 }
 0x1c4   :  { %3126 = vrot.lane.b32.xlu0 %v3125_v46, %s3574_s22 }
 0x1c7   :  { %3121 = vrot.lane.b32.xlu1 %v5040_v18, %s3574_s22  ;;  %v3160_v18 = vpack.i.bf16 %v5157_v1, %v5155_v34 }
 0x1c8   :  { %3136 = vrot.lane.b32.xlu0 %v3100_v19, %s3573_s3  ;;  %v1308_v19 = vld [vmem:[%s7700_s4] sm:$0xff] }
 0x1cb   :  { %3131 = vrot.lane.b32.xlu1 %v5027_v31, %s3574_s22  ;;  %v8169_v31 = vld [vmem:[#allocation19_spill] sm:$0xff] }
 0x1cc   :  { %3146 = vrot.lane.b32.xlu0 %v3145_v26, %s3573_s3 }
 0x1cf   :  { %3141 = vrot.lane.b32.xlu1 %v3140_v55, %s3573_s3 }
 0x1d0   :  { %3156 = vrot.lane.b32.xlu0 %v3155_v54, %s3573_s3 }
 0x1d3   :  { %3151 = vrot.lane.b32.xlu1 %v3125_v46, %s3573_s3  ;;  %v1312_v46 = vld [vmem:[%s7700_s4 + $0x20] sm:$0xff] }
 0x1d4   :  { %3166 = vrot.lane.b32.xlu0 %v3140_v55, %s3574_s22  ;;  %v1314_v55 = vld [vmem:[%s7700_s4 + $0x30] sm:$0xff] }
 0x1d7   :  { %3161 = vrot.lane.b32.xlu1 %v3160_v18, %s3573_s3 }
 0x1d8   :  { %3176 = vrot.lane.b32.xlu0 %v8169_v31, %s3574_s22 }
 0x1db   :  { %3171 = vrot.lane.b32.xlu1 %v3145_v26, %s3574_s22  ;;  %v1311_v26 = vld [vmem:[%s7700_s4 + $0x18] sm:$0xff] }
 0x1dc   :  { %3186 = vrot.lane.b32.xlu0 %v3160_v18, %s3574_s22 }
 0x1df   :  { %3181 = vrot.lane.b32.xlu1 %v3155_v54, %s3574_s22  ;;  %v1315_v54 = vld [vmem:[%s7700_s4 + $0x38] sm:$0xff] }
 0x1e0   :  { %1318 = vperm.xlu0 %2873, %v1308_v19  }
 0x1e3   :  { %3191 = vrot.lane.b32.xlu1 %v5098_v0, %s3574_s22  ;;  %v1313_v0 = vld [vmem:[%s7700_s4 + $0x28] sm:$0xff] }
 0x1e4   :  { %1328 = vperm.xlu0 %2873, %v1310_v52   ;;  %v8170_v52 = vld [vmem:[#allocation12_spill] sm:$0xff] }
 0x1e7   :  { %1323 = vperm.xlu1 %2874, %v1309_v22  }
 0x1e8   :  { %1338 = vperm.xlu0 %2873, %v1312_v46  }
 0x1eb   :  { %1333 = vperm.xlu1 %2874, %v1311_v26  }
 0x1ec   :  { %1348 = vperm.xlu0 %2873, %v1314_v55  }
 0x1ef   :  { %1343 = vperm.xlu1 %2874, %v1313_v0  }
 0x1f3   :  { %1353 = vperm.xlu1 %2874, %v1315_v54  }
 0x20c   :  { %v3037_v18 = vpop.permute.xlu0 %3036 }
 0x20d   :  { %v3039_v22 = vunpack.i.h.bf16 %v3037_v18  ;;  %v3038_v46 = vunpack.i.l.bf16 %v3037_v18 }
 0x210   :  { %v3047_v31 = vpop.permute.xlu0 %3046 }
 0x211   :  { %v3042_v19 = vpop.permute.xlu1 %3041  ;;  %v3049_v0 = vunpack.i.h.bf16 %v3047_v31  ;;  %v3048_v63 = vunpack.i.l.bf16 %v3047_v31 }
 0x212   :  { %v3044_v26 = vunpack.i.h.bf16 %v3042_v19  ;;  %v3043_v55 = vunpack.i.l.bf16 %v3042_v19 }
 0x214   :  { %v5261_v43 = vpop.permute.xlu0 %3056  ;;  %v1084_v54 = vsel %vm7819_vm0, %v3038_v46, %v3043_v55  ;;  %v1085_v38 = vsel %vm7819_vm0, %v3039_v22, %v3044_v26  ;;  %v1080_v42 = vsel %vm7819_vm0, %v3043_v55, %v3048_v63 }
 0x215   :  { %v7817_v19 = vunpack.i.h.bf16 %v5261_v43  ;;  %v7812_v29 = vunpack.i.l.bf16 %v5261_v43  ;;  %v2622_v44 = vpack.c.bf16 %v1085_v38, %v1084_v54  ;;  %v5276_v31 = vpop.permute.xlu1 %3051 }
 0x216   :  { %v7815_v2 = vunpack.i.h.bf16 %v5276_v31  ;;  %v7816_v5 = vunpack.i.l.bf16 %v5276_v31 }
 0x217   :  { %2623 = vmatprep.subr.msk.bf16.mxu0 %vm5267_vm5, %v2622_v44  ;;  %v1088_v38 = vsel %vm7819_vm0, %v7812_v29, %v3038_v46  ;;  %v1089_v54 = vsel %vm7819_vm0, %v7817_v19, %v3039_v22  ;;  %v1081_v44 = vsel %vm7819_vm0, %v3044_v26, %v3049_v0 }
 0x218   :  { %v2627_v15 = vpack.c.bf16 %v1089_v54, %v1088_v38  ;;  %v1076_v46 = vsel %vm7819_vm0, %v3048_v63, %v7816_v5  ;;  %v1077_v22 = vsel %vm7819_vm0, %v3049_v0, %v7815_v2  ;;  %v2671_v38 = vpack.c.bf16 %v1081_v44, %v1080_v42 }
 0x219   :  { %v2666_v26 = vpack.c.bf16 %v1077_v22, %v1076_v46 }
 0x21a   :  { %2628 = vmatpush1.bf16.msk.msra.mxu0 %vm8182_vm1, %v2627_v15 }
 0x21b   :  { %v3067_v63 = vpop.permute.xlu0 %3066  ;;  %2667 = vmatprep.subr.msk.bf16.mxu1 %vm5306_vm4, %v2666_v26 }
 0x21c   :  { %2672 = vmatpush1.bf16.msk.msra.mxu1 %vm5315_vm10, %v2671_v38  ;;  %v3069_v0 = vunpack.i.h.bf16 %v3067_v63  ;;  %v3068_v54 = vunpack.i.l.bf16 %v3067_v63 }
 0x221   :  { %v3062_v2 = vpop.permute.xlu1 %3061 }
 0x222   :  { %v3064_v5 = vunpack.i.h.bf16 %v3062_v2  ;;  %v3063_v19 = vunpack.i.l.bf16 %v3062_v2  ;;  %v5323_v28 = vpop.permute.xlu0 %3076 }
 0x223   :  { %v7818_v42 = vunpack.i.h.bf16 %v5323_v28  ;;  %v3078_v44 = vunpack.i.l.bf16 %v5323_v28 }
 0x224   :  { %v1087_v15 = vsel %vm7819_vm0, %v3064_v5, %v3069_v0  ;;  %v1086_v46 = vsel %vm7819_vm0, %v3063_v19, %v3068_v54 }
 0x225   :  { %v3072_v22 = vpop.permute.xlu1 %3071  ;;  %v2632_v26 = vpack.c.bf16 %v1087_v15, %v1086_v46 }
 0x226   :  { %v3074_v38 = vunpack.i.h.bf16 %v3072_v22  ;;  %v3073_v32 = vunpack.i.l.bf16 %v3072_v22  ;;  %v3087_v63 = vpop.permute.xlu0 %3086 }
 0x227   :  { %2633 = vmatprep.subr.msk.bf16.mxu0 %vm5267_vm5, %v2632_v26  ;;  %v3088_v55 = vunpack.i.l.bf16 %v3087_v63  ;;  %vm8190_vm5 = vcmp.lt.s32.totalorder %v8063_v36, 127 }
 0x228   :  { %v1079_v2 = vsel %vm7819_vm0, %v3074_v38, %v7818_v42  ;;  %v1083_v10 = vsel %vm7819_vm0, %v3069_v0, %v3074_v38  ;;  %v1078_v4 = vsel %vm7819_vm0, %v3073_v32, %v3078_v44  ;;  %v1082_v15 = vsel %vm7819_vm0, %v3068_v54, %v3073_v32  ;;  %vm8191_vm6 = vmmov %vm8190_vm5 }
 0x229   :  { %v2676_v46 = vpack.c.bf16 %v1079_v2, %v1078_v4  ;;  %v2681_v22 = vpack.c.bf16 %v1083_v10, %v1082_v15  ;;  %v5345_v18 = vpop.permute.xlu1 %3081  ;;  %v8185_v54 = vpack.c.bf16 %v4924_v62, %v4906_v61  ;;  %v8187_v61 = vpack.c.bf16 %v4884_v7, %v4859_v17  ;;  %vm8195_vm1 = vmmov %vm8190_vm5 }
 0x22a   :  { %v3084_v26 = vunpack.i.h.bf16 %v5345_v18  ;;  %v3083_v13 = vunpack.i.l.bf16 %v5345_v18  ;;  %v3097_v42 = vpop.permute.xlu0 %3096  ;;  %v8188_v62 = vpack.c.bf16 %v4852_v27, %v4825_v20  ;;  %v8192_v27 = vpack.c.bf16 %v5023_v33, %v5020_v9 }
 0x22b   :  { %2677 = vmatprep.subr.msk.bf16.mxu1 %vm5306_vm4, %v2676_v46  ;;  %v3099_v15 = vunpack.i.h.bf16 %v3097_v42 }
 0x22c   :  { %v1090_v0 = vsel %vm7819_vm0, %v3083_v13, %v3063_v19  ;;  %v1091_v4 = vsel %vm7819_vm0, %v3084_v26, %v3064_v5  ;;  %2682 = vmatpush1.bf16.msk.msra.mxu1 %vm5315_vm10, %v2681_v22  ;;  %v3098_v19 = vunpack.i.l.bf16 %v3097_v42  ;;  %vm2683_vm10 = vmneg %vm3937_vm13  ;;  %v3089_v5 = vunpack.i.h.bf16 %v3087_v63 }
 0x22d   :  { %v2637_v10 = vpack.c.bf16 %v1091_v4, %v1090_v0  ;;  %v3092_v32 = vpop.permute.xlu1 %3091  ;;  %1466 = vmatprep.subr.bf16.mxu1 %v8185_v54  ;;  %vm5394_vm4 = vmpackc.low %vm2683_vm10, %vm2683_vm10  ;;  %v8197_v54 = vpack.c.bf16 %v8166_v24, %v4813_v50 }
 0x22e   :  { %v3094_v29 = vunpack.i.h.bf16 %v3092_v32  ;;  %v3093_v38 = vunpack.i.l.bf16 %v3092_v32  ;;  %v5364_v2 = vpop.permute.xlu0 %3106  ;;  %vm8198_vm10 = vmmov %vm8195_vm1 }
 0x22f   :  { %2638 = vmatpush1.bf16.msk.msra.mxu0 %vm8186_vm2, %v2637_v10  ;;  %v7830_v42 = vunpack.i.h.bf16 %v5364_v2  ;;  %v7831_v46 = vunpack.i.l.bf16 %v5364_v2  ;;  %vm8196_vm2 = vmmov %vm8195_vm1 }
 0x230   :  { %1393 = vmatprep.subr.bf16.mxu0 %v8187_v61  ;;  %1467 = vmatpush1.bf16.msra.mxu1 %v8188_v62  ;;  %v1209_v63 = vsel %vm8190_vm5, %v3089_v5, %v3094_v29  ;;  %v1208_v17 = vsel %vm8191_vm6, %v3088_v55, %v3093_v38  ;;  %v1205_v10 = vsel %vm8195_vm1, %v3094_v29, %v3099_v15  ;;  %vm2688_vm5 = vmneg %vm3905_vm12 }
 0x231   :  { %v5381_v60 = vpop.permute.xlu1 %3101  ;;  %1468 = vmatprep.subr.bf16.mxu1 %v8192_v27  ;;  %v1204_v32 = vsel %vm8196_vm2, %v3093_v38, %v3098_v19  ;;  %vm8199_vm6 = vmmov %vm8195_vm1  ;;  %v8200_v29 = vpack.c.bf16 %v4948_v59, %v4945_v48  ;;  %v8203_v62 = vpack.c.bf16 %v5033_v39, %v5030_v37  ;;  %vm8204_vm2 = vcmp.eq.s32.totalorder %v8063_v36, 127 }
 0x232   :  { %v3104_v7 = vunpack.i.h.bf16 %v5381_v60  ;;  %v3103_v20 = vunpack.i.l.bf16 %v5381_v60  ;;  %v3117_v0 = vpop.permute.xlu0 %3116  ;;  %vm5422_vm1 = vmpackc.low %vm2639_vm9, %vm2639_vm9  ;;  %v8270_v60 = vunpack.i.l.bf16 %v5364_v2 }
 0x233   :  { %1394 = vmatpush1.bf16.msra.mxu0 %v8197_v54  ;;  %v3119_v38 = vunpack.i.h.bf16 %v3117_v0  ;;  %v3118_v50 = vunpack.i.l.bf16 %v3117_v0  ;;  %vm8207_vm9 = vmmov %vm8199_vm6  ;;  %v2691_v0 = vpack.c.bf16 %v1205_v10, %v1204_v32 }
 0x234   :  { %v1201_v9 = vsel %vm8198_vm10, %v3099_v15, %v3104_v7  ;;  %v1200_v33 = vsel %vm8199_vm6, %v3098_v19, %v3103_v20  ;;  %1395 = vmatprep.subr.bf16.mxu0 %v8200_v29  ;;  %v2642_v15 = vpack.c.bf16 %v1209_v63, %v1208_v17  ;;  %1469 = vmatpush1.bf16.msra.mxu1 %v8203_v62  ;;  %vm5431_vm10 = vmneg %vm8204_vm2 }
 0x235   :  { %v2686_v61 = vpack.c.bf16 %v1201_v9, %v1200_v33  ;;  %v3112_v19 = vpop.permute.xlu1 %3111  ;;  %v1212_v59 = vsel %vm8207_vm9, %v7831_v46, %v3088_v55  ;;  %v1213_v63 = vsel %vm8199_vm6, %v7830_v42, %v3089_v5  ;;  %vm5447_vm2 = vmpackc.low %vm2688_vm5, %vm2688_vm5  ;;  %v8210_v55 = vpack.c.bf16 %v5015_v58, %v4995_v35 }
 0x236   :  { %v3114_v17 = vunpack.i.h.bf16 %v3112_v19  ;;  %v3113_v37 = vunpack.i.l.bf16 %v3112_v19  ;;  %v5451_v27 = vpop.permute.xlu0 %3126  ;;  %vm8211_vm9 = vmmov %vm8199_vm6  ;;  %v2647_v35 = vpack.c.bf16 %v1213_v63, %v1212_v59 }
 0x237   :  { %1396 = vmatpush1.bf16.msra.mxu0 %v8210_v55  ;;  %2687 = vmatprep.subr.msk.bf16.mxu1 %vm5394_vm4, %v2686_v61  ;;  %v7829_v9 = vunpack.i.h.bf16 %v5451_v27  ;;  %v7825_v10 = vunpack.i.l.bf16 %v5451_v27  ;;  %vm7822_vm5 = vmpackc.low %vm5431_vm10, %vm5431_vm10 }
 0x238   :  { %v1211_v5 = vsel %vm8211_vm9, %v3114_v17, %v3119_v38  ;;  %v1210_v54 = vsel %vm8199_vm6, %v3113_v37, %v3118_v50  ;;  %2643 = vmatprep.subr.msk.bf16.mxu0 %vm5422_vm1, %v2642_v15  ;;  %2692 = vmatpush1.bf16.msk.msra.mxu1 %vm5447_vm2, %v2691_v0  ;;  %vm8212_vm9 = vmmov %vm8199_vm6 }
 0x239   :  { %v2652_v58 = vpack.c.bf16 %v1211_v5, %v1210_v54  ;;  %v3122_v32 = vpop.permute.xlu1 %3121  ;;  %vm8213_vm0 = vmmov %vm8199_vm6 }
 0x23a   :  { %v3124_v33 = vunpack.i.h.bf16 %v3122_v32  ;;  %v3123_v29 = vunpack.i.l.bf16 %v3122_v32  ;;  %v3137_v61 = vpop.permute.xlu0 %3136  ;;  %vm8214_vm13 = vmmov %vm8213_vm0 }
 0x23b   :  { %2648 = vmatpush1.bf16.msk.msra.mxu0 %vm7822_vm5, %v2647_v35  ;;  %v3139_v32 = vunpack.i.h.bf16 %v3137_v61 }
 0x23c   :  { %v1203_v15 = vsel %vm8212_vm9, %v3124_v33, %v7829_v9  ;;  %v1207_v62 = vsel %vm8199_vm6, %v3119_v38, %v3124_v33  ;;  %v1202_v19 = vsel %vm8213_vm0, %v3123_v29, %v7825_v10  ;;  %v1206_v59 = vsel %vm8214_vm13, %v3118_v50, %v3123_v29  ;;  %2653 = vmatprep.subr.msk.bf16.mxu0 %vm5422_vm1, %v2652_v58  ;;  %vm2751_vm9 = vmneg %vm3827_vm8  ;;  %v5498_v58 = vld [vmem:[#allocation4] sm:$0xff]   ;;  %v8216_v29 = vld [vmem:[#allocation15_spill] sm:$0xff] }
 0x23d   :  { %v2696_v63 = vpack.c.bf16 %v1203_v15, %v1202_v19  ;;  %v2701_v0 = vpack.c.bf16 %v1207_v62, %v1206_v59  ;;  %v5490_v55 = vpop.permute.xlu1 %3131  ;;  %v3138_v33 = vunpack.i.l.bf16 %v3137_v61  ;;  %vm8217_vm0 = vnez %v8216_v29  ;;  %vm8218_vm1 = vmmov %vm8199_vm6  ;;  %v8227_v10 = vld [vmem:[#allocation14_spill] sm:$0xff] }
 0x23e   :  { %v7823_v38 = vunpack.i.h.bf16 %v5490_v55  ;;  %v7824_v54 = vunpack.i.l.bf16 %v5490_v55  ;;  %v3147_v35 = vpop.permute.xlu0 %3146  ;;  %vm8219_vm6 = vmmov %vm8218_vm1  ;;  %v8222_v19 = vunpack.i.h.bf16 %v5261_v43  ;;  %vm8223_vm13 = vcmp.lt.s32.totalorder %v8063_v36, 1 }
 0x23f   :  { %2697 = vmatprep.subr.msk.bf16.mxu1 %vm5394_vm4, %v2696_v63  ;;  %v3149_v50 = vunpack.i.h.bf16 %v3147_v35  ;;  %v3148_v24 = vunpack.i.l.bf16 %v3147_v35  ;;  %vm7828_vm4 = vcmask 785408   ;;  %vm5512_vm5 = vmpackc.low %vm2751_vm9, %vm2751_vm9  ;;  %vm8228_vm9 = vnez %v8227_v10 }
 0x240   :  { %v1214_v15 = vsel %vm8218_vm1, %v7824_v54, %v3113_v37  ;;  %v1215_v61 = vsel %vm8219_vm6, %v7823_v38, %v3114_v17  ;;  %2702 = vmatpush1.bf16.msk.msra.mxu1 %vm5447_vm2, %v2701_v0  ;;  %v8224_v37 = vunpack.i.l.bf16 %v5261_v43  ;;  %vm8225_vm1 = vmmov %vm8223_vm13  ;;  %v8231_v43 = vunpack.i.h.bf16 %v5276_v31 }
 0x241   :  { %v2657_v62 = vpack.c.bf16 %v1215_v61, %v1214_v15  ;;  %v1061_v59 = vsel %vm8223_vm13, %v3149_v50, %v8222_v19  ;;  %v3142_v17 = vpop.permute.xlu1 %3141  ;;  %v8229_v15 = vunpack.i.l.bf16 %v5276_v31  ;;  %vm8230_vm13 = vmmov %vm8225_vm1 }
 0x242   :  { %v1060_v63 = vsel %vm8225_vm1, %v3148_v24, %v8224_v37  ;;  %v3144_v0 = vunpack.i.h.bf16 %v3142_v17  ;;  %v3143_v38 = vunpack.i.l.bf16 %v3142_v17  ;;  %v3157_v54 = vpop.permute.xlu0 %3156  ;;  %v1073_v19 = vsel %vm8225_vm1, %v8231_v43, %v3139_v32  ;;  %vm8232_vm2 = vmpackc.low %vm5431_vm10, %vm5431_vm10 }
 0x243   :  { %v2754_v39 = vpack.c.bf16 %v1061_v59, %v1060_v63  ;;  %v1072_v61 = vsel %vm8230_vm13, %v8229_v15, %v3138_v33  ;;  %2658 = vmatpush1.bf16.msk.msra.mxu0 %vm8232_vm2, %v2657_v62  ;;  %2703 = vmatmul.mubr.msk.bf16.vlgmr.msra.gmra.mrb[0].mxu1 %vm7828_vm4, %v5498_v58  ;;  %v3159_v59 = vunpack.i.h.bf16 %v3157_v54  ;;  %v3158_v37 = vunpack.i.l.bf16 %v3157_v54  ;;  %vm8233_vm6 = vmneg %vm8217_vm0 }
 0x244   :  { %vm5547_vm13 = vmpackc.low %vm8233_vm6, %vm8233_vm6  ;;  %v1065_v63 = vsel %vm8225_vm1, %v3144_v0, %v3149_v50 }
 0x245   :  { %vm8236_vm8 = vmmov %vm8225_vm1  ;;  %2755 = vmatprep.subr.msk.bf16.mxu1 %vm5512_vm5, %v2754_v39 }
 0x246   :  { %v1069_v48 = vsel %vm8236_vm8, %v3139_v32, %v3144_v0  ;;  %vm8237_vm10 = vmmov %vm8225_vm1  ;;  %v3152_v32 = vpop.permute.xlu1 %3151  ;;  %v3167_v43 = vpop.permute.xlu0 %3166 }
 0x247   :  { %v1064_v62 = vsel %vm8237_vm10, %v3143_v38, %v3148_v24  ;;  %vm8238_vm2 = vmmov %vm8225_vm1  ;;  %v2715_v24 = vpack.c.bf16 %v1073_v19, %v1072_v61  ;;  %v3154_v39 = vunpack.i.h.bf16 %v3152_v32  ;;  %v3153_v0 = vunpack.i.l.bf16 %v3152_v32 }
 0x248   :  { %v1068_v54 = vsel %vm8238_vm2, %v3138_v33, %v3143_v38  ;;  %vm8239_vm6 = vmneg %vm3807_vm7  ;;  %v2759_v15 = vpack.c.bf16 %v1065_v63, %v1064_v62  ;;  %v8245_v33 = vmov 0   ;;  %vm8246_vm10 = vcmask 785408   ;;  %v5584_v63 = vld [vmem:[#allocation4 + $0x8] sm:$0xff]  }
 0x249   :  { %vm5565_vm4 = vmpackc.low %vm8239_vm6, %vm8239_vm6  ;;  %v2710_v50 = vpack.c.bf16 %v1069_v48, %v1068_v54  ;;  %1504 = vmatprep.mubr.bf16.mxu1 %v8245_v33  ;;  %2659 = vmatmul.mubr.msk.bf16.vlgmr.msra.gmra.mrb[0].mxu0 %vm8246_vm10, %v5498_v58  ;;  %v1071_v48 = vsel %vm8238_vm2, %v3154_v39, %v3159_v59  ;;  %v8247_v62 = vunpack.i.h.bf16 %v5323_v28 }
 0x24a   :  { %vm8242_vm8 = vmneg %vm8228_vm9  ;;  %2760 = vmatpush1.bf16.msk.msra.mxu1 %vm5565_vm4, %v2759_v15  ;;  %v3162_v32 = vpop.permute.xlu1 %3161  ;;  %1431 = vmatprep.mubr.bf16.mxu0 %v8245_v33  ;;  %v5601_v46 = vpop.permute.xlu0 %3176 }
 0x24b   :  { %vm5573_vm1 = vmpackc.low %vm8242_vm8, %vm8242_vm8  ;;  %2711 = vmatprep.subr.msk.bf16.mxu0 %vm5547_vm13, %v2710_v50  ;;  %v3164_v9 = vunpack.i.h.bf16 %v3162_v32  ;;  %v3163_v42 = vunpack.i.l.bf16 %v3162_v32  ;;  %v3179_v4 = vunpack.i.h.bf16 %v5601_v46  ;;  %v8272_v32 = vunpack.i.h.bf16 %v5364_v2 }
 0x24c   :  { %vm8248_vm6 = vmmov %vm8238_vm2  ;;  %2716 = vmatpush1.bf16.msk.msra.mxu0 %vm5573_vm1, %v2715_v24  ;;  %v8277_v2 = vpack.c.bf16 %v5080_v40, %v5078_v12  ;;  %v3518_v12 = vld [vmem:[#allocation4 + $0x18] sm:$0xff]  }
 0x24d   :  { %v1075_v61 = vsel %vm8248_vm6, %v8247_v62, %v3154_v39  ;;  %vm8249_vm8 = vmmov %vm8238_vm2  ;;  %v1067_v28 = vsel %vm8248_vm6, %v3159_v59, %v3164_v9  ;;  %v8255_v59 = vpack.c.bf16 %v5140_v3, %v5137_v56  ;;  %v3169_v62 = vunpack.i.h.bf16 %v3167_v43 }
 0x24e   :  { %v1070_v19 = vsel %vm8249_vm8, %v3153_v0, %v3158_v37  ;;  %vm8250_vm10 = vmmov %vm8238_vm2  ;;  %vm8251_vm2 = vcmask 785408  }
 0x24f   :  { %v1074_v54 = vsel %vm8250_vm10, %v3078_v44, %v3153_v0  ;;  %v2720_v50 = vpack.c.bf16 %v1071_v48, %v1070_v19  ;;  %2704 = vmatmul.mubr.msk.bf16.gmra.mrb[4].mxu1 %vm8251_vm2, %v5584_v63  ;;  %vm8252_vm8 = vmmov %vm8248_vm6  ;;  %v3172_v48 = vpop.permute.xlu1 %3171 }
 0x250   :  { %v2725_v15 = vpack.c.bf16 %v1075_v61, %v1074_v54  ;;  %v1062_v44 = vsel %vm8252_vm8, %v3163_v42, %v3083_v13  ;;  %vm8253_vm10 = vmmov %vm8248_vm6  ;;  %v3168_v13 = vunpack.i.l.bf16 %v3167_v43  ;;  %v3174_v61 = vunpack.i.h.bf16 %v3172_v48  ;;  %1514 = vmatprep.mubr.bf16.mxu1 %v8245_v33 }
 0x251   :  { %2721 = vmatprep.subr.msk.bf16.mxu0 %vm5547_vm13, %v2720_v50  ;;  %v1063_v24 = vsel %vm8253_vm10, %v3164_v9, %v3084_v26  ;;  %vm8254_vm7 = vmmov %vm8248_vm6  ;;  %v3173_v18 = vunpack.i.l.bf16 %v3172_v48  ;;  %v5626_v26 = vpop.permute.xlu0 %3186  ;;  %v8259_v9 = vpack.c.bf16 %v5104_v8, %v5101_v51  ;;  %v3178_v43 = vunpack.i.l.bf16 %v5601_v46 }
 0x252   :  { %v1066_v39 = vsel %vm8254_vm7, %v3158_v37, %v3163_v42  ;;  %2726 = vmatpush1.bf16.msk.msra.mxu0 %vm5573_vm1, %v2725_v15  ;;  %v2764_v31 = vpack.c.bf16 %v1063_v24, %v1062_v44  ;;  %vm8256_vm13 = vmmov %vm8251_vm2  ;;  %v5633_v42 = vld [vmem:[#allocation4 + $0x10] sm:$0xff]   ;;  %vm8257_vm1 = vcmp.lt.s32.totalorder %v8063_v36, 127  ;;  %v3189_v37 = vunpack.i.h.bf16 %v5626_v26 }
 0x253   :  { %v2769_v0 = vpack.c.bf16 %v1067_v28, %v1066_v39  ;;  %1539 = vmatprep.subr.bf16.mxu0 %v8255_v59  ;;  %2660 = vmatmul.mubr.msk.bf16.gmra.mrb[4].mxu0 %vm8256_vm13, %v5584_v63  ;;  %vm2727_vm7 = vmneg %vm3957_vm15  ;;  %v1193_v56 = vsel %vm8257_vm1, %v3169_v62, %v3174_v61  ;;  %v3188_v38 = vunpack.i.l.bf16 %v5626_v26  ;;  %v3182_v19 = vpop.permute.xlu1 %3181  ;;  %v8260_v54 = vpack.c.bf16 %v5146_v47, %v5143_v23 }
 0x254   :  { %2765 = vmatprep.subr.msk.bf16.mxu1 %vm5512_vm5, %v2764_v31  ;;  %1441 = vmatprep.mubr.bf16.mxu0 %v8245_v33  ;;  %vm8258_vm2 = vmmov %vm8257_vm1  ;;  %v3184_v51 = vunpack.i.h.bf16 %v3182_v19  ;;  %v3183_v8 = vunpack.i.l.bf16 %v3182_v19  ;;  %v8263_v15 = vpack.c.bf16 %v8168_v6, %v8167_v11  ;;  %v8274_v44 = vpack.c.bf16 %v5152_v41, %v5149_v16 }
 0x255   :  { %v1192_v3 = vsel %vm8258_vm2, %v3168_v13, %v3173_v18  ;;  %2770 = vmatpush1.bf16.msk.msra.mxu1 %vm5565_vm4, %v2769_v0  ;;  %vm5652_vm5 = vmpackc.low %vm2727_vm7, %vm2727_vm7  ;;  %v8280_v41 = vunpack.i.h.bf16 %v5451_v27  ;;  %v8282_v48 = vunpack.i.l.bf16 %v5451_v27  ;;  %v8286_v27 = vunpack.i.l.bf16 %v5490_v55 }
 0x256   :  { %1540 = vmatpush1.bf16.msra.mxu0 %v8259_v9  ;;  %1612 = vmatprep.subr.bf16.mxu1 %v8263_v15  ;;  %vm2732_vm6 = vmneg %vm3951_vm14  ;;  %v2730_v47 = vpack.c.bf16 %v1193_v56, %v1192_v3  ;;  %v1194_v6 = vsel %vm8257_vm1, %v3183_v8, %v3188_v38  ;;  %v8288_v3 = vunpack.i.h.bf16 %v5490_v55  ;;  %v8289_v19 = vpack.c.bf16 %v5157_v1, %v5155_v34 }
 0x257   :  { %1541 = vmatprep.subr.bf16.mxu0 %v8260_v54  ;;  %vm8264_vm4 = vmmov %vm8257_vm1  ;;  %v3192_v24 = vpop.permute.xlu1 %3191  ;;  %v1198_v59 = vsel %vm8257_vm1, %v8282_v48, %v3183_v8 }
 0x258   :  { %v1196_v46 = vsel %vm8264_vm4, %v3103_v20, %v3168_v13  ;;  %vm8265_vm8 = vmmov %vm8257_vm1  ;;  %v8269_v20 = vpack.c.bf16 %v5134_v14, %v5131_v53  ;;  %v3194_v39 = vunpack.i.h.bf16 %v3192_v24  ;;  %v3193_v31 = vunpack.i.l.bf16 %v3192_v24 }
 0x259   :  { %v1197_v23 = vsel %vm8265_vm8, %v3104_v7, %v3169_v62  ;;  %vm8266_vm10 = vmmov %vm8256_vm13  ;;  %1613 = vmatpush1.bf16.msra.mxu1 %v8274_v44 }
 0x25a   :  { %2705 = vmatmul.mubr.msk.bf16.gmra.mrb[8].mxu1 %vm8266_vm10, %v5633_v42  ;;  %vm2771_vm13 = vmneg %vm4053_vm3  ;;  %1542 = vmatpush1.bf16.msra.mxu0 %v8269_v20  ;;  %v2735_v14 = vpack.c.bf16 %v1197_v23, %v1196_v46  ;;  %v1219_v9 = vsel %vm8257_vm1, %v3194_v39, %v8288_v3 }
 0x25b   :  { %vm8268_vm7 = vmmov %vm8257_vm1  ;;  %2731 = vmatprep.subr.msk.bf16.mxu0 %vm5652_vm5, %v2730_v47  ;;  %1614 = vmatprep.subr.bf16.mxu1 %v8277_v2 }
 0x25c   :  { %v1195_v11 = vsel %vm8268_vm7, %v3184_v51, %v3189_v37  ;;  %vm8271_vm2 = vmmov %vm8257_vm1  ;;  %2661 = vmatmul.mubr.msk.bf16.gmra.mrb[8].mxu0 %vm8266_vm10, %v5633_v42  ;;  %1524 = vmatprep.mubr.bf16.mxu1 %v8245_v33 }
 0x25d   :  { %v1216_v7 = vsel %vm8271_vm2, %v3178_v43, %v8270_v60  ;;  %vm8273_vm4 = vmmov %vm8257_vm1  ;;  %v2740_v62 = vpack.c.bf16 %v1195_v11, %v1194_v6  ;;  %vm8283_vm2 = vnez %v8162_v45  ;;  %1451 = vmatprep.mubr.bf16.mxu0 %v8245_v33  ;;  %1615 = vmatpush1.bf16.msra.mxu1 %v8289_v19 }
 0x25e   :  { %v1217_v28 = vsel %vm8273_vm4, %v3179_v4, %v8272_v32  ;;  %vm5693_vm8 = vmpackc.low %vm2732_vm6, %vm2732_vm6 }
 0x25f   :  { %vm5702_vm7 = vmpackc.low %vm2771_vm13, %vm2771_vm13  ;;  %v2774_v40 = vpack.c.bf16 %v1217_v28, %v1216_v7  ;;  %2736 = vmatpush1.bf16.msk.msra.mxu0 %vm5693_vm8, %v2735_v14 }
 0x260   :  { %vm8281_vm6 = vmmov %vm8257_vm1  ;;  %2741 = vmatprep.subr.msk.bf16.mxu0 %vm5652_vm5, %v2740_v62 }
 0x261   :  { %v1199_v0 = vsel %vm8281_vm6, %v8280_v41, %v3184_v51  ;;  %vm2776_vm13 = vmneg %vm8283_vm2  ;;  %2775 = vmatprep.subr.msk.bf16.mxu1 %vm5702_vm7, %v2774_v40 }
 0x262   :  { %vm8284_vm4 = vmmov %vm8257_vm1 }
 0x263   :  { %v1189_v13 = vsel %vm8284_vm4, %v3174_v61, %v3179_v4  ;;  %vm8285_vm10 = vmmov %vm8257_vm1  ;;  %v2745_v61 = vpack.c.bf16 %v1199_v0, %v1198_v59  ;;  %v1190_v4 = vsel %vm8257_vm1, %v3188_v38, %v3193_v31 }
 0x264   :  { %v1188_v26 = vsel %vm8285_vm10, %v3173_v18, %v3178_v43  ;;  %vm8287_vm6 = vmmov %vm8257_vm1  ;;  %vm8290_vm10 = vcmask 785408  }
 0x265   :  { %v1218_v56 = vsel %vm8287_vm6, %v3193_v31, %v8286_v27  ;;  %vm2778_vm4 = vmpackc.low %vm2776_vm13, %vm2776_vm13  ;;  %v2779_v18 = vpack.c.bf16 %v1189_v13, %v1188_v26  ;;  %2706 = vmatmul.mubr.msk.bf16.gmra.mrb[12].mxu1 %vm8290_vm10, %v3518_v12  ;;  %2746 = vmatpush1.bf16.msk.msra.mxu0 %vm5693_vm8, %v2745_v61 }
 0x266   :  { %vm8291_vm6 = vmmov %vm8257_vm1  ;;  %v2784_v43 = vpack.c.bf16 %v1219_v9, %v1218_v56  ;;  %1640 = vmatprep.mubr.bf16.mxu1 %v8245_v33  ;;  %v5776_v8 = vpop.permute.xlu1 %1323 }
 0x267   :  { %v1191_v55 = vsel %vm8291_vm6, %v3189_v37, %v3194_v39  ;;  %2780 = vmatpush1.bf16.msk.msra.mxu1 %vm2778_vm4, %v2779_v18  ;;  %vm8292_vm5 = vmmov %vm8290_vm10  ;;  %v5771_v37 = vpop.permute.xlu0 %1318 }
 0x268   :  { %2785 = vmatprep.subr.msk.bf16.mxu1 %vm5702_vm7, %v2784_v43  ;;  %2662 = vmatmul.mubr.msk.bf16.gmra.mrb[12].mxu0 %vm8292_vm5, %v3518_v12  ;;  %v2789_v34 = vpack.c.bf16 %v1191_v55, %v1190_v4  ;;  %vm8293_vm13 = vmmov %vm8292_vm5 }
 0x269   :  { %1567 = vmatprep.mubr.bf16.mxu0 %v8245_v33  ;;  %vm8294_vm10 = vmmov %vm8292_vm5 }
 0x26a   :  { %vm8295_vm8 = vmmov %vm8292_vm5  ;;  %v5801_v31 = vpop.permute.xlu1 %1333 }
 0x26b   :  { %2790 = vmatpush1.bf16.msk.msra.mxu1 %vm2778_vm4, %v2789_v34  ;;  %vm8296_vm7 = vmmov %vm8292_vm5  ;;  %v5789_v60 = vpop.permute.xlu0 %1328 }
 0x26c   :  { %vm8297_vm4 = vmmov %vm8292_vm5 }
 0x26d   :  { %vm8298_vm6 = vmmov %vm8297_vm4 }
 0x26e   :  { %2791 = vmatmul.mubr.msk.bf16.vlgmr.msra.gmra.mrb[16].mxu1 %vm8293_vm13, %v5498_v58  ;;  %vm8299_vm1 = vmmov %vm8297_vm4  ;;  %vm8355_vm13 = vcmp.lt.s32.totalorder %v8063_v36, 1 }
 0x26f   :  { %1650 = vmatprep.mubr.bf16.mxu1 %v8245_v33  ;;  %vm8300_vm5 = vmmov %vm8299_vm1 }
 0x270   :  { %2747 = vmatmul.mubr.msk.bf16.vlgmr.msra.gmra.mrb[16].mxu0 %vm8294_vm10, %v5498_v58  ;;  %vm8356_vm10 = vmmov %vm8355_vm13 }
 0x271   :  { %1577 = vmatprep.mubr.bf16.mxu0 %v8245_v33 }
 0x276   :  { %2792 = vmatmul.mubr.msk.bf16.gmra.mrb[20].mxu1 %vm8295_vm8, %v5584_v63  ;;  %vm8357_vm8 = vmmov %vm8356_vm10 }
 0x277   :  { %1660 = vmatprep.mubr.bf16.mxu1 %v8245_v33 }
 0x278   :  { %2748 = vmatmul.mubr.msk.bf16.gmra.mrb[20].mxu0 %vm8296_vm7, %v5584_v63  ;;  %vm8359_vm7 = vmmov %vm8357_vm8 }
 0x279   :  { %1587 = vmatprep.mubr.bf16.mxu0 %v8245_v33 }
 0x27e   :  { %2793 = vmatmul.mubr.msk.bf16.gmra.mrb[24].mxu1 %vm8297_vm4, %v5633_v42  ;;  %vm8360_vm4 = vnez %v8170_v52 }
 0x27f   :  { %1670 = vmatprep.mubr.bf16.mxu1 %v8245_v33 }
 0x280   :  { %2749 = vmatmul.mubr.msk.bf16.gmra.mrb[24].mxu0 %vm8298_vm6, %v5633_v42  ;;  %vm8361_vm6 = vnez %v8178_v57 }
 0x281   :  { %1597 = vmatprep.mubr.bf16.mxu0 %v8245_v33 }
 0x286   :  { %2794 = vmatmul.mubr.msk.bf16.gmra.mrb[28].mxu1 %vm8299_vm1, %v3518_v12  ;;  %vm8362_vm1 = vmmov %vm8359_vm7 }
 0x288   :  { %2750 = vmatmul.mubr.msk.bf16.gmra.mrb[28].mxu0 %vm8300_vm5, %v3518_v12  ;;  %vm8364_vm5 = vmmov %vm8362_vm1 }
 0x316   :  { %v1496_v1 = vpop.f32.mrb[0].mxu1 }
 0x317   :  { %v1498_v58 = vpop.f32.mrb[1].mxu1  ;;  %v5785_v23 = vadd.f32 %v1496_v1, %v5771_v37 }
 0x318   :  { %v1500_v63 = vpop.f32.mrb[2].mxu1 }
 0x319   :  { %v1502_v54 = vpop.f32.mrb[3].mxu1  ;;  %v5779_v33 = vadd.f32 %v1500_v63, %v5776_v8  ;;  %v7844_v53 = vmax.f32 %v5785_v23, 0.0 }
 0x31a   :  { %v5842_v43 = vadd.f32 %v1502_v54, %v5776_v8 }
 0x31b   :  { %8302 = vst [vmem:[#allocation38_spill] sm:$0xff] %v5779_v33  ;;  %v7840_v7 = vmax.f32 %v5779_v33, 0.0 }
 0x31c   :  { %v1423_v38 = vpop.f32.mrb[0].mxu0  ;;  %8308 = vst [vmem:[#allocation21_spill] sm:$0xff] %v5842_v43 }
 0x31d   :  { %v5774_v50 = vadd.f32 %v1423_v38, %v5771_v37  ;;  %v1425_v51 = vpop.f32.mrb[1].mxu0  ;;  %v3200_v16 = vpack.i.bf16 %v7840_v7, %v7844_v53  ;;  %v5852_v38 = vadd.f32 %v1498_v58, %v5771_v37 }
 0x31e   :  { %v1427_v42 = vpop.f32.mrb[2].mxu0  ;;  %v5834_v61 = vadd.f32 %v1425_v51, %v5771_v37 }
 0x31f   :  { %8301 = vst [vmem:[#allocation31_spill] sm:$0xff] %v5774_v50  ;;  %v5782_v15 = vadd.f32 %v1427_v42, %v5776_v8  ;;  %v1429_v46 = vpop.f32.mrb[3].mxu0  ;;  %v7837_v47 = vmax.f32 %v5774_v50, 0.0  ;;  %8309 = vst [vmem:[#allocation8_spill] sm:$0xff] %v5852_v38 }
 0x320   :  { %v5824_v26 = vadd.f32 %v1429_v46, %v5776_v8  ;;  %v7845_v51 = vmax.f32 %v5834_v61, 0.0  ;;  %v7841_v46 = vmax.f32 %v5842_v43, 0.0 }
 0x321   :  { %8303 = vst [vmem:[#allocation20_spill] sm:$0xff] %v5782_v15  ;;  %v7836_v11 = vmax.f32 %v5782_v15, 0.0 }
 0x322   :  { %v1506_v6 = vpop.f32.mrb[4].mxu1  ;;  %v7843_v34 = vmax.f32 %v5824_v26, 0.0 }
 0x323   :  { %v1508_v20 = vpop.f32.mrb[5].mxu1  ;;  %v3195_v32 = vpack.i.bf16 %v7836_v11, %v7837_v47  ;;  %v5814_v59 = vadd.f32 %v1506_v6, %v5789_v60 }
 0x324   :  { %v1510_v28 = vpop.f32.mrb[6].mxu1  ;;  %v3215_v6 = vpack.i.bf16 %v7843_v34, %v7845_v51 }
 0x325   :  { %v1512_v24 = vpop.f32.mrb[7].mxu1  ;;  %3196 = vrot.lane.b32.xlu0 %v3195_v32, %s3573_s3  ;;  %v5808_v41 = vadd.f32 %v1510_v28, %v5801_v31  ;;  %8307 = vst [vmem:[#allocation9_spill] sm:$0xff] %v5814_v59  ;;  %v7839_v18 = vmax.f32 %v5814_v59, 0.0 }
 0x326   :  { %v1433_v44 = vpop.f32.mrb[4].mxu0  ;;  %v5884_v11 = vadd.f32 %v1512_v24, %v5801_v31 }
 0x327   :  { %v5798_v14 = vadd.f32 %v1433_v44, %v5789_v60  ;;  %v1435_v39 = vpop.f32.mrb[5].mxu0  ;;  %8305 = vst [vmem:[#allocation34_spill] sm:$0xff] %v5808_v41  ;;  %v7838_v27 = vmax.f32 %v5808_v41, 0.0 }
 0x328   :  { %v1437_v2 = vpop.f32.mrb[6].mxu0  ;;  %8310 = vst [vmem:[#allocation10_spill] sm:$0xff] %v5884_v11 }
 0x329   :  { %8304 = vst [vmem:[#allocation37_spill] sm:$0xff] %v5798_v14  ;;  %v5811_v0 = vadd.f32 %v1437_v2, %v5801_v31  ;;  %v1439_v48 = vpop.f32.mrb[7].mxu0  ;;  %v7835_v62 = vmax.f32 %v5798_v14, 0.0  ;;  %3201 = vrot.lane.b32.xlu0 %v3200_v16, %s3573_s3  ;;  %v3240_v1 = vpack.i.bf16 %v7838_v27, %v7839_v18  ;;  %v7842_v2 = vmax.f32 %v5852_v38, 0.0  ;;  %v5895_v18 = vpop.permute.xlu1 %1343 }
 0x32a   :  { %v5867_v58 = vadd.f32 %v1439_v48, %v5801_v31 }
 0x32b   :  { %8306 = vst [vmem:[#allocation39_spill] sm:$0xff] %v5811_v0  ;;  %v7834_v12 = vmax.f32 %v5811_v0, 0.0  ;;  %v3220_v48 = vpack.i.bf16 %v7841_v46, %v7842_v2  ;;  %v5899_v46 = vpop.permute.xlu0 %1338 }
 0x32c   :  { %v7847_v47 = vmax.f32 %v5867_v58, 0.0 }
 0x32d   :  { %v5818_v40 = vpop.f32.mrb[8].mxu1  ;;  %v3235_v56 = vpack.i.bf16 %v7834_v12, %v7835_v62  ;;  %3206 = vrot.lane.b32.xlu0 %v3195_v32, %s3574_s22  ;;  %v5944_v30 = vpop.permute.xlu1 %1353 }
 0x32e   :  { %v5821_v13 = vpop.f32.mrb[9].mxu1  ;;  %v5939_v21 = vadd.f32 %v5818_v40, %v5899_v46 }
 0x32f   :  { %v1520_v3 = vpop.f32.mrb[10].mxu1  ;;  %v1443_v9 = vpop.f32.mrb[8].mxu0  ;;  %3236 = vrot.lane.b32.xlu1 %v3235_v56, %s3573_s3  ;;  %v6036_v41 = vadd.f32 %v5821_v13, %v5899_v46 }
 0x330   :  { %v5831_v19 = vpop.f32.mrb[11].mxu1  ;;  %v5837_v55 = vpop.f32.mrb[9].mxu0  ;;  %v5917_v17 = vadd.f32 %v1443_v9, %v5899_v46  ;;  %v5932_v0 = vadd.f32 %v1520_v3, %v5895_v18  ;;  %8316 = vst [vmem:[#allocation18_spill] sm:$0xff] %v5939_v21  ;;  %v7865_v35 = vmax.f32 %v5939_v21, 0.0 }
 0x331   :  { %v1447_v4 = vpop.f32.mrb[10].mxu0  ;;  %3211 = vrot.lane.b32.xlu0 %v3200_v16, %s3574_s22  ;;  %v5873_v16 = vadd.f32 %v1435_v39, %v5789_v60  ;;  %v5890_v39 = vadd.f32 %v1508_v20, %v5789_v60  ;;  %v5948_v3 = vpop.permute.xlu0 %1348 }
 0x332   :  { %v5849_v63 = vpop.f32.mrb[11].mxu0  ;;  %v5907_v2 = vadd.f32 %v1447_v4, %v5895_v18  ;;  %8313 = vst [vmem:[#allocation25_spill] sm:$0xff] %v5917_v17  ;;  %8315 = vst [vmem:[#allocation32_spill] sm:$0xff] %v5932_v0 }
 0x333   :  { %3241 = vrot.lane.b32.xlu1 %v3240_v1, %s3573_s3  ;;  %8311 = vst [vmem:[#allocation24_spill] sm:$0xff] %v5890_v39  ;;  %v7853_v51 = vmax.f32 %v5890_v39, 0.0 }
 0x334   :  { %8312 = vst [vmem:[#allocation26_spill] sm:$0xff] %v5907_v2  ;;  %v7859_v9 = vmax.f32 %v5907_v2, 0.0 }
 0x335   :  { %3216 = vrot.lane.b32.xlu0 %v3215_v6, %s3573_s3 }
 0x337   :  { %3246 = vrot.lane.b32.xlu1 %v3235_v56, %s3574_s22  ;;  %v7848_v56 = vmax.f32 %v5873_v16, 0.0 }
 0x338   :  { %v5855_v42 = vpop.f32.mrb[12].mxu1 }
 0x339   :  { %v5859_v54 = vpop.f32.mrb[13].mxu1  ;;  %3221 = vrot.lane.b32.xlu0 %v3220_v48, %s3573_s3  ;;  %v3255_v20 = vpack.i.bf16 %v7847_v47, %v7848_v56  ;;  %v8314_v47 = vmax.f32 %v5884_v11, 0.0  ;;  %v5988_v10 = vadd.f32 %v5855_v42, %v5948_v3  ;;  %v6012_v11 = vadd.f32 %v5837_v55, %v5899_v46 }
 0x33a   :  { %v1530_v32 = vpop.f32.mrb[14].mxu1 }
 0x33b   :  { %v1453_v28 = vpop.f32.mrb[12].mxu0  ;;  %v5869_v44 = vpop.f32.mrb[15].mxu1  ;;  %3251 = vrot.lane.b32.xlu1 %v3240_v1, %s3574_s22  ;;  %v3260_v56 = vpack.i.bf16 %v8314_v47, %v7853_v51  ;;  %v5981_v2 = vadd.f32 %v1530_v32, %v5944_v30  ;;  %8321 = vst [vmem:[#allocation12_spill] sm:$0xff] %v5988_v10  ;;  %v5997_v32 = vadd.f32 %v5849_v63, %v5895_v18  ;;  %8323 = vst [vmem:[#allocation22_spill] sm:$0xff] %v6012_v11 }
 0x33c   :  { %v5875_v12 = vpop.f32.mrb[13].mxu0  ;;  %v5966_v29 = vadd.f32 %v1453_v28, %v5948_v3  ;;  %v7875_v63 = vmax.f32 %v5988_v10, 0.0  ;;  %v6077_v43 = vadd.f32 %v5869_v44, %v5944_v30 }
 0x33d   :  { %v1457_v62 = vpop.f32.mrb[14].mxu0  ;;  %3226 = vrot.lane.b32.xlu0 %v3215_v6, %s3574_s22  ;;  %v7860_v6 = vmax.f32 %v5917_v17, 0.0  ;;  %8320 = vst [vmem:[#allocation19_spill] sm:$0xff] %v5981_v2  ;;  %8322 = vst [vmem:[#allocation13_spill] sm:$0xff] %v5997_v32  ;;  %v8325_v55 = vmax.f32 %v5981_v2, 0.0 }
 0x33e   :  { %v5887_v27 = vpop.f32.mrb[15].mxu0  ;;  %v5956_v15 = vadd.f32 %v1457_v62, %v5944_v30  ;;  %8318 = vst [vmem:[#allocation27_spill] sm:$0xff] %v5966_v29 }
 0x33f   :  { %3256 = vrot.lane.b32.xlu1 %v3255_v20, %s3573_s3  ;;  %v3275_v40 = vpack.i.bf16 %v7859_v9, %v7860_v6  ;;  %v8319_v9 = vmax.f32 %v5932_v0, 0.0  ;;  %v6050_v2 = vadd.f32 %v5887_v27, %v5944_v30 }
 0x340   :  { %8317 = vst [vmem:[#allocation33_spill] sm:$0xff] %v5956_v15  ;;  %v7869_v28 = vmax.f32 %v5956_v15, 0.0  ;;  %v6061_v15 = vadd.f32 %v5875_v12, %v5948_v3 }
 0x341   :  { %v5897_v7 = vpop.f32.mrb[16].mxu1  ;;  %3231 = vrot.lane.b32.xlu0 %v3220_v48, %s3574_s22  ;;  %v3280_v6 = vpack.i.bf16 %v8319_v9, %v7865_v35  ;;  %v7887_v12 = vmax.f32 %v6050_v2, 0.0 }
 0x342   :  { %v5909_v34 = vpop.f32.mrb[17].mxu1  ;;  %v7888_v33 = vmax.f32 %v6061_v15, 0.0 }
 0x343   :  { %v5911_v1 = vpop.f32.mrb[18].mxu1  ;;  %v5913_v53 = vpop.f32.mrb[16].mxu0  ;;  %3261 = vrot.lane.b32.xlu1 %v3260_v56, %s3573_s3 }
 0x344   :  { %v5919_v24 = vpop.f32.mrb[19].mxu1  ;;  %v5921_v45 = vpop.f32.mrb[17].mxu0  ;;  %v3335_v44 = vpack.i.bf16 %v7887_v12, %v7888_v33  ;;  %v6111_v12 = vadd.f32 %v5911_v1, %v5776_v8  ;;  %v6116_v33 = vadd.f32 %v5897_v7, %v5771_v37 }
 0x345   :  { %v5925_v4 = vpop.f32.mrb[18].mxu0  ;;  %3276 = vrot.lane.b32.xlu0 %v3275_v40, %s3573_s3 }
 0x346   :  { %v5935_v14 = vpop.f32.mrb[19].mxu0  ;;  %v7894_v7 = vmax.f32 %v6116_v33, 0.0 }
 0x347   :  { %3266 = vrot.lane.b32.xlu1 %v3255_v20, %s3574_s22  ;;  %v7870_v20 = vmax.f32 %v5966_v29, 0.0  ;;  %v3320_v29 = vpack.i.bf16 %v8325_v55, %v7875_v63  ;;  %v8326_v55 = vmax.f32 %v5997_v32, 0.0 }
 0x349   :  { %v5946_v47 = vpop.f32.mrb[20].mxu1  ;;  %3281 = vrot.lane.b32.xlu0 %v3280_v6, %s3573_s3  ;;  %v3315_v42 = vpack.i.bf16 %v7869_v28, %v7870_v20  ;;  %v6025_v20 = vadd.f32 %v5831_v19, %v5895_v18 }
 0x34a   :  { %v5958_v50 = vpop.f32.mrb[21].mxu1 }
 0x34b   :  { %v5960_v5 = vpop.f32.mrb[22].mxu1  ;;  %v5962_v48 = vpop.f32.mrb[20].mxu0  ;;  %3271 = vrot.lane.b32.xlu1 %v3260_v56, %s3574_s22  ;;  %8324 = vst [vmem:[#allocation40_spill] sm:$0xff] %v6025_v20 }
 0x34c   :  { %v5968_v51 = vpop.f32.mrb[23].mxu1  ;;  %v5970_v17 = vpop.f32.mrb[21].mxu0 }
 0x34d   :  { %v5974_v62 = vpop.f32.mrb[22].mxu0  ;;  %3286 = vrot.lane.b32.xlu0 %v3275_v40, %s3574_s22  ;;  %v7881_v40 = vmax.f32 %v6012_v11, 0.0 }
 0x34e   :  { %v5984_v25 = vpop.f32.mrb[23].mxu0 }
 0x34f   :  { %3316 = vrot.lane.b32.xlu1 %v3315_v42, %s3573_s3  ;;  %v3295_v63 = vpack.i.bf16 %v8326_v55, %v7881_v40  ;;  %v8327_v55 = vmax.f32 %v6025_v20, 0.0  ;;  %v6101_v20 = vadd.f32 %v5913_v53, %v5771_v37 }
 0x351   :  { %v5993_v21 = vpop.f32.mrb[24].mxu1  ;;  %3291 = vrot.lane.b32.xlu0 %v3280_v6, %s3574_s22  ;;  %v7885_v6 = vmax.f32 %v6036_v41, 0.0  ;;  %v7892_v53 = vmax.f32 %v6101_v20, 0.0 }
 0x352   :  { %v6004_v35 = vpop.f32.mrb[25].mxu1 }
 0x353   :  { %v6006_v0 = vpop.f32.mrb[26].mxu1  ;;  %v6008_v56 = vpop.f32.mrb[24].mxu0  ;;  %3321 = vrot.lane.b32.xlu1 %v3320_v29, %s3573_s3  ;;  %v3300_v40 = vpack.i.bf16 %v8327_v55, %v7885_v6  ;;  %v7889_v55 = vmax.f32 %v6077_v43, 0.0  ;;  %v6096_v6 = vadd.f32 %v5925_v4, %v5776_v8 }
 0x354   :  { %v6015_v39 = vpop.f32.mrb[27].mxu1  ;;  %v6017_v9 = vpop.f32.mrb[25].mxu0 }
 0x355   :  { %v6021_v28 = vpop.f32.mrb[26].mxu0  ;;  %3296 = vrot.lane.b32.xlu0 %v3295_v63, %s3573_s3  ;;  %v7891_v4 = vmax.f32 %v6096_v6, 0.0 }
 0x356   :  { %v6032_v49 = vpop.f32.mrb[27].mxu0 }
 0x357   :  { %3326 = vrot.lane.b32.xlu1 %v3315_v42, %s3574_s22  ;;  %v6084_v42 = vadd.f32 %v5859_v54, %v5948_v3  ;;  %v3355_v1 = vpack.i.bf16 %v7891_v4, %v7892_v53  ;;  %v6143_v4 = vadd.f32 %v5960_v5, %v5801_v31  ;;  %v6148_v53 = vadd.f32 %v5946_v47, %v5789_v60 }
 0x358   :  { %v6164_v47 = vadd.f32 %v5921_v45, %v5771_v37  ;;  %v6180_v45 = vadd.f32 %v5909_v34, %v5771_v37  ;;  %v6197_v34 = vadd.f32 %v5970_v17, %v5789_v60 }
 0x359   :  { %v6041_v19 = vpop.f32.mrb[28].mxu1  ;;  %3301 = vrot.lane.b32.xlu0 %v3300_v40, %s3573_s3  ;;  %v7890_v54 = vmax.f32 %v6084_v42, 0.0  ;;  %8328 = vst [vmem:[#allocation41_spill] sm:$0xff] %v6143_v4  ;;  %8329 = vst [vmem:[#allocation42_spill] sm:$0xff] %v6148_v53 }
 0x35a   :  { %v6052_v13 = vpop.f32.mrb[29].mxu1  ;;  %8331 = vst [vmem:[#allocation44_spill] sm:$0xff] %v6180_v45  ;;  %v7920_v37 = vmax.f32 %v6180_v45, 0.0  ;;  %8333 = vst [vmem:[#allocation46_spill] sm:$0xff] %v6197_v34  ;;  %v7900_v17 = vmax.f32 %v6197_v34, 0.0 }
 0x35b   :  { %v6054_v10 = vpop.f32.mrb[30].mxu1  ;;  %v6056_v59 = vpop.f32.mrb[28].mxu0  ;;  %3331 = vrot.lane.b32.xlu1 %v3320_v29, %s3574_s22  ;;  %v3340_v29 = vpack.i.bf16 %v7889_v55, %v7890_v54  ;;  %v6128_v55 = vadd.f32 %v5974_v62, %v5801_v31  ;;  %v6133_v54 = vadd.f32 %v5962_v48, %v5789_v60 }
 0x35c   :  { %v6063_v11 = vpop.f32.mrb[31].mxu1  ;;  %v6065_v32 = vpop.f32.mrb[29].mxu0 }
 0x35d   :  { %v6069_v27 = vpop.f32.mrb[30].mxu0  ;;  %3306 = vrot.lane.b32.xlu0 %v3295_v63, %s3574_s22  ;;  %v7893_v63 = vmax.f32 %v6111_v12, 0.0  ;;  %v7895_v62 = vmax.f32 %v6128_v55, 0.0  ;;  %v7896_v48 = vmax.f32 %v6133_v54, 0.0 }
 0x35e   :  { %v6080_v38 = vpop.f32.mrb[31].mxu0 }
 0x35f   :  { %3336 = vrot.lane.b32.xlu1 %v3335_v44, %s3573_s3  ;;  %v3395_v5 = vpack.i.bf16 %v7895_v62, %v7896_v48  ;;  %v7922_v48 = vmax.f32 %v6164_v47, 0.0 }
 0x361   :  { %3311 = vrot.lane.b32.xlu0 %v3300_v40, %s3574_s22  ;;  %v3360_v40 = vpack.i.bf16 %v7893_v63, %v7894_v7  ;;  %v7897_v63 = vmax.f32 %v6143_v4, 0.0  ;;  %v7898_v7 = vmax.f32 %v6148_v53, 0.0  ;;  %v8385_v4 = vld [vmem:[#allocation38_spill] sm:$0xff] }
 0x363   :  { %3341 = vrot.lane.b32.xlu1 %v3340_v29, %s3573_s3  ;;  %v3400_v62 = vpack.i.bf16 %v7897_v63, %v7898_v7  ;;  %v6207_v63 = vadd.f32 %v5968_v51, %v5801_v31  ;;  %v6212_v7 = vadd.f32 %v5958_v50, %v5789_v60  ;;  %v6224_v51 = vadd.f32 %v6021_v28, %v5895_v18 }
 0x364   :  { %v6229_v60 = vadd.f32 %v6008_v56, %v5899_v46 }
 0x365   :  { %3356 = vrot.lane.b32.xlu0 %v3355_v1, %s3573_s3  ;;  %8334 = vst [vmem:[#allocation47_spill] sm:$0xff] %v6207_v63  ;;  %8335 = vst [vmem:[#allocation48_spill] sm:$0xff] %v6212_v7  ;;  %v7902_v50 = vmax.f32 %v6212_v7, 0.0  ;;  %v7903_v28 = vmax.f32 %v6224_v51, 0.0 }
 0x366   :  { %8336 = vst [vmem:[#allocation49_spill] sm:$0xff] %v6224_v51  ;;  %8337 = vst [vmem:[#allocation50_spill] sm:$0xff] %v6229_v60  ;;  %v7904_v56 = vmax.f32 %v6229_v60, 0.0 }
 0x367   :  { %3346 = vrot.lane.b32.xlu1 %v3335_v44, %s3574_s22  ;;  %v6155_v44 = vadd.f32 %v5935_v14, %v5776_v8  ;;  %v6171_v14 = vadd.f32 %v5919_v24, %v5776_v8 }
 0x369   :  { %3361 = vrot.lane.b32.xlu0 %v3360_v40, %s3573_s3  ;;  %8330 = vst [vmem:[#allocation43_spill] sm:$0xff] %v6171_v14  ;;  %v7919_v8 = vmax.f32 %v6171_v14, 0.0  ;;  %v8443_v14 = vld [vmem:[#allocation13_spill] sm:$0xff] }
 0x36b   :  { %3351 = vrot.lane.b32.xlu1 %v3340_v29, %s3574_s22  ;;  %v7921_v29 = vmax.f32 %v6155_v44, 0.0 }
 0x36d   :  { %3366 = vrot.lane.b32.xlu0 %v3355_v1, %s3574_s22  ;;  %v3375_v24 = vpack.i.bf16 %v7921_v29, %v7922_v48  ;;  %v6192_v1 = vadd.f32 %v5984_v25, %v5801_v31 }
 0x36f   :  { %3396 = vrot.lane.b32.xlu1 %v3395_v5, %s3573_s3  ;;  %8332 = vst [vmem:[#allocation45_spill] sm:$0xff] %v6192_v1  ;;  %v7899_v25 = vmax.f32 %v6192_v1, 0.0  ;;  %v8386_v1 = vmax.f32 %v8385_v4, 0.0 }
 0x371   :  { %3371 = vrot.lane.b32.xlu0 %v3360_v40, %s3574_s22  ;;  %v3380_v40 = vpack.i.bf16 %v7919_v8, %v7920_v37  ;;  %v3415_v31 = vpack.i.bf16 %v7899_v25, %v7900_v17  ;;  %v6239_v25 = vadd.f32 %v6006_v0, %v5895_v18  ;;  %v6244_v17 = vadd.f32 %v5993_v21, %v5899_v46 }
 0x372   :  { %v3435_v0 = vpack.i.bf16 %v7903_v28, %v7904_v56  ;;  %v6271_v28 = vadd.f32 %v6054_v10, %v5944_v30  ;;  %v6276_v56 = vadd.f32 %v6041_v19, %v5948_v3  ;;  %v6292_v19 = vadd.f32 %v6017_v9, %v5899_v46 }
 0x373   :  { %3401 = vrot.lane.b32.xlu1 %v3400_v62, %s3573_s3  ;;  %8338 = vst [vmem:[#allocation51_spill] sm:$0xff] %v6239_v25  ;;  %8339 = vst [vmem:[#allocation52_spill] sm:$0xff] %v6244_v17  ;;  %v7906_v21 = vmax.f32 %v6244_v17, 0.0  ;;  %v6308_v9 = vadd.f32 %v6004_v35, %v5899_v46  ;;  %v6325_v46 = vadd.f32 %v6065_v32, %v5948_v3 }
 0x374   :  { %8342 = vst [vmem:[#allocation55_spill] sm:$0xff] %v6271_v28  ;;  %8343 = vst [vmem:[#allocation56_spill] sm:$0xff] %v6276_v56  ;;  %v6342_v32 = vadd.f32 %v6052_v13, %v5948_v3 }
 0x375   :  { %3376 = vrot.lane.b32.xlu0 %v3375_v24, %s3573_s3  ;;  %8345 = vst [vmem:[#allocation58_spill] sm:$0xff] %v6292_v19  ;;  %8347 = vst [vmem:[#allocation60_spill] sm:$0xff] %v6308_v9  ;;  %v7912_v35 = vmax.f32 %v6308_v9, 0.0 }
 0x376   :  { %8349 = vst [vmem:[#allocation62_spill] sm:$0xff] %v6325_v46  ;;  %8351 = vst [vmem:[#allocation64_spill] sm:$0xff] %v6342_v32 }
 0x377   :  { %3406 = vrot.lane.b32.xlu1 %v3395_v5, %s3574_s22  ;;  %v7901_v5 = vmax.f32 %v6207_v63, 0.0  ;;  %v8376_v63 = vmax.f32 %v5873_v16, 0.0 }
 0x379   :  { %3381 = vrot.lane.b32.xlu0 %v3380_v40, %s3573_s3 }
 0x37b   :  { %3411 = vrot.lane.b32.xlu1 %v3400_v62, %s3574_s22  ;;  %v3420_v62 = vpack.i.bf16 %v7901_v5, %v7902_v50  ;;  %v6256_v5 = vadd.f32 %v6069_v27, %v5944_v30  ;;  %v6261_v50 = vadd.f32 %v6056_v59, %v5948_v3 }
 0x37d   :  { %3386 = vrot.lane.b32.xlu0 %v3375_v24, %s3574_s22  ;;  %v7905_v24 = vmax.f32 %v6239_v25, 0.0  ;;  %8340 = vst [vmem:[#allocation53_spill] sm:$0xff] %v6256_v5  ;;  %8341 = vst [vmem:[#allocation54_spill] sm:$0xff] %v6261_v50  ;;  %v7907_v27 = vmax.f32 %v6256_v5, 0.0  ;;  %v7908_v59 = vmax.f32 %v6261_v50, 0.0  ;;  %v8367_v50 = vmax.f32 %v5834_v61, 0.0 }
 0x37f   :  { %3416 = vrot.lane.b32.xlu1 %v3415_v31, %s3573_s3  ;;  %v3470_v10 = vpack.i.bf16 %v7907_v27, %v7908_v59  ;;  %v7918_v59 = vmax.f32 %v6292_v19, 0.0 }
 0x381   :  { %3391 = vrot.lane.b32.xlu0 %v3380_v40, %s3574_s22  ;;  %v3440_v40 = vpack.i.bf16 %v7905_v24, %v7906_v21  ;;  %v7909_v24 = vmax.f32 %v6271_v28, 0.0  ;;  %v7910_v21 = vmax.f32 %v6276_v56, 0.0 }
 0x383   :  { %3421 = vrot.lane.b32.xlu1 %v3420_v62, %s3573_s3  ;;  %v3475_v27 = vpack.i.bf16 %v7909_v24, %v7910_v21  ;;  %v6335_v24 = vadd.f32 %v6063_v11, %v5944_v30 }
 0x385   :  { %3436 = vrot.lane.b32.xlu0 %v3435_v0, %s3573_s3  ;;  %8350 = vst [vmem:[#allocation63_spill] sm:$0xff] %v6335_v24 }
 0x387   :  { %3426 = vrot.lane.b32.xlu1 %v3415_v31, %s3574_s22  ;;  %v6283_v31 = vadd.f32 %v6032_v49, %v5895_v18  ;;  %v6299_v49 = vadd.f32 %v6015_v39, %v5895_v18 }
 0x389   :  { %3441 = vrot.lane.b32.xlu0 %v3440_v40, %s3573_s3  ;;  %8344 = vst [vmem:[#allocation57_spill] sm:$0xff] %v6283_v31  ;;  %8346 = vst [vmem:[#allocation59_spill] sm:$0xff] %v6299_v49  ;;  %v7911_v18 = vmax.f32 %v6299_v49, 0.0 }
 0x38b   :  { %3431 = vrot.lane.b32.xlu1 %v3420_v62, %s3574_s22  ;;  %v7915_v62 = vmax.f32 %v6283_v31, 0.0 }
 0x38d   :  { %3446 = vrot.lane.b32.xlu0 %v3435_v0, %s3574_s22  ;;  %v3455_v39 = vpack.i.bf16 %v7915_v62, %v7918_v59  ;;  %v6320_v0 = vadd.f32 %v6080_v38, %v5944_v30 }
 0x38f   :  { %3471 = vrot.lane.b32.xlu1 %v3470_v10, %s3573_s3  ;;  %8348 = vst [vmem:[#allocation61_spill] sm:$0xff] %v6320_v0  ;;  %v7913_v38 = vmax.f32 %v6320_v0, 0.0 }
 0x391   :  { %3451 = vrot.lane.b32.xlu0 %v3440_v40, %s3574_s22  ;;  %v3460_v40 = vpack.i.bf16 %v7911_v18, %v7912_v35  ;;  %v7916_v18 = vmax.f32 %v6335_v24, 0.0  ;;  %v7917_v35 = vmax.f32 %v6342_v32, 0.0 }
 0x393   :  { %3476 = vrot.lane.b32.xlu1 %v3475_v27, %s3573_s3  ;;  %v3495_v3 = vpack.i.bf16 %v7916_v18, %v7917_v35 }
 0x395   :  { %3456 = vrot.lane.b32.xlu0 %v3455_v39, %s3573_s3 }
 0x397   :  { %3481 = vrot.lane.b32.xlu1 %v3470_v10, %s3574_s22  ;;  %v6338_v21 = vpop.permute.xlu0 %3196  ;;  %v7914_v10 = vmax.f32 %v6325_v46, 0.0 }
 0x398   :  { %v7933_v8 = vunpack.i.l.bf16 %v6338_v21 }
 0x399   :  { %3461 = vrot.lane.b32.xlu0 %v3460_v40, %s3573_s3  ;;  %v3490_v30 = vpack.i.bf16 %v7913_v38, %v7914_v10 }
 0x39b   :  { %3486 = vrot.lane.b32.xlu1 %v3475_v27, %s3574_s22  ;;  %v6352_v11 = vpop.permute.xlu0 %3201 }
 0x39c   :  { %v3204_v0 = vunpack.i.h.bf16 %v6352_v11 }
 0x39d   :  { %3466 = vrot.lane.b32.xlu0 %v3455_v39, %s3574_s22 }
 0x39f   :  { %3491 = vrot.lane.b32.xlu1 %v3490_v30, %s3573_s3  ;;  %v6363_v27 = vpop.permute.xlu0 %3206 }
 0x3a0   :  { %8353 = vst [vmem:[#allocation66_spill] sm:$0xff] %v6363_v27 }
 0x3a1   :  { %v6361_v13 = vpop.permute.xlu1 %3236  ;;  %3506 = vrot.lane.b32.xlu0 %v3460_v40, %s3574_s22  ;;  %v3203_v40 = vunpack.i.l.bf16 %v6352_v11  ;;  %v8358_v11 = vunpack.i.h.bf16 %v6338_v21 }
 0x3a2   :  { %8352 = vst [vmem:[#allocation65_spill] sm:$0xff] %v6361_v13  ;;  %v7937_v46 = vunpack.i.l.bf16 %v6361_v13  ;;  %v8363_v17 = vunpack.i.h.bf16 %v6361_v13 }
 0x3a3   :  { %3496 = vrot.lane.b32.xlu1 %v3495_v3, %s3573_s3  ;;  %v6369_v10 = vpop.permute.xlu0 %3211 }
 0x3a4   :  { %v3214_v9 = vunpack.i.h.bf16 %v6369_v10 }
 0x3a5   :  { %v6367_v38 = vpop.permute.xlu1 %3241 }
 0x3a6   :  { %v3243_v25 = vunpack.i.l.bf16 %v6367_v38 }
 0x3a7   :  { %3501 = vrot.lane.b32.xlu1 %v3490_v30, %s3574_s22  ;;  %v3217_v62 = vpop.permute.xlu0 %3216 }
 0x3a8   :  { %v3218_v59 = vunpack.i.l.bf16 %v3217_v62  ;;  %v3219_v30 = vunpack.i.h.bf16 %v3217_v62 }
 0x3a9   :  { %v6372_v39 = vpop.permute.xlu1 %3246 }
 0x3aa   :  { %8354 = vst [vmem:[#allocation67_spill] sm:$0xff] %v6372_v39  ;;  %v1913_v24 = vsel %vm8355_vm13, %v3218_v59, %v3203_v40  ;;  %vm8366_vm13 = vmmov %vm8362_vm1 }
 0x3ab   :  { %3511 = vrot.lane.b32.xlu1 %v3495_v3, %s3574_s22  ;;  %v6377_v35 = vpop.permute.xlu0 %3221  ;;  %v1921_v3 = vsel %vm8356_vm10, %v7933_v8, %v3218_v59  ;;  %v1922_v8 = vsel %vm8359_vm7, %v8358_v11, %v3219_v30  ;;  %v1939_v48 = vsel %vm8361_vm6, -inf, %v1913_v24  ;;  %v3213_v11 = vunpack.i.l.bf16 %v6369_v10  ;;  %vm8371_vm10 = vmmov %vm8362_vm1 }
 0x3ac   :  { %v1938_v62 = vsel %vm8360_vm4, -inf, %v1921_v3  ;;  %v8365_v19 = vunpack.i.l.bf16 %v6377_v35  ;;  %v1946_v5 = vsel %vm8360_vm4, -inf, %v1922_v8  ;;  %v8368_v10 = vmax.f32 %v5785_v23, 0.0  ;;  %vm8374_vm7 = vmmov %vm8362_vm1 }
 0x3ad   :  { %v6375_v18 = vpop.permute.xlu1 %3251 }
 0x3ae   :  { %v1905_v49 = vsel %vm8366_vm13, %v3203_v40, %v8365_v19  ;;  %v6439_v3 = vmax.f32 %v1939_v48, %v8368_v10  ;;  %v3253_v61 = vunpack.i.l.bf16 %v6375_v18  ;;  %v8372_v48 = vld [vmem:[#allocation11_spill] sm:$0xff]  ;;  %v8375_v10 = vunpack.i.h.bf16 %v6367_v38 }
 0x3af   :  { %v6381_v29 = vpop.permute.xlu0 %3226 }
 0x3b1   :  { %v3257_v37 = vpop.permute.xlu1 %3256 }
 0x3b2   :  { %v3259_v32 = vunpack.i.h.bf16 %v3257_v37  ;;  %v3258_v28 = vunpack.i.l.bf16 %v3257_v37  ;;  %v1914_v37 = vsel %vm8357_vm8, %v3219_v30, %v3204_v0  ;;  %vm8373_vm8 = vnez %v8372_v48 }
 0x3b3   :  { %v6400_v59 = vpop.permute.xlu0 %3231 }
 0x3b4   :  { %v1923_v56 = vsel %vm8362_vm1, %v7937_v46, %v3258_v28  ;;  %v1924_v30 = vsel %vm8364_vm5, %v8363_v17, %v3259_v32  ;;  %v1947_v46 = vsel %vm8361_vm6, -inf, %v1914_v37  ;;  %v6435_v17 = vmax.f32 %v1938_v62, %v8367_v50 }
 0x3b5   :  { %v6398_v31 = vpop.permute.xlu1 %3261  ;;  %v1954_v19 = vsel %vm8360_vm4, -inf, %v1923_v56  ;;  %v1962_v8 = vsel %vm8360_vm4, -inf, %v1924_v30  ;;  %v3254_v37 = vunpack.i.h.bf16 %v6375_v18  ;;  %v8370_v50 = vunpack.i.h.bf16 %v6377_v35 }
 0x3b6   :  { %v1940_v62 = vsel %vm8373_vm8, -inf, %v1905_v49  ;;  %v1915_v56 = vsel %vm8374_vm7, %v3258_v28, %v3243_v25  ;;  %v1916_v30 = vsel %vm8362_vm1, %v3259_v32, %v8375_v10  ;;  %v3228_v18 = vunpack.i.l.bf16 %v6381_v29 }
 0x3b7   :  { %v6441_v51 = vpop.permute.xlu0 %3276  ;;  %v1906_v23 = vsel %vm8371_vm10, %v3204_v0, %v8370_v50  ;;  %v2018_v7 = vmax.f32 %v1954_v19, %v8376_v63  ;;  %v8377_v0 = vmax.f32 %v5867_v58, 0.0  ;;  %vm8378_vm5 = vcmp.lt.s32.totalorder %v8063_v36, 127 }
 0x3b8   :  { %8369 = vst [vmem:[#allocation68_spill] sm:$0xff] %v6441_v51  ;;  %vm8379_vm13 = vmmov %vm8378_vm5  ;;  %v8380_v58 = vunpack.i.l.bf16 %v6372_v39  ;;  %v8382_v19 = vunpack.i.h.bf16 %v6372_v39  ;;  %v8384_v10 = vmax.f32 %v5824_v26, 0.0  ;;  %v2011_v53 = vmax.f32 %v1947_v46, %v8386_v1 }
 0x3b9   :  { %v3267_v24 = vpop.permute.xlu1 %3266  ;;  %v2026_v50 = vmax.f32 %v1962_v8, %v8377_v0  ;;  %vm8381_vm10 = vmmov %vm8378_vm5  ;;  %v1963_v1 = vsel %vm8361_vm6, -inf, %v1916_v30  ;;  %v8395_v46 = vunpack.i.l.bf16 %v6363_v27 }
 0x3ba   :  { %v3269_v40 = vunpack.i.h.bf16 %v3267_v24  ;;  %v3268_v60 = vunpack.i.l.bf16 %v3267_v24  ;;  %v3229_v24 = vunpack.i.h.bf16 %v6381_v29  ;;  %vm8383_vm7 = vmmov %vm8378_vm5  ;;  %v2010_v49 = vmax.f32 %v1946_v5, %v8384_v10 }
 0x3bb   :  { %v6471_v13 = vpop.permute.xlu0 %3281  ;;  %vm8391_vm1 = vmmov %vm8378_vm5  ;;  %v8400_v10 = vunpack.i.h.bf16 %v6367_v38 }
 0x3bc   :  { %v2235_v29 = vsel %vm8378_vm5, %v3268_v60, %v3253_v61  ;;  %v2236_v16 = vsel %vm8379_vm13, %v3269_v40, %v3254_v37  ;;  %v2243_v63 = vsel %vm8381_vm10, %v8380_v58, %v3268_v60  ;;  %v2244_v8 = vsel %vm8383_vm7, %v8382_v19, %v3269_v40  ;;  %v8389_v40 = vld [vmem:[#allocation8_spill] sm:$0xff]  ;;  %vm8392_vm5 = vmmov %vm8391_vm1 }
 0x3bd   :  { %v6469_v28 = vpop.permute.xlu1 %3271  ;;  %v2274_v0 = vsel %vm3897_vm11, -inf, %v2235_v29  ;;  %v2282_v32 = vsel %vm3897_vm11, -inf, %v2236_v16  ;;  %v1948_v58 = vsel %vm8373_vm8, -inf, %v1906_v23  ;;  %v8390_v19 = vmax.f32 %v8389_v40, 0.0  ;;  %vm8396_vm13 = vmmov %vm8391_vm1  ;;  %v8411_v40 = vld [vmem:[#allocation34_spill] sm:$0xff] }
 0x3be   :  { %v6495_v34 = vmax.f32 %v2018_v7, %v2274_v0  ;;  %v6497_v60 = vmax.f32 %v2026_v50, %v2282_v32  ;;  %v2233_v29 = vsel %vm8391_vm1, %v3228_v18, %v3213_v11  ;;  %v2234_v26 = vsel %vm8392_vm5, %v3229_v24, %v3214_v9  ;;  %vm8404_vm5 = vmmov %vm8391_vm1 }
 0x3bf   :  { %v6503_v39 = vmax.f32 %v1940_v62, %v8390_v19  ;;  %v6511_v4 = vpop.permute.xlu0 %3286  ;;  %v1955_v7 = vsel %vm8361_vm6, -inf, %v1915_v56  ;;  %v2241_v23 = vsel %vm8396_vm13, %v8395_v46, %v3228_v18  ;;  %v8397_v62 = vunpack.i.l.bf16 %v6398_v31  ;;  %vm8406_vm13 = vmmov %vm8391_vm1 }
 0x3c0   :  { %8387 = vst [vmem:[#allocation11_spill] sm:$0xff] %v6495_v34  ;;  %8388 = vst [vmem:[#allocation38_spill] sm:$0xff] %v6497_v60  ;;  %vm8398_vm10 = vcmp.lt.s32.totalorder %v8063_v36, 1  ;;  %v8399_v32 = vunpack.i.h.bf16 %v6398_v31  ;;  %v8402_v16 = vunpack.i.l.bf16 %v6400_v59  ;;  %v8403_v0 = vunpack.i.h.bf16 %v6400_v59 }
 0x3c1   :  { %v6509_v5 = vpop.permute.xlu1 %3316  ;;  %8394 = vst [vmem:[#allocation69_spill] sm:$0xff] %v6511_v4  ;;  %v1907_v50 = vsel %vm8398_vm10, %v3243_v25, %v8397_v62  ;;  %vm8401_vm7 = vmmov %vm8398_vm10  ;;  %v8405_v25 = vunpack.i.h.bf16 %v6363_v27  ;;  %v2258_v19 = vsel %vm3897_vm11, -inf, %v2233_v29  ;;  %v2266_v46 = vsel %vm3897_vm11, -inf, %v2234_v26  ;;  %v8407_v62 = vld [vmem:[#allocation21_spill] sm:$0xff] }
 0x3c2   :  { %8393 = vst [vmem:[#allocation8_spill] sm:$0xff] %v6509_v5  ;;  %v1908_v56 = vsel %vm8401_vm7, %v8400_v10, %v8399_v32  ;;  %v2225_v30 = vsel %vm8391_vm1, %v3213_v11, %v8402_v16  ;;  %v2226_v18 = vsel %vm8404_vm5, %v3214_v9, %v8403_v0  ;;  %v7951_v11 = vunpack.i.h.bf16 %v6469_v28  ;;  %v8409_v9 = vld [vmem:[#allocation9_spill] sm:$0xff]  ;;  %vm8423_vm5 = vmmov %vm8391_vm1 }
 0x3c3   :  { %v2242_v38 = vsel %vm8406_vm13, %v8405_v25, %v3229_v24  ;;  %v8408_v32 = vmax.f32 %v8407_v62, 0.0  ;;  %v8410_v16 = vmax.f32 %v8409_v9, 0.0  ;;  %v8412_v60 = vmax.f32 %v8411_v40, 0.0  ;;  %v6561_v29 = vpop.permute.xlu0 %3291 }
 0x3c4   :  { %v1956_v24 = vsel %vm8373_vm8, -inf, %v1907_v50  ;;  %vm8413_vm10 = vcmp.eq.s32.totalorder %v8063_v36, 127  ;;  %v6578_v50 = vmax.f32 %v6435_v17, %v2258_v19  ;;  %v6580_v40 = vmax.f32 %v2010_v49, %v2266_v46  ;;  %v8424_v49 = vld [vmem:[#allocation10_spill] sm:$0xff] }
 0x3c5   :  { %v6551_v10 = vmax.f32 %v1948_v58, %v8408_v32  ;;  %v2019_v0 = vmax.f32 %v1955_v7, %v8410_v16  ;;  %v2027_v34 = vmax.f32 %v1963_v1, %v8412_v60  ;;  %v6559_v25 = vpop.permute.xlu1 %3321  ;;  %v6565_v26 = vsel %vm8413_vm10, -inf, %v2241_v23  ;;  %vm8416_vm7 = vmmov %vm8413_vm10  ;;  %v8421_v32 = vld [vmem:[#allocation24_spill] sm:$0xff] }
 0x3c6   :  { %8414 = vst [vmem:[#allocation21_spill] sm:$0xff] %v6565_v26  ;;  %v1964_v58 = vsel %vm8373_vm8, -inf, %v1908_v56  ;;  %v2259_v7 = vsel %vm3905_vm12, -inf, %v2225_v30  ;;  %v2267_v60 = vsel %vm3905_vm12, -inf, %v2226_v18  ;;  %v6575_v1 = vsel %vm8416_vm7, -inf, %v2242_v38  ;;  %8418 = vst [vmem:[#allocation34_spill] sm:$0xff] %v6578_v50 }
 0x3c7   :  { %8417 = vst [vmem:[#allocation9_spill] sm:$0xff] %v6575_v1  ;;  %8419 = vst [vmem:[#allocation23_spill] sm:$0xff] %v6580_v40  ;;  %v8420_v23 = vunpack.i.l.bf16 %v6469_v28  ;;  %v8422_v9 = vmax.f32 %v8421_v32, 0.0  ;;  %v7952_v16 = vunpack.i.l.bf16 %v6441_v51  ;;  %v2228_v17 = vsel %vm8423_vm5, %v3254_v37, %v7951_v11  ;;  %v3297_v32 = vpop.permute.xlu0 %3296  ;;  %v8441_v40 = vld [vmem:[#allocation18_spill] sm:$0xff] }
 0x3c8   :  { %v8425_v38 = vmax.f32 %v8424_v49, 0.0  ;;  %v6601_v46 = vmax.f32 %v6439_v3, %v2259_v7  ;;  %v3283_v18 = vunpack.i.l.bf16 %v6471_v13  ;;  %v3299_v37 = vunpack.i.h.bf16 %v3297_v32  ;;  %vm8427_vm13 = vmmov %vm8416_vm7 }
 0x3c9   :  { %v2227_v56 = vsel %vm8391_vm1, %v3253_v61, %v8420_v23  ;;  %v6588_v30 = vmax.f32 %v1956_v24, %v8422_v9  ;;  %v6603_v61 = vmax.f32 %v2011_v53, %v2267_v60  ;;  %v3284_v24 = vunpack.i.h.bf16 %v6471_v13  ;;  %v6606_v23 = vpop.permute.xlu1 %3326  ;;  %vm8429_vm10 = vmmov %vm8416_vm7 }
 0x3ca   :  { %v6598_v19 = vmax.f32 %v1964_v58, %v8425_v38  ;;  %8426 = vst [vmem:[#allocation24_spill] sm:$0xff] %v6606_v23  ;;  %v2275_v9 = vsel %vm3905_vm12, -inf, %v2227_v56  ;;  %v3298_v11 = vunpack.i.l.bf16 %v3297_v32  ;;  %v6613_v58 = vsel %vm8427_vm13, -inf, %v2243_v63 }
 0x3cb   :  { %8428 = vst [vmem:[#allocation10_spill] sm:$0xff] %v6613_v58  ;;  %v6617_v53 = vsel %vm8429_vm10, -inf, %v2244_v8  ;;  %v2283_v3 = vsel %vm3905_vm12, -inf, %v2228_v17  ;;  %vm8431_vm7 = vcmp.lt.s32.totalorder %v8063_v36, 1  ;;  %v8434_v56 = vunpack.i.h.bf16 %v6441_v51  ;;  %v8437_v17 = vld [vmem:[#allocation22_spill] sm:$0xff] }
 0x3cc   :  { %8430 = vst [vmem:[#allocation70_spill] sm:$0xff] %v6617_v53  ;;  %v1917_v60 = vsel %vm8431_vm7, %v3298_v11, %v3283_v18  ;;  %vm8432_vm1 = vmmov %vm8431_vm7  ;;  %v6634_v49 = vmax.f32 %v2019_v0, %v2275_v9  ;;  %v6641_v53 = vpop.permute.xlu0 %3301  ;;  %v6643_v58 = vmax.f32 %v2027_v34, %v2283_v3  ;;  %v3294_v34 = vunpack.i.h.bf16 %v6561_v29 }
 0x3cd   :  { %v1918_v13 = vsel %vm8432_vm1, %v3299_v37, %v3284_v24  ;;  %vm8433_vm5 = vmmov %vm8432_vm1  ;;  %v6639_v7 = vpop.permute.xlu1 %3331  ;;  %8436 = vst [vmem:[#allocation71_spill] sm:$0xff] %v6641_v53  ;;  %v1971_v9 = vsel %vm8361_vm6, -inf, %v1917_v60  ;;  %v7959_v38 = vunpack.i.l.bf16 %v6641_v53  ;;  %v3293_v3 = vunpack.i.l.bf16 %v6561_v29 }
 0x3ce   :  { %v1925_v63 = vsel %vm8433_vm5, %v7952_v16, %v3298_v11  ;;  %vm8435_vm13 = vmmov %vm8432_vm1  ;;  %v3324_v11 = vunpack.i.h.bf16 %v6559_v25  ;;  %v3323_v16 = vunpack.i.l.bf16 %v6559_v25  ;;  %v8438_v60 = vmax.f32 %v8437_v17, 0.0 }
 0x3cf   :  { %v1926_v8 = vsel %vm8435_vm13, %v8434_v56, %v3299_v37  ;;  %v1970_v0 = vsel %vm8360_vm4, -inf, %v1925_v63  ;;  %v7962_v56 = vunpack.i.h.bf16 %v6641_v53  ;;  %v1979_v63 = vsel %vm8361_vm6, -inf, %v1918_v13  ;;  %vm8439_vm10 = vmmov %vm8432_vm1 }
 0x3d0   :  { %v1978_v37 = vsel %vm8360_vm4, -inf, %v1926_v8  ;;  %v2034_v51 = vmax.f32 %v1970_v0, %v8438_v60  ;;  %v1909_v8 = vsel %vm8439_vm10, %v3283_v18, %v7959_v38  ;;  %vm8440_vm7 = vmmov %vm8432_vm1  ;;  %v3307_v32 = vpop.permute.xlu0 %3306  ;;  %v8442_v25 = vmax.f32 %v8441_v40, 0.0 }
 0x3d1   :  { %v1910_v29 = vsel %vm8440_vm7, %v3284_v24, %v7962_v56  ;;  %v3337_v27 = vpop.permute.xlu1 %3336  ;;  %v8444_v13 = vmax.f32 %v8443_v14, 0.0  ;;  %v1972_v60 = vsel %vm8373_vm8, -inf, %v1909_v8  ;;  %v3309_v38 = vunpack.i.h.bf16 %v3307_v32  ;;  %vm8445_vm5 = vmmov %vm8432_vm1 }
 0x3d2   :  { %v2035_v50 = vmax.f32 %v1971_v9, %v8442_v25  ;;  %v3339_v17 = vunpack.i.h.bf16 %v3337_v27  ;;  %v3338_v0 = vunpack.i.l.bf16 %v3337_v27  ;;  %v1980_v18 = vsel %vm8373_vm8, -inf, %v1910_v29  ;;  %vm8447_vm13 = vmmov %vm8432_vm1  ;;  %v8450_v25 = vld [vmem:[#allocation32_spill] sm:$0xff] }
 0x3d3   :  { %v2042_v45 = vmax.f32 %v1978_v37, %v8444_v13  ;;  %v3308_v53 = vunpack.i.l.bf16 %v3307_v32  ;;  %v8446_v9 = vunpack.i.l.bf16 %v6509_v5  ;;  %v8448_v27 = vunpack.i.h.bf16 %v6509_v5  ;;  %vm8449_vm10 = vmmov %vm8432_vm1  ;;  %v8453_v5 = vld [vmem:[#allocation40_spill] sm:$0xff] }
 0x3d4   :  { %v1919_v24 = vsel %vm8432_vm1, %v3338_v0, %v3323_v16  ;;  %v1920_v40 = vsel %vm8445_vm5, %v3339_v17, %v3324_v11  ;;  %v8451_v8 = vmax.f32 %v8450_v25, 0.0  ;;  %v6699_v26 = vpop.permute.xlu0 %3311  ;;  %vm8455_vm7 = vcmp.lt.s32.totalorder %v8063_v36, 127 }
 0x3d5   :  { %v1927_v14 = vsel %vm8447_vm13, %v8446_v9, %v3338_v0  ;;  %v1928_v37 = vsel %vm8449_vm10, %v8448_v27, %v3339_v17  ;;  %v6697_v1 = vpop.permute.xlu1 %3341  ;;  %v8452_v0 = vmax.f32 %v6036_v41, 0.0  ;;  %v8454_v17 = vmax.f32 %v8453_v5, 0.0  ;;  %vm8456_vm1 = vmmov %vm8455_vm7 }
 0x3d6   :  { %v2043_v29 = vmax.f32 %v1979_v63, %v8451_v8  ;;  %v1986_v56 = vsel %vm8360_vm4, -inf, %v1927_v14  ;;  %v1987_v63 = vsel %vm8361_vm6, -inf, %v1919_v24  ;;  %v1994_v25 = vsel %vm8360_vm4, -inf, %v1928_v37  ;;  %vm8458_vm5 = vmmov %vm8456_vm1 }
 0x3d7   :  { %v6703_v9 = vmax.f32 %v1972_v60, %v8452_v0  ;;  %v6707_v27 = vmax.f32 %v1980_v18, %v8454_v17  ;;  %v2237_v14 = vsel %vm8455_vm7, %v3308_v53, %v3293_v3  ;;  %v2238_v8 = vsel %vm8456_vm1, %v3309_v38, %v3294_v34  ;;  %vm8460_vm13 = vmmov %vm8456_vm1 }
 0x3d8   :  { %v8457_v41 = vunpack.i.l.bf16 %v6511_v4  ;;  %v8459_v5 = vunpack.i.h.bf16 %v6511_v4  ;;  %v1995_v52 = vsel %vm8361_vm6, -inf, %v1920_v40  ;;  %v8461_v24 = vmax.f32 %v6061_v15, 0.0  ;;  %v6739_v57 = vpop.permute.xlu0 %3356  ;;  %vm8467_vm4 = vmmov %vm8449_vm10 }
 0x3d9   :  { %v2290_v0 = vsel %vm3897_vm11, -inf, %v2237_v14  ;;  %v2298_v17 = vsel %vm3897_vm11, -inf, %v2238_v8  ;;  %v7965_v15 = vunpack.i.h.bf16 %v6699_v26  ;;  %vm8468_vm6 = vmmov %vm8467_vm4  ;;  %v8484_v22 = vunpack.i.h.bf16 %v6739_v57 }
 0x3da   :  { %v2245_v60 = vsel %vm8458_vm5, %v8457_v41, %v3308_v53  ;;  %v2246_v18 = vsel %vm8460_vm13, %v8459_v5, %v3309_v38  ;;  %v2050_v37 = vmax.f32 %v1986_v56, %v8461_v24  ;;  %v6733_v32 = vmax.f32 %v2034_v51, %v2290_v0  ;;  %v3347_v5 = vpop.permute.xlu1 %3346  ;;  %v8464_v24 = vld [vmem:[#allocation12_spill] sm:$0xff]  ;;  %vm8469_vm10 = vmmov %vm8456_vm1 }
 0x3db   :  { %v6735_v53 = vmax.f32 %v2042_v45, %v2298_v17  ;;  %v7967_v41 = vunpack.i.h.bf16 %v6697_v1  ;;  %v7968_v38 = vunpack.i.l.bf16 %v6697_v1  ;;  %v7966_v56 = vunpack.i.l.bf16 %v6699_v26  ;;  %vm8470_vm7 = vmmov %vm8456_vm1 }
 0x3dc   :  { %8462 = vst [vmem:[#allocation22_spill] sm:$0xff] %v6733_v32  ;;  %v3349_v40 = vunpack.i.h.bf16 %v3347_v5  ;;  %v3348_v14 = vunpack.i.l.bf16 %v3347_v5  ;;  %v8465_v13 = vmax.f32 %v8464_v24, 0.0  ;;  %v8466_v51 = vmax.f32 %v6050_v2, 0.0  ;;  %vm8475_vm5 = vmmov %vm8456_vm1 }
 0x3dd   :  { %8463 = vst [vmem:[#allocation18_spill] sm:$0xff] %v6735_v53  ;;  %v1911_v0 = vsel %vm8467_vm4, %v3323_v16, %v7968_v38  ;;  %v1912_v17 = vsel %vm8468_vm6, %v3324_v11, %v7967_v41  ;;  %v2229_v5 = vsel %vm8469_vm10, %v3293_v3, %v7966_v56  ;;  %v2230_v2 = vsel %vm8470_vm7, %v3294_v34, %v7965_v15  ;;  %vm8477_vm13 = vmmov %vm8456_vm1 }
 0x3de   :  { %v2051_v8 = vmax.f32 %v1987_v63, %v8465_v13  ;;  %v2058_v45 = vmax.f32 %v1994_v25, %v8466_v51  ;;  %v7971_v63 = vunpack.i.l.bf16 %v6739_v57  ;;  %v1988_v16 = vsel %vm8373_vm8, -inf, %v1911_v0  ;;  %v6773_v24 = vpop.permute.xlu1 %3351  ;;  %v6775_v51 = vpop.permute.xlu0 %3361 }
 0x3df   :  { %v1996_v11 = vsel %vm8373_vm8, -inf, %v1912_v17  ;;  %v2291_v25 = vsel %vm3905_vm12, -inf, %v2229_v5  ;;  %v2299_v3 = vsel %vm3905_vm12, -inf, %v2230_v2  ;;  %v8471_v56 = vunpack.i.l.bf16 %v6639_v7  ;;  %vm8473_vm8 = vmmov %vm8456_vm1 }
 0x3e0   :  { %v6777_v34 = vmax.f32 %v2035_v50, %v2291_v25  ;;  %v6779_v15 = vmax.f32 %v2043_v29, %v2299_v3  ;;  %v8472_v0 = vunpack.i.h.bf16 %v6639_v7  ;;  %v8474_v5 = vunpack.i.l.bf16 %v6606_v23  ;;  %v8478_v3 = vld [vmem:[#allocation19_spill] sm:$0xff] }
 0x3e1   :  { %v2239_v48 = vsel %vm8456_vm1, %v3348_v14, %v8471_v56  ;;  %v8476_v50 = vunpack.i.h.bf16 %v6606_v23  ;;  %v8479_v41 = vmax.f32 %v8478_v3, 0.0  ;;  %vm8480_vm4 = vcmp.eq.s32.totalorder %v8063_v36, 127 }
 0x3e2   :  { %v2240_v17 = vsel %vm8473_vm8, %v3349_v40, %v8472_v0  ;;  %v2247_v2 = vsel %vm8475_vm5, %v8474_v5, %v3348_v14  ;;  %v2306_v25 = vsel %vm3897_vm11, -inf, %v2239_v48  ;;  %v6805_v0 = vsel %vm8480_vm4, -inf, %v2245_v60  ;;  %vm8487_vm10 = vmmov %vm8480_vm4 }
 0x3e3   :  { %v2248_v29 = vsel %vm8477_vm13, %v8476_v50, %v3349_v40  ;;  %v2314_v56 = vsel %vm3897_vm11, -inf, %v2240_v17  ;;  %v2059_v38 = vmax.f32 %v1995_v52, %v8479_v41  ;;  %v6807_v13 = vmax.f32 %v2050_v37, %v2306_v25  ;;  %vm8486_vm11 = vmmov %vm8468_vm6  ;;  %v6825_v41 = vpop.permute.xlu1 %3396 }
 0x3e4   :  { %v6809_v14 = vmax.f32 %v2058_v45, %v2314_v56  ;;  %v8483_v40 = vunpack.i.l.bf16 %v6377_v35  ;;  %v8485_v17 = vunpack.i.h.bf16 %v6377_v35  ;;  %v7970_v60 = vunpack.i.h.bf16 %v6773_v24  ;;  %v6827_v45 = vpop.permute.xlu0 %3366  ;;  %vm8490_vm7 = vmmov %vm8480_vm4 }
 0x3e5   :  { %8481 = vst [vmem:[#allocation13_spill] sm:$0xff] %v6807_v13  ;;  %v7969_v37 = vunpack.i.l.bf16 %v6773_v24  ;;  %v6831_v5 = vsel %vm8487_vm10, -inf, %v2246_v18  ;;  %v8488_v50 = vmax.f32 %v6084_v42, 0.0  ;;  %v8489_v35 = vmax.f32 %v6077_v43, 0.0  ;;  %vm8495_vm8 = vmmov %vm8456_vm1  ;;  %v8556_v13 = vld [vmem:[#allocation43_spill] sm:$0xff] }
 0x3e6   :  { %8482 = vst [vmem:[#allocation32_spill] sm:$0xff] %v6809_v14  ;;  %v1897_v48 = vsel %vm8468_vm6, %v8483_v40, %v7971_v63  ;;  %v1898_v52 = vsel %vm8486_vm11, %v8485_v17, %v8484_v22  ;;  %v6843_v3 = vsel %vm8490_vm7, -inf, %v2247_v2  ;;  %v8493_v42 = vunpack.i.l.bf16 %v6639_v7  ;;  %vm8496_vm5 = vmmov %vm8480_vm4 }
 0x3e7   :  { %v6835_v25 = vmax.f32 %v1988_v16, %v8488_v50  ;;  %v6839_v56 = vmax.f32 %v1996_v11, %v8489_v35  ;;  %8491 = vst [vmem:[#allocation40_spill] sm:$0xff] %v6843_v3  ;;  %v1941_v22 = vsel %vm8228_vm9, -inf, %v1897_v48  ;;  %v1949_v17 = vsel %vm8228_vm9, -inf, %v1898_v52  ;;  %vm8503_vm13 = vmmov %vm8456_vm1 }
 0x3e8   :  { %v2231_v18 = vsel %vm8456_vm1, %v8493_v42, %v7969_v37  ;;  %v8494_v43 = vunpack.i.h.bf16 %v6639_v7  ;;  %v7974_v52 = vunpack.i.l.bf16 %v6825_v41  ;;  %v7972_v42 = vunpack.i.h.bf16 %v6827_v45  ;;  %v6873_v37 = vpop.permute.xlu1 %3401  ;;  %vm8505_vm4 = vmmov %vm8456_vm1 }
 0x3e9   :  { %v2307_v11 = vsel %vm3905_vm12, -inf, %v2231_v18  ;;  %v7973_v7 = vunpack.i.l.bf16 %v6827_v45  ;;  %v6879_v62 = vsel %vm8496_vm5, -inf, %v2248_v29  ;;  %v8502_v29 = vunpack.i.l.bf16 %v6400_v59  ;;  %vm8512_vm10 = vmmov %vm8456_vm1 }
 0x3ea   :  { %v2232_v16 = vsel %vm8495_vm8, %v8494_v43, %v7970_v60  ;;  %v6867_v50 = vmax.f32 %v2051_v8, %v2307_v11  ;;  %v6875_v43 = vpop.permute.xlu0 %3371  ;;  %8497 = vst [vmem:[#allocation12_spill] sm:$0xff] %v6879_v62  ;;  %v8500_v11 = vmax.f32 %v6101_v20, 0.0  ;;  %v8501_v60 = vmax.f32 %v6096_v6, 0.0  ;;  %vm8514_vm7 = vmmov %vm8456_vm1 }
 0x3eb   :  { %v2315_v2 = vsel %vm3905_vm12, -inf, %v2232_v16  ;;  %v3363_v16 = vunpack.i.l.bf16 %v6775_v51  ;;  %vm8499_vm12 = vmmov %vm8468_vm6  ;;  %v2217_v18 = vsel %vm8503_vm13, %v8502_v29, %v7973_v7  ;;  %v8504_v48 = vunpack.i.h.bf16 %v6400_v59 }
 0x3ec   :  { %v6869_v35 = vmax.f32 %v2059_v38, %v2315_v2  ;;  %v8498_v38 = vunpack.i.l.bf16 %v6398_v31  ;;  %v6891_v2 = vmax.f32 %v1941_v22, %v8500_v11  ;;  %v6895_v63 = vmax.f32 %v1949_v17, %v8501_v60  ;;  %v6925_v7 = vpop.permute.xlu1 %3406  ;;  %vm8515_vm1 = vmmov %vm8468_vm6 }
 0x3ed   :  { %v2218_v20 = vsel %vm8505_vm4, %v8504_v48, %v7972_v42  ;;  %v8506_v22 = vunpack.i.h.bf16 %v6825_v41  ;;  %v8507_v6 = vunpack.i.h.bf16 %v6398_v31  ;;  %v8511_v42 = vunpack.i.l.bf16 %v6469_v28  ;;  %vm8517_vm8 = vmmov %vm8515_vm1 }
 0x3ee   :  { %v1899_v8 = vsel %vm8499_vm12, %v8498_v38, %v7974_v52  ;;  %v8508_v38 = vld [vmem:[#allocation28_spill] sm:$0xff]  ;;  %vm8519_vm5 = vmmov %vm8515_vm1  ;;  %v8557_v62 = vmax.f32 %v8556_v13, 0.0 }
 0x3ef   :  { %v1900_v60 = vsel %vm8468_vm6, %v8507_v6, %v8506_v22  ;;  %v1957_v17 = vsel %vm8228_vm9, -inf, %v1899_v8  ;;  %vm8509_vm11 = vnez %v8508_v38  ;;  %v3377_v22 = vpop.permute.xlu0 %3376  ;;  %v7975_v6 = vunpack.i.h.bf16 %v6925_v7  ;;  %vm8521_vm12 = vmmov %vm8515_vm1 }
 0x3f0   :  { %v2260_v11 = vsel %vm8509_vm11, -inf, %v2217_v18  ;;  %v2268_v29 = vsel %vm8509_vm11, -inf, %v2218_v20  ;;  %v7976_v8 = vunpack.i.l.bf16 %v6925_v7  ;;  %v3379_v52 = vunpack.i.h.bf16 %v3377_v22  ;;  %vm8530_vm4 = vmmov %vm8515_vm1 }
 0x3f1   :  { %v2324_v59 = vmax.f32 %v6503_v39, %v2260_v11  ;;  %v2332_v48 = vmax.f32 %v6551_v10, %v2268_v29  ;;  %v3378_v18 = vunpack.i.l.bf16 %v3377_v22  ;;  %v1965_v20 = vsel %vm8228_vm9, -inf, %v1900_v60  ;;  %vm8532_vm6 = vmmov %vm8515_vm1 }
 0x3f2   :  { %v8510_v39 = vmax.f32 %v6133_v54, 0.0  ;;  %v2219_v31 = vsel %vm8512_vm10, %v8511_v42, %v7976_v8  ;;  %v8513_v22 = vunpack.i.h.bf16 %v6469_v28  ;;  %vm8534_vm10 = vmmov %vm8515_vm1 }
 0x3f3   :  { %v2828_v10 = vpack.c.bf16 %v2324_v59, %v6601_v46  ;;  %v2832_v29 = vpack.c.bf16 %v2332_v48, %v6603_v61  ;;  %v1881_v60 = vsel %vm8515_vm1, %v3378_v18, %v3363_v16  ;;  %v8516_v46 = vunpack.i.h.bf16 %v6775_v51 }
 0x3f4   :  { %v6933_v11 = vmax.f32 %v1957_v17, %v8510_v39  ;;  %v2220_v54 = vsel %vm8514_vm7, %v8513_v22, %v7975_v6  ;;  %v2276_v28 = vsel %vm8509_vm11, -inf, %v2219_v31  ;;  %v8518_v17 = vunpack.i.l.bf16 %v6739_v57  ;;  %v3382_v22 = vpop.permute.xlu0 %3381  ;;  %v8523_v6 = vld [vmem:[#allocation16_spill] sm:$0xff]  ;;  %vm8536_vm7 = vmmov %vm8515_vm1 }
 0x3f5   :  { %v1882_v61 = vsel %vm8517_vm8, %v3379_v52, %v8516_v46  ;;  %2578 = vst [vmem:[%s7701_s5 + $0x8] sm:$0xff] %v2828_v10  ;;  %2582 = vst [vmem:[%s7701_s5 + $0x28] sm:$0xff] %v2832_v29  ;;  %v2284_v42 = vsel %vm8509_vm11, -inf, %v2220_v54  ;;  %v8520_v48 = vunpack.i.h.bf16 %v6739_v57  ;;  %v6973_v10 = vpop.permute.xlu1 %3411  ;;  %v2340_v29 = vmax.f32 %v6588_v30, %v2276_v28 }
 0x3f6   :  { %v1889_v59 = vsel %vm8519_vm5, %v8518_v17, %v3378_v18  ;;  %v2348_v31 = vmax.f32 %v6598_v19, %v2284_v42  ;;  %vm8524_vm13 = vnez %v8523_v6  ;;  %v8525_v18 = vmax.f32 %v6128_v55, 0.0 }
 0x3f7   :  { %v1890_v39 = vsel %vm8521_vm12, %v8520_v48, %v3379_v52  ;;  %v1942_v54 = vsel %vm8217_vm0, -inf, %v1889_v59  ;;  %v1943_v8 = vsel %vm8524_vm13, -inf, %v1881_v60  ;;  %v1951_v30 = vsel %vm8524_vm13, -inf, %v1882_v61  ;;  %vm8546_vm12 = vmmov %vm8530_vm4 }
 0x3f8   :  { %v6983_v17 = vmax.f32 %v1965_v20, %v8525_v18  ;;  %v1950_v52 = vsel %vm8217_vm0, -inf, %v1890_v39  ;;  %v2836_v28 = vpack.c.bf16 %v2340_v29, %v6634_v49  ;;  %v2840_v42 = vpack.c.bf16 %v2348_v31, %v6643_v58  ;;  %v3387_v61 = vpop.permute.xlu0 %3386  ;;  %v8554_v58 = vld [vmem:[#allocation44_spill] sm:$0xff] }
 0x3f9   :  { %v8526_v60 = vmax.f32 %v6164_v47, 0.0  ;;  %v8527_v55 = vmax.f32 %v6116_v33, 0.0  ;;  %v8528_v48 = vmax.f32 %v6155_v44, 0.0  ;;  %v3384_v39 = vunpack.i.h.bf16 %v3382_v22  ;;  %v3417_v23 = vpop.permute.xlu1 %3416 }
 0x3fa   :  { %v3383_v57 = vunpack.i.l.bf16 %v3382_v22  ;;  %2586 = vst [vmem:[%s7701_s5 + $0x48] sm:$0xff] %v2836_v28  ;;  %2590 = vst [vmem:[%s7701_s5 + $0x68] sm:$0xff] %v2840_v42  ;;  %v8529_v47 = vmax.f32 %v6111_v12, 0.0  ;;  %v3419_v44 = vunpack.i.h.bf16 %v3417_v23  ;;  %v3418_v49 = vunpack.i.l.bf16 %v3417_v23  ;;  %v8539_v28 = vld [vmem:[#allocation17_spill] sm:$0xff] }
 0x3fb   :  { %v2006_v59 = vmax.f32 %v1942_v54, %v8526_v60  ;;  %v6997_v20 = vmax.f32 %v1943_v8, %v8527_v55  ;;  %v2014_v18 = vmax.f32 %v1950_v52, %v8528_v48  ;;  %v8531_v22 = vunpack.i.h.bf16 %v6775_v51  ;;  %v8543_v48 = vld [vmem:[#allocation20_spill] sm:$0xff] }
 0x3fc   :  { %v7009_v33 = vmax.f32 %v1951_v30, %v8529_v47  ;;  %v1873_v8 = vsel %vm8530_vm4, %v3363_v16, %v3383_v57  ;;  %v8533_v31 = vunpack.i.l.bf16 %v6338_v21  ;;  %v8535_v12 = vunpack.i.h.bf16 %v6338_v21 }
 0x3fd   :  { %v1874_v29 = vsel %vm8532_vm6, %v8531_v22, %v3384_v39  ;;  %vm8537_vm1 = vcmp.eq.s32.totalorder %v8063_v36, 0  ;;  %v3389_v51 = vunpack.i.h.bf16 %v3387_v61  ;;  %v3388_v30 = vunpack.i.l.bf16 %v3387_v61  ;;  %v3422_v22 = vpop.permute.xlu1 %3421  ;;  %vm8549_vm6 = vmmov %vm8530_vm4 }
 0x3fe   :  { %v1929_v54 = vsel %vm8534_vm10, %v3383_v57, %v8533_v31  ;;  %v1930_v52 = vsel %vm8536_vm7, %v3384_v39, %v8535_v12  ;;  %vm8538_vm8 = vmmov %vm8537_vm1  ;;  %vm8540_vm5 = vnez %v8539_v28  ;;  %v8541_v57 = vld [vmem:[#allocation31_spill] sm:$0xff]  ;;  %v8544_v47 = vmax.f32 %v8543_v48, 0.0  ;;  %v3392_v31 = vpop.permute.xlu0 %3391 }
 0x3ff   :  { %v1937_v23 = vsel %vm8537_vm1, -inf, %v1929_v54  ;;  %v1945_v16 = vsel %vm8538_vm8, -inf, %v1930_v52  ;;  %v1944_v42 = vsel %vm8540_vm5, -inf, %v1873_v8  ;;  %v1952_v60 = vsel %vm8540_vm5, -inf, %v1874_v29  ;;  %vm8551_vm10 = vmmov %vm8530_vm4 }
 0x400   :  { %v8542_v55 = vmax.f32 %v8541_v57, 0.0  ;;  %v2009_v39 = vmax.f32 %v1945_v16, %v8544_v47  ;;  %v8545_v54 = vunpack.i.l.bf16 %v6873_v37  ;;  %v8547_v61 = vunpack.i.h.bf16 %v6873_v37  ;;  %v8553_v47 = vld [vmem:[#allocation9_spill] sm:$0xff] }
 0x401   :  { %v8548_v29 = vunpack.i.l.bf16 %v6825_v41  ;;  %v8555_v19 = vmax.f32 %v8554_v58, 0.0  ;;  %v8560_v58 = vld [vmem:[#allocation46_spill] sm:$0xff]  ;;  %v7080_v13 = vpop.permute.xlu1 %3426  ;;  %vm8563_vm7 = vcmp.lt.s32.totalorder %v8063_v36, 127  ;;  %v3423_v3 = vunpack.i.l.bf16 %v3422_v22 }
 0x402   :  { %v2001_v21 = vmax.f32 %v1937_v23, %v8542_v55  ;;  %v1883_v12 = vsel %vm8546_vm12, %v3418_v49, %v8545_v54  ;;  %v7046_v8 = vsel %vm8530_vm4, %v3419_v44, %v8547_v61  ;;  %v8550_v23 = vunpack.i.h.bf16 %v6825_v41  ;;  %v8552_v55 = vld [vmem:[#allocation21_spill] sm:$0xff]  ;;  %vm8565_vm1 = vmmov %vm8563_vm7 }
 0x403   :  { %v1891_v52 = vsel %vm8549_vm6, %v8548_v29, %v3418_v49  ;;  %v2329_v54 = vmax.f32 %v2009_v39, %v8553_v47  ;;  %v2008_v14 = vmax.f32 %v1944_v42, %v8555_v19  ;;  %v7065_v49 = vmax.f32 %v1952_v60, %v8557_v62  ;;  %v8558_v29 = vld [vmem:[#allocation34_spill] sm:$0xff]  ;;  %v7082_v62 = vpop.permute.xlu0 %3436  ;;  %vm8567_vm8 = vmmov %vm8565_vm1 }
 0x404   :  { %v1892_v16 = vsel %vm8551_vm10, %v8550_v23, %v3419_v44  ;;  %v2321_v48 = vmax.f32 %v2001_v21, %v8552_v55  ;;  %v1958_v61 = vsel %vm8217_vm0, -inf, %v1891_v52  ;;  %v1959_v41 = vsel %vm8524_vm13, -inf, %v1883_v12  ;;  %v8559_v23 = vld [vmem:[#allocation23_spill] sm:$0xff]  ;;  %vm8569_vm12 = vmmov %vm8565_vm1 }
 0x405   :  { %v1966_v44 = vsel %vm8217_vm0, -inf, %v1892_v16  ;;  %v2831_v39 = vpack.c.bf16 %v8559_v23, %v2329_v54  ;;  %v8561_v19 = vmax.f32 %v8560_v58, 0.0  ;;  %v8562_v60 = vunpack.i.l.bf16 %v6875_v43  ;;  %v7122_v4 = vpop.permute.xlu1 %3431  ;;  %vm8578_vm6 = vmmov %vm8530_vm4  ;;  %v8724_v58 = vld [vmem:[#allocation64_spill] sm:$0xff] }
 0x406   :  { %v2827_v21 = vpack.c.bf16 %v8558_v29, %v2321_v48  ;;  %v8564_v16 = vunpack.i.h.bf16 %v6875_v43  ;;  %v8566_v48 = vunpack.i.l.bf16 %v6827_v45  ;;  %v8568_v54 = vunpack.i.h.bf16 %v6827_v45  ;;  %vm8581_vm10 = vmmov %vm8530_vm4 }
 0x407   :  { %v7078_v42 = vmax.f32 %v1958_v61, %v8561_v19  ;;  %v2201_v12 = vsel %vm8563_vm7, %v3388_v30, %v8562_v60  ;;  %2581 = vst [vmem:[%s7701_s5 + $0x20] sm:$0xff] %v2831_v39  ;;  %v3393_v32 = vunpack.i.l.bf16 %v3392_v31  ;;  %vm8583_vm7 = vmmov %vm8530_vm4 }
 0x408   :  { %v2202_v55 = vsel %vm8565_vm1, %v3389_v51, %v8564_v16  ;;  %v2209_v47 = vsel %vm8567_vm8, %v8566_v48, %v3388_v30  ;;  %v2210_v61 = vsel %vm8569_vm12, %v8568_v54, %v3389_v51  ;;  %2577 = vst [vmem:[%s7701_s5] sm:$0xff] %v2827_v21  ;;  %v2262_v19 = vsel %vm3957_vm15, -inf, %v2201_v12  ;;  %v8572_v48 = vld [vmem:[#allocation42_spill] sm:$0xff] }
 0x409   :  { %v2261_v23 = vsel %vm3951_vm14, -inf, %v2209_v47  ;;  %v2269_v45 = vsel %vm3951_vm14, -inf, %v2210_v61  ;;  %v2270_v51 = vsel %vm3957_vm15, -inf, %v2202_v55  ;;  %v2326_v60 = vmax.f32 %v2006_v59, %v2262_v19  ;;  %v8574_v47 = vld [vmem:[#allocation45_spill] sm:$0xff] }
 0x40a   :  { %v2325_v30 = vmax.f32 %v6891_v2, %v2261_v23  ;;  %v2333_v21 = vmax.f32 %v6895_v63, %v2269_v45  ;;  %v2334_v16 = vmax.f32 %v2014_v18, %v2270_v51  ;;  %v8573_v39 = vmax.f32 %v8572_v48, 0.0  ;;  %v7124_v2 = vpop.permute.xlu0 %3441 }
 0x40b   :  { %v8575_v52 = vmax.f32 %v8574_v47, 0.0  ;;  %v3424_v12 = vunpack.i.h.bf16 %v3422_v22  ;;  %v3394_v55 = vunpack.i.h.bf16 %v3392_v31  ;;  %v8576_v63 = vunpack.i.l.bf16 %v6873_v37 }
 0x40c   :  { %v7118_v54 = vmax.f32 %v1959_v41, %v8573_v39  ;;  %v2829_v61 = vpack.c.bf16 %v2326_v60, %v2325_v30  ;;  %v2833_v53 = vpack.c.bf16 %v2334_v16, %v2333_v21  ;;  %v8577_v18 = vunpack.i.h.bf16 %v6873_v37  ;;  %v8586_v60 = vld [vmem:[#allocation37_spill] sm:$0xff] }
 0x40d   :  { %v2030_v57 = vmax.f32 %v1966_v44, %v8575_v52  ;;  %v1875_v59 = vsel %vm8530_vm4, %v8576_v63, %v3423_v3  ;;  %v8579_v44 = vld [vmem:[#allocation65_spill] sm:$0xff]  ;;  %vm8584_vm1 = vcmp.eq.s32.totalorder %v8063_v36, 0  ;;  %v3428_v45 = vunpack.i.l.bf16 %v7080_v13  ;;  %vm8592_vm4 = vmmov %vm8569_vm12  ;;  %v8593_v63 = vld [vmem:[#allocation66_spill] sm:$0xff] }
 0x40e   :  { %v1876_v41 = vsel %vm8578_vm6, %v8577_v18, %v3424_v12  ;;  %v8580_v22 = vunpack.i.l.bf16 %v8579_v44  ;;  %v8582_v23 = vunpack.i.h.bf16 %v8579_v44  ;;  %2579 = vst [vmem:[%s7701_s5 + $0x10] sm:$0xff] %v2829_v61  ;;  %2583 = vst [vmem:[%s7701_s5 + $0x30] sm:$0xff] %v2833_v53  ;;  %v1960_v51 = vsel %vm8540_vm5, -inf, %v1875_v59  ;;  %v8588_v53 = vld [vmem:[#allocation39_spill] sm:$0xff] }
 0x40f   :  { %vm8585_vm8 = vmmov %vm8584_vm1  ;;  %v1968_v30 = vsel %vm8540_vm5, -inf, %v1876_v41  ;;  %v8587_v21 = vmax.f32 %v8586_v60, 0.0  ;;  %v8589_v48 = vmax.f32 %v8588_v53, 0.0  ;;  %v8590_v47 = vunpack.i.l.bf16 %v6875_v43 }
 0x410   :  { %v1931_v52 = vsel %vm8581_vm10, %v3423_v3, %v8580_v22  ;;  %v1932_v31 = vsel %vm8583_vm7, %v3424_v12, %v8582_v23  ;;  %v3429_v3 = vunpack.i.h.bf16 %v7080_v13  ;;  %v8591_v61 = vunpack.i.h.bf16 %v6875_v43  ;;  %vm8595_vm6 = vmmov %vm8592_vm4  ;;  %v7178_v22 = vpop.permute.xlu1 %3471 }
 0x411   :  { %v1953_v37 = vsel %vm8584_vm1, -inf, %v1931_v52  ;;  %v1961_v19 = vsel %vm8585_vm8, -inf, %v1932_v31  ;;  %v2193_v12 = vsel %vm8569_vm12, %v8590_v47, %v3393_v32  ;;  %v8594_v59 = vunpack.i.l.bf16 %v8593_v63  ;;  %vm8597_vm10 = vmmov %vm8592_vm4  ;;  %v8598_v52 = vld [vmem:[#allocation10_spill] sm:$0xff]  ;;  %v7191_v47 = vpop.permute.xlu0 %3446 }
 0x412   :  { %v2017_v16 = vmax.f32 %v1953_v37, %v8587_v21  ;;  %v2025_v39 = vmax.f32 %v1961_v19, %v8589_v48  ;;  %v2194_v13 = vsel %vm8592_vm4, %v8591_v61, %v3394_v55  ;;  %v8596_v41 = vunpack.i.h.bf16 %v8593_v63  ;;  %v8599_v31 = vld [vmem:[#allocation70_spill] sm:$0xff]  ;;  %vm8605_vm7 = vmmov %vm8592_vm4 }
 0x413   :  { %v2249_v18 = vsel %vm8595_vm6, %v3393_v32, %v8594_v59  ;;  %v2263_v19 = vsel %vm8283_vm2, -inf, %v2193_v12  ;;  %v2271_v32 = vsel %vm8283_vm2, -inf, %v2194_v13  ;;  %vm8607_vm1 = vmmov %vm8592_vm4  ;;  %vm8619_vm4 = vcmp.lt.s32.totalorder %v8063_v36, 1 }
 0x414   :  { %v2250_v44 = vsel %vm8597_vm10, %v3394_v55, %v8596_v41  ;;  %v2337_v23 = vmax.f32 %v2017_v16, %v8598_v52  ;;  %v2345_v37 = vmax.f32 %v2025_v39, %v8599_v31  ;;  %v2264_v21 = vsel %vm4053_vm3, -inf, %v2249_v18  ;;  %v8602_v16 = vld [vmem:[#allocation11_spill] sm:$0xff]  ;;  %v8603_v39 = vld [vmem:[#allocation38_spill] sm:$0xff]  ;;  %vm8609_vm8 = vmmov %vm8607_vm1 }
 0x415   :  { %v2272_v53 = vsel %vm4053_vm3, -inf, %v2250_v44  ;;  %v2327_v55 = vmax.f32 %v6997_v20, %v2263_v19  ;;  %v2328_v48 = vmax.f32 %v2008_v14, %v2264_v21  ;;  %v2335_v12 = vmax.f32 %v7009_v33, %v2271_v32  ;;  %vm8611_vm12 = vmmov %vm8607_vm1  ;;  %v7232_v21 = vpop.permute.xlu1 %3476 }
 0x416   :  { %v2835_v61 = vpack.c.bf16 %v8602_v16, %v2337_v23  ;;  %v2839_v63 = vpack.c.bf16 %v8603_v39, %v2345_v37  ;;  %v2336_v59 = vmax.f32 %v7065_v49, %v2272_v53  ;;  %v8604_v41 = vunpack.i.l.bf16 %v6973_v10  ;;  %v8612_v16 = vld [vmem:[#allocation41_spill] sm:$0xff]  ;;  %vm8621_vm6 = vmmov %vm8619_vm4 }
 0x417   :  { %v2830_v18 = vpack.c.bf16 %v2328_v48, %v2327_v55  ;;  %v8606_v44 = vunpack.i.h.bf16 %v6973_v10  ;;  %v8608_v20 = vunpack.i.l.bf16 %v6925_v7  ;;  %v8610_v49 = vunpack.i.h.bf16 %v6925_v7  ;;  %vm8625_vm10 = vmmov %vm8607_vm1 }
 0x418   :  { %v2203_v13 = vsel %vm8605_vm7, %v3428_v45, %v8604_v41  ;;  %2585 = vst [vmem:[%s7701_s5 + $0x40] sm:$0xff] %v2835_v61  ;;  %2589 = vst [vmem:[%s7701_s5 + $0x60] sm:$0xff] %v2839_v63  ;;  %v2834_v33 = vpack.c.bf16 %v2336_v59, %v2335_v12  ;;  %v3439_v55 = vunpack.i.h.bf16 %v7082_v62  ;;  %v3438_v48 = vunpack.i.l.bf16 %v7082_v62  ;;  %v7248_v59 = vpop.permute.xlu0 %3451 }
 0x419   :  { %v2204_v14 = vsel %vm8607_vm1, %v3429_v3, %v8606_v44  ;;  %v2211_v52 = vsel %vm8609_vm8, %v8608_v20, %v3428_v45  ;;  %v2212_v23 = vsel %vm8611_vm12, %v8610_v49, %v3429_v3  ;;  %v2278_v45 = vsel %vm3957_vm15, -inf, %v2203_v13  ;;  %2580 = vst [vmem:[%s7701_s5 + $0x18] sm:$0xff] %v2830_v18  ;;  %v8617_v13 = vld [vmem:[#allocation71_spill] sm:$0xff]  ;;  %vm8627_vm7 = vmmov %vm8607_vm1 }
 0x41a   :  { %v2277_v31 = vsel %vm3951_vm14, -inf, %v2211_v52  ;;  %v2285_v37 = vsel %vm3951_vm14, -inf, %v2212_v23  ;;  %v2286_v19 = vsel %vm3957_vm15, -inf, %v2204_v14  ;;  %v2342_v3 = vmax.f32 %v7078_v42, %v2278_v45  ;;  %2584 = vst [vmem:[%s7701_s5 + $0x38] sm:$0xff] %v2834_v33  ;;  %v8622_v20 = vld [vmem:[#allocation47_spill] sm:$0xff]  ;;  %vm8631_vm8 = vmmov %vm8607_vm1 }
 0x41b   :  { %v2341_v7 = vmax.f32 %v6933_v11, %v2277_v31  ;;  %v2349_v32 = vmax.f32 %v6983_v17, %v2285_v37  ;;  %v2350_v53 = vmax.f32 %v2030_v57, %v2286_v19  ;;  %v8613_v61 = vmax.f32 %v8612_v16, 0.0  ;;  %v8615_v17 = vld [vmem:[#allocation48_spill] sm:$0xff]  ;;  %v8628_v19 = vld [vmem:[#allocation67_spill] sm:$0xff]  ;;  %vm8635_vm12 = vmmov %vm8619_vm4 }
 0x41c   :  { %v8614_v11 = vsel %vm8524_vm13, -inf, %v7046_v8  ;;  %v3434_v63 = vunpack.i.h.bf16 %v7122_v4  ;;  %v3433_v12 = vunpack.i.l.bf16 %v7122_v4  ;;  %v8616_v57 = vmax.f32 %v8615_v17, 0.0 }
 0x41d   :  { %v2031_v42 = vmax.f32 %v8614_v11, %v8613_v61  ;;  %v2837_v39 = vpack.c.bf16 %v2342_v3, %v2341_v7  ;;  %v2841_v41 = vpack.c.bf16 %v2350_v53, %v2349_v32  ;;  %v8618_v44 = vunpack.i.l.bf16 %v8617_v13 }
 0x41e   :  { %v2024_v18 = vmax.f32 %v1960_v51, %v8616_v57  ;;  %v8620_v8 = vunpack.i.h.bf16 %v8617_v13  ;;  %v8623_v52 = vmax.f32 %v8622_v20, 0.0  ;;  %v8624_v51 = vunpack.i.l.bf16 %v6973_v10 }
 0x41f   :  { %v1901_v14 = vsel %vm8619_vm4, %v8618_v44, %v3438_v48  ;;  %2587 = vst [vmem:[%s7701_s5 + $0x50] sm:$0xff] %v2837_v39  ;;  %v8626_v23 = vunpack.i.h.bf16 %v6973_v10  ;;  %v3444_v45 = vunpack.i.h.bf16 %v7124_v2  ;;  %2591 = vst [vmem:[%s7701_s5 + $0x70] sm:$0xff] %v2841_v41  ;;  %v8629_v7 = vunpack.i.l.bf16 %v8628_v19  ;;  %v7301_v39 = vpop.permute.xlu1 %3481 }
 0x420   :  { %v1902_v4 = vsel %vm8621_vm6, %v8620_v8, %v3439_v55  ;;  %v2032_v33 = vmax.f32 %v1968_v30, %v8623_v52  ;;  %v2195_v49 = vsel %vm8625_vm10, %v8624_v51, %v3433_v12  ;;  %v1973_v30 = vsel %vm8228_vm9, -inf, %v1901_v14  ;;  %v3457_v8 = vpop.permute.xlu0 %3456  ;;  %vm8638_vm6 = vmmov %vm8607_vm1 }
 0x421   :  { %v2196_v31 = vsel %vm8627_vm7, %v8626_v23, %v3434_v63  ;;  %v1981_v37 = vsel %vm8228_vm9, -inf, %v1902_v4  ;;  %v2251_v10 = vsel %vm8607_vm1, %v3433_v12, %v8629_v7  ;;  %v8630_v3 = vunpack.i.h.bf16 %v8628_v19  ;;  %v8632_v4 = vld [vmem:[#allocation50_spill] sm:$0xff]  ;;  %vm8640_vm10 = vmmov %vm8607_vm1 }
 0x422   :  { %v2279_v53 = vsel %vm8283_vm2, -inf, %v2195_v49  ;;  %v2280_v16 = vsel %vm4053_vm3, -inf, %v2251_v10  ;;  %v2287_v61 = vsel %vm8283_vm2, -inf, %v2196_v31  ;;  %v3473_v13 = vunpack.i.l.bf16 %v7178_v22  ;;  %v8641_v10 = vld [vmem:[#allocation49_spill] sm:$0xff]  ;;  %vm8650_vm7 = vmmov %vm8607_vm1 }
 0x423   :  { %v2252_v32 = vsel %vm8631_vm8, %v3434_v63, %v8630_v3  ;;  %v2343_v12 = vmax.f32 %v7118_v54, %v2279_v53  ;;  %v2344_v17 = vmax.f32 %v2024_v18, %v2280_v16  ;;  %v2351_v57 = vmax.f32 %v2031_v42, %v2287_v61 }
 0x424   :  { %v2288_v11 = vsel %vm4053_vm3, -inf, %v2252_v32  ;;  %v3474_v63 = vunpack.i.h.bf16 %v7178_v22  ;;  %v3449_v44 = vunpack.i.h.bf16 %v7191_v47  ;;  %v3448_v14 = vunpack.i.l.bf16 %v7191_v47 }
 0x425   :  { %v2352_v41 = vmax.f32 %v2032_v33, %v2288_v11  ;;  %v8633_v20 = vmax.f32 %v8632_v4, 0.0  ;;  %v2838_v51 = vpack.c.bf16 %v2344_v17, %v2343_v12  ;;  %v3443_v54 = vunpack.i.l.bf16 %v7124_v2  ;;  %v7358_v12 = vpop.permute.xlu1 %3486  ;;  %v8643_v17 = vld [vmem:[#allocation54_spill] sm:$0xff] }
 0x426   :  { %v8634_v42 = vunpack.i.l.bf16 %v6697_v1  ;;  %v8636_v33 = vunpack.i.h.bf16 %v6697_v1  ;;  %v8637_v31 = vunpack.i.l.bf16 %v6699_v26  ;;  %v8639_v19 = vunpack.i.h.bf16 %v6699_v26 }
 0x427   :  { %v7310_v52 = vmax.f32 %v1973_v30, %v8633_v20  ;;  %v2842_v49 = vpack.c.bf16 %v2352_v41, %v2351_v57  ;;  %v8642_v3 = vmax.f32 %v8641_v10, 0.0  ;;  %2588 = vst [vmem:[%s7701_s5 + $0x58] sm:$0xff] %v2838_v51  ;;  %v3479_v11 = vunpack.i.h.bf16 %v7232_v21 }
 0x428   :  { %v1903_v18 = vsel %vm8635_vm12, %v8634_v42, %v3473_v13  ;;  %v1904_v23 = vsel %vm8619_vm4, %v8636_v33, %v3474_v63  ;;  %v2221_v30 = vsel %vm8638_vm6, %v8637_v31, %v3448_v14  ;;  %v2222_v7 = vsel %vm8640_vm10, %v8639_v19, %v3449_v44  ;;  %v3462_v42 = vpop.permute.xlu0 %3461 }
 0x429   :  { %v7339_v1 = vmax.f32 %v1981_v37, %v8642_v3  ;;  %2592 = vst [vmem:[%s7701_s5 + $0x78] sm:$0xff] %v2842_v49  ;;  %v1989_v32 = vsel %vm8228_vm9, -inf, %v1903_v18  ;;  %v2292_v26 = vsel %vm8509_vm11, -inf, %v2221_v30  ;;  %v2300_v53 = vsel %vm8509_vm11, -inf, %v2222_v7  ;;  %v8645_v18 = vld [vmem:[#allocation53_spill] sm:$0xff] }
 0x42a   :  { %v1997_v37 = vsel %vm8228_vm9, -inf, %v1904_v23  ;;  %v2356_v16 = vmax.f32 %v6703_v9, %v2292_v26  ;;  %v2364_v61 = vmax.f32 %v6707_v27, %v2300_v53  ;;  %v8644_v57 = vmax.f32 %v8643_v17, 0.0  ;;  %vm8648_vm9 = vmmov %vm8607_vm1 }
 0x42b   :  { %v3478_v4 = vunpack.i.l.bf16 %v7232_v21  ;;  %v3484_v20 = vunpack.i.h.bf16 %v7301_v39  ;;  %v3483_v51 = vunpack.i.l.bf16 %v7301_v39  ;;  %v3459_v49 = vunpack.i.h.bf16 %v3457_v8  ;;  %vm8651_vm1 = vmmov %vm8619_vm4 }
 0x42c   :  { %v7362_v41 = vmax.f32 %v1989_v32, %v8644_v57  ;;  %v2844_v40 = vpack.c.bf16 %v2356_v16, %v6777_v34  ;;  %v2848_v9 = vpack.c.bf16 %v2364_v61, %v6779_v15  ;;  %v3458_v27 = vunpack.i.l.bf16 %v3457_v8  ;;  %vm8652_vm8 = vmmov %vm8651_vm1  ;;  %v3492_v16 = vpop.permute.xlu1 %3491  ;;  %v8655_v57 = vld [vmem:[#allocation58_spill] sm:$0xff] }
 0x42d   :  { %v8646_v33 = vmax.f32 %v8645_v18, 0.0  ;;  %v3454_v31 = vunpack.i.h.bf16 %v7248_v59  ;;  %v8647_v30 = vunpack.i.l.bf16 %v6773_v24  ;;  %v8649_v15 = vunpack.i.h.bf16 %v6773_v24  ;;  %vm8653_vm12 = vmmov %vm8651_vm1  ;;  %v3467_v18 = vpop.permute.xlu0 %3466 }
 0x42e   :  { %2594 = vst [vmem:[%s7701_s5 + $0x88] sm:$0xff] %v2844_v40  ;;  %2598 = vst [vmem:[%s7701_s5 + $0xa8] sm:$0xff] %v2848_v9  ;;  %v1885_v24 = vsel %vm8651_vm1, %v3458_v27, %v3443_v54  ;;  %v1886_v10 = vsel %vm8652_vm8, %v3459_v49, %v3444_v45  ;;  %v1893_v26 = vsel %vm8653_vm12, %v3438_v48, %v3458_v27  ;;  %v3453_v53 = vunpack.i.l.bf16 %v7248_v59 }
 0x42f   :  { %v7371_v23 = vmax.f32 %v1997_v37, %v8646_v33  ;;  %v2223_v19 = vsel %vm8648_vm9, %v8647_v30, %v3483_v51  ;;  %v2224_v34 = vsel %vm8650_vm7, %v8649_v15, %v3484_v20  ;;  %v1974_v37 = vsel %vm8217_vm0, -inf, %v1893_v26  ;;  %v8659_v30 = vld [vmem:[#allocation57_spill] sm:$0xff]  ;;  %vm8661_vm4 = vmmov %vm8651_vm1 }
 0x430   :  { %v2308_v8 = vsel %vm8509_vm11, -inf, %v2223_v19  ;;  %v2316_v7 = vsel %vm8509_vm11, -inf, %v2224_v34  ;;  %vm8654_vm11 = vmmov %vm8651_vm1  ;;  %v3489_v62 = vunpack.i.h.bf16 %v7358_v12  ;;  %v1983_v17 = vsel %vm8524_vm13, -inf, %v1886_v10 }
 0x431   :  { %v2372_v3 = vmax.f32 %v6835_v25, %v2308_v8  ;;  %v2380_v32 = vmax.f32 %v6839_v56, %v2316_v7  ;;  %v1894_v38 = vsel %vm8654_vm11, %v3439_v55, %v3459_v49  ;;  %v1975_v25 = vsel %vm8524_vm13, -inf, %v1885_v24  ;;  %vm8662_vm6 = vmmov %vm8651_vm1  ;;  %v8663_v24 = vld [vmem:[#allocation68_spill] sm:$0xff] }
 0x432   :  { %v1982_v56 = vsel %vm8217_vm0, -inf, %v1894_v38  ;;  %v3488_v55 = vunpack.i.l.bf16 %v7358_v12  ;;  %v8656_v40 = vmax.f32 %v8655_v57, 0.0  ;;  %v3464_v49 = vunpack.i.h.bf16 %v3462_v42  ;;  %vm8665_vm10 = vmmov %vm8651_vm1 }
 0x433   :  { %v2852_v61 = vpack.c.bf16 %v2372_v3, %v6867_v50  ;;  %v2856_v48 = vpack.c.bf16 %v2380_v32, %v6869_v35  ;;  %v3463_v27 = vunpack.i.l.bf16 %v3462_v42  ;;  %v8657_v50 = vld [vmem:[#allocation52_spill] sm:$0xff]  ;;  %v8660_v19 = vmax.f32 %v8659_v30, 0.0  ;;  %vm8667_vm9 = vmmov %vm8651_vm1 }
 0x434   :  { %v2038_v9 = vmax.f32 %v1974_v37, %v8656_v40  ;;  %v8658_v35 = vmax.f32 %v8657_v50, 0.0  ;;  %v3494_v34 = vunpack.i.h.bf16 %v3492_v16  ;;  %v3493_v8 = vunpack.i.l.bf16 %v3492_v16  ;;  %vm8674_vm8 = vmmov %vm8661_vm4 }
 0x435   :  { %2602 = vst [vmem:[%s7701_s5 + $0xc8] sm:$0xff] %v2852_v61  ;;  %2606 = vst [vmem:[%s7701_s5 + $0xe8] sm:$0xff] %v2856_v48  ;;  %v2046_v15 = vmax.f32 %v1982_v56, %v8660_v19  ;;  %v1877_v42 = vsel %vm8661_vm4, %v3443_v54, %v3463_v27  ;;  %v1878_v7 = vsel %vm8662_vm6, %v3444_v45, %v3464_v49  ;;  %v8664_v10 = vunpack.i.l.bf16 %v8663_v24  ;;  %v8670_v56 = vld [vmem:[#allocation25_spill] sm:$0xff]  ;;  %v8672_v48 = vld [vmem:[#allocation26_spill] sm:$0xff] }
 0x436   :  { %v7435_v33 = vmax.f32 %v1975_v25, %v8658_v35  ;;  %v8666_v32 = vunpack.i.h.bf16 %v8663_v24  ;;  %vm8668_vm7 = vcmp.eq.s32.totalorder %v8063_v36, 0  ;;  %v3469_v2 = vunpack.i.h.bf16 %v3467_v18  ;;  %vm8675_vm12 = vmmov %vm8661_vm4  ;;  %v8677_v35 = vld [vmem:[#allocation51_spill] sm:$0xff] }
 0x437   :  { %v1933_v3 = vsel %vm8665_vm10, %v3463_v27, %v8664_v10  ;;  %vm8669_vm1 = vmmov %vm8668_vm7  ;;  %v3468_v37 = vunpack.i.l.bf16 %v3467_v18  ;;  %v1976_v45 = vsel %vm8540_vm5, -inf, %v1877_v42  ;;  %v1984_v25 = vsel %vm8540_vm5, -inf, %v1878_v7  ;;  %v3497_v10 = vpop.permute.xlu1 %3496 }
 0x438   :  { %v1934_v26 = vsel %vm8667_vm9, %v3464_v49, %v8666_v32  ;;  %v1969_v38 = vsel %vm8668_vm7, -inf, %v1933_v3  ;;  %v8671_v16 = vmax.f32 %v8670_v56, 0.0  ;;  %v8673_v57 = vmax.f32 %v8672_v48, 0.0  ;;  %vm8676_vm11 = vmmov %vm8661_vm4  ;;  %v8679_v3 = vld [vmem:[#allocation60_spill] sm:$0xff]  ;;  %v8685_v56 = vld [vmem:[#allocation62_spill] sm:$0xff] }
 0x439   :  { %v1977_v54 = vsel %vm8669_vm1, -inf, %v1934_v26  ;;  %v1887_v49 = vsel %vm8674_vm8, %v3493_v8, %v3478_v4  ;;  %v7473_v27 = vsel %vm8675_vm12, %v3494_v34, %v3479_v11  ;;  %v1895_v18 = vsel %vm8676_vm11, %v3473_v13, %v3493_v8  ;;  %v8681_v8 = vld [vmem:[#allocation59_spill] sm:$0xff]  ;;  %vm8695_vm7 = vmmov %vm8661_vm4 }
 0x43a   :  { %v2033_v61 = vmax.f32 %v1969_v38, %v8671_v16  ;;  %v2041_v40 = vmax.f32 %v1977_v54, %v8673_v57  ;;  %v1896_v50 = vsel %vm8661_vm4, %v3474_v63, %v3494_v34  ;;  %v8678_v30 = vmax.f32 %v8677_v35, 0.0  ;;  %v8683_v34 = vld [vmem:[#allocation22_spill] sm:$0xff]  ;;  %vm8696_vm1 = vmmov %vm8661_vm4 }
 0x43b   :  { %v1990_v24 = vsel %vm8217_vm0, -inf, %v1895_v18  ;;  %v8680_v32 = vmax.f32 %v8679_v3, 0.0  ;;  %v8682_v22 = vmax.f32 %v8681_v8, 0.0  ;;  %v1991_v63 = vsel %vm8524_vm13, -inf, %v1887_v49  ;;  %v8684_v38 = vld [vmem:[#allocation18_spill] sm:$0xff]  ;;  %v3502_v8 = vpop.permute.xlu1 %3501  ;;  %vm8699_vm8 = vmmov %vm8696_vm1 }
 0x43c   :  { %v7485_v19 = vmax.f32 %v1983_v17, %v8678_v30  ;;  %v2353_v42 = vmax.f32 %v2033_v61, %v6805_v0  ;;  %v2361_v7 = vmax.f32 %v2041_v40, %v6831_v5  ;;  %v1998_v17 = vsel %vm8217_vm0, -inf, %v1896_v50  ;;  %v8691_v50 = vld [vmem:[#allocation56_spill] sm:$0xff]  ;;  %vm8701_vm12 = vmmov %vm8696_vm1 }
 0x43d   :  { %v2040_v13 = vmax.f32 %v1976_v45, %v8680_v32  ;;  %v2048_v26 = vmax.f32 %v1984_v25, %v8682_v22  ;;  %v1999_v54 = vsel %vm8524_vm13, -inf, %v7473_v27  ;;  %v8686_v16 = vmax.f32 %v8685_v56, 0.0  ;;  %v8730_v27 = vld [vmem:[#allocation24_spill] sm:$0xff] }
 0x43e   :  { %v2843_v0 = vpack.c.bf16 %v8683_v34, %v2353_v42  ;;  %v2847_v5 = vpack.c.bf16 %v8684_v38, %v2361_v7  ;;  %vm8687_vm6 = vcmp.lt.s32.totalorder %v8063_v36, 127  ;;  %v8692_v35 = vmax.f32 %v8691_v50, 0.0  ;;  %v8693_v42 = vld [vmem:[#allocation61_spill] sm:$0xff] }
 0x43f   :  { %v7506_v45 = vmax.f32 %v1990_v24, %v8686_v16  ;;  %v2205_v25 = vsel %vm8687_vm6, %v3468_v37, %v3453_v53  ;;  %vm8688_vm0 = vmmov %vm8687_vm6  ;;  %v8694_v7 = vmax.f32 %v8693_v42, 0.0  ;;  %v3499_v3 = vunpack.i.h.bf16 %v3497_v10 }
 0x440   :  { %v2206_v46 = vsel %vm8688_vm0, %v3469_v2, %v3454_v31  ;;  %vm8689_vm10 = vmmov %vm8688_vm0  ;;  %2593 = vst [vmem:[%s7701_s5 + $0x80] sm:$0xff] %v2843_v0  ;;  %v2294_v40 = vsel %vm3957_vm15, -inf, %v2205_v25  ;;  %v7542_v30 = vmax.f32 %v1991_v63, %v8692_v35  ;;  %v3498_v32 = vunpack.i.l.bf16 %v3497_v10  ;;  %v8704_v25 = vld [vmem:[#allocation27_spill] sm:$0xff]  ;;  %v8715_v35 = vld [vmem:[#allocation12_spill] sm:$0xff] }
 0x441   :  { %v2213_v61 = vsel %vm8689_vm10, %v3448_v14, %v3468_v37  ;;  %vm8690_vm9 = vmmov %vm8688_vm0  ;;  %2597 = vst [vmem:[%s7701_s5 + $0xa0] sm:$0xff] %v2847_v5  ;;  %v3507_v14 = vpop.permute.xlu0 %3506  ;;  %v2358_v37 = vmax.f32 %v2038_v9, %v2294_v40  ;;  %v2062_v24 = vmax.f32 %v1998_v17, %v8694_v7  ;;  %v8697_v9 = vld [vmem:[#allocation8_spill] sm:$0xff]  ;;  %vm8702_vm11 = vcmp.eq.s32.totalorder %v8063_v36, 0 }
 0x442   :  { %v2214_v48 = vsel %vm8690_vm9, %v3449_v44, %v3469_v2  ;;  %v2293_v57 = vsel %vm3951_vm14, -inf, %v2213_v61  ;;  %v2302_v44 = vsel %vm3957_vm15, -inf, %v2206_v46  ;;  %v3509_v0 = vunpack.i.h.bf16 %v3507_v14  ;;  %vm8703_vm4 = vmmov %vm8702_vm11 }
 0x443   :  { %v2301_v47 = vsel %vm3951_vm14, -inf, %v2214_v48  ;;  %v2357_v2 = vmax.f32 %v7310_v52, %v2293_v57  ;;  %v2366_v18 = vmax.f32 %v2046_v15, %v2302_v44  ;;  %v3508_v38 = vunpack.i.l.bf16 %v3507_v14  ;;  %v8706_v48 = vld [vmem:[#allocation33_spill] sm:$0xff]  ;;  %vm8708_vm6 = vmmov %vm8688_vm0 }
 0x444   :  { %v2365_v49 = vmax.f32 %v7339_v1, %v2301_v47  ;;  %v1879_v52 = vsel %vm8695_vm7, %v3478_v4, %v3498_v32  ;;  %v1880_v1 = vsel %vm8696_vm1, %v3479_v11, %v3499_v3  ;;  %v8698_v15 = vunpack.i.l.bf16 %v8697_v9  ;;  %v8709_v14 = vld [vmem:[#allocation69_spill] sm:$0xff]  ;;  %vm8713_vm10 = vmmov %vm8688_vm0 }
 0x445   :  { %v2845_v22 = vpack.c.bf16 %v2358_v37, %v2357_v2  ;;  %v8700_v63 = vunpack.i.h.bf16 %v8697_v9  ;;  %v3504_v4 = vunpack.i.h.bf16 %v3502_v8  ;;  %v3503_v5 = vunpack.i.l.bf16 %v3502_v8  ;;  %v8716_v8 = vld [vmem:[#allocation13_spill] sm:$0xff]  ;;  %vm8718_vm9 = vmmov %vm8688_vm0 }
 0x446   :  { %v2849_v34 = vpack.c.bf16 %v2366_v18, %v2365_v49  ;;  %v1935_v10 = vsel %vm8699_vm8, %v3498_v32, %v8698_v15  ;;  %v1992_v56 = vsel %vm8540_vm5, -inf, %v1879_v52  ;;  %v2000_v16 = vsel %vm8540_vm5, -inf, %v1880_v1  ;;  %vm8711_vm5 = vmmov %vm8688_vm0  ;;  %v8714_v18 = vld [vmem:[#allocation40_spill] sm:$0xff] }
 0x447   :  { %v1936_v17 = vsel %vm8701_vm12, %v3499_v3, %v8700_v63  ;;  %2595 = vst [vmem:[%s7701_s5 + $0x90] sm:$0xff] %v2845_v22  ;;  %v1985_v21 = vsel %vm8702_vm11, -inf, %v1935_v10  ;;  %v8705_v46 = vmax.f32 %v8704_v25, 0.0  ;;  %v8707_v57 = vmax.f32 %v8706_v48, 0.0  ;;  %vm8719_vm7 = vmmov %vm8688_vm0  ;;  %v8722_v25 = vld [vmem:[#allocation55_spill] sm:$0xff] }
 0x448   :  { %2599 = vst [vmem:[%s7701_s5 + $0xb0] sm:$0xff] %v2849_v34  ;;  %v1993_v11 = vsel %vm8703_vm4, -inf, %v1936_v17  ;;  %v2197_v47 = vsel %vm8708_vm6, %v3453_v53, %v3508_v38  ;;  %v2198_v44 = vsel %vm8688_vm0, %v3454_v31, %v3509_v0  ;;  %v8710_v2 = vunpack.i.l.bf16 %v8709_v14  ;;  %v8717_v34 = vld [vmem:[#allocation32_spill] sm:$0xff]  ;;  %vm8720_vm1 = vmmov %vm8688_vm0 }
 0x449   :  { %v2049_v61 = vmax.f32 %v1985_v21, %v8705_v46  ;;  %v2057_v40 = vmax.f32 %v1993_v11, %v8707_v57  ;;  %v8712_v37 = vunpack.i.h.bf16 %v8709_v14  ;;  %v2295_v59 = vsel %vm8283_vm2, -inf, %v2197_v47  ;;  %vm8721_vm8 = vmmov %vm8688_vm0 }
 0x44a   :  { %v2253_v28 = vsel %vm8711_vm5, %v3508_v38, %v8710_v2  ;;  %v2303_v53 = vsel %vm8283_vm2, -inf, %v2198_v44  ;;  %v2359_v3 = vmax.f32 %v7435_v33, %v2295_v59  ;;  %v2207_v9 = vsel %vm8718_vm9, %v3503_v5, %v3488_v55  ;;  %vm8732_vm13 = vmmov %vm8688_vm0 }
 0x44b   :  { %v2254_v49 = vsel %vm8713_vm10, %v3509_v0, %v8712_v37  ;;  %v2369_v50 = vmax.f32 %v2049_v61, %v8714_v18  ;;  %v2377_v42 = vmax.f32 %v2057_v40, %v8715_v35  ;;  %v2296_v31 = vsel %vm4053_vm3, -inf, %v2253_v28  ;;  %vm8734_vm12 = vmmov %vm8688_vm0 }
 0x44c   :  { %v2304_v7 = vsel %vm4053_vm3, -inf, %v2254_v49  ;;  %v2360_v32 = vmax.f32 %v2040_v13, %v2296_v31  ;;  %v2367_v38 = vmax.f32 %v7485_v19, %v2303_v53  ;;  %v2208_v15 = vsel %vm8719_vm7, %v3504_v4, %v3489_v62  ;;  %v3512_v13 = vpop.permute.xlu1 %3511 }
 0x44d   :  { %v2851_v22 = vpack.c.bf16 %v8716_v8, %v2369_v50  ;;  %v2855_v0 = vpack.c.bf16 %v8717_v34, %v2377_v42  ;;  %v2368_v52 = vmax.f32 %v2048_v26, %v2304_v7  ;;  %v2215_v33 = vsel %vm8720_vm1, %v3483_v51, %v3503_v5 }
 0x44e   :  { %v2846_v1 = vpack.c.bf16 %v2360_v32, %v2359_v3  ;;  %v2216_v26 = vsel %vm8721_vm8, %v3484_v20, %v3504_v4  ;;  %v2309_v10 = vsel %vm3951_vm14, -inf, %v2215_v33  ;;  %v2310_v51 = vsel %vm3957_vm15, -inf, %v2207_v9 }
 0x44f   :  { %2601 = vst [vmem:[%s7701_s5 + $0xc0] sm:$0xff] %v2851_v22  ;;  %2605 = vst [vmem:[%s7701_s5 + $0xe0] sm:$0xff] %v2855_v0  ;;  %v2850_v19 = vpack.c.bf16 %v2368_v52, %v2367_v38  ;;  %v2317_v63 = vsel %vm3951_vm14, -inf, %v2216_v26  ;;  %v2318_v17 = vsel %vm3957_vm15, -inf, %v2208_v15  ;;  %v2373_v39 = vmax.f32 %v7362_v41, %v2309_v10 }
 0x450   :  { %2596 = vst [vmem:[%s7701_s5 + $0x98] sm:$0xff] %v2846_v1  ;;  %v2374_v20 = vmax.f32 %v7506_v45, %v2310_v51  ;;  %v2381_v21 = vmax.f32 %v7371_v23, %v2317_v63  ;;  %v2382_v11 = vmax.f32 %v2062_v24, %v2318_v17  ;;  %v3514_v4 = vunpack.i.h.bf16 %v3512_v13  ;;  %v8726_v45 = vld [vmem:[#allocation63_spill] sm:$0xff]  ;;  %vm8728_vm14 = vmmov %vm8688_vm0 }
 0x451   :  { %2600 = vst [vmem:[%s7701_s5 + $0xb8] sm:$0xff] %v2850_v19  ;;  %v3513_v5 = vunpack.i.l.bf16 %v3512_v13  ;;  %v8723_v46 = vmax.f32 %v8722_v25, 0.0  ;;  %v8725_v41 = vmax.f32 %v8724_v58, 0.0  ;;  %v8727_v48 = vmax.f32 %v8726_v45, 0.0  ;;  %vm8729_vm15 = vmmov %vm8688_vm0 }
 0x452   :  { %v2853_v40 = vpack.c.bf16 %v2374_v20, %v2373_v39  ;;  %v2857_v47 = vpack.c.bf16 %v2382_v11, %v2381_v21  ;;  %v2200_v6 = vsel %vm8729_vm15, %v3489_v62, %v3514_v4 }
 0x453   :  { %v2063_v29 = vmax.f32 %v1999_v54, %v8723_v46  ;;  %v2056_v61 = vmax.f32 %v1992_v56, %v8725_v41  ;;  %v2064_v57 = vmax.f32 %v2000_v16, %v8727_v48  ;;  %v2199_v23 = vsel %vm8728_vm14, %v3488_v55, %v3513_v5 }
 0x454   :  { %v8731_v54 = vunpack.i.l.bf16 %v8730_v27  ;;  %2603 = vst [vmem:[%s7701_s5 + $0xd0] sm:$0xff] %v2853_v40  ;;  %v8733_v56 = vunpack.i.h.bf16 %v8730_v27  ;;  %v2311_v12 = vsel %vm8283_vm2, -inf, %v2199_v23  ;;  %v2319_v55 = vsel %vm8283_vm2, -inf, %v2200_v6  ;;  %2607 = vst [vmem:[%s7701_s5 + $0xf0] sm:$0xff] %v2857_v47 }
 0x455   :  { %v2375_v14 = vmax.f32 %v7542_v30, %v2311_v12  ;;  %v2383_v2 = vmax.f32 %v2063_v29, %v2319_v55 }
 0x456   :  { %v2255_v24 = vsel %vm8732_vm13, %v3513_v5, %v8731_v54  ;;  %v2256_v16 = vsel %vm8734_vm12, %v3514_v4, %v8733_v56 }
 0x457   :  { %v2312_v62 = vsel %vm4053_vm3, -inf, %v2255_v24  ;;  %v2320_v44 = vsel %vm4053_vm3, -inf, %v2256_v16 }
 0x458   :  { %v2376_v36 = vmax.f32 %v2056_v61, %v2312_v62  ;;  %v2384_v28 = vmax.f32 %v2064_v57, %v2320_v44 }
 0x45a   :  { %v2854_v37 = vpack.c.bf16 %v2376_v36, %v2375_v14  ;;  %v2858_v49 = vpack.c.bf16 %v2384_v28, %v2383_v2 }
 0x45c   :  { %2604 = vst [vmem:[%s7701_s5 + $0xd8] sm:$0xff] %v2854_v37  ;;  %2608 = vst [vmem:[%s7701_s5 + $0xf8] sm:$0xff] %v2858_v49 }
 0x45d   :  { %2613 = vsyncpa [#allocation3], 1 }
 0x45e   :  { %2614 = vsyncpa [#allocation5], 1 }

// kernel: cnn1_forward.3
= control target key start
LH: loop header
LB: loop body
LE: loop exit
PB: predicated region body
PF: predicated region fallthrough
CT: control target
= control target key end

     0   :  { %s8165_s0 = inlined_call_operand.vmem [shape: bf16[8,8192], index: 0, kind: input, shape index: {}]   ;;  %s8166_s1 = inlined_call_operand.hbm [shape: bf16[8192,128], index: 1, kind: input, shape index: {}]   ;;  %s8167_s2 = inlined_call_operand.hbm [shape: f32[1,128], index: 2, kind: input, shape index: {}]   ;;  %s8168_s3 = inlined_call_operand.hbm [shape: f32[128,128], index: 3, kind: input, shape index: {}]   ;;  %s8169_s4 = inlined_call_operand.hbm [shape: f32[1,128], index: 4, kind: input, shape index: {}]   ;;  %s8170_s5 = inlined_call_operand.hbm [shape: f32[1,128], index: 5, kind: input, shape index: {}]   ;;  %s8171_s6 = inlined_call_operand.<no memory space> [shape: f32[1,1], index: 6, kind: input, shape index: {}]   ;;  %s8172_s7 = inlined_call_operand.vmem [shape: f32[8,1], index: 7, kind: output, shape index: {}]  }
   0x1   :  { %v12_v0 = vstv %s8171_s6 }
   0x2   :  { %13 = vst [vmem:[#allocation2] sm:$0x1] %v12_v0 }
   0x3   :  { %14 = vsyncpa [#allocation4], 0 }
   0x4   :  { %15 = vsyncpa [#allocation6], 0 }
   0x5   :  { %16 = vsyncpa [#allocation9], 0  ;;  %s7927_s26 = smov [#allocation5]   ;;  %s7928_s28 = smov [#allocation8]  }
   0x6   :  { %s37_s27 = sshll.u32 %s7927_s26, 4  ;;  %s59_s29 = sshll.u32 %s7928_s28, 4  ;;  %s38_s27 = int_to_ptr.vmem [resolvable:$true] %s37_s27  ;;  %s60_s29 = int_to_ptr.vmem [resolvable:$true] %s59_s29 }
   0x7   :  { %s7811_s9 = scalar_lea.hbm %s8167_s2, 16 }
   0x8   :  { %p7812_p0 = scmp.ne.s32.totalorder %s8167_s2, %s7811_s9  ;;  %p7815_p1 = scmp.lt.u32.totalorder %s7811_s9, %s8167_s2 }
   0xa   :  { %p7817_p2 = pnand %p7815_p1, %p7812_p0 }
   0xc   :  { %7820 = shalt.err (!%p7817_p2)
}
   0xd   :  { %s7821_s13 = scalar_lea.vmem %s38_s27, 16  ;;  %s7825_s14 = scalar_lea.vmem %s38_s27, 32 }
   0xe   :  { %p7822_p3 = scmp.ne.s32.totalorder %s38_s27, %s7821_s13  ;;  %p7826_p4 = scmp.lt.s32.totalorder %s38_s27, %s38_s27 }
   0xf   :  { %p7827_p5 = scmp.lt.s32.totalorder %s7825_s14, %s7821_s13 }
  0x11   :  { %p7828_p6 = por %p7827_p5, %p7826_p4 }
  0x13   :  { %p7829_p7 = pnand %p7828_p6, %p7822_p3 }
  0x15   :  { %7832 = shalt.err (!%p7829_p7)
}
  0x16   :  { %40 = dma.hbm_to_vmem [thread:$0]  %s8167_s2, 16, %s38_s27, [#allocation6]  }
  0x17   :  { %s7833_s19 = scalar_lea.hbm %s8169_s4, 16 }
  0x18   :  { %p7834_p8 = scmp.ne.s32.totalorder %s8169_s4, %s7833_s19  ;;  %p7837_p9 = scmp.lt.u32.totalorder %s7833_s19, %s8169_s4 }
  0x1a   :  { %p7839_p10 = pnand %p7837_p9, %p7834_p8 }
  0x1c   :  { %7842 = shalt.err (!%p7839_p10)
}
  0x1d   :  { %s7843_s24 = scalar_lea.vmem %s60_s29, 16  ;;  %s7847_s25 = scalar_lea.vmem %s60_s29, 32 }
  0x1e   :  { %p7844_p11 = scmp.ne.s32.totalorder %s60_s29, %s7843_s24  ;;  %p7848_p12 = scmp.lt.s32.totalorder %s60_s29, %s60_s29 }
  0x1f   :  { %p7849_p13 = scmp.lt.s32.totalorder %s7847_s25, %s7843_s24 }
  0x21   :  { %p7850_p0 = por %p7849_p13, %p7848_p12 }
  0x23   :  { %p7851_p1 = pnand %p7850_p0, %p7844_p11 }
  0x25   :  { %7854 = shalt.err (!%p7851_p1)
}
  0x26   :  { %62 = dma.hbm_to_vmem [thread:$0]  %s8169_s4, 16, %s60_s29, [#allocation9]  }
  0x27   :  { %s7929_s27 = smov [#allocation3]   ;;  %s7855_s9 = scalar_lea.hbm %s8166_s1, 65536 }
  0x28   :  { %s24_s28 = sshll.u32 %s7929_s27, 4  ;;  %p7856_p2 = scmp.ne.s32.totalorder %s8166_s1, %s7855_s9  ;;  %s25_s28 = int_to_ptr.vmem [resolvable:$true] %s24_s28 }
  0x29   :  { %p7859_p3 = scmp.lt.u32.totalorder %s7855_s9, %s8166_s1 }
  0x2b   :  { %p7861_p4 = pnand %p7859_p3, %p7856_p2 }
  0x2d   :  { %7864 = shalt.err (!%p7861_p4)
}
  0x2e   :  { %s7865_s13 = scalar_lea.vmem %s25_s28, 65536  ;;  %p7870_p6 = scmp.lt.s32.totalorder %s25_s28, %s25_s28 }
  0x2f   :  { %p7866_p5 = scmp.ne.s32.totalorder %s25_s28, %s7865_s13  ;;  %p7871_p7 = scmp.lt.s32.totalorder %s7865_s13, %s7865_s13 }
  0x31   :  { %p7872_p8 = por %p7871_p7, %p7870_p6 }
  0x33   :  { %p7873_p9 = pnand %p7872_p8, %p7866_p5 }
  0x35   :  { %7876 = shalt.err (!%p7873_p9)
}
  0x36   :  { %s7930_s4 = smov 64   ;;  %s7931_s29 = smov 4  }
  0x37   :  { %30 = dma.hbm_to_vmem [thread:$0]  %s8166_s1, 65536, %s25_s28, [#allocation4], %s7930_s4, %s7930_s4, %s7931_s29  }
  0x38   :  { %s7932_s16 = smov [#allocation7]   ;;  %s7877_s20 = scalar_lea.hbm %s8168_s3, 2048 }
  0x39   :  { %s46_s17 = sshll.u32 %s7932_s16, 4  ;;  %p7878_p10 = scmp.ne.s32.totalorder %s8168_s3, %s7877_s20  ;;  %s47_s17 = int_to_ptr.vmem [resolvable:$true] %s46_s17 }
  0x3a   :  { %p7881_p11 = scmp.lt.u32.totalorder %s7877_s20, %s8168_s3 }
  0x3c   :  { %p7883_p12 = pnand %p7881_p11, %p7878_p10 }
  0x3e   :  { %7886 = shalt.err (!%p7883_p12)
}
  0x3f   :  { %s7887_s25 = scalar_lea.vmem %s47_s17, 2048  ;;  %p7892_p0 = scmp.lt.s32.totalorder %s47_s17, %s47_s17 }
  0x40   :  { %p7888_p13 = scmp.ne.s32.totalorder %s47_s17, %s7887_s25  ;;  %p7893_p1 = scmp.lt.s32.totalorder %s7887_s25, %s7887_s25 }
  0x42   :  { %p7894_p2 = por %p7893_p1, %p7892_p0 }
  0x44   :  { %p7895_p3 = pnand %p7894_p2, %p7888_p13 }
  0x46   :  { %7898 = shalt.err (!%p7895_p3)
}
  0x47   :  { %s7933_s1 = smov 128   ;;  %s7934_s2 = smov 8  }
  0x48   :  { %52 = dma.hbm_to_vmem [thread:$0]  %s8168_s3, 2048, %s47_s17, [#allocation6], %s7933_s1, %s7933_s1, %s7934_s2  }
  0x49   :  { %s7935_s28 = smov [#allocation10]   ;;  %s7899_s10 = scalar_lea.hbm %s8170_s5, 16 }
  0x4a   :  { %s69_s30 = sshll.u32 %s7935_s28, 4  ;;  %p7900_p4 = scmp.ne.s32.totalorder %s8170_s5, %s7899_s10  ;;  %s70_s30 = int_to_ptr.vmem [resolvable:$true] %s69_s30 }
  0x4b   :  { %p7903_p5 = scmp.lt.u32.totalorder %s7899_s10, %s8170_s5 }
  0x4d   :  { %p7905_p6 = pnand %p7903_p5, %p7900_p4 }
  0x4f   :  { %7908 = shalt.err (!%p7905_p6)
}
  0x50   :  { %s7909_s4 = scalar_lea.vmem %s70_s30, 16  ;;  %s7913_s3 = scalar_lea.vmem %s70_s30, 32 }
  0x51   :  { %p7910_p7 = scmp.ne.s32.totalorder %s70_s30, %s7909_s4  ;;  %p7914_p8 = scmp.lt.s32.totalorder %s70_s30, %s70_s30 }
  0x52   :  { %p7915_p9 = scmp.lt.s32.totalorder %s7913_s3, %s7909_s4 }
  0x54   :  { %p7916_p10 = por %p7915_p9, %p7914_p8 }
  0x56   :  { %p7917_p11 = pnand %p7916_p10, %p7910_p7 }
  0x58   :  { %7920 = shalt.err (!%p7917_p11)
}
  0x59   :  { %72 = dma.hbm_to_vmem [thread:$0]  %s8170_s5, 16, %s70_s30, [#allocation9]  }
  0x5a   :  { %7921 = dma.done.wait [#allocation4], 65536  }
  0x5b   :  { %7922 = vsyncadd [#allocation4], 4294901760 }
  0x5c   :  { %7923 = dma.done.wait [#allocation6], 2064  }
  0x5d   :  { %7924 = vsyncadd [#allocation6], 4294965232 }
  0x5e   :  { %7925 = dma.done.wait [#allocation9], 32  }
  0x5f   :  { %7926 = vsyncadd [#allocation9], 4294967264  ;;  %v7231_v1 = vld [vmem:[#allocation3 + $0x40] sm:$0xff]   ;;  %v7235_v5 = vld [vmem:[#allocation3 + $0x48] sm:$0xff]   ;;  %vm7937_vm0 = vmmov 0   ;;  %vm5849_vm1 = vcmask 7168  }
  0x60   :  { %v7232_v2 = vld [vmem:[#allocation3 + $0xc0] sm:$0xff]   ;;  %6439 = vmatprep.subr.bf16.mxu0 %v7231_v1  ;;  %v7236_v6 = vld [vmem:[#allocation3 + $0xc8] sm:$0xff]   ;;  %v7239_v9 = vld [vmem:[#allocation3 + $0x50] sm:$0xff]  }
  0x61   :  { %v7233_v3 = vld [vmem:[#allocation3] sm:$0xff]   ;;  %6461 = vmatprep.subr.bf16.mxu1 %v7232_v2  ;;  %v7237_v7 = vld [vmem:[#allocation3 + $0x8] sm:$0xff]   ;;  %v7240_v10 = vld [vmem:[#allocation3 + $0xd0] sm:$0xff]  }
  0x62   :  { %v7234_v4 = vld [vmem:[#allocation3 + $0x80] sm:$0xff]   ;;  %6440 = vmatpush3.bf16.msra.mxu0 %v7233_v3  ;;  %v7238_v8 = vld [vmem:[#allocation3 + $0x88] sm:$0xff]   ;;  %v7241_v11 = vld [vmem:[#allocation3 + $0x10] sm:$0xff]  }
  0x63   :  { %6462 = vmatpush3.bf16.msra.mxu1 %v7234_v4  ;;  %6441 = vmatprep.subr.bf16.mxu0 %v7235_v5  ;;  %v7242_v12 = vld [vmem:[#allocation3 + $0x90] sm:$0xff]   ;;  %v7243_v13 = vld [vmem:[#allocation3 + $0x58] sm:$0xff]   ;;  %v7247_v17 = vld [vmem:[#allocation3 + $0x60] sm:$0xff]  }
  0x64   :  { %6463 = vmatprep.subr.bf16.mxu1 %v7236_v6  ;;  %v7244_v14 = vld [vmem:[#allocation3 + $0xd8] sm:$0xff]   ;;  %v7248_v18 = vld [vmem:[#allocation3 + $0xe0] sm:$0xff]   ;;  %v7251_v21 = vld [vmem:[#allocation3 + $0x68] sm:$0xff]  }
  0x65   :  { %v7245_v15 = vld [vmem:[#allocation3 + $0x18] sm:$0xff]   ;;  %v7249_v19 = vld [vmem:[#allocation3 + $0x20] sm:$0xff]   ;;  %v7252_v22 = vld [vmem:[#allocation3 + $0xe8] sm:$0xff]  }
  0x66   :  { %6442 = vmatpush3.bf16.msra.mxu0 %v7237_v7  ;;  %v7246_v16 = vld [vmem:[#allocation3 + $0x98] sm:$0xff]   ;;  %v7250_v20 = vld [vmem:[#allocation3 + $0xa0] sm:$0xff]   ;;  %v7253_v23 = vld [vmem:[#allocation3 + $0x28] sm:$0xff]  }
  0x67   :  { %6464 = vmatpush3.bf16.msra.mxu1 %v7238_v8  ;;  %6443 = vmatprep.subr.bf16.mxu0 %v7239_v9  ;;  %v7254_v24 = vld [vmem:[#allocation3 + $0xa8] sm:$0xff]   ;;  %v7255_v25 = vld [vmem:[#allocation3 + $0x70] sm:$0xff]   ;;  %v7259_v29 = vld [vmem:[#allocation3 + $0x78] sm:$0xff]  }
  0x68   :  { %6465 = vmatprep.subr.bf16.mxu1 %v7240_v10  ;;  %v7256_v26 = vld [vmem:[#allocation3 + $0xf0] sm:$0xff]   ;;  %v7260_v30 = vld [vmem:[#allocation3 + $0xf8] sm:$0xff]   ;;  %v92_v34 = vld [vmem:[%s8165_s0 + $0x8] sm:$0xff] }
  0x69   :  { %v7257_v27 = vld [vmem:[#allocation3 + $0x30] sm:$0xff]   ;;  %v7261_v31 = vld [vmem:[#allocation3 + $0x38] sm:$0xff]   ;;  %v5861_v37 = vcombine.low %v92_v34, %v92_v34  ;;  %v5862_v38 = vcombine.high %v92_v34, %v92_v34  ;;  %v7267_v39 = vld [vmem:[#allocation3 + $0x140] sm:$0xff]  }
  0x6a   :  { %6444 = vmatpush3.bf16.msra.mxu0 %v7241_v11  ;;  %v7258_v28 = vld [vmem:[#allocation3 + $0xb0] sm:$0xff]   ;;  %v7262_v32 = vld [vmem:[#allocation3 + $0xb8] sm:$0xff]   ;;  %v7268_v40 = vld [vmem:[#allocation3 + $0x1c0] sm:$0xff]  }
  0x6b   :  { %6466 = vmatpush3.bf16.msra.mxu1 %v7242_v12  ;;  %6445 = vmatprep.subr.bf16.mxu0 %v7243_v13  ;;  %v91_v33 = vld [vmem:[%s8165_s0] sm:$0xff]  ;;  %v7271_v43 = vld [vmem:[#allocation3 + $0x148] sm:$0xff]   ;;  %v7275_v47 = vld [vmem:[#allocation3 + $0x150] sm:$0xff]  }
  0x6c   :  { %6467 = vmatprep.subr.bf16.mxu1 %v7244_v14  ;;  %v5859_v35 = vcombine.low %v91_v33, %v91_v33  ;;  %v5860_v36 = vcombine.high %v91_v33, %v91_v33  ;;  %4522 = vmatprep.mubr.bf16.mxu1 %v5862_v38  ;;  %v7269_v41 = vld [vmem:[#allocation3 + $0x100] sm:$0xff]   ;;  %v7272_v44 = vld [vmem:[#allocation3 + $0x1c8] sm:$0xff]   ;;  %v7276_v48 = vld [vmem:[#allocation3 + $0x1d0] sm:$0xff]  }
  0x6d   :  { %v7270_v42 = vld [vmem:[#allocation3 + $0x180] sm:$0xff]   ;;  %v7273_v45 = vld [vmem:[#allocation3 + $0x108] sm:$0xff]   ;;  %v7277_v49 = vld [vmem:[#allocation3 + $0x110] sm:$0xff]  }
  0x6e   :  { %6446 = vmatpush3.bf16.msra.mxu0 %v7245_v15  ;;  %4482 = vmatprep.mubr.bf16.mxu0 %v5860_v36  ;;  %v7274_v46 = vld [vmem:[#allocation3 + $0x188] sm:$0xff]   ;;  %v7278_v50 = vld [vmem:[#allocation3 + $0x190] sm:$0xff]   ;;  %v7279_v51 = vld [vmem:[#allocation3 + $0x158] sm:$0xff]  }
  0x6f   :  { %6468 = vmatpush3.bf16.msra.mxu1 %v7246_v16  ;;  %6447 = vmatprep.subr.bf16.mxu0 %v7247_v17  ;;  %v7280_v52 = vld [vmem:[#allocation3 + $0x1d8] sm:$0xff]   ;;  %v7283_v55 = vld [vmem:[#allocation3 + $0x160] sm:$0xff]   ;;  %v7287_v59 = vld [vmem:[#allocation3 + $0x168] sm:$0xff]  }
  0x70   :  { %6469 = vmatprep.subr.bf16.mxu1 %v7248_v18  ;;  %v7281_v53 = vld [vmem:[#allocation3 + $0x118] sm:$0xff]   ;;  %v7284_v56 = vld [vmem:[#allocation3 + $0x1e0] sm:$0xff]   ;;  %v7288_v60 = vld [vmem:[#allocation3 + $0x1e8] sm:$0xff]  }
  0x71   :  { %v7282_v54 = vld [vmem:[#allocation3 + $0x198] sm:$0xff]   ;;  %v7285_v57 = vld [vmem:[#allocation3 + $0x120] sm:$0xff]   ;;  %v7289_v61 = vld [vmem:[#allocation3 + $0x128] sm:$0xff]  }
  0x72   :  { %6448 = vmatpush3.bf16.msra.mxu0 %v7249_v19  ;;  %v7286_v58 = vld [vmem:[#allocation3 + $0x1a0] sm:$0xff]   ;;  %v7290_v62 = vld [vmem:[#allocation3 + $0x1a8] sm:$0xff]   ;;  %v7291_v63 = vld [vmem:[#allocation3 + $0x170] sm:$0xff]  }
  0x73   :  { %6470 = vmatpush3.bf16.msra.mxu1 %v7250_v20  ;;  %6449 = vmatprep.subr.bf16.mxu0 %v7251_v21  ;;  %v7292_v0 = vld [vmem:[#allocation3 + $0x1f0] sm:$0xff]   ;;  %v7295_v3 = vld [vmem:[#allocation3 + $0x178] sm:$0xff]   ;;  %v7303_v13 = vld [vmem:[#allocation3 + $0x240] sm:$0xff]  }
  0x74   :  { %6471 = vmatprep.subr.bf16.mxu1 %v7252_v22  ;;  %v7293_v1 = vld [vmem:[#allocation3 + $0x130] sm:$0xff]   ;;  %v7296_v4 = vld [vmem:[#allocation3 + $0x1f8] sm:$0xff]   ;;  %v7304_v14 = vld [vmem:[#allocation3 + $0x2c0] sm:$0xff]  }
  0x75   :  { %v7294_v2 = vld [vmem:[#allocation3 + $0x1b0] sm:$0xff]   ;;  %v7297_v5 = vld [vmem:[#allocation3 + $0x138] sm:$0xff]   ;;  %v7305_v15 = vld [vmem:[#allocation3 + $0x200] sm:$0xff]  }
  0x76   :  { %6450 = vmatpush3.bf16.msra.mxu0 %v7253_v23  ;;  %v7298_v6 = vld [vmem:[#allocation3 + $0x1b8] sm:$0xff]   ;;  %v93_v7 = vld [vmem:[%s8165_s0 + $0x10] sm:$0xff]  ;;  %v7306_v16 = vld [vmem:[#allocation3 + $0x280] sm:$0xff]  }
  0x77   :  { %6472 = vmatpush3.bf16.msra.mxu1 %v7254_v24  ;;  %6451 = vmatprep.subr.bf16.mxu0 %v7255_v25  ;;  %v5863_v8 = vcombine.low %v93_v7, %v93_v7  ;;  %v5864_v9 = vcombine.high %v93_v7, %v93_v7  ;;  %v94_v10 = vld [vmem:[%s8165_s0 + $0x18] sm:$0xff]  ;;  %v7307_v17 = vld [vmem:[#allocation3 + $0x248] sm:$0xff]  }
  0x78   :  { %6473 = vmatprep.subr.bf16.mxu1 %v7256_v26  ;;  %v5865_v11 = vcombine.low %v94_v10, %v94_v10  ;;  %v5866_v12 = vcombine.high %v94_v10, %v94_v10  ;;  %v7308_v18 = vld [vmem:[#allocation3 + $0x2c8] sm:$0xff]   ;;  %v7311_v21 = vld [vmem:[#allocation3 + $0x250] sm:$0xff]   ;;  %v7315_v25 = vld [vmem:[#allocation3 + $0x258] sm:$0xff]  }
  0x79   :  { %v7309_v19 = vld [vmem:[#allocation3 + $0x208] sm:$0xff]   ;;  %v7312_v22 = vld [vmem:[#allocation3 + $0x2d0] sm:$0xff]   ;;  %v7316_v26 = vld [vmem:[#allocation3 + $0x2d8] sm:$0xff]  }
  0x7a   :  { %6452 = vmatpush3.bf16.msra.mxu0 %v7257_v27  ;;  %v7310_v20 = vld [vmem:[#allocation3 + $0x288] sm:$0xff]   ;;  %v7313_v23 = vld [vmem:[#allocation3 + $0x210] sm:$0xff]   ;;  %v7317_v27 = vld [vmem:[#allocation3 + $0x218] sm:$0xff]  }
  0x7b   :  { %6474 = vmatpush3.bf16.msra.mxu1 %v7258_v28  ;;  %6453 = vmatprep.subr.bf16.mxu0 %v7259_v29  ;;  %v7314_v24 = vld [vmem:[#allocation3 + $0x290] sm:$0xff]   ;;  %v7318_v28 = vld [vmem:[#allocation3 + $0x298] sm:$0xff]   ;;  %v7319_v29 = vld [vmem:[#allocation3 + $0x260] sm:$0xff]  }
  0x7c   :  { %6475 = vmatprep.subr.bf16.mxu1 %v7260_v30  ;;  %v7320_v30 = vld [vmem:[#allocation3 + $0x2e0] sm:$0xff]   ;;  %v7323_v33 = vld [vmem:[#allocation3 + $0x268] sm:$0xff]   ;;  %v7328_v38 = vld [vmem:[#allocation3 + $0x2f0] sm:$0xff]  }
  0x7d   :  { %v7324_v34 = vld [vmem:[#allocation3 + $0x2e8] sm:$0xff]  }
  0x7e   :  { %6454 = vmatpush3.bf16.msra.mxu0 %v7261_v31  ;;  %v7321_v31 = vld [vmem:[#allocation3 + $0x220] sm:$0xff]   ;;  %v7326_v36 = vld [vmem:[#allocation3 + $0x2a8] sm:$0xff]  }
  0x7f   :  { %6476 = vmatpush3.bf16.msra.mxu1 %v7262_v32  ;;  %6483 = vmatprep.subr.bf16.mxu0 %v7267_v39  ;;  %v7322_v32 = vld [vmem:[#allocation3 + $0x2a0] sm:$0xff]   ;;  %v7329_v39 = vld [vmem:[#allocation3 + $0x230] sm:$0xff]   ;;  %v7359_v7 = vld [vmem:[#allocation3 + $0x368] sm:$0xff]  }
  0x80   :  { %6505 = vmatprep.subr.bf16.mxu1 %v7268_v40  ;;  %v7330_v40 = vld [vmem:[#allocation3 + $0x2b0] sm:$0xff]   ;;  %v7362_v10 = vld [vmem:[#allocation3 + $0x3a8] sm:$0xff]  }
  0x81   :  { %4483 = vmatmul.mubr.bf16.vlgmr.msra.gmra.mrb[0].mxu0 %v5859_v35  ;;  %v7325_v35 = vld [vmem:[#allocation3 + $0x228] sm:$0xff]  }
  0x82   :  { %4523 = vmatmul.mubr.bf16.vlgmr.msra.gmra.mrb[0].mxu1 %v5861_v37  ;;  %6484 = vmatpush3.bf16.msra.mxu0 %v7269_v41  ;;  %v7327_v37 = vld [vmem:[#allocation3 + $0x270] sm:$0xff]   ;;  %v7331_v41 = vld [vmem:[#allocation3 + $0x278] sm:$0xff]  }
  0x83   :  { %6506 = vmatpush3.bf16.msra.mxu1 %v7270_v42  ;;  %6485 = vmatprep.subr.bf16.mxu0 %v7271_v43  ;;  %v7332_v42 = vld [vmem:[#allocation3 + $0x2f8] sm:$0xff]  }
  0x84   :  { %6507 = vmatprep.subr.bf16.mxu1 %v7272_v44  ;;  %4562 = vmatprep.mubr.bf16.mxu0 %v5864_v9  ;;  %v7333_v43 = vld [vmem:[#allocation3 + $0x238] sm:$0xff]   ;;  %v7361_v9 = vld [vmem:[#allocation3 + $0x328] sm:$0xff]  }
  0x85   :  { %4602 = vmatprep.mubr.bf16.mxu1 %v5866_v12  ;;  %v7334_v44 = vld [vmem:[#allocation3 + $0x2b8] sm:$0xff]   ;;  %v7364_v12 = vld [vmem:[#allocation3 + $0x3f0] sm:$0xff]  }
  0x86   :  { %6486 = vmatpush3.bf16.msra.mxu0 %v7273_v45  ;;  %v95_v45 = vld [vmem:[%s8165_s0 + $0x20] sm:$0xff] }
  0x87   :  { %6508 = vmatpush3.bf16.msra.mxu1 %v7274_v46  ;;  %6487 = vmatprep.subr.bf16.mxu0 %v7275_v47  ;;  %v96_v46 = vld [vmem:[%s8165_s0 + $0x28] sm:$0xff]  ;;  %v5867_v47 = vcombine.low %v95_v45, %v95_v45 }
  0x88   :  { %6509 = vmatprep.subr.bf16.mxu1 %v7276_v48  ;;  %v5868_v48 = vcombine.high %v95_v45, %v95_v45  ;;  %v7395_v45 = vld [vmem:[#allocation3 + $0x468] sm:$0xff]  }
  0x8a   :  { %6488 = vmatpush3.bf16.msra.mxu0 %v7277_v49  ;;  %v5869_v49 = vcombine.low %v96_v46, %v96_v46 }
  0x8b   :  { %6510 = vmatpush3.bf16.msra.mxu1 %v7278_v50  ;;  %6489 = vmatprep.subr.bf16.mxu0 %v7279_v51  ;;  %v5870_v50 = vcombine.high %v96_v46, %v96_v46  ;;  %v7339_v51 = vld [vmem:[#allocation3 + $0x340] sm:$0xff]   ;;  %v7396_v46 = vld [vmem:[#allocation3 + $0x4e8] sm:$0xff]  }
  0x8c   :  { %6511 = vmatprep.subr.bf16.mxu1 %v7280_v52  ;;  %v7340_v52 = vld [vmem:[#allocation3 + $0x3c0] sm:$0xff]  }
  0x8e   :  { %6490 = vmatpush3.bf16.msra.mxu0 %v7281_v53  ;;  %v7341_v53 = vld [vmem:[#allocation3 + $0x300] sm:$0xff]  }
  0x8f   :  { %6512 = vmatpush3.bf16.msra.mxu1 %v7282_v54  ;;  %6491 = vmatprep.subr.bf16.mxu0 %v7283_v55  ;;  %v7342_v54 = vld [vmem:[#allocation3 + $0x380] sm:$0xff]   ;;  %v7343_v55 = vld [vmem:[#allocation3 + $0x348] sm:$0xff]  }
  0x90   :  { %6513 = vmatprep.subr.bf16.mxu1 %v7284_v56  ;;  %v7344_v56 = vld [vmem:[#allocation3 + $0x3c8] sm:$0xff]  }
  0x92   :  { %6492 = vmatpush3.bf16.msra.mxu0 %v7285_v57  ;;  %v7345_v57 = vld [vmem:[#allocation3 + $0x308] sm:$0xff]  }
  0x93   :  { %6514 = vmatpush3.bf16.msra.mxu1 %v7286_v58  ;;  %6493 = vmatprep.subr.bf16.mxu0 %v7287_v59  ;;  %v7346_v58 = vld [vmem:[#allocation3 + $0x388] sm:$0xff]   ;;  %v7347_v59 = vld [vmem:[#allocation3 + $0x350] sm:$0xff]  }
  0x94   :  { %6515 = vmatprep.subr.bf16.mxu1 %v7288_v60  ;;  %v7348_v60 = vld [vmem:[#allocation3 + $0x3d0] sm:$0xff]  }
  0x96   :  { %6494 = vmatpush3.bf16.msra.mxu0 %v7289_v61  ;;  %v7349_v61 = vld [vmem:[#allocation3 + $0x310] sm:$0xff]  }
  0x97   :  { %6516 = vmatpush3.bf16.msra.mxu1 %v7290_v62  ;;  %6495 = vmatprep.subr.bf16.mxu0 %v7291_v63  ;;  %v7350_v62 = vld [vmem:[#allocation3 + $0x390] sm:$0xff]   ;;  %v7351_v63 = vld [vmem:[#allocation3 + $0x358] sm:$0xff]  }
  0x98   :  { %6517 = vmatprep.subr.bf16.mxu1 %v7292_v0  ;;  %v7352_v0 = vld [vmem:[#allocation3 + $0x3d8] sm:$0xff]  }
  0x9a   :  { %6496 = vmatpush3.bf16.msra.mxu0 %v7293_v1  ;;  %v7353_v1 = vld [vmem:[#allocation3 + $0x318] sm:$0xff]  }
  0x9b   :  { %6518 = vmatpush3.bf16.msra.mxu1 %v7294_v2  ;;  %6497 = vmatprep.subr.bf16.mxu0 %v7295_v3  ;;  %v7354_v2 = vld [vmem:[#allocation3 + $0x398] sm:$0xff]   ;;  %v7355_v3 = vld [vmem:[#allocation3 + $0x360] sm:$0xff]  }
  0x9c   :  { %6519 = vmatprep.subr.bf16.mxu1 %v7296_v4  ;;  %v7356_v4 = vld [vmem:[#allocation3 + $0x3e0] sm:$0xff]  }
  0x9e   :  { %6498 = vmatpush3.bf16.msra.mxu0 %v7297_v5  ;;  %v7357_v5 = vld [vmem:[#allocation3 + $0x320] sm:$0xff]  }
  0x9f   :  { %6520 = vmatpush3.bf16.msra.mxu1 %v7298_v6  ;;  %6527 = vmatprep.subr.bf16.mxu0 %v7303_v13  ;;  %v7358_v6 = vld [vmem:[#allocation3 + $0x3a0] sm:$0xff]   ;;  %v7365_v13 = vld [vmem:[#allocation3 + $0x330] sm:$0xff]  }
  0xa0   :  { %6549 = vmatprep.subr.bf16.mxu1 %v7304_v14  ;;  %v7366_v14 = vld [vmem:[#allocation3 + $0x3b0] sm:$0xff]  }
  0xa1   :  { %4563 = vmatmul.mubr.bf16.vlgmr.msra.gmra.mrb[4].mxu0 %v5863_v8  ;;  %v7360_v8 = vld [vmem:[#allocation3 + $0x3e8] sm:$0xff]  }
  0xa2   :  { %4603 = vmatmul.mubr.bf16.vlgmr.msra.gmra.mrb[4].mxu1 %v5865_v11  ;;  %6528 = vmatpush3.bf16.msra.mxu0 %v7305_v15  ;;  %v7363_v11 = vld [vmem:[#allocation3 + $0x370] sm:$0xff]   ;;  %v7367_v15 = vld [vmem:[#allocation3 + $0x378] sm:$0xff]  }
  0xa3   :  { %6550 = vmatpush3.bf16.msra.mxu1 %v7306_v16  ;;  %6529 = vmatprep.subr.bf16.mxu0 %v7307_v17  ;;  %v7368_v16 = vld [vmem:[#allocation3 + $0x3f8] sm:$0xff]  }
  0xa4   :  { %6551 = vmatprep.subr.bf16.mxu1 %v7308_v18  ;;  %4642 = vmatprep.mubr.bf16.mxu0 %v5868_v48  ;;  %v7369_v17 = vld [vmem:[#allocation3 + $0x338] sm:$0xff]   ;;  %v7398_v48 = vld [vmem:[#allocation3 + $0x4a8] sm:$0xff]  }
  0xa5   :  { %4682 = vmatprep.mubr.bf16.mxu1 %v5870_v50  ;;  %v7370_v18 = vld [vmem:[#allocation3 + $0x3b8] sm:$0xff]   ;;  %v7400_v50 = vld [vmem:[#allocation3 + $0x4f0] sm:$0xff]  }
  0xa6   :  { %6530 = vmatpush3.bf16.msra.mxu0 %v7309_v19  ;;  %v97_v19 = vld [vmem:[%s8165_s0 + $0x30] sm:$0xff] }
  0xa7   :  { %6552 = vmatpush3.bf16.msra.mxu1 %v7310_v20  ;;  %6531 = vmatprep.subr.bf16.mxu0 %v7311_v21  ;;  %v98_v20 = vld [vmem:[%s8165_s0 + $0x38] sm:$0xff]  ;;  %v5871_v21 = vcombine.low %v97_v19, %v97_v19 }
  0xa8   :  { %6553 = vmatprep.subr.bf16.mxu1 %v7312_v22  ;;  %v5872_v22 = vcombine.high %v97_v19, %v97_v19  ;;  %v7431_v19 = vld [vmem:[#allocation3 + $0x568] sm:$0xff]  }
  0xaa   :  { %6532 = vmatpush3.bf16.msra.mxu0 %v7313_v23  ;;  %v5873_v23 = vcombine.low %v98_v20, %v98_v20 }
  0xab   :  { %6554 = vmatpush3.bf16.msra.mxu1 %v7314_v24  ;;  %6533 = vmatprep.subr.bf16.mxu0 %v7315_v25  ;;  %v7375_v24 = vld [vmem:[#allocation3 + $0x440] sm:$0xff]   ;;  %v5874_v25 = vcombine.high %v98_v20, %v98_v20  ;;  %v7432_v20 = vld [vmem:[#allocation3 + $0x5e8] sm:$0xff]  }
  0xac   :  { %6555 = vmatprep.subr.bf16.mxu1 %v7316_v26  ;;  %v7376_v26 = vld [vmem:[#allocation3 + $0x4c0] sm:$0xff]  }
  0xae   :  { %6534 = vmatpush3.bf16.msra.mxu0 %v7317_v27  ;;  %v7377_v27 = vld [vmem:[#allocation3 + $0x400] sm:$0xff]  }
  0xaf   :  { %6556 = vmatpush3.bf16.msra.mxu1 %v7318_v28  ;;  %6535 = vmatprep.subr.bf16.mxu0 %v7319_v29  ;;  %v7378_v28 = vld [vmem:[#allocation3 + $0x480] sm:$0xff]   ;;  %v7379_v29 = vld [vmem:[#allocation3 + $0x448] sm:$0xff]  }
  0xb0   :  { %6557 = vmatprep.subr.bf16.mxu1 %v7320_v30  ;;  %v7380_v30 = vld [vmem:[#allocation3 + $0x4c8] sm:$0xff]  }
  0xb2   :  { %6536 = vmatpush3.bf16.msra.mxu0 %v7321_v31  ;;  %v7381_v31 = vld [vmem:[#allocation3 + $0x408] sm:$0xff]  }
  0xb3   :  { %6558 = vmatpush3.bf16.msra.mxu1 %v7322_v32  ;;  %6537 = vmatprep.subr.bf16.mxu0 %v7323_v33  ;;  %v7382_v32 = vld [vmem:[#allocation3 + $0x488] sm:$0xff]   ;;  %v7383_v33 = vld [vmem:[#allocation3 + $0x450] sm:$0xff]  }
  0xb4   :  { %6559 = vmatprep.subr.bf16.mxu1 %v7324_v34  ;;  %v7384_v34 = vld [vmem:[#allocation3 + $0x4d0] sm:$0xff]  }
  0xb6   :  { %6538 = vmatpush3.bf16.msra.mxu0 %v7325_v35  ;;  %v7385_v35 = vld [vmem:[#allocation3 + $0x410] sm:$0xff]  }
  0xb7   :  { %6560 = vmatpush3.bf16.msra.mxu1 %v7326_v36  ;;  %6539 = vmatprep.subr.bf16.mxu0 %v7327_v37  ;;  %v7386_v36 = vld [vmem:[#allocation3 + $0x490] sm:$0xff]   ;;  %v7387_v37 = vld [vmem:[#allocation3 + $0x458] sm:$0xff]  }
  0xb8   :  { %6561 = vmatprep.subr.bf16.mxu1 %v7328_v38  ;;  %v7388_v38 = vld [vmem:[#allocation3 + $0x4d8] sm:$0xff]  }
  0xba   :  { %6540 = vmatpush3.bf16.msra.mxu0 %v7329_v39  ;;  %v7389_v39 = vld [vmem:[#allocation3 + $0x418] sm:$0xff]  }
  0xbb   :  { %6562 = vmatpush3.bf16.msra.mxu1 %v7330_v40  ;;  %6541 = vmatprep.subr.bf16.mxu0 %v7331_v41  ;;  %v7390_v40 = vld [vmem:[#allocation3 + $0x498] sm:$0xff]   ;;  %v7391_v41 = vld [vmem:[#allocation3 + $0x460] sm:$0xff]  }
  0xbc   :  { %6563 = vmatprep.subr.bf16.mxu1 %v7332_v42  ;;  %v7392_v42 = vld [vmem:[#allocation3 + $0x4e0] sm:$0xff]  }
  0xbe   :  { %6542 = vmatpush3.bf16.msra.mxu0 %v7333_v43  ;;  %v7393_v43 = vld [vmem:[#allocation3 + $0x420] sm:$0xff]  }
  0xbf   :  { %6564 = vmatpush3.bf16.msra.mxu1 %v7334_v44  ;;  %6571 = vmatprep.subr.bf16.mxu0 %v7339_v51  ;;  %v7394_v44 = vld [vmem:[#allocation3 + $0x4a0] sm:$0xff]   ;;  %v7401_v51 = vld [vmem:[#allocation3 + $0x430] sm:$0xff]  }
  0xc0   :  { %6593 = vmatprep.subr.bf16.mxu1 %v7340_v52  ;;  %v7402_v52 = vld [vmem:[#allocation3 + $0x4b0] sm:$0xff]  }
  0xc1   :  { %4643 = vmatmul.mubr.bf16.vlgmr.msra.gmra.mrb[8].mxu0 %v5867_v47  ;;  %v7397_v47 = vld [vmem:[#allocation3 + $0x428] sm:$0xff]  }
  0xc2   :  { %4683 = vmatmul.mubr.bf16.vlgmr.msra.gmra.mrb[8].mxu1 %v5869_v49  ;;  %6572 = vmatpush3.bf16.msra.mxu0 %v7341_v53  ;;  %v7399_v49 = vld [vmem:[#allocation3 + $0x470] sm:$0xff]   ;;  %v7403_v53 = vld [vmem:[#allocation3 + $0x478] sm:$0xff]  }
  0xc3   :  { %6594 = vmatpush3.bf16.msra.mxu1 %v7342_v54  ;;  %6573 = vmatprep.subr.bf16.mxu0 %v7343_v55  ;;  %v7404_v54 = vld [vmem:[#allocation3 + $0x4f8] sm:$0xff]  }
  0xc4   :  { %6595 = vmatprep.subr.bf16.mxu1 %v7344_v56  ;;  %4722 = vmatprep.mubr.bf16.mxu0 %v5872_v22  ;;  %v7405_v55 = vld [vmem:[#allocation3 + $0x438] sm:$0xff]   ;;  %v7434_v22 = vld [vmem:[#allocation3 + $0x5a8] sm:$0xff]  }
  0xc5   :  { %4762 = vmatprep.mubr.bf16.mxu1 %v5874_v25  ;;  %v7406_v56 = vld [vmem:[#allocation3 + $0x4b8] sm:$0xff]   ;;  %v7437_v25 = vld [vmem:[#allocation3 + $0x530] sm:$0xff]  }
  0xc6   :  { %6574 = vmatpush3.bf16.msra.mxu0 %v7345_v57  ;;  %v99_v57 = vld [vmem:[%s8165_s0 + $0x40] sm:$0xff] }
  0xc7   :  { %6596 = vmatpush3.bf16.msra.mxu1 %v7346_v58  ;;  %6575 = vmatprep.subr.bf16.mxu0 %v7347_v59  ;;  %v5875_v58 = vcombine.low %v99_v57, %v99_v57  ;;  %v5876_v59 = vcombine.high %v99_v57, %v99_v57  ;;  %v7467_v57 = vld [vmem:[#allocation3 + $0x668] sm:$0xff]  }
  0xc8   :  { %6597 = vmatprep.subr.bf16.mxu1 %v7348_v60  ;;  %v100_v60 = vld [vmem:[%s8165_s0 + $0x48] sm:$0xff] }
  0xca   :  { %6576 = vmatpush3.bf16.msra.mxu0 %v7349_v61  ;;  %v5877_v61 = vcombine.low %v100_v60, %v100_v60 }
  0xcb   :  { %6598 = vmatpush3.bf16.msra.mxu1 %v7350_v62  ;;  %6577 = vmatprep.subr.bf16.mxu0 %v7351_v63  ;;  %v5878_v62 = vcombine.high %v100_v60, %v100_v60  ;;  %v7411_v63 = vld [vmem:[#allocation3 + $0x540] sm:$0xff]   ;;  %v7470_v60 = vld [vmem:[#allocation3 + $0x6a8] sm:$0xff]  }
  0xcc   :  { %6599 = vmatprep.subr.bf16.mxu1 %v7352_v0  ;;  %v7412_v0 = vld [vmem:[#allocation3 + $0x5c0] sm:$0xff]  }
  0xce   :  { %6578 = vmatpush3.bf16.msra.mxu0 %v7353_v1  ;;  %v7413_v1 = vld [vmem:[#allocation3 + $0x500] sm:$0xff]  }
  0xcf   :  { %6600 = vmatpush3.bf16.msra.mxu1 %v7354_v2  ;;  %6579 = vmatprep.subr.bf16.mxu0 %v7355_v3  ;;  %v7414_v2 = vld [vmem:[#allocation3 + $0x580] sm:$0xff]   ;;  %v7415_v3 = vld [vmem:[#allocation3 + $0x548] sm:$0xff]  }
  0xd0   :  { %6601 = vmatprep.subr.bf16.mxu1 %v7356_v4  ;;  %v7416_v4 = vld [vmem:[#allocation3 + $0x5c8] sm:$0xff]  }
  0xd2   :  { %6580 = vmatpush3.bf16.msra.mxu0 %v7357_v5  ;;  %v7417_v5 = vld [vmem:[#allocation3 + $0x508] sm:$0xff]  }
  0xd3   :  { %6602 = vmatpush3.bf16.msra.mxu1 %v7358_v6  ;;  %6581 = vmatprep.subr.bf16.mxu0 %v7359_v7  ;;  %v7418_v6 = vld [vmem:[#allocation3 + $0x588] sm:$0xff]   ;;  %v7419_v7 = vld [vmem:[#allocation3 + $0x550] sm:$0xff]  }
  0xd4   :  { %6603 = vmatprep.subr.bf16.mxu1 %v7360_v8  ;;  %v7420_v8 = vld [vmem:[#allocation3 + $0x5d0] sm:$0xff]  }
  0xd6   :  { %6582 = vmatpush3.bf16.msra.mxu0 %v7361_v9  ;;  %v7421_v9 = vld [vmem:[#allocation3 + $0x510] sm:$0xff]  }
  0xd7   :  { %6604 = vmatpush3.bf16.msra.mxu1 %v7362_v10  ;;  %6583 = vmatprep.subr.bf16.mxu0 %v7363_v11  ;;  %v7422_v10 = vld [vmem:[#allocation3 + $0x590] sm:$0xff]   ;;  %v7423_v11 = vld [vmem:[#allocation3 + $0x558] sm:$0xff]  }
  0xd8   :  { %6605 = vmatprep.subr.bf16.mxu1 %v7364_v12  ;;  %v7424_v12 = vld [vmem:[#allocation3 + $0x5d8] sm:$0xff]  }
  0xda   :  { %6584 = vmatpush3.bf16.msra.mxu0 %v7365_v13  ;;  %v7425_v13 = vld [vmem:[#allocation3 + $0x518] sm:$0xff]  }
  0xdb   :  { %6606 = vmatpush3.bf16.msra.mxu1 %v7366_v14  ;;  %6585 = vmatprep.subr.bf16.mxu0 %v7367_v15  ;;  %v7426_v14 = vld [vmem:[#allocation3 + $0x598] sm:$0xff]   ;;  %v7427_v15 = vld [vmem:[#allocation3 + $0x560] sm:$0xff]  }
  0xdc   :  { %6607 = vmatprep.subr.bf16.mxu1 %v7368_v16  ;;  %v7428_v16 = vld [vmem:[#allocation3 + $0x5e0] sm:$0xff]  }
  0xde   :  { %6586 = vmatpush3.bf16.msra.mxu0 %v7369_v17  ;;  %v7429_v17 = vld [vmem:[#allocation3 + $0x520] sm:$0xff]  }
  0xdf   :  { %6608 = vmatpush3.bf16.msra.mxu1 %v7370_v18  ;;  %6615 = vmatprep.subr.bf16.mxu0 %v7375_v24  ;;  %v7430_v18 = vld [vmem:[#allocation3 + $0x5a0] sm:$0xff]   ;;  %v7436_v24 = vld [vmem:[#allocation3 + $0x5f0] sm:$0xff]  }
  0xe0   :  { %6637 = vmatprep.subr.bf16.mxu1 %v7376_v26  ;;  %v7438_v26 = vld [vmem:[#allocation3 + $0x5b0] sm:$0xff]  }
  0xe1   :  { %4723 = vmatmul.mubr.bf16.vlgmr.msra.gmra.mrb[12].mxu0 %v5871_v21  ;;  %v7433_v21 = vld [vmem:[#allocation3 + $0x528] sm:$0xff]  }
  0xe2   :  { %4763 = vmatmul.mubr.bf16.vlgmr.msra.gmra.mrb[12].mxu1 %v5873_v23  ;;  %6616 = vmatpush3.bf16.msra.mxu0 %v7377_v27  ;;  %v7435_v23 = vld [vmem:[#allocation3 + $0x570] sm:$0xff]   ;;  %v7439_v27 = vld [vmem:[#allocation3 + $0x578] sm:$0xff]  }
  0xe3   :  { %6638 = vmatpush3.bf16.msra.mxu1 %v7378_v28  ;;  %6617 = vmatprep.subr.bf16.mxu0 %v7379_v29  ;;  %v7440_v28 = vld [vmem:[#allocation3 + $0x5f8] sm:$0xff]  }
  0xe4   :  { %6639 = vmatprep.subr.bf16.mxu1 %v7380_v30  ;;  %4802 = vmatprep.mubr.bf16.mxu0 %v5876_v59  ;;  %v7441_v29 = vld [vmem:[#allocation3 + $0x538] sm:$0xff]   ;;  %v7469_v59 = vld [vmem:[#allocation3 + $0x628] sm:$0xff]  }
  0xe5   :  { %4842 = vmatprep.mubr.bf16.mxu1 %v5878_v62  ;;  %v7442_v30 = vld [vmem:[#allocation3 + $0x5b8] sm:$0xff]   ;;  %v7472_v62 = vld [vmem:[#allocation3 + $0x6f0] sm:$0xff]  }
  0xe6   :  { %6618 = vmatpush3.bf16.msra.mxu0 %v7381_v31  ;;  %v101_v31 = vld [vmem:[%s8165_s0 + $0x50] sm:$0xff] }
  0xe7   :  { %6640 = vmatpush3.bf16.msra.mxu1 %v7382_v32  ;;  %6619 = vmatprep.subr.bf16.mxu0 %v7383_v33  ;;  %v102_v32 = vld [vmem:[%s8165_s0 + $0x58] sm:$0xff]  ;;  %v5879_v33 = vcombine.low %v101_v31, %v101_v31 }
  0xe8   :  { %6641 = vmatprep.subr.bf16.mxu1 %v7384_v34  ;;  %v5880_v34 = vcombine.high %v101_v31, %v101_v31  ;;  %v7502_v31 = vld [vmem:[#allocation3 + $0x7a0] sm:$0xff]  }
  0xea   :  { %6620 = vmatpush3.bf16.msra.mxu0 %v7385_v35  ;;  %v5881_v35 = vcombine.low %v102_v32, %v102_v32 }
  0xeb   :  { %6642 = vmatpush3.bf16.msra.mxu1 %v7386_v36  ;;  %6621 = vmatprep.subr.bf16.mxu0 %v7387_v37  ;;  %v5882_v36 = vcombine.high %v102_v32, %v102_v32  ;;  %v7447_v37 = vld [vmem:[#allocation3 + $0x640] sm:$0xff]  }
  0xec   :  { %6643 = vmatprep.subr.bf16.mxu1 %v7388_v38  ;;  %v7448_v38 = vld [vmem:[#allocation3 + $0x6c0] sm:$0xff]  }
  0xee   :  { %6622 = vmatpush3.bf16.msra.mxu0 %v7389_v39  ;;  %v7449_v39 = vld [vmem:[#allocation3 + $0x600] sm:$0xff]  }
  0xef   :  { %6644 = vmatpush3.bf16.msra.mxu1 %v7390_v40  ;;  %6623 = vmatprep.subr.bf16.mxu0 %v7391_v41  ;;  %v7450_v40 = vld [vmem:[#allocation3 + $0x680] sm:$0xff]   ;;  %v7451_v41 = vld [vmem:[#allocation3 + $0x648] sm:$0xff]  }
  0xf0   :  { %6645 = vmatprep.subr.bf16.mxu1 %v7392_v42  ;;  %v7452_v42 = vld [vmem:[#allocation3 + $0x6c8] sm:$0xff]  }
  0xf2   :  { %6624 = vmatpush3.bf16.msra.mxu0 %v7393_v43  ;;  %v7453_v43 = vld [vmem:[#allocation3 + $0x608] sm:$0xff]  }
  0xf3   :  { %6646 = vmatpush3.bf16.msra.mxu1 %v7394_v44  ;;  %6625 = vmatprep.subr.bf16.mxu0 %v7395_v45  ;;  %v7454_v44 = vld [vmem:[#allocation3 + $0x688] sm:$0xff]   ;;  %v7455_v45 = vld [vmem:[#allocation3 + $0x650] sm:$0xff]  }
  0xf4   :  { %6647 = vmatprep.subr.bf16.mxu1 %v7396_v46  ;;  %v7456_v46 = vld [vmem:[#allocation3 + $0x6d0] sm:$0xff]  }
  0xf6   :  { %6626 = vmatpush3.bf16.msra.mxu0 %v7397_v47  ;;  %v7457_v47 = vld [vmem:[#allocation3 + $0x610] sm:$0xff]  }
  0xf7   :  { %6648 = vmatpush3.bf16.msra.mxu1 %v7398_v48  ;;  %6627 = vmatprep.subr.bf16.mxu0 %v7399_v49  ;;  %v7458_v48 = vld [vmem:[#allocation3 + $0x690] sm:$0xff]   ;;  %v7459_v49 = vld [vmem:[#allocation3 + $0x658] sm:$0xff]  }
  0xf8   :  { %6649 = vmatprep.subr.bf16.mxu1 %v7400_v50  ;;  %v7460_v50 = vld [vmem:[#allocation3 + $0x6d8] sm:$0xff]  }
  0xfa   :  { %6628 = vmatpush3.bf16.msra.mxu0 %v7401_v51  ;;  %v7461_v51 = vld [vmem:[#allocation3 + $0x618] sm:$0xff]  }
  0xfb   :  { %6650 = vmatpush3.bf16.msra.mxu1 %v7402_v52  ;;  %6629 = vmatprep.subr.bf16.mxu0 %v7403_v53  ;;  %v7462_v52 = vld [vmem:[#allocation3 + $0x698] sm:$0xff]   ;;  %v7463_v53 = vld [vmem:[#allocation3 + $0x660] sm:$0xff]  }
  0xfc   :  { %6651 = vmatprep.subr.bf16.mxu1 %v7404_v54  ;;  %v7464_v54 = vld [vmem:[#allocation3 + $0x6e0] sm:$0xff]  }
  0xfe   :  { %6630 = vmatpush3.bf16.msra.mxu0 %v7405_v55  ;;  %v7465_v55 = vld [vmem:[#allocation3 + $0x620] sm:$0xff]  }
  0xff   :  { %6652 = vmatpush3.bf16.msra.mxu1 %v7406_v56  ;;  %6659 = vmatprep.subr.bf16.mxu0 %v7411_v63  ;;  %v7466_v56 = vld [vmem:[#allocation3 + $0x6a0] sm:$0xff]   ;;  %v7473_v63 = vld [vmem:[#allocation3 + $0x630] sm:$0xff]  }
 0x100   :  { %6681 = vmatprep.subr.bf16.mxu1 %v7412_v0  ;;  %v7474_v0 = vld [vmem:[#allocation3 + $0x6b0] sm:$0xff]  }
 0x101   :  { %4803 = vmatmul.mubr.bf16.vlgmr.msra.gmra.mrb[16].mxu0 %v5875_v58  ;;  %v7468_v58 = vld [vmem:[#allocation3 + $0x6e8] sm:$0xff]  }
 0x102   :  { %4843 = vmatmul.mubr.bf16.vlgmr.msra.gmra.mrb[16].mxu1 %v5877_v61  ;;  %6660 = vmatpush3.bf16.msra.mxu0 %v7413_v1  ;;  %v7471_v61 = vld [vmem:[#allocation3 + $0x670] sm:$0xff]   ;;  %v7475_v1 = vld [vmem:[#allocation3 + $0x678] sm:$0xff]  }
 0x103   :  { %6682 = vmatpush3.bf16.msra.mxu1 %v7414_v2  ;;  %6661 = vmatprep.subr.bf16.mxu0 %v7415_v3  ;;  %v7476_v2 = vld [vmem:[#allocation3 + $0x6f8] sm:$0xff]  }
 0x104   :  { %6683 = vmatprep.subr.bf16.mxu1 %v7416_v4  ;;  %4882 = vmatprep.mubr.bf16.mxu0 %v5880_v34  ;;  %v7477_v3 = vld [vmem:[#allocation3 + $0x638] sm:$0xff]  }
 0x105   :  { %4922 = vmatprep.mubr.bf16.mxu1 %v5882_v36  ;;  %v7478_v4 = vld [vmem:[#allocation3 + $0x6b8] sm:$0xff]  }
 0x106   :  { %6662 = vmatpush3.bf16.msra.mxu0 %v7417_v5  ;;  %v103_v5 = vld [vmem:[%s8165_s0 + $0x60] sm:$0xff] }
 0x107   :  { %6684 = vmatpush3.bf16.msra.mxu1 %v7418_v6  ;;  %6663 = vmatprep.subr.bf16.mxu0 %v7419_v7  ;;  %v104_v6 = vld [vmem:[%s8165_s0 + $0x68] sm:$0xff]  ;;  %v5883_v7 = vcombine.low %v103_v5, %v103_v5 }
 0x108   :  { %6685 = vmatprep.subr.bf16.mxu1 %v7420_v8  ;;  %v5884_v8 = vcombine.high %v103_v5, %v103_v5  ;;  %v7526_v5 = vld [vmem:[#allocation3 + $0x888] sm:$0xff]  }
 0x10a   :  { %6664 = vmatpush3.bf16.msra.mxu0 %v7421_v9  ;;  %v5885_v9 = vcombine.low %v104_v6, %v104_v6 }
 0x10b   :  { %6686 = vmatpush3.bf16.msra.mxu1 %v7422_v10  ;;  %6665 = vmatprep.subr.bf16.mxu0 %v7423_v11  ;;  %v7483_v10 = vld [vmem:[#allocation3 + $0x740] sm:$0xff]   ;;  %v5886_v11 = vcombine.high %v104_v6, %v104_v6  ;;  %v7527_v6 = vld [vmem:[#allocation3 + $0x850] sm:$0xff]  }
 0x10c   :  { %6687 = vmatprep.subr.bf16.mxu1 %v7424_v12  ;;  %v7484_v12 = vld [vmem:[#allocation3 + $0x7c0] sm:$0xff]  }
 0x10e   :  { %6666 = vmatpush3.bf16.msra.mxu0 %v7425_v13  ;;  %v7485_v13 = vld [vmem:[#allocation3 + $0x700] sm:$0xff]  }
 0x10f   :  { %6688 = vmatpush3.bf16.msra.mxu1 %v7426_v14  ;;  %6667 = vmatprep.subr.bf16.mxu0 %v7427_v15  ;;  %v7486_v14 = vld [vmem:[#allocation3 + $0x780] sm:$0xff]   ;;  %v7487_v15 = vld [vmem:[#allocation3 + $0x748] sm:$0xff]  }
 0x110   :  { %6689 = vmatprep.subr.bf16.mxu1 %v7428_v16  ;;  %v7488_v16 = vld [vmem:[#allocation3 + $0x7c8] sm:$0xff]  }
 0x112   :  { %6668 = vmatpush3.bf16.msra.mxu0 %v7429_v17  ;;  %v7489_v17 = vld [vmem:[#allocation3 + $0x708] sm:$0xff]  }
 0x113   :  { %6690 = vmatpush3.bf16.msra.mxu1 %v7430_v18  ;;  %6669 = vmatprep.subr.bf16.mxu0 %v7431_v19  ;;  %v7490_v18 = vld [vmem:[#allocation3 + $0x788] sm:$0xff]   ;;  %v7491_v19 = vld [vmem:[#allocation3 + $0x750] sm:$0xff]  }
 0x114   :  { %6691 = vmatprep.subr.bf16.mxu1 %v7432_v20  ;;  %v7492_v20 = vld [vmem:[#allocation3 + $0x7d0] sm:$0xff]  }
 0x116   :  { %6670 = vmatpush3.bf16.msra.mxu0 %v7433_v21  ;;  %v7493_v21 = vld [vmem:[#allocation3 + $0x710] sm:$0xff]  }
 0x117   :  { %6692 = vmatpush3.bf16.msra.mxu1 %v7434_v22  ;;  %6671 = vmatprep.subr.bf16.mxu0 %v7435_v23  ;;  %v7494_v22 = vld [vmem:[#allocation3 + $0x790] sm:$0xff]   ;;  %v7495_v23 = vld [vmem:[#allocation3 + $0x758] sm:$0xff]  }
 0x118   :  { %6693 = vmatprep.subr.bf16.mxu1 %v7436_v24  ;;  %v7496_v24 = vld [vmem:[#allocation3 + $0x7d8] sm:$0xff]  }
 0x11a   :  { %6672 = vmatpush3.bf16.msra.mxu0 %v7437_v25  ;;  %v7497_v25 = vld [vmem:[#allocation3 + $0x718] sm:$0xff]  }
 0x11b   :  { %6694 = vmatpush3.bf16.msra.mxu1 %v7438_v26  ;;  %6673 = vmatprep.subr.bf16.mxu0 %v7439_v27  ;;  %v7498_v26 = vld [vmem:[#allocation3 + $0x798] sm:$0xff]   ;;  %v7499_v27 = vld [vmem:[#allocation3 + $0x760] sm:$0xff]  }
 0x11c   :  { %6695 = vmatprep.subr.bf16.mxu1 %v7440_v28  ;;  %v7500_v28 = vld [vmem:[#allocation3 + $0x7e0] sm:$0xff]  }
 0x11e   :  { %6674 = vmatpush3.bf16.msra.mxu0 %v7441_v29  ;;  %v7501_v29 = vld [vmem:[#allocation3 + $0x720] sm:$0xff]  }
 0x11f   :  { %6696 = vmatpush3.bf16.msra.mxu1 %v7442_v30  ;;  %6703 = vmatprep.subr.bf16.mxu0 %v7447_v37 }
 0x120   :  { %6725 = vmatprep.subr.bf16.mxu1 %v7448_v38  ;;  %v7503_v38 = vld [vmem:[#allocation3 + $0x768] sm:$0xff]  }
 0x121   :  { %4883 = vmatmul.mubr.bf16.vlgmr.msra.gmra.mrb[20].mxu0 %v5879_v33  ;;  %v5858_v33 = vld [vmem:[#allocation5] ss:$0 sm:$0xff] }
 0x122   :  { %4923 = vmatmul.mubr.bf16.vlgmr.msra.gmra.mrb[20].mxu1 %v5881_v35  ;;  %6704 = vmatpush3.bf16.msra.mxu0 %v7449_v39 }
 0x123   :  { %6726 = vmatpush3.bf16.msra.mxu1 %v7450_v40  ;;  %6705 = vmatprep.subr.bf16.mxu0 %v7451_v41  ;;  %v7504_v40 = vld [vmem:[#allocation3 + $0x7e8] sm:$0xff]  }
 0x124   :  { %6727 = vmatprep.subr.bf16.mxu1 %v7452_v42  ;;  %4962 = vmatprep.mubr.bf16.mxu0 %v5884_v8  ;;  %v7529_v8 = vld [vmem:[#allocation3 + $0x810] sm:$0xff]  }
 0x125   :  { %5002 = vmatprep.mubr.bf16.mxu1 %v5886_v11  ;;  %v7532_v11 = vld [vmem:[#allocation3 + $0x8d8] sm:$0xff]  }
 0x126   :  { %6706 = vmatpush3.bf16.msra.mxu0 %v7453_v43  ;;  %v7505_v43 = vld [vmem:[#allocation3 + $0x728] sm:$0xff]  }
 0x127   :  { %6728 = vmatpush3.bf16.msra.mxu1 %v7454_v44  ;;  %6707 = vmatprep.subr.bf16.mxu0 %v7455_v45  ;;  %v7506_v45 = vld [vmem:[#allocation3 + $0x7a8] sm:$0xff]  }
 0x128   :  { %6729 = vmatprep.subr.bf16.mxu1 %v7456_v46 }
 0x12a   :  { %6708 = vmatpush3.bf16.msra.mxu0 %v7457_v47 }
 0x12b   :  { %6730 = vmatpush3.bf16.msra.mxu1 %v7458_v48  ;;  %6709 = vmatprep.subr.bf16.mxu0 %v7459_v49  ;;  %v7507_v48 = vld [vmem:[#allocation3 + $0x770] sm:$0xff]  }
 0x12c   :  { %6731 = vmatprep.subr.bf16.mxu1 %v7460_v50  ;;  %v7508_v49 = vld [vmem:[#allocation3 + $0x7f0] sm:$0xff]  }
 0x12d   :  { %v7509_v50 = vld [vmem:[#allocation3 + $0x730] sm:$0xff]  }
 0x12e   :  { %6710 = vmatpush3.bf16.msra.mxu0 %v7461_v51  ;;  %v7510_v51 = vld [vmem:[#allocation3 + $0x7b0] sm:$0xff]  }
 0x12f   :  { %6732 = vmatpush3.bf16.msra.mxu1 %v7462_v52  ;;  %6711 = vmatprep.subr.bf16.mxu0 %v7463_v53  ;;  %v7511_v52 = vld [vmem:[#allocation3 + $0x778] sm:$0xff]  }
 0x130   :  { %6733 = vmatprep.subr.bf16.mxu1 %v7464_v54  ;;  %v7512_v53 = vld [vmem:[#allocation3 + $0x7f8] sm:$0xff]  }
 0x131   :  { %v7513_v54 = vld [vmem:[#allocation3 + $0x738] sm:$0xff]  }
 0x132   :  { %6712 = vmatpush3.bf16.msra.mxu0 %v7465_v55  ;;  %v7514_v55 = vld [vmem:[#allocation3 + $0x7b8] sm:$0xff]  }
 0x133   :  { %6734 = vmatpush3.bf16.msra.mxu1 %v7466_v56  ;;  %6713 = vmatprep.subr.bf16.mxu0 %v7467_v57  ;;  %v105_v56 = vld [vmem:[%s8165_s0 + $0x70] sm:$0xff]  ;;  %v106_v57 = vld [vmem:[%s8165_s0 + $0x78] sm:$0xff] }
 0x134   :  { %6735 = vmatprep.subr.bf16.mxu1 %v7468_v58  ;;  %v5887_v58 = vcombine.low %v105_v56, %v105_v56 }
 0x136   :  { %6714 = vmatpush3.bf16.msra.mxu0 %v7469_v59  ;;  %v5888_v59 = vcombine.high %v105_v56, %v105_v56  ;;  %v7563_v56 = vld [vmem:[#allocation3 + $0x950] sm:$0xff]  }
 0x137   :  { %6736 = vmatpush3.bf16.msra.mxu1 %v7470_v60  ;;  %6715 = vmatprep.subr.bf16.mxu0 %v7471_v61  ;;  %v5889_v60 = vcombine.low %v106_v57, %v106_v57  ;;  %v5890_v61 = vcombine.high %v106_v57, %v106_v57  ;;  %v7564_v57 = vld [vmem:[#allocation3 + $0x9d0] sm:$0xff]  }
 0x138   :  { %6737 = vmatprep.subr.bf16.mxu1 %v7472_v62  ;;  %v7519_v62 = vld [vmem:[#allocation3 + $0x840] sm:$0xff]  }
 0x13a   :  { %6716 = vmatpush3.bf16.msra.mxu0 %v7473_v63  ;;  %v7520_v63 = vld [vmem:[#allocation3 + $0x8c0] sm:$0xff]  }
 0x13b   :  { %6738 = vmatpush3.bf16.msra.mxu1 %v7474_v0  ;;  %6717 = vmatprep.subr.bf16.mxu0 %v7475_v1  ;;  %v7521_v0 = vld [vmem:[#allocation3 + $0x800] sm:$0xff]  }
 0x13c   :  { %6739 = vmatprep.subr.bf16.mxu1 %v7476_v2  ;;  %v7522_v1 = vld [vmem:[#allocation3 + $0x880] sm:$0xff]   ;;  %v7523_v2 = vld [vmem:[#allocation3 + $0x848] sm:$0xff]  }
 0x13e   :  { %6718 = vmatpush3.bf16.msra.mxu0 %v7477_v3  ;;  %v7524_v3 = vld [vmem:[#allocation3 + $0x8c8] sm:$0xff]  }
 0x13f   :  { %6740 = vmatpush3.bf16.msra.mxu1 %v7478_v4  ;;  %6747 = vmatprep.subr.bf16.mxu0 %v7483_v10  ;;  %v7525_v4 = vld [vmem:[#allocation3 + $0x808] sm:$0xff]   ;;  %v7531_v10 = vld [vmem:[#allocation3 + $0x858] sm:$0xff]  }
 0x140   :  { %6769 = vmatprep.subr.bf16.mxu1 %v7484_v12  ;;  %v7533_v12 = vld [vmem:[#allocation3 + $0x818] sm:$0xff]  }
 0x141   :  { %4963 = vmatmul.mubr.bf16.vlgmr.msra.gmra.mrb[24].mxu0 %v5883_v7  ;;  %v7528_v7 = vld [vmem:[#allocation3 + $0x8d0] sm:$0xff]  }
 0x142   :  { %5003 = vmatmul.mubr.bf16.vlgmr.msra.gmra.mrb[24].mxu1 %v5885_v9  ;;  %6748 = vmatpush3.bf16.msra.mxu0 %v7485_v13  ;;  %v7530_v9 = vld [vmem:[#allocation3 + $0x890] sm:$0xff]   ;;  %v7534_v13 = vld [vmem:[#allocation3 + $0x898] sm:$0xff]  }
 0x143   :  { %6770 = vmatpush3.bf16.msra.mxu1 %v7486_v14  ;;  %6749 = vmatprep.subr.bf16.mxu0 %v7487_v15  ;;  %v7535_v14 = vld [vmem:[#allocation3 + $0x860] sm:$0xff]  }
 0x144   :  { %6771 = vmatprep.subr.bf16.mxu1 %v7488_v16  ;;  %5042 = vmatprep.mubr.bf16.mxu0 %v5888_v59  ;;  %v7536_v15 = vld [vmem:[#allocation3 + $0x8e0] sm:$0xff]   ;;  %v7566_v59 = vld [vmem:[#allocation3 + $0x990] sm:$0xff]  }
 0x145   :  { %5082 = vmatprep.mubr.bf16.mxu1 %v5890_v61  ;;  %v7537_v16 = vld [vmem:[#allocation3 + $0x820] sm:$0xff]   ;;  %v7568_v61 = vld [vmem:[#allocation3 + $0x9d8] sm:$0xff]  }
 0x146   :  { %6750 = vmatpush3.bf16.msra.mxu0 %v7489_v17 }
 0x147   :  { %6772 = vmatpush3.bf16.msra.mxu1 %v7490_v18  ;;  %6751 = vmatprep.subr.bf16.mxu0 %v7491_v19  ;;  %v7538_v18 = vld [vmem:[#allocation3 + $0x8a0] sm:$0xff]  }
 0x148   :  { %6773 = vmatprep.subr.bf16.mxu1 %v7492_v20 }
 0x14a   :  { %6752 = vmatpush3.bf16.msra.mxu0 %v7493_v21 }
 0x14b   :  { %6774 = vmatpush3.bf16.msra.mxu1 %v7494_v22  ;;  %6753 = vmatprep.subr.bf16.mxu0 %v7495_v23 }
 0x14c   :  { %6775 = vmatprep.subr.bf16.mxu1 %v7496_v24  ;;  %v7539_v24 = vld [vmem:[#allocation3 + $0x868] sm:$0xff]  }
 0x14e   :  { %6754 = vmatpush3.bf16.msra.mxu0 %v7497_v25 }
 0x14f   :  { %6776 = vmatpush3.bf16.msra.mxu1 %v7498_v26  ;;  %6755 = vmatprep.subr.bf16.mxu0 %v7499_v27  ;;  %v7540_v26 = vld [vmem:[#allocation3 + $0x8e8] sm:$0xff]  }
 0x150   :  { %6777 = vmatprep.subr.bf16.mxu1 %v7500_v28 }
 0x152   :  { %6756 = vmatpush3.bf16.msra.mxu0 %v7501_v29  ;;  %v7541_v29 = vld [vmem:[#allocation3 + $0x828] sm:$0xff]  }
 0x153   :  { %6778 = vmatpush3.bf16.msra.mxu1 %v7502_v31  ;;  %6757 = vmatprep.subr.bf16.mxu0 %v7503_v38  ;;  %v7542_v31 = vld [vmem:[#allocation3 + $0x8a8] sm:$0xff]   ;;  %v7547_v38 = vld [vmem:[#allocation3 + $0x878] sm:$0xff]  }
 0x154   :  { %v6455_v30 = vpop.f32.mrb[0].mxu0  ;;  %6779 = vmatprep.subr.bf16.mxu1 %v7504_v40  ;;  %v7549_v40 = vld [vmem:[#allocation3 + $0x838] sm:$0xff]  }
 0x155   :  { %v6477_v32 = vpop.f32.mrb[0].mxu1  ;;  %v6456_v34 = vpop.f32.mrb[1].mxu0 }
 0x156   :  { %v6478_v35 = vpop.f32.mrb[1].mxu1  ;;  %v6457_v36 = vadd.f32 %v6456_v34, %v6455_v30  ;;  %v6458_v39 = vpop.f32.mrb[2].mxu0  ;;  %6758 = vmatpush3.bf16.msra.mxu0 %v7505_v43  ;;  %v7543_v34 = vld [vmem:[#allocation3 + $0x870] sm:$0xff]   ;;  %v108_v43 = vld [vmem:[%s8165_s0 + $0x88] sm:$0xff] }
 0x157   :  { %v6479_v37 = vadd.f32 %v6478_v35, %v6477_v32  ;;  %v6480_v41 = vpop.f32.mrb[2].mxu1  ;;  %v6459_v44 = vpop.f32.mrb[3].mxu0  ;;  %6780 = vmatpush3.bf16.msra.mxu1 %v7506_v45  ;;  %6759 = vmatprep.subr.bf16.mxu0 %v7507_v48  ;;  %v7544_v35 = vld [vmem:[#allocation3 + $0x8f0] sm:$0xff]   ;;  %v7548_v39 = vld [vmem:[#allocation3 + $0x8f8] sm:$0xff]   ;;  %v7555_v48 = vld [vmem:[#allocation3 + $0x940] sm:$0xff]  }
 0x158   :  { %v4485_v42 = vadd.f32 %v6457_v36, %v5858_v33  ;;  %v6481_v46 = vpop.f32.mrb[3].mxu1  ;;  %6781 = vmatprep.subr.bf16.mxu1 %v7508_v49  ;;  %v7545_v36 = vld [vmem:[#allocation3 + $0x830] sm:$0xff]   ;;  %v7550_v41 = vld [vmem:[#allocation3 + $0x8b8] sm:$0xff]   ;;  %v7556_v49 = vld [vmem:[#allocation3 + $0x9c0] sm:$0xff]  }
 0x159   :  { %v5893_v46 = vcombine.low %v108_v43, %v108_v43 }
 0x15a   :  { %v8084_v47 = vadd.f32 %v6479_v37, %v4485_v42  ;;  %6760 = vmatpush3.bf16.msra.mxu0 %v7509_v50  ;;  %v7546_v37 = vld [vmem:[#allocation3 + $0x8b0] sm:$0xff]   ;;  %v107_v42 = vld [vmem:[%s8165_s0 + $0x80] sm:$0xff] }
 0x15b   :  { %6782 = vmatpush3.bf16.msra.mxu1 %v7510_v51  ;;  %6761 = vmatprep.subr.bf16.mxu0 %v7511_v52  ;;  %v5891_v44 = vcombine.low %v107_v42, %v107_v42  ;;  %v5892_v45 = vcombine.high %v107_v42, %v107_v42  ;;  %v7557_v50 = vld [vmem:[#allocation3 + $0x900] sm:$0xff]   ;;  %v7559_v52 = vld [vmem:[#allocation3 + $0x948] sm:$0xff]   ;;  %v7599_v42 = vld [vmem:[#allocation3 + $0xa50] sm:$0xff]  }
 0x15c   :  { %6783 = vmatprep.subr.bf16.mxu1 %v7512_v53  ;;  %v7558_v51 = vld [vmem:[#allocation3 + $0x980] sm:$0xff]   ;;  %v7560_v53 = vld [vmem:[#allocation3 + $0x9c8] sm:$0xff]  }
 0x15e   :  { %6762 = vmatpush3.bf16.msra.mxu0 %v7513_v54  ;;  %v7561_v54 = vld [vmem:[#allocation3 + $0x908] sm:$0xff]  }
 0x15f   :  { %6784 = vmatpush3.bf16.msra.mxu1 %v7514_v55  ;;  %6791 = vmatprep.subr.bf16.mxu0 %v7519_v62  ;;  %v7562_v55 = vld [vmem:[#allocation3 + $0x988] sm:$0xff]   ;;  %v7569_v62 = vld [vmem:[#allocation3 + $0x918] sm:$0xff]  }
 0x160   :  { %6813 = vmatprep.subr.bf16.mxu1 %v7520_v63  ;;  %v7570_v63 = vld [vmem:[#allocation3 + $0x998] sm:$0xff]  }
 0x161   :  { %5043 = vmatmul.mubr.bf16.vlgmr.msra.gmra.mrb[28].mxu0 %v5887_v58  ;;  %v7565_v58 = vld [vmem:[#allocation3 + $0x910] sm:$0xff]  }
 0x162   :  { %5083 = vmatmul.mubr.bf16.vlgmr.msra.gmra.mrb[28].mxu1 %v5889_v60  ;;  %6792 = vmatpush3.bf16.msra.mxu0 %v7521_v0  ;;  %v7567_v60 = vld [vmem:[#allocation3 + $0x958] sm:$0xff]   ;;  %v7571_v0 = vld [vmem:[#allocation3 + $0x960] sm:$0xff]  }
 0x163   :  { %6814 = vmatpush3.bf16.msra.mxu1 %v7522_v1  ;;  %6793 = vmatprep.subr.bf16.mxu0 %v7523_v2  ;;  %v7572_v1 = vld [vmem:[#allocation3 + $0x9e0] sm:$0xff]  }
 0x164   :  { %6815 = vmatprep.subr.bf16.mxu1 %v7524_v3  ;;  %5122 = vmatprep.mubr.bf16.mxu0 %v5892_v45  ;;  %v7573_v3 = vld [vmem:[#allocation3 + $0x920] sm:$0xff]   ;;  %v7602_v45 = vld [vmem:[#allocation3 + $0xa90] sm:$0xff]  }
 0x166   :  { %6794 = vmatpush3.bf16.msra.mxu0 %v7525_v4 }
 0x167   :  { %6816 = vmatpush3.bf16.msra.mxu1 %v7526_v5  ;;  %6795 = vmatprep.subr.bf16.mxu0 %v7527_v6  ;;  %v7574_v5 = vld [vmem:[#allocation3 + $0x9a0] sm:$0xff]  }
 0x168   :  { %6817 = vmatprep.subr.bf16.mxu1 %v7528_v7 }
 0x16a   :  { %6796 = vmatpush3.bf16.msra.mxu0 %v7529_v8 }
 0x16b   :  { %6818 = vmatpush3.bf16.msra.mxu1 %v7530_v9  ;;  %6797 = vmatprep.subr.bf16.mxu0 %v7531_v10  ;;  %v7575_v9 = vld [vmem:[#allocation3 + $0x968] sm:$0xff]  }
 0x16c   :  { %6819 = vmatprep.subr.bf16.mxu1 %v7532_v11  ;;  %v7576_v11 = vld [vmem:[#allocation3 + $0x9e8] sm:$0xff]  }
 0x16e   :  { %6798 = vmatpush3.bf16.msra.mxu0 %v7533_v12 }
 0x16f   :  { %6820 = vmatpush3.bf16.msra.mxu1 %v7534_v13  ;;  %6799 = vmatprep.subr.bf16.mxu0 %v7535_v14 }
 0x170   :  { %6821 = vmatprep.subr.bf16.mxu1 %v7536_v15  ;;  %v7577_v15 = vld [vmem:[#allocation3 + $0x928] sm:$0xff]  }
 0x172   :  { %6800 = vmatpush3.bf16.msra.mxu0 %v7537_v16  ;;  %v7578_v16 = vld [vmem:[#allocation3 + $0x9a8] sm:$0xff]  }
 0x173   :  { %6822 = vmatpush3.bf16.msra.mxu1 %v7538_v18  ;;  %6801 = vmatprep.subr.bf16.mxu0 %v7539_v24  ;;  %v7583_v24 = vld [vmem:[#allocation3 + $0x978] sm:$0xff]  }
 0x174   :  { %v6499_v17 = vpop.f32.mrb[4].mxu0  ;;  %6823 = vmatprep.subr.bf16.mxu1 %v7540_v26  ;;  %v7585_v26 = vld [vmem:[#allocation3 + $0x938] sm:$0xff]  }
 0x175   :  { %v6521_v19 = vpop.f32.mrb[4].mxu1  ;;  %v6500_v20 = vpop.f32.mrb[5].mxu0 }
 0x176   :  { %v6522_v21 = vpop.f32.mrb[5].mxu1  ;;  %v6501_v22 = vadd.f32 %v6500_v20, %v6499_v17  ;;  %v6502_v25 = vpop.f32.mrb[6].mxu0  ;;  %6802 = vmatpush3.bf16.msra.mxu0 %v7541_v29  ;;  %v7579_v20 = vld [vmem:[#allocation3 + $0x970] sm:$0xff]  }
 0x177   :  { %v6523_v23 = vadd.f32 %v6522_v21, %v6521_v19  ;;  %v6524_v27 = vpop.f32.mrb[6].mxu1  ;;  %v6503_v30 = vpop.f32.mrb[7].mxu0  ;;  %6824 = vmatpush3.bf16.msra.mxu1 %v7542_v31  ;;  %6803 = vmatprep.subr.bf16.mxu0 %v7543_v34  ;;  %v7580_v21 = vld [vmem:[#allocation3 + $0x9f0] sm:$0xff]   ;;  %v7584_v25 = vld [vmem:[#allocation3 + $0x9f8] sm:$0xff]  }
 0x178   :  { %v4565_v28 = vadd.f32 %v6501_v22, %v8084_v47  ;;  %v6525_v32 = vpop.f32.mrb[7].mxu1  ;;  %6825 = vmatprep.subr.bf16.mxu1 %v7544_v35  ;;  %v5894_v47 = vcombine.high %v108_v43, %v108_v43  ;;  %v7581_v22 = vld [vmem:[#allocation3 + $0x930] sm:$0xff]   ;;  %v7586_v27 = vld [vmem:[#allocation3 + $0x9b8] sm:$0xff]   ;;  %v7592_v35 = vld [vmem:[#allocation3 + $0xac0] sm:$0xff]  }
 0x179   :  { %v110_v29 = vld [vmem:[%s8165_s0 + $0x98] sm:$0xff] }
 0x17a   :  { %v8093_v33 = vadd.f32 %v6523_v23, %v4565_v28  ;;  %6804 = vmatpush3.bf16.msra.mxu0 %v7545_v36  ;;  %5162 = vmatprep.mubr.bf16.mxu1 %v5894_v47  ;;  %v7582_v23 = vld [vmem:[#allocation3 + $0x9b0] sm:$0xff]   ;;  %v5897_v32 = vcombine.low %v110_v29, %v110_v29  ;;  %v5898_v34 = vcombine.high %v110_v29, %v110_v29  ;;  %v7593_v36 = vld [vmem:[#allocation3 + $0xa00] sm:$0xff]   ;;  %v7604_v47 = vld [vmem:[#allocation3 + $0xad8] sm:$0xff]  }
 0x17b   :  { %6826 = vmatpush3.bf16.msra.mxu1 %v7546_v37  ;;  %6805 = vmatprep.subr.bf16.mxu0 %v7547_v38  ;;  %v109_v28 = vld [vmem:[%s8165_s0 + $0x90] sm:$0xff]  ;;  %v7594_v37 = vld [vmem:[#allocation3 + $0xa80] sm:$0xff]  }
 0x17c   :  { %6827 = vmatprep.subr.bf16.mxu1 %v7548_v39  ;;  %v5895_v30 = vcombine.low %v109_v28, %v109_v28  ;;  %v5896_v31 = vcombine.high %v109_v28, %v109_v28  ;;  %v7595_v38 = vld [vmem:[#allocation3 + $0xa48] sm:$0xff]   ;;  %v7600_v43 = vld [vmem:[#allocation3 + $0xad0] sm:$0xff]  }
 0x17d   :  { %v7596_v39 = vld [vmem:[#allocation3 + $0xac8] sm:$0xff]   ;;  %v7635_v28 = vld [vmem:[#allocation3 + $0xb50] sm:$0xff]  }
 0x17e   :  { %6806 = vmatpush3.bf16.msra.mxu0 %v7549_v40  ;;  %v7597_v40 = vld [vmem:[#allocation3 + $0xa08] sm:$0xff]   ;;  %v7636_v29 = vld [vmem:[#allocation3 + $0xbd0] sm:$0xff]  }
 0x17f   :  { %6828 = vmatpush3.bf16.msra.mxu1 %v7550_v41  ;;  %6835 = vmatprep.subr.bf16.mxu0 %v7555_v48  ;;  %v7598_v41 = vld [vmem:[#allocation3 + $0xa88] sm:$0xff]   ;;  %v7605_v48 = vld [vmem:[#allocation3 + $0xa18] sm:$0xff]  }
 0x180   :  { %6857 = vmatprep.subr.bf16.mxu1 %v7556_v49  ;;  %v7606_v49 = vld [vmem:[#allocation3 + $0xa98] sm:$0xff]  }
 0x181   :  { %5123 = vmatmul.mubr.bf16.vlgmr.msra.gmra.mrb[32].mxu0 %v5891_v44  ;;  %v7601_v44 = vld [vmem:[#allocation3 + $0xa10] sm:$0xff]  }
 0x182   :  { %5163 = vmatmul.mubr.bf16.vlgmr.msra.gmra.mrb[32].mxu1 %v5893_v46  ;;  %6836 = vmatpush3.bf16.msra.mxu0 %v7557_v50  ;;  %v7603_v46 = vld [vmem:[#allocation3 + $0xa58] sm:$0xff]   ;;  %v7607_v50 = vld [vmem:[#allocation3 + $0xa60] sm:$0xff]  }
 0x183   :  { %6858 = vmatpush3.bf16.msra.mxu1 %v7558_v51  ;;  %6837 = vmatprep.subr.bf16.mxu0 %v7559_v52  ;;  %v7608_v51 = vld [vmem:[#allocation3 + $0xae0] sm:$0xff]  }
 0x184   :  { %6859 = vmatprep.subr.bf16.mxu1 %v7560_v53  ;;  %5202 = vmatprep.mubr.bf16.mxu0 %v5896_v31  ;;  %v7609_v53 = vld [vmem:[#allocation3 + $0xa20] sm:$0xff]   ;;  %v7638_v31 = vld [vmem:[#allocation3 + $0xb90] sm:$0xff]  }
 0x185   :  { %5242 = vmatprep.mubr.bf16.mxu1 %v5898_v34  ;;  %v7641_v34 = vld [vmem:[#allocation3 + $0xb18] sm:$0xff]  }
 0x186   :  { %6838 = vmatpush3.bf16.msra.mxu0 %v7561_v54 }
 0x187   :  { %6860 = vmatpush3.bf16.msra.mxu1 %v7562_v55  ;;  %6839 = vmatprep.subr.bf16.mxu0 %v7563_v56  ;;  %v7610_v55 = vld [vmem:[#allocation3 + $0xaa0] sm:$0xff]  }
 0x188   :  { %6861 = vmatprep.subr.bf16.mxu1 %v7564_v57 }
 0x18a   :  { %6840 = vmatpush3.bf16.msra.mxu0 %v7565_v58  ;;  %v7611_v58 = vld [vmem:[#allocation3 + $0xa68] sm:$0xff]  }
 0x18b   :  { %6862 = vmatpush3.bf16.msra.mxu1 %v7566_v59  ;;  %6841 = vmatprep.subr.bf16.mxu0 %v7567_v60 }
 0x18c   :  { %6863 = vmatprep.subr.bf16.mxu1 %v7568_v61  ;;  %v7612_v61 = vld [vmem:[#allocation3 + $0xae8] sm:$0xff]  }
 0x18e   :  { %6842 = vmatpush3.bf16.msra.mxu0 %v7569_v62 }
 0x18f   :  { %6864 = vmatpush3.bf16.msra.mxu1 %v7570_v63  ;;  %6843 = vmatprep.subr.bf16.mxu0 %v7571_v0  ;;  %v7613_v0 = vld [vmem:[#allocation3 + $0xa28] sm:$0xff]  }
 0x190   :  { %6865 = vmatprep.subr.bf16.mxu1 %v7572_v1 }
 0x192   :  { %6844 = vmatpush3.bf16.msra.mxu0 %v7573_v3 }
 0x193   :  { %6866 = vmatpush3.bf16.msra.mxu1 %v7574_v5  ;;  %6845 = vmatprep.subr.bf16.mxu0 %v7575_v9  ;;  %v7615_v5 = vld [vmem:[#allocation3 + $0xa70] sm:$0xff]  }
 0x194   :  { %v6543_v2 = vpop.f32.mrb[8].mxu0  ;;  %6867 = vmatprep.subr.bf16.mxu1 %v7576_v11  ;;  %v7618_v9 = vld [vmem:[#allocation3 + $0xab0] sm:$0xff]   ;;  %v7620_v11 = vld [vmem:[#allocation3 + $0xaf8] sm:$0xff]  }
 0x195   :  { %v6565_v4 = vpop.f32.mrb[8].mxu1  ;;  %v6544_v6 = vpop.f32.mrb[9].mxu0 }
 0x196   :  { %v6545_v7 = vadd.f32 %v6544_v6, %v6543_v2  ;;  %v6566_v8 = vpop.f32.mrb[9].mxu1  ;;  %v6546_v12 = vpop.f32.mrb[10].mxu0  ;;  %6846 = vmatpush3.bf16.msra.mxu0 %v7577_v15  ;;  %v7614_v2 = vld [vmem:[#allocation3 + $0xaa8] sm:$0xff]  }
 0x197   :  { %v6567_v10 = vadd.f32 %v6566_v8, %v6565_v4  ;;  %v6568_v14 = vpop.f32.mrb[10].mxu1  ;;  %v6547_v17 = vpop.f32.mrb[11].mxu0  ;;  %6868 = vmatpush3.bf16.msra.mxu1 %v7578_v16  ;;  %6847 = vmatprep.subr.bf16.mxu0 %v7579_v20  ;;  %v7617_v8 = vld [vmem:[#allocation3 + $0xa30] sm:$0xff]   ;;  %v7621_v12 = vld [vmem:[#allocation3 + $0xa38] sm:$0xff]   ;;  %v7627_v20 = vld [vmem:[#allocation3 + $0xb40] sm:$0xff]  }
 0x198   :  { %v4645_v13 = vadd.f32 %v6545_v7, %v8093_v33  ;;  %v6569_v19 = vpop.f32.mrb[11].mxu1  ;;  %6869 = vmatprep.subr.bf16.mxu1 %v7580_v21  ;;  %v7591_v33 = vld [vmem:[#allocation3 + $0xa40] sm:$0xff]   ;;  %v7616_v7 = vld [vmem:[#allocation3 + $0xaf0] sm:$0xff]  }
 0x199   :  { %v111_v14 = vld [vmem:[%s8165_s0 + $0xa0] sm:$0xff]  ;;  %v112_v17 = vld [vmem:[%s8165_s0 + $0xa8] sm:$0xff] }
 0x19a   :  { %v8102_v18 = vadd.f32 %v6567_v10, %v4645_v13  ;;  %6848 = vmatpush3.bf16.msra.mxu0 %v7581_v22  ;;  %v7619_v10 = vld [vmem:[#allocation3 + $0xa78] sm:$0xff]   ;;  %v5899_v15 = vcombine.low %v111_v14, %v111_v14  ;;  %v5900_v16 = vcombine.high %v111_v14, %v111_v14  ;;  %v5902_v19 = vcombine.high %v112_v17, %v112_v17  ;;  %v7628_v21 = vld [vmem:[#allocation3 + $0xbc0] sm:$0xff]   ;;  %v7671_v14 = vld [vmem:[#allocation3 + $0xc50] sm:$0xff]  }
 0x19b   :  { %6870 = vmatpush3.bf16.msra.mxu1 %v7582_v23  ;;  %6849 = vmatprep.subr.bf16.mxu0 %v7583_v24  ;;  %v7622_v13 = vld [vmem:[#allocation3 + $0xab8] sm:$0xff]   ;;  %v7629_v22 = vld [vmem:[#allocation3 + $0xb00] sm:$0xff]   ;;  %v7631_v24 = vld [vmem:[#allocation3 + $0xb48] sm:$0xff]  }
 0x19c   :  { %6871 = vmatprep.subr.bf16.mxu1 %v7584_v25  ;;  %v7630_v23 = vld [vmem:[#allocation3 + $0xb80] sm:$0xff]   ;;  %v7632_v25 = vld [vmem:[#allocation3 + $0xbc8] sm:$0xff]  }
 0x19e   :  { %6850 = vmatpush3.bf16.msra.mxu0 %v7585_v26  ;;  %v7633_v26 = vld [vmem:[#allocation3 + $0xb08] sm:$0xff]  }
 0x19f   :  { %6872 = vmatpush3.bf16.msra.mxu1 %v7586_v27  ;;  %6879 = vmatprep.subr.bf16.mxu0 %v7591_v33  ;;  %v7634_v27 = vld [vmem:[#allocation3 + $0xb88] sm:$0xff]   ;;  %v7640_v33 = vld [vmem:[#allocation3 + $0xbd8] sm:$0xff]  }
 0x1a0   :  { %6901 = vmatprep.subr.bf16.mxu1 %v7592_v35  ;;  %v7642_v35 = vld [vmem:[#allocation3 + $0xb98] sm:$0xff]  }
 0x1a1   :  { %5203 = vmatmul.mubr.bf16.vlgmr.msra.gmra.mrb[36].mxu0 %v5895_v30  ;;  %v7637_v30 = vld [vmem:[#allocation3 + $0xb10] sm:$0xff]  }
 0x1a2   :  { %5243 = vmatmul.mubr.bf16.vlgmr.msra.gmra.mrb[36].mxu1 %v5897_v32  ;;  %6880 = vmatpush3.bf16.msra.mxu0 %v7593_v36  ;;  %v7639_v32 = vld [vmem:[#allocation3 + $0xb58] sm:$0xff]   ;;  %v7643_v36 = vld [vmem:[#allocation3 + $0xb60] sm:$0xff]  }
 0x1a3   :  { %6902 = vmatpush3.bf16.msra.mxu1 %v7594_v37  ;;  %6881 = vmatprep.subr.bf16.mxu0 %v7595_v38  ;;  %v7644_v37 = vld [vmem:[#allocation3 + $0xbe0] sm:$0xff]  }
 0x1a4   :  { %6903 = vmatprep.subr.bf16.mxu1 %v7596_v39  ;;  %5282 = vmatprep.mubr.bf16.mxu0 %v5900_v16  ;;  %v7645_v39 = vld [vmem:[#allocation3 + $0xb20] sm:$0xff]   ;;  %v7673_v16 = vld [vmem:[#allocation3 + $0xc10] sm:$0xff]  }
 0x1a5   :  { %5322 = vmatprep.mubr.bf16.mxu1 %v5902_v19  ;;  %v7676_v19 = vld [vmem:[#allocation3 + $0xcd8] sm:$0xff]  }
 0x1a6   :  { %6882 = vmatpush3.bf16.msra.mxu0 %v7597_v40 }
 0x1a7   :  { %6904 = vmatpush3.bf16.msra.mxu1 %v7598_v41  ;;  %6883 = vmatprep.subr.bf16.mxu0 %v7599_v42  ;;  %v7646_v41 = vld [vmem:[#allocation3 + $0xba0] sm:$0xff]  }
 0x1a8   :  { %6905 = vmatprep.subr.bf16.mxu1 %v7600_v43 }
 0x1aa   :  { %6884 = vmatpush3.bf16.msra.mxu0 %v7601_v44  ;;  %v7647_v44 = vld [vmem:[#allocation3 + $0xb68] sm:$0xff]  }
 0x1ab   :  { %6906 = vmatpush3.bf16.msra.mxu1 %v7602_v45  ;;  %6885 = vmatprep.subr.bf16.mxu0 %v7603_v46 }
 0x1ac   :  { %6907 = vmatprep.subr.bf16.mxu1 %v7604_v47  ;;  %v7648_v47 = vld [vmem:[#allocation3 + $0xbe8] sm:$0xff]  }
 0x1ae   :  { %6886 = vmatpush3.bf16.msra.mxu0 %v7605_v48 }
 0x1af   :  { %6908 = vmatpush3.bf16.msra.mxu1 %v7606_v49  ;;  %6887 = vmatprep.subr.bf16.mxu0 %v7607_v50  ;;  %v7649_v50 = vld [vmem:[#allocation3 + $0xb28] sm:$0xff]  }
 0x1b0   :  { %6909 = vmatprep.subr.bf16.mxu1 %v7608_v51 }
 0x1b2   :  { %6888 = vmatpush3.bf16.msra.mxu0 %v7609_v53 }
 0x1b3   :  { %6910 = vmatpush3.bf16.msra.mxu1 %v7610_v55  ;;  %6889 = vmatprep.subr.bf16.mxu0 %v7611_v58  ;;  %v7651_v55 = vld [vmem:[#allocation3 + $0xb70] sm:$0xff]  }
 0x1b4   :  { %v6587_v52 = vpop.f32.mrb[12].mxu0  ;;  %6911 = vmatprep.subr.bf16.mxu1 %v7612_v61  ;;  %v7653_v58 = vld [vmem:[#allocation3 + $0xb30] sm:$0xff]   ;;  %v7656_v61 = vld [vmem:[#allocation3 + $0xbf8] sm:$0xff]  }
 0x1b5   :  { %v6609_v54 = vpop.f32.mrb[12].mxu1  ;;  %v6588_v56 = vpop.f32.mrb[13].mxu0 }
 0x1b6   :  { %v6610_v57 = vpop.f32.mrb[13].mxu1  ;;  %v6589_v59 = vadd.f32 %v6588_v56, %v6587_v52  ;;  %v6590_v62 = vpop.f32.mrb[14].mxu0  ;;  %6890 = vmatpush3.bf16.msra.mxu0 %v7613_v0  ;;  %v7650_v52 = vld [vmem:[#allocation3 + $0xba8] sm:$0xff]  }
 0x1b7   :  { %v6611_v60 = vadd.f32 %v6610_v57, %v6609_v54  ;;  %v6612_v63 = vpop.f32.mrb[14].mxu1  ;;  %v6591_v3 = vpop.f32.mrb[15].mxu0  ;;  %6912 = vmatpush3.bf16.msra.mxu1 %v7614_v2  ;;  %6891 = vmatprep.subr.bf16.mxu0 %v7615_v5  ;;  %v7652_v57 = vld [vmem:[#allocation3 + $0xbf0] sm:$0xff]   ;;  %v7657_v62 = vld [vmem:[#allocation3 + $0xb38] sm:$0xff]  }
 0x1b8   :  { %v4725_v1 = vadd.f32 %v6589_v59, %v8102_v18  ;;  %v6613_v4 = vpop.f32.mrb[15].mxu1  ;;  %6913 = vmatprep.subr.bf16.mxu1 %v7616_v7  ;;  %v5901_v18 = vcombine.low %v112_v17, %v112_v17  ;;  %v7654_v59 = vld [vmem:[#allocation3 + $0xbb0] sm:$0xff]   ;;  %v7658_v63 = vld [vmem:[#allocation3 + $0xbb8] sm:$0xff]   ;;  %v7664_v7 = vld [vmem:[#allocation3 + $0xcc0] sm:$0xff]  }
 0x1b9   :  { %v113_v0 = vld [vmem:[%s8165_s0 + $0xb0] sm:$0xff] }
 0x1ba   :  { %v8111_v6 = vadd.f32 %v6611_v60, %v4725_v1  ;;  %6892 = vmatpush3.bf16.msra.mxu0 %v7617_v8  ;;  %v7655_v60 = vld [vmem:[#allocation3 + $0xb78] sm:$0xff]   ;;  %v5903_v2 = vcombine.low %v113_v0, %v113_v0  ;;  %v5904_v3 = vcombine.high %v113_v0, %v113_v0  ;;  %v7665_v8 = vld [vmem:[#allocation3 + $0xc00] sm:$0xff]   ;;  %v7674_v17 = vld [vmem:[#allocation3 + $0xc90] sm:$0xff]  }
 0x1bb   :  { %6914 = vmatpush3.bf16.msra.mxu1 %v7618_v9  ;;  %6893 = vmatprep.subr.bf16.mxu0 %v7619_v10  ;;  %v114_v1 = vld [vmem:[%s8165_s0 + $0xb8] sm:$0xff]  ;;  %v7666_v9 = vld [vmem:[#allocation3 + $0xc80] sm:$0xff]   ;;  %v7667_v10 = vld [vmem:[#allocation3 + $0xc48] sm:$0xff]  }
 0x1bc   :  { %6915 = vmatprep.subr.bf16.mxu1 %v7620_v11  ;;  %v5905_v4 = vcombine.low %v114_v1, %v114_v1  ;;  %v5906_v5 = vcombine.high %v114_v1, %v114_v1  ;;  %v7668_v11 = vld [vmem:[#allocation3 + $0xcc8] sm:$0xff]   ;;  %v7707_v0 = vld [vmem:[#allocation3 + $0xd50] sm:$0xff]  }
 0x1bd   :  { %v7708_v1 = vld [vmem:[#allocation3 + $0xdd0] sm:$0xff]  }
 0x1be   :  { %6894 = vmatpush3.bf16.msra.mxu0 %v7621_v12  ;;  %v7669_v12 = vld [vmem:[#allocation3 + $0xc08] sm:$0xff]  }
 0x1bf   :  { %6916 = vmatpush3.bf16.msra.mxu1 %v7622_v13  ;;  %6923 = vmatprep.subr.bf16.mxu0 %v7627_v20  ;;  %v7670_v13 = vld [vmem:[#allocation3 + $0xc88] sm:$0xff]   ;;  %v7677_v20 = vld [vmem:[#allocation3 + $0xc18] sm:$0xff]  }
 0x1c0   :  { %6945 = vmatprep.subr.bf16.mxu1 %v7628_v21  ;;  %v7678_v21 = vld [vmem:[#allocation3 + $0xc98] sm:$0xff]  }
 0x1c1   :  { %5283 = vmatmul.mubr.bf16.vlgmr.msra.gmra.mrb[40].mxu0 %v5899_v15  ;;  %v7672_v15 = vld [vmem:[#allocation3 + $0xcd0] sm:$0xff]  }
 0x1c2   :  { %5323 = vmatmul.mubr.bf16.vlgmr.msra.gmra.mrb[40].mxu1 %v5901_v18  ;;  %6924 = vmatpush3.bf16.msra.mxu0 %v7629_v22  ;;  %v7675_v18 = vld [vmem:[#allocation3 + $0xc58] sm:$0xff]   ;;  %v7679_v22 = vld [vmem:[#allocation3 + $0xc60] sm:$0xff]  }
 0x1c3   :  { %6946 = vmatpush3.bf16.msra.mxu1 %v7630_v23  ;;  %6925 = vmatprep.subr.bf16.mxu0 %v7631_v24  ;;  %v7680_v23 = vld [vmem:[#allocation3 + $0xce0] sm:$0xff]  }
 0x1c4   :  { %6947 = vmatprep.subr.bf16.mxu1 %v7632_v25  ;;  %5362 = vmatprep.mubr.bf16.mxu0 %v5904_v3  ;;  %v7681_v25 = vld [vmem:[#allocation3 + $0xc20] sm:$0xff]   ;;  %v7710_v3 = vld [vmem:[#allocation3 + $0xd90] sm:$0xff]  }
 0x1c5   :  { %5402 = vmatprep.mubr.bf16.mxu1 %v5906_v5  ;;  %v7712_v5 = vld [vmem:[#allocation3 + $0xdd8] sm:$0xff]  }
 0x1c6   :  { %6926 = vmatpush3.bf16.msra.mxu0 %v7633_v26 }
 0x1c7   :  { %6948 = vmatpush3.bf16.msra.mxu1 %v7634_v27  ;;  %6927 = vmatprep.subr.bf16.mxu0 %v7635_v28  ;;  %v7682_v27 = vld [vmem:[#allocation3 + $0xca0] sm:$0xff]  }
 0x1c8   :  { %6949 = vmatprep.subr.bf16.mxu1 %v7636_v29 }
 0x1ca   :  { %6928 = vmatpush3.bf16.msra.mxu0 %v7637_v30 }
 0x1cb   :  { %6950 = vmatpush3.bf16.msra.mxu1 %v7638_v31  ;;  %6929 = vmatprep.subr.bf16.mxu0 %v7639_v32  ;;  %v7683_v31 = vld [vmem:[#allocation3 + $0xc68] sm:$0xff]  }
 0x1cc   :  { %6951 = vmatprep.subr.bf16.mxu1 %v7640_v33  ;;  %v7684_v33 = vld [vmem:[#allocation3 + $0xce8] sm:$0xff]  }
 0x1ce   :  { %6930 = vmatpush3.bf16.msra.mxu0 %v7641_v34 }
 0x1cf   :  { %6952 = vmatpush3.bf16.msra.mxu1 %v7642_v35  ;;  %6931 = vmatprep.subr.bf16.mxu0 %v7643_v36 }
 0x1d0   :  { %6953 = vmatprep.subr.bf16.mxu1 %v7644_v37  ;;  %v7685_v37 = vld [vmem:[#allocation3 + $0xc28] sm:$0xff]  }
 0x1d2   :  { %6932 = vmatpush3.bf16.msra.mxu0 %v7645_v39 }
 0x1d3   :  { %6954 = vmatpush3.bf16.msra.mxu1 %v7646_v41  ;;  %6933 = vmatprep.subr.bf16.mxu0 %v7647_v44  ;;  %v7689_v44 = vld [vmem:[#allocation3 + $0xc30] sm:$0xff]  }
 0x1d4   :  { %v6631_v38 = vpop.f32.mrb[16].mxu0  ;;  %6955 = vmatprep.subr.bf16.mxu1 %v7648_v47  ;;  %v7692_v47 = vld [vmem:[#allocation3 + $0xcf8] sm:$0xff]  }
 0x1d5   :  { %v6653_v40 = vpop.f32.mrb[16].mxu1  ;;  %v6632_v42 = vpop.f32.mrb[17].mxu0 }
 0x1d6   :  { %v6654_v43 = vpop.f32.mrb[17].mxu1  ;;  %v6633_v45 = vadd.f32 %v6632_v42, %v6631_v38  ;;  %v6634_v48 = vpop.f32.mrb[18].mxu0  ;;  %6934 = vmatpush3.bf16.msra.mxu0 %v7649_v50  ;;  %v7686_v38 = vld [vmem:[#allocation3 + $0xca8] sm:$0xff]   ;;  %v7687_v42 = vld [vmem:[#allocation3 + $0xc70] sm:$0xff]   ;;  %v115_v50 = vld [vmem:[%s8165_s0 + $0xc0] sm:$0xff] }
 0x1d7   :  { %v6655_v46 = vadd.f32 %v6654_v43, %v6653_v40  ;;  %v6656_v49 = vpop.f32.mrb[18].mxu1  ;;  %v6635_v53 = vpop.f32.mrb[19].mxu0  ;;  %6956 = vmatpush3.bf16.msra.mxu1 %v7650_v52  ;;  %6935 = vmatprep.subr.bf16.mxu0 %v7651_v55  ;;  %v7688_v43 = vld [vmem:[#allocation3 + $0xcf0] sm:$0xff]   ;;  %v7693_v48 = vld [vmem:[#allocation3 + $0xc38] sm:$0xff]   ;;  %v5907_v52 = vcombine.low %v115_v50, %v115_v50  ;;  %v7699_v55 = vld [vmem:[#allocation3 + $0xd40] sm:$0xff]  }
 0x1d8   :  { %v4805_v51 = vadd.f32 %v6633_v45, %v8111_v6  ;;  %v6657_v54 = vpop.f32.mrb[19].mxu1  ;;  %6957 = vmatprep.subr.bf16.mxu1 %v7652_v57  ;;  %v7663_v6 = vld [vmem:[#allocation3 + $0xc40] sm:$0xff]   ;;  %v7690_v45 = vld [vmem:[#allocation3 + $0xcb0] sm:$0xff]   ;;  %v7694_v49 = vld [vmem:[#allocation3 + $0xcb8] sm:$0xff]   ;;  %v5908_v53 = vcombine.high %v115_v50, %v115_v50 }
 0x1d9   :  { %v7700_v57 = vld [vmem:[#allocation3 + $0xdc0] sm:$0xff]   ;;  %v7743_v50 = vld [vmem:[#allocation3 + $0xe50] sm:$0xff]  }
 0x1da   :  { %v8120_v56 = vadd.f32 %v6655_v46, %v4805_v51  ;;  %6936 = vmatpush3.bf16.msra.mxu0 %v7653_v58  ;;  %v7691_v46 = vld [vmem:[#allocation3 + $0xc78] sm:$0xff]   ;;  %v116_v51 = vld [vmem:[%s8165_s0 + $0xc8] sm:$0xff] }
 0x1db   :  { %6958 = vmatpush3.bf16.msra.mxu1 %v7654_v59  ;;  %6937 = vmatprep.subr.bf16.mxu0 %v7655_v60  ;;  %v5909_v54 = vcombine.low %v116_v51, %v116_v51  ;;  %v7701_v58 = vld [vmem:[#allocation3 + $0xd00] sm:$0xff]   ;;  %v7703_v60 = vld [vmem:[#allocation3 + $0xd48] sm:$0xff]  }
 0x1dc   :  { %6959 = vmatprep.subr.bf16.mxu1 %v7656_v61  ;;  %v7702_v59 = vld [vmem:[#allocation3 + $0xd80] sm:$0xff]   ;;  %v7704_v61 = vld [vmem:[#allocation3 + $0xdc8] sm:$0xff]  }
 0x1de   :  { %6938 = vmatpush3.bf16.msra.mxu0 %v7657_v62  ;;  %v7705_v62 = vld [vmem:[#allocation3 + $0xd08] sm:$0xff]  }
 0x1df   :  { %6960 = vmatpush3.bf16.msra.mxu1 %v7658_v63  ;;  %6967 = vmatprep.subr.bf16.mxu0 %v7663_v6  ;;  %v7706_v63 = vld [vmem:[#allocation3 + $0xd88] sm:$0xff]   ;;  %v7713_v6 = vld [vmem:[#allocation3 + $0xd18] sm:$0xff]  }
 0x1e0   :  { %6989 = vmatprep.subr.bf16.mxu1 %v7664_v7  ;;  %v7714_v7 = vld [vmem:[#allocation3 + $0xd98] sm:$0xff]  }
 0x1e1   :  { %5363 = vmatmul.mubr.bf16.vlgmr.msra.gmra.mrb[44].mxu0 %v5903_v2  ;;  %v7709_v2 = vld [vmem:[#allocation3 + $0xd10] sm:$0xff]  }
 0x1e2   :  { %5403 = vmatmul.mubr.bf16.vlgmr.msra.gmra.mrb[44].mxu1 %v5905_v4  ;;  %6968 = vmatpush3.bf16.msra.mxu0 %v7665_v8  ;;  %v7711_v4 = vld [vmem:[#allocation3 + $0xd58] sm:$0xff]   ;;  %v7715_v8 = vld [vmem:[#allocation3 + $0xd60] sm:$0xff]  }
 0x1e3   :  { %6990 = vmatpush3.bf16.msra.mxu1 %v7666_v9  ;;  %6969 = vmatprep.subr.bf16.mxu0 %v7667_v10  ;;  %v7716_v9 = vld [vmem:[#allocation3 + $0xde0] sm:$0xff]  }
 0x1e4   :  { %6991 = vmatprep.subr.bf16.mxu1 %v7668_v11  ;;  %5442 = vmatprep.mubr.bf16.mxu0 %v5908_v53  ;;  %v7717_v11 = vld [vmem:[#allocation3 + $0xd20] sm:$0xff]   ;;  %v7746_v53 = vld [vmem:[#allocation3 + $0xe90] sm:$0xff]  }
 0x1e6   :  { %6970 = vmatpush3.bf16.msra.mxu0 %v7669_v12 }
 0x1e7   :  { %6992 = vmatpush3.bf16.msra.mxu1 %v7670_v13  ;;  %6971 = vmatprep.subr.bf16.mxu0 %v7671_v14  ;;  %v7718_v13 = vld [vmem:[#allocation3 + $0xda0] sm:$0xff]  }
 0x1e8   :  { %6993 = vmatprep.subr.bf16.mxu1 %v7672_v15 }
 0x1ea   :  { %6972 = vmatpush3.bf16.msra.mxu0 %v7673_v16  ;;  %v7719_v16 = vld [vmem:[#allocation3 + $0xd68] sm:$0xff]  }
 0x1eb   :  { %6994 = vmatpush3.bf16.msra.mxu1 %v7674_v17  ;;  %6973 = vmatprep.subr.bf16.mxu0 %v7675_v18 }
 0x1ec   :  { %6995 = vmatprep.subr.bf16.mxu1 %v7676_v19  ;;  %v7720_v19 = vld [vmem:[#allocation3 + $0xde8] sm:$0xff]  }
 0x1ee   :  { %6974 = vmatpush3.bf16.msra.mxu0 %v7677_v20 }
 0x1ef   :  { %6996 = vmatpush3.bf16.msra.mxu1 %v7678_v21  ;;  %6975 = vmatprep.subr.bf16.mxu0 %v7679_v22  ;;  %v7721_v22 = vld [vmem:[#allocation3 + $0xd28] sm:$0xff]  }
 0x1f0   :  { %6997 = vmatprep.subr.bf16.mxu1 %v7680_v23 }
 0x1f2   :  { %6976 = vmatpush3.bf16.msra.mxu0 %v7681_v25 }
 0x1f3   :  { %6998 = vmatpush3.bf16.msra.mxu1 %v7682_v27  ;;  %6977 = vmatprep.subr.bf16.mxu0 %v7683_v31  ;;  %v7723_v27 = vld [vmem:[#allocation3 + $0xd70] sm:$0xff]  }
 0x1f4   :  { %v6675_v24 = vpop.f32.mrb[20].mxu0  ;;  %6999 = vmatprep.subr.bf16.mxu1 %v7684_v33  ;;  %v7726_v31 = vld [vmem:[#allocation3 + $0xdb0] sm:$0xff]   ;;  %v7728_v33 = vld [vmem:[#allocation3 + $0xdf8] sm:$0xff]  }
 0x1f5   :  { %v6697_v26 = vpop.f32.mrb[20].mxu1  ;;  %v6676_v28 = vpop.f32.mrb[21].mxu0 }
 0x1f6   :  { %v6677_v29 = vadd.f32 %v6676_v28, %v6675_v24  ;;  %v6698_v30 = vpop.f32.mrb[21].mxu1  ;;  %v6678_v34 = vpop.f32.mrb[22].mxu0  ;;  %6978 = vmatpush3.bf16.msra.mxu0 %v7685_v37  ;;  %v7722_v24 = vld [vmem:[#allocation3 + $0xda8] sm:$0xff]  }
 0x1f7   :  { %v6699_v32 = vadd.f32 %v6698_v30, %v6697_v26  ;;  %v6700_v36 = vpop.f32.mrb[22].mxu1  ;;  %v6679_v39 = vpop.f32.mrb[23].mxu0  ;;  %7000 = vmatpush3.bf16.msra.mxu1 %v7686_v38  ;;  %6979 = vmatprep.subr.bf16.mxu0 %v7687_v42  ;;  %v7725_v30 = vld [vmem:[#allocation3 + $0xd30] sm:$0xff]   ;;  %v7729_v34 = vld [vmem:[#allocation3 + $0xd38] sm:$0xff]   ;;  %v7735_v42 = vld [vmem:[#allocation3 + $0xe40] sm:$0xff]  }
 0x1f8   :  { %v4885_v35 = vadd.f32 %v6677_v29, %v8120_v56  ;;  %v6701_v41 = vpop.f32.mrb[23].mxu1  ;;  %7001 = vmatprep.subr.bf16.mxu1 %v7688_v43  ;;  %v5910_v56 = vcombine.high %v116_v51, %v116_v51  ;;  %v7724_v29 = vld [vmem:[#allocation3 + $0xdf0] sm:$0xff]   ;;  %v7736_v43 = vld [vmem:[#allocation3 + $0xec0] sm:$0xff]  }
 0x1f9   :  { %v117_v36 = vld [vmem:[%s8165_s0 + $0xd0] sm:$0xff]  ;;  %v118_v39 = vld [vmem:[%s8165_s0 + $0xd8] sm:$0xff] }
 0x1fa   :  { %v8129_v40 = vadd.f32 %v6699_v32, %v4885_v35  ;;  %6980 = vmatpush3.bf16.msra.mxu0 %v7689_v44  ;;  %5482 = vmatprep.mubr.bf16.mxu1 %v5910_v56  ;;  %v7727_v32 = vld [vmem:[#allocation3 + $0xd78] sm:$0xff]   ;;  %v5911_v37 = vcombine.low %v117_v36, %v117_v36  ;;  %v5912_v38 = vcombine.high %v117_v36, %v117_v36  ;;  %v7737_v44 = vld [vmem:[#allocation3 + $0xe00] sm:$0xff]   ;;  %v7744_v51 = vld [vmem:[#allocation3 + $0xed0] sm:$0xff]  }
 0x1fb   :  { %7002 = vmatpush3.bf16.msra.mxu1 %v7690_v45  ;;  %6981 = vmatprep.subr.bf16.mxu0 %v7691_v46  ;;  %v7730_v35 = vld [vmem:[#allocation3 + $0xdb8] sm:$0xff]   ;;  %v5914_v41 = vcombine.high %v118_v39, %v118_v39  ;;  %v7738_v45 = vld [vmem:[#allocation3 + $0xe80] sm:$0xff]   ;;  %v7739_v46 = vld [vmem:[#allocation3 + $0xe48] sm:$0xff]  }
 0x1fc   :  { %7003 = vmatprep.subr.bf16.mxu1 %v7692_v47  ;;  %v7740_v47 = vld [vmem:[#allocation3 + $0xec8] sm:$0xff]   ;;  %v7749_v56 = vld [vmem:[#allocation3 + $0xe18] sm:$0xff]   ;;  %v7779_v36 = vld [vmem:[#allocation3 + $0xf50] sm:$0xff]  }
 0x1fe   :  { %6982 = vmatpush3.bf16.msra.mxu0 %v7693_v48  ;;  %v7741_v48 = vld [vmem:[#allocation3 + $0xe08] sm:$0xff]  }
 0x1ff   :  { %7004 = vmatpush3.bf16.msra.mxu1 %v7694_v49  ;;  %7011 = vmatprep.subr.bf16.mxu0 %v7699_v55  ;;  %v7742_v49 = vld [vmem:[#allocation3 + $0xe88] sm:$0xff]   ;;  %v7748_v55 = vld [vmem:[#allocation3 + $0xed8] sm:$0xff]  }
 0x200   :  { %7033 = vmatprep.subr.bf16.mxu1 %v7700_v57  ;;  %v7750_v57 = vld [vmem:[#allocation3 + $0xe98] sm:$0xff]  }
 0x201   :  { %5443 = vmatmul.mubr.bf16.vlgmr.msra.gmra.mrb[48].mxu0 %v5907_v52  ;;  %v7745_v52 = vld [vmem:[#allocation3 + $0xe10] sm:$0xff]  }
 0x202   :  { %5483 = vmatmul.mubr.bf16.vlgmr.msra.gmra.mrb[48].mxu1 %v5909_v54  ;;  %7012 = vmatpush3.bf16.msra.mxu0 %v7701_v58  ;;  %v7747_v54 = vld [vmem:[#allocation3 + $0xe58] sm:$0xff]   ;;  %v7751_v58 = vld [vmem:[#allocation3 + $0xe60] sm:$0xff]  }
 0x203   :  { %7034 = vmatpush3.bf16.msra.mxu1 %v7702_v59  ;;  %7013 = vmatprep.subr.bf16.mxu0 %v7703_v60  ;;  %v7752_v59 = vld [vmem:[#allocation3 + $0xee0] sm:$0xff]  }
 0x204   :  { %7035 = vmatprep.subr.bf16.mxu1 %v7704_v61  ;;  %5522 = vmatprep.mubr.bf16.mxu0 %v5912_v38  ;;  %v7753_v61 = vld [vmem:[#allocation3 + $0xe20] sm:$0xff]   ;;  %v7781_v38 = vld [vmem:[#allocation3 + $0xf10] sm:$0xff]  }
 0x205   :  { %5562 = vmatprep.mubr.bf16.mxu1 %v5914_v41  ;;  %v7784_v41 = vld [vmem:[#allocation3 + $0xfd8] sm:$0xff]  }
 0x206   :  { %7014 = vmatpush3.bf16.msra.mxu0 %v7705_v62 }
 0x207   :  { %7036 = vmatpush3.bf16.msra.mxu1 %v7706_v63  ;;  %7015 = vmatprep.subr.bf16.mxu0 %v7707_v0  ;;  %v7754_v63 = vld [vmem:[#allocation3 + $0xea0] sm:$0xff]  }
 0x208   :  { %7037 = vmatprep.subr.bf16.mxu1 %v7708_v1 }
 0x20a   :  { %7016 = vmatpush3.bf16.msra.mxu0 %v7709_v2  ;;  %v7755_v2 = vld [vmem:[#allocation3 + $0xe68] sm:$0xff]  }
 0x20b   :  { %7038 = vmatpush3.bf16.msra.mxu1 %v7710_v3  ;;  %7017 = vmatprep.subr.bf16.mxu0 %v7711_v4 }
 0x20c   :  { %7039 = vmatprep.subr.bf16.mxu1 %v7712_v5  ;;  %v7756_v5 = vld [vmem:[#allocation3 + $0xee8] sm:$0xff]  }
 0x20e   :  { %7018 = vmatpush3.bf16.msra.mxu0 %v7713_v6 }
 0x20f   :  { %7040 = vmatpush3.bf16.msra.mxu1 %v7714_v7  ;;  %7019 = vmatprep.subr.bf16.mxu0 %v7715_v8  ;;  %v7757_v8 = vld [vmem:[#allocation3 + $0xe28] sm:$0xff]  }
 0x210   :  { %7041 = vmatprep.subr.bf16.mxu1 %v7716_v9 }
 0x212   :  { %7020 = vmatpush3.bf16.msra.mxu0 %v7717_v11 }
 0x213   :  { %7042 = vmatpush3.bf16.msra.mxu1 %v7718_v13  ;;  %7021 = vmatprep.subr.bf16.mxu0 %v7719_v16  ;;  %v7759_v13 = vld [vmem:[#allocation3 + $0xe70] sm:$0xff]  }
 0x214   :  { %v6719_v10 = vpop.f32.mrb[24].mxu0  ;;  %7043 = vmatprep.subr.bf16.mxu1 %v7720_v19  ;;  %v7761_v16 = vld [vmem:[#allocation3 + $0xe30] sm:$0xff]   ;;  %v7764_v19 = vld [vmem:[#allocation3 + $0xef8] sm:$0xff]  }
 0x215   :  { %v6741_v12 = vpop.f32.mrb[24].mxu1  ;;  %v6720_v14 = vpop.f32.mrb[25].mxu0 }
 0x216   :  { %v6742_v15 = vpop.f32.mrb[25].mxu1  ;;  %v6721_v17 = vadd.f32 %v6720_v14, %v6719_v10  ;;  %v6722_v20 = vpop.f32.mrb[26].mxu0  ;;  %7022 = vmatpush3.bf16.msra.mxu0 %v7721_v22  ;;  %v7758_v10 = vld [vmem:[#allocation3 + $0xea8] sm:$0xff]   ;;  %v119_v22 = vld [vmem:[%s8165_s0 + $0xe0] sm:$0xff] }
 0x217   :  { %v6743_v18 = vadd.f32 %v6742_v15, %v6741_v12  ;;  %v6744_v21 = vpop.f32.mrb[26].mxu1  ;;  %v6723_v25 = vpop.f32.mrb[27].mxu0  ;;  %7044 = vmatpush3.bf16.msra.mxu1 %v7722_v24  ;;  %7023 = vmatprep.subr.bf16.mxu0 %v7723_v27  ;;  %v7760_v15 = vld [vmem:[#allocation3 + $0xef0] sm:$0xff]   ;;  %v7765_v20 = vld [vmem:[#allocation3 + $0xe38] sm:$0xff]   ;;  %v5915_v24 = vcombine.low %v119_v22, %v119_v22 }
 0x218   :  { %v4965_v23 = vadd.f32 %v6721_v17, %v8129_v40  ;;  %v6745_v26 = vpop.f32.mrb[27].mxu1  ;;  %7045 = vmatprep.subr.bf16.mxu1 %v7724_v29  ;;  %v5913_v40 = vcombine.low %v118_v39, %v118_v39  ;;  %v7762_v17 = vld [vmem:[#allocation3 + $0xeb0] sm:$0xff]   ;;  %v7766_v21 = vld [vmem:[#allocation3 + $0xeb8] sm:$0xff]   ;;  %v5916_v25 = vcombine.high %v119_v22, %v119_v22  ;;  %v7772_v29 = vld [vmem:[#allocation3 + $0xfc0] sm:$0xff]  }
 0x219   :  { %v7782_v39 = vld [vmem:[#allocation3 + $0xf90] sm:$0xff]  }
 0x21a   :  { %v8138_v28 = vadd.f32 %v6743_v18, %v4965_v23  ;;  %7024 = vmatpush3.bf16.msra.mxu0 %v7725_v30  ;;  %v7763_v18 = vld [vmem:[#allocation3 + $0xe78] sm:$0xff]   ;;  %v120_v23 = vld [vmem:[%s8165_s0 + $0xe8] sm:$0xff] }
 0x21b   :  { %7046 = vmatpush3.bf16.msra.mxu1 %v7726_v31  ;;  %7025 = vmatprep.subr.bf16.mxu0 %v7727_v32  ;;  %v5917_v26 = vcombine.low %v120_v23, %v120_v23  ;;  %v5918_v27 = vcombine.high %v120_v23, %v120_v23  ;;  %v7773_v30 = vld [vmem:[#allocation3 + $0xf00] sm:$0xff]   ;;  %v7775_v32 = vld [vmem:[#allocation3 + $0xf48] sm:$0xff]  }
 0x21c   :  { %7047 = vmatprep.subr.bf16.mxu1 %v7728_v33  ;;  %v7774_v31 = vld [vmem:[#allocation3 + $0xf80] sm:$0xff]   ;;  %v7776_v33 = vld [vmem:[#allocation3 + $0xfc8] sm:$0xff]  }
 0x21e   :  { %7026 = vmatpush3.bf16.msra.mxu0 %v7729_v34  ;;  %v7777_v34 = vld [vmem:[#allocation3 + $0xf08] sm:$0xff]  }
 0x21f   :  { %7048 = vmatpush3.bf16.msra.mxu1 %v7730_v35  ;;  %7055 = vmatprep.subr.bf16.mxu0 %v7735_v42  ;;  %v7778_v35 = vld [vmem:[#allocation3 + $0xf88] sm:$0xff]   ;;  %v7785_v42 = vld [vmem:[#allocation3 + $0xf18] sm:$0xff]  }
 0x220   :  { %7077 = vmatprep.subr.bf16.mxu1 %v7736_v43  ;;  %v7786_v43 = vld [vmem:[#allocation3 + $0xf98] sm:$0xff]  }
 0x221   :  { %5523 = vmatmul.mubr.bf16.vlgmr.msra.gmra.mrb[52].mxu0 %v5911_v37  ;;  %v7780_v37 = vld [vmem:[#allocation3 + $0xfd0] sm:$0xff]  }
 0x222   :  { %5563 = vmatmul.mubr.bf16.vlgmr.msra.gmra.mrb[52].mxu1 %v5913_v40  ;;  %7056 = vmatpush3.bf16.msra.mxu0 %v7737_v44  ;;  %v7783_v40 = vld [vmem:[#allocation3 + $0xf58] sm:$0xff]   ;;  %v7787_v44 = vld [vmem:[#allocation3 + $0xf60] sm:$0xff]  }
 0x223   :  { %7078 = vmatpush3.bf16.msra.mxu1 %v7738_v45  ;;  %7057 = vmatprep.subr.bf16.mxu0 %v7739_v46  ;;  %v7788_v45 = vld [vmem:[#allocation3 + $0xfe0] sm:$0xff]  }
 0x224   :  { %7079 = vmatprep.subr.bf16.mxu1 %v7740_v47  ;;  %5602 = vmatprep.mubr.bf16.mxu0 %v5916_v25  ;;  %v7789_v46 = vld [vmem:[#allocation3 + $0xf20] sm:$0xff]  }
 0x225   :  { %5642 = vmatprep.mubr.bf16.mxu1 %v5918_v27 }
 0x226   :  { %7058 = vmatpush3.bf16.msra.mxu0 %v7741_v48  ;;  %v7790_v48 = vld [vmem:[#allocation3 + $0xfa0] sm:$0xff]  }
 0x227   :  { %7080 = vmatpush3.bf16.msra.mxu1 %v7742_v49  ;;  %7059 = vmatprep.subr.bf16.mxu0 %v7743_v50 }
 0x228   :  { %7081 = vmatprep.subr.bf16.mxu1 %v7744_v51 }
 0x22a   :  { %7060 = vmatpush3.bf16.msra.mxu0 %v7745_v52 }
 0x22b   :  { %7082 = vmatpush3.bf16.msra.mxu1 %v7746_v53  ;;  %7061 = vmatprep.subr.bf16.mxu0 %v7747_v54  ;;  %v7791_v54 = vld [vmem:[#allocation3 + $0xf68] sm:$0xff]  }
 0x22c   :  { %7083 = vmatprep.subr.bf16.mxu1 %v7748_v55 }
 0x22e   :  { %7062 = vmatpush3.bf16.msra.mxu0 %v7749_v56  ;;  %v7792_v56 = vld [vmem:[#allocation3 + $0xfe8] sm:$0xff]  }
 0x22f   :  { %7084 = vmatpush3.bf16.msra.mxu1 %v7750_v57  ;;  %7063 = vmatprep.subr.bf16.mxu0 %v7751_v58 }
 0x230   :  { %7085 = vmatprep.subr.bf16.mxu1 %v7752_v59  ;;  %v7793_v59 = vld [vmem:[#allocation3 + $0xf28] sm:$0xff]  }
 0x232   :  { %7064 = vmatpush3.bf16.msra.mxu0 %v7753_v61  ;;  %v7794_v61 = vld [vmem:[#allocation3 + $0xfa8] sm:$0xff]  }
 0x233   :  { %7086 = vmatpush3.bf16.msra.mxu1 %v7754_v63  ;;  %7065 = vmatprep.subr.bf16.mxu0 %v7755_v2  ;;  %v7797_v2 = vld [vmem:[#allocation3 + $0xf30] sm:$0xff]  }
 0x234   :  { %v6763_v60 = vpop.f32.mrb[28].mxu0  ;;  %7087 = vmatprep.subr.bf16.mxu1 %v7756_v5  ;;  %v7800_v5 = vld [vmem:[#allocation3 + $0xff8] sm:$0xff]  }
 0x235   :  { %v6785_v62 = vpop.f32.mrb[28].mxu1  ;;  %v6764_v0 = vpop.f32.mrb[29].mxu0 }
 0x236   :  { %v6786_v1 = vpop.f32.mrb[29].mxu1  ;;  %v6765_v3 = vadd.f32 %v6764_v0, %v6763_v60  ;;  %v6766_v6 = vpop.f32.mrb[30].mxu0  ;;  %7066 = vmatpush3.bf16.msra.mxu0 %v7757_v8  ;;  %v7795_v0 = vld [vmem:[#allocation3 + $0xf70] sm:$0xff]  }
 0x237   :  { %v6787_v4 = vadd.f32 %v6786_v1, %v6785_v62  ;;  %v6788_v7 = vpop.f32.mrb[30].mxu1  ;;  %v6767_v11 = vpop.f32.mrb[31].mxu0  ;;  %7088 = vmatpush3.bf16.msra.mxu1 %v7758_v10  ;;  %7067 = vmatprep.subr.bf16.mxu0 %v7759_v13  ;;  %v7796_v1 = vld [vmem:[#allocation3 + $0xff0] sm:$0xff]   ;;  %v7801_v6 = vld [vmem:[#allocation3 + $0xf38] sm:$0xff]  }
 0x238   :  { %v5045_v9 = vadd.f32 %v6765_v3, %v8138_v28  ;;  %v6789_v12 = vpop.f32.mrb[31].mxu1  ;;  %7089 = vmatprep.subr.bf16.mxu1 %v7760_v15  ;;  %v7771_v28 = vld [vmem:[#allocation3 + $0xf40] sm:$0xff]   ;;  %v7798_v3 = vld [vmem:[#allocation3 + $0xfb0] sm:$0xff]   ;;  %v7802_v7 = vld [vmem:[#allocation3 + $0xfb8] sm:$0xff]  }
 0x239   :  { %v121_v8 = vld [vmem:[%s8165_s0 + $0xf0] sm:$0xff] }
 0x23a   :  { %v8147_v14 = vadd.f32 %v6787_v4, %v5045_v9  ;;  %7068 = vmatpush3.bf16.msra.mxu0 %v7761_v16  ;;  %v7799_v4 = vld [vmem:[#allocation3 + $0xf78] sm:$0xff]   ;;  %v5919_v10 = vcombine.low %v121_v8, %v121_v8  ;;  %v5920_v11 = vcombine.high %v121_v8, %v121_v8 }
 0x23b   :  { %7090 = vmatpush3.bf16.msra.mxu1 %v7762_v17  ;;  %7069 = vmatprep.subr.bf16.mxu0 %v7763_v18  ;;  %v122_v9 = vld [vmem:[%s8165_s0 + $0xf8] sm:$0xff] }
 0x23c   :  { %7091 = vmatprep.subr.bf16.mxu1 %v7764_v19  ;;  %v5921_v12 = vcombine.low %v122_v9, %v122_v9  ;;  %v5922_v13 = vcombine.high %v122_v9, %v122_v9  ;;  %v5745_v8 = vld [vmem:[#allocation7 + $0x70] sm:$0xff]  ;;  %v5746_v9 = vld [vmem:[#allocation7 + $0x78] sm:$0xff] }
 0x23e   :  { %7070 = vmatpush3.bf16.msra.mxu0 %v7765_v20 }
 0x23f   :  { %7092 = vmatpush3.bf16.msra.mxu1 %v7766_v21  ;;  %7099 = vmatprep.subr.bf16.mxu0 %v7771_v28 }
 0x240   :  { %7121 = vmatprep.subr.bf16.mxu1 %v7772_v29 }
 0x241   :  { %5603 = vmatmul.mubr.bf16.vlgmr.msra.gmra.mrb[56].mxu0 %v5915_v24 }
 0x242   :  { %5643 = vmatmul.mubr.bf16.vlgmr.msra.gmra.mrb[56].mxu1 %v5917_v26  ;;  %7100 = vmatpush3.bf16.msra.mxu0 %v7773_v30 }
 0x243   :  { %7122 = vmatpush3.bf16.msra.mxu1 %v7774_v31  ;;  %7101 = vmatprep.subr.bf16.mxu0 %v7775_v32 }
 0x244   :  { %7123 = vmatprep.subr.bf16.mxu1 %v7776_v33  ;;  %5682 = vmatprep.mubr.bf16.mxu0 %v5920_v11  ;;  %v7938_v11 = vmov 0.0  }
 0x245   :  { %5722 = vmatprep.mubr.bf16.mxu1 %v5922_v13 }
 0x246   :  { %7102 = vmatpush3.bf16.msra.mxu0 %v7777_v34 }
 0x247   :  { %7124 = vmatpush3.bf16.msra.mxu1 %v7778_v35  ;;  %7103 = vmatprep.subr.bf16.mxu0 %v7779_v36 }
 0x248   :  { %7125 = vmatprep.subr.bf16.mxu1 %v7780_v37 }
 0x24a   :  { %7104 = vmatpush3.bf16.msra.mxu0 %v7781_v38  ;;  %v5731_v38 = vld [vmem:[#allocation7] sm:$0xff] }
 0x24b   :  { %7126 = vmatpush3.bf16.msra.mxu1 %v7782_v39  ;;  %7105 = vmatprep.subr.bf16.mxu0 %v7783_v40  ;;  %v5732_v39 = vld [vmem:[#allocation7 + $0x8] sm:$0xff]  ;;  %v5733_v40 = vld [vmem:[#allocation7 + $0x10] sm:$0xff] }
 0x24c   :  { %7127 = vmatprep.subr.bf16.mxu1 %v7784_v41  ;;  %v7936_v41 = vmov 0.0|0.0  }
 0x24e   :  { %7106 = vmatpush3.bf16.msra.mxu0 %v7785_v42  ;;  %v7196_v42 = vpack.c.bf16 %v5732_v39, %v5731_v38 }
 0x24f   :  { %7128 = vmatpush3.bf16.msra.mxu1 %v7786_v43  ;;  %7107 = vmatprep.subr.bf16.mxu0 %v7787_v44  ;;  %v5734_v43 = vld [vmem:[#allocation7 + $0x18] sm:$0xff] }
 0x250   :  { %7129 = vmatprep.subr.bf16.mxu1 %v7788_v45  ;;  %v7199_v44 = vpack.c.bf16 %v5734_v43, %v5733_v40  ;;  %v5735_v45 = vld [vmem:[#allocation7 + $0x20] sm:$0xff] }
 0x252   :  { %7108 = vmatpush3.bf16.msra.mxu0 %v7789_v46  ;;  %v5736_v46 = vld [vmem:[#allocation7 + $0x28] sm:$0xff] }
 0x253   :  { %7130 = vmatpush3.bf16.msra.mxu1 %v7790_v48  ;;  %7109 = vmatprep.subr.bf16.mxu0 %v7791_v54  ;;  %v5737_v48 = vld [vmem:[#allocation7 + $0x30] sm:$0xff] }
 0x254   :  { %v6807_v47 = vpop.f32.mrb[32].mxu0  ;;  %7131 = vmatprep.subr.bf16.mxu1 %v7792_v56  ;;  %v5741_v54 = vld [vmem:[#allocation7 + $0x50] sm:$0xff] }
 0x255   :  { %v6829_v49 = vpop.f32.mrb[32].mxu1  ;;  %v6808_v50 = vpop.f32.mrb[33].mxu0 }
 0x256   :  { %v6830_v51 = vpop.f32.mrb[33].mxu1  ;;  %v6809_v52 = vadd.f32 %v6808_v50, %v6807_v47  ;;  %v6810_v55 = vpop.f32.mrb[34].mxu0  ;;  %7110 = vmatpush3.bf16.msra.mxu0 %v7793_v59  ;;  %v7202_v47 = vpack.c.bf16 %v5736_v46, %v5735_v45 }
 0x257   :  { %v6831_v53 = vadd.f32 %v6830_v51, %v6829_v49  ;;  %v6832_v57 = vpop.f32.mrb[34].mxu1  ;;  %v6811_v60 = vpop.f32.mrb[35].mxu0  ;;  %7132 = vmatpush3.bf16.msra.mxu1 %v7794_v61  ;;  %7111 = vmatprep.subr.bf16.mxu0 %v7795_v0  ;;  %v5738_v49 = vld [vmem:[#allocation7 + $0x38] sm:$0xff]  ;;  %v5739_v51 = vld [vmem:[#allocation7 + $0x40] sm:$0xff] }
 0x258   :  { %v5125_v58 = vadd.f32 %v6809_v52, %v8147_v14  ;;  %v6833_v62 = vpop.f32.mrb[35].mxu1  ;;  %7133 = vmatprep.subr.bf16.mxu1 %v7796_v1  ;;  %v7205_v50 = vpack.c.bf16 %v5738_v49, %v5737_v48  ;;  %v5740_v52 = vld [vmem:[#allocation7 + $0x48] sm:$0xff]  ;;  %v5742_v55 = vld [vmem:[#allocation7 + $0x58] sm:$0xff] }
 0x259   :  { %v7211_v56 = vpack.c.bf16 %v5742_v55, %v5741_v54 }
 0x25a   :  { %v5165_v63 = vadd.f32 %v6831_v53, %v5125_v58  ;;  %7112 = vmatpush3.bf16.msra.mxu0 %v7797_v2  ;;  %v7208_v53 = vpack.c.bf16 %v5740_v52, %v5739_v51 }
 0x25b   :  { %7134 = vmatpush3.bf16.msra.mxu1 %v7798_v3  ;;  %7113 = vmatprep.subr.bf16.mxu0 %v7799_v4  ;;  %v5743_v4 = vld [vmem:[#allocation7 + $0x60] sm:$0xff] }
 0x25c   :  { %7135 = vmatprep.subr.bf16.mxu1 %v7800_v5  ;;  %v5744_v5 = vld [vmem:[#allocation7 + $0x68] sm:$0xff] }
 0x25e   :  { %7114 = vmatpush3.bf16.msra.mxu0 %v7801_v6  ;;  %v7214_v6 = vpack.c.bf16 %v5744_v5, %v5743_v4  ;;  %v6437_v4 = vld [vmem:[#allocation2] ss:$0 sm:$0xff] }
 0x25f   :  { %7136 = vmatpush3.bf16.msra.mxu1 %v7802_v7  ;;  %7195 = vmatprep.subr.bf16.mxu0 %v7936_v41 }
 0x261   :  { %5683 = vmatmul.mubr.bf16.vlgmr.msra.gmra.mrb[60].mxu0 %v5919_v10  ;;  %v7217_v10 = vpack.c.bf16 %v5746_v9, %v5745_v8 }
 0x262   :  { %5723 = vmatmul.mubr.bf16.vlgmr.msra.gmra.mrb[60].mxu1 %v5921_v12  ;;  %7197 = vmatpush3.bf16.msra.mxu0 %v7196_v42 }
 0x263   :  { %7198 = vmatprep.subr.bf16.mxu0 %v7936_v41  ;;  %7192 = vmatprep.mubr.msk.f32.mxu0 %vm7937_vm0, %v7938_v11 }
 0x266   :  { %7200 = vmatpush3.bf16.msra.mxu0 %v7199_v44 }
 0x267   :  { %7201 = vmatprep.subr.bf16.mxu0 %v7936_v41 }
 0x26a   :  { %7203 = vmatpush3.bf16.msra.mxu0 %v7202_v47 }
 0x26b   :  { %7204 = vmatprep.subr.bf16.mxu0 %v7936_v41 }
 0x26e   :  { %7206 = vmatpush3.bf16.msra.mxu0 %v7205_v50 }
 0x26f   :  { %7207 = vmatprep.subr.bf16.mxu0 %v7936_v41 }
 0x272   :  { %7209 = vmatpush3.bf16.msra.mxu0 %v7208_v53 }
 0x273   :  { %7210 = vmatprep.subr.bf16.mxu0 %v7936_v41 }
 0x274   :  { %v6851_v14 = vpop.f32.mrb[36].mxu0 }
 0x275   :  { %v6873_v15 = vpop.f32.mrb[36].mxu1  ;;  %v6852_v16 = vpop.f32.mrb[37].mxu0 }
 0x276   :  { %v6853_v17 = vadd.f32 %v6852_v16, %v6851_v14  ;;  %v6874_v18 = vpop.f32.mrb[37].mxu1  ;;  %v6854_v19 = vpop.f32.mrb[38].mxu0  ;;  %7212 = vmatpush3.bf16.msra.mxu0 %v7211_v56 }
 0x277   :  { %v6875_v20 = vadd.f32 %v6874_v18, %v6873_v15  ;;  %v6876_v21 = vpop.f32.mrb[38].mxu1  ;;  %v6855_v22 = vpop.f32.mrb[39].mxu0  ;;  %7213 = vmatprep.subr.bf16.mxu0 %v7936_v41 }
 0x278   :  { %v5205_v23 = vadd.f32 %v6853_v17, %v5165_v63  ;;  %v6877_v24 = vpop.f32.mrb[39].mxu1 }
 0x27a   :  { %v5245_v25 = vadd.f32 %v6875_v20, %v5205_v23  ;;  %7215 = vmatpush3.bf16.msra.mxu0 %v7214_v6 }
 0x27b   :  { %7216 = vmatprep.subr.bf16.mxu0 %v7936_v41 }
 0x27e   :  { %7218 = vmatpush3.bf16.msra.mxu0 %v7217_v10 }
 0x294   :  { %v6895_v26 = vpop.f32.mrb[40].mxu0 }
 0x295   :  { %v6917_v27 = vpop.f32.mrb[40].mxu1  ;;  %v6896_v28 = vpop.f32.mrb[41].mxu0 }
 0x296   :  { %v6918_v29 = vpop.f32.mrb[41].mxu1  ;;  %v6897_v30 = vadd.f32 %v6896_v28, %v6895_v26  ;;  %v6898_v32 = vpop.f32.mrb[42].mxu0 }
 0x297   :  { %v6919_v31 = vadd.f32 %v6918_v29, %v6917_v27  ;;  %v6920_v33 = vpop.f32.mrb[42].mxu1  ;;  %v6899_v34 = vpop.f32.mrb[43].mxu0 }
 0x298   :  { %v6921_v35 = vpop.f32.mrb[43].mxu1  ;;  %v5285_v36 = vadd.f32 %v6897_v30, %v5245_v25 }
 0x29a   :  { %v5325_v37 = vadd.f32 %v6919_v31, %v5285_v36 }
 0x2b4   :  { %v6939_v57 = vpop.f32.mrb[44].mxu0 }
 0x2b5   :  { %v6961_v58 = vpop.f32.mrb[44].mxu1  ;;  %v6940_v59 = vpop.f32.mrb[45].mxu0 }
 0x2b6   :  { %v6941_v60 = vadd.f32 %v6940_v59, %v6939_v57  ;;  %v6962_v61 = vpop.f32.mrb[45].mxu1  ;;  %v6942_v62 = vpop.f32.mrb[46].mxu0 }
 0x2b7   :  { %v6963_v63 = vadd.f32 %v6962_v61, %v6961_v58  ;;  %v6964_v0 = vpop.f32.mrb[46].mxu1  ;;  %v6943_v1 = vpop.f32.mrb[47].mxu0  ;;  %v6435_v61 = vld [vmem:[#allocation8] ss:$0 sm:$0xff] }
 0x2b8   :  { %v5365_v2 = vadd.f32 %v6941_v60, %v5325_v37  ;;  %v6965_v3 = vpop.f32.mrb[47].mxu1  ;;  %v6436_v1 = vld [vmem:[#allocation10] ss:$0 sm:$0xff] }
 0x2ba   :  { %v5405_v7 = vadd.f32 %v6963_v63, %v5365_v2 }
 0x2d4   :  { %v6983_v12 = vpop.f32.mrb[48].mxu0 }
 0x2d5   :  { %v7005_v13 = vpop.f32.mrb[48].mxu1  ;;  %v6984_v14 = vpop.f32.mrb[49].mxu0 }
 0x2d6   :  { %v6985_v15 = vadd.f32 %v6984_v14, %v6983_v12  ;;  %v7006_v16 = vpop.f32.mrb[49].mxu1  ;;  %v6986_v17 = vpop.f32.mrb[50].mxu0 }
 0x2d7   :  { %v7007_v18 = vadd.f32 %v7006_v16, %v7005_v13  ;;  %v7008_v19 = vpop.f32.mrb[50].mxu1  ;;  %v6987_v20 = vpop.f32.mrb[51].mxu0 }
 0x2d8   :  { %v5445_v21 = vadd.f32 %v6985_v15, %v5405_v7  ;;  %v7009_v22 = vpop.f32.mrb[51].mxu1 }
 0x2da   :  { %v5485_v23 = vadd.f32 %v7007_v18, %v5445_v21 }
 0x2f4   :  { %v7027_v24 = vpop.f32.mrb[52].mxu0 }
 0x2f5   :  { %v7049_v25 = vpop.f32.mrb[52].mxu1  ;;  %v7028_v26 = vpop.f32.mrb[53].mxu0 }
 0x2f6   :  { %v7050_v27 = vpop.f32.mrb[53].mxu1  ;;  %v7029_v28 = vadd.f32 %v7028_v26, %v7027_v24  ;;  %v7030_v30 = vpop.f32.mrb[54].mxu0 }
 0x2f7   :  { %v7051_v29 = vadd.f32 %v7050_v27, %v7049_v25  ;;  %v7052_v31 = vpop.f32.mrb[54].mxu1  ;;  %v7031_v32 = vpop.f32.mrb[55].mxu0 }
 0x2f8   :  { %v7053_v33 = vpop.f32.mrb[55].mxu1  ;;  %v5525_v34 = vadd.f32 %v7029_v28, %v5485_v23 }
 0x2fa   :  { %v5565_v35 = vadd.f32 %v7051_v29, %v5525_v34 }
 0x314   :  { %v7071_v36 = vpop.f32.mrb[56].mxu0 }
 0x315   :  { %v7093_v37 = vpop.f32.mrb[56].mxu1  ;;  %v7072_v38 = vpop.f32.mrb[57].mxu0 }
 0x316   :  { %v7073_v39 = vadd.f32 %v7072_v38, %v7071_v36  ;;  %v7094_v40 = vpop.f32.mrb[57].mxu1  ;;  %v7074_v41 = vpop.f32.mrb[58].mxu0 }
 0x317   :  { %v7095_v42 = vadd.f32 %v7094_v40, %v7093_v37  ;;  %v7096_v43 = vpop.f32.mrb[58].mxu1  ;;  %v7075_v44 = vpop.f32.mrb[59].mxu0 }
 0x318   :  { %v5605_v45 = vadd.f32 %v7073_v39, %v5565_v35  ;;  %v7097_v46 = vpop.f32.mrb[59].mxu1 }
 0x31a   :  { %v5645_v47 = vadd.f32 %v7095_v42, %v5605_v45 }
 0x334   :  { %v7115_v48 = vpop.f32.mrb[60].mxu0 }
 0x335   :  { %v7137_v49 = vpop.f32.mrb[60].mxu1  ;;  %v7116_v50 = vpop.f32.mrb[61].mxu0 }
 0x336   :  { %v7117_v51 = vadd.f32 %v7116_v50, %v7115_v48  ;;  %v7138_v52 = vpop.f32.mrb[61].mxu1  ;;  %v7118_v53 = vpop.f32.mrb[62].mxu0 }
 0x337   :  { %v7139_v54 = vadd.f32 %v7138_v52, %v7137_v49  ;;  %v7140_v55 = vpop.f32.mrb[62].mxu1  ;;  %v7119_v56 = vpop.f32.mrb[63].mxu0 }
 0x338   :  { %v5685_v57 = vadd.f32 %v7117_v51, %v5645_v47  ;;  %v7141_v58 = vpop.f32.mrb[63].mxu1 }
 0x33a   :  { %v5725_v59 = vadd.f32 %v7139_v54, %v5685_v57 }
 0x33c   :  { %v5730_v60 = vmax.f32 %v5725_v59, 0.0 }
 0x33e   :  { %7193 = vmatmul.mubr.f32.vlgmr.msra.gmra.mrb[64].mxu0 %v5730_v60 }
 0x411   :  { %v5820_v62 = vpop.f32.mrb[64].mxu0 }
 0x412   :  { %v5821_v63 = vadd.f32 %v6435_v61, %v5820_v62  ;;  %v7194_v0 = vpop.f32.mrb[65].mxu0 }
 0x414   :  { %v5824_v2 = vmax.f32 %v5821_v63, 0.0 }
 0x416   :  { %v5832_v3 = vmul.f32 %v6436_v1, %v5824_v2 }
 0x418   :  { %5833 = vadd.xlane.f32.xlu0 %v5832_v3 }
 0x4a5   :  { %v5834_v5 = vpop.xlane.xlu0 %5833 }
 0x4a6   :  { %v5842_v6 = vadd.f32 %v6437_v4, %v5834_v5 }
 0x4a8   :  { %v6438_v7 = vmul.f32 -1.442695, %v5842_v6 }
 0x4aa   :  { %7807 = vpow2.f32 %v6438_v7 }
 0x4b4   :  { %v7808_v8 = vpop.eup %7807 }
 0x4b5   :  { %v5846_v9 = vadd.f32 1.0, %v7808_v8 }
 0x4b7   :  { %7809 = vrcp.f32 %v5846_v9 }
 0x4c1   :  { %v7810_v10 = vpop.eup %7809 }
 0x4c2   :  { %5850 = vst.msk [vmem:[%s8172_s7] sm:$0xff] %vm5849_vm1, %v7810_v10 }
 0x4c3   :  { %5855 = vsyncpa [#allocation4], 1 }
 0x4c4   :  { %5856 = vsyncpa [#allocation6], 1 }
 0x4c5   :  { %5857 = vsyncpa [#allocation9], 1 }

</bundles_post_ra>
